<compile_context>
chip_gen: v5e
topology: v5e:2x2
jax: 0.10.0
libtpu: 0.0.40
codegen_flags: <defaults>
</compile_context>

<pallas_src>
import functools
import math

import jax
import jax.numpy as jnp
from jax.experimental import pallas as pl
from jax.experimental.pallas import tpu as pltpu


# --------------------------------------------------------------------------
# Kernel
# --------------------------------------------------------------------------
def _abmil_kernel(x_ref, wp_ref, bp_ref, qT_ref, wkv_ref, bkv_ref,
                  wbag_ref, bbag_ref,
                  logits_ref, attn_ref, proj_ref,
                  *, tb, n, din, hidden_dim, n_classes):
    H = hidden_dim
    C = n_classes

    # ---- input projection: Linear + ReLU (Dropout == identity in eval) ----
    x2d = x_ref[...].reshape(tb * n, din)                        # (TB*N, Din) bf16
    proj = jnp.dot(x2d, wp_ref[...],
                   preferred_element_type=jnp.float32)           # f32 accumulation
    proj = jnp.maximum(proj + bp_ref[...], 0.0)                  # (TB*N, H) f32
    proj_bf = proj.astype(jnp.bfloat16)                          # single f32->bf16 pass
    proj_ref[...] = proj_bf.reshape(tb, n, H)

    # ---- fused K/V projection: one streaming (TB*N, H) @ (H, 2H) matmul ----
    kv = jnp.dot(proj_bf, wkv_ref[...],
                 preferred_element_type=jnp.float32) + bkv_ref[...]   # (TB*N, 2H) f32
    k_bf = kv[:, :H].astype(jnp.bfloat16)                        # lane-aligned slice
    v3 = kv[:, H:2 * H].reshape(tb, n, H)                        # (TB, N, H) f32

    # ---- class-attention scores: one flat bf16 MXU matmul ----
    # qT = ((cls @ Wq + bq) / sqrt(H)).T was precomputed in the wrapper.
    scores = jnp.dot(k_bf, qT_ref[...],
                     preferred_element_type=jnp.float32)         # (TB*N, C)
    scores = jnp.swapaxes(scores.reshape(tb, n, C), 1, 2)        # (TB, C, N)

    # ---- softmax over the N instances of each sample ----
    m = jnp.max(scores, axis=-1, keepdims=True)
    p = jnp.exp(scores - m)
    attn = p * pl.reciprocal(jnp.sum(p, axis=-1, keepdims=True), approx=True)
    # lane-dense store: (TB, C*N)
    attn_ref[0] = attn.reshape(tb, C * n).astype(attn_ref.dtype)

    # ---- class representations + per-class bag classifiers (VPU; C tiny) ----
    rep = jnp.stack(
        [jnp.sum(attn[:, cc, :][:, :, None] * v3, axis=1) for cc in range(C)],
        axis=1)                                                  # (TB, C, H) f32
    logits = jnp.sum(rep * wbag_ref[...][None], axis=-1) + bbag_ref[...]  # (TB, C)
    logits_ref[0] = logits.astype(logits_ref.dtype)


# --------------------------------------------------------------------------
# Tiling helpers (generation-aware)
# --------------------------------------------------------------------------
def _tpu_vmem_bytes():
    """Physical VMEM per TensorCore; falls back to 128 MiB (v5e/v6e) if unknown."""
    try:
        info = pltpu.get_tpu_info()
        cap = getattr(info, "vmem_capacity_bytes", None)
        if cap:
            return int(cap)
    except Exception:
        pass
    return 128 << 20


def _residency_bytes(tb, n, din, h, c):
    """Rough per-step VMEM residency (double-buffered blocks + intermediates)."""
    bf, f4 = 2, 4
    b = 0
    b += 2 * tb * n * din * bf                     # x input blocks (bf16, x2 buf)
    b += 2 * tb * n * h * bf                       # proj output blocks (bf16)
    b += 2 * tb * c * n * f4                       # attention output blocks
    b += 2 * tb * c * f4                           # logits output blocks
    b += 2 * (din * h + h * 2 * h) * bf            # Wp, Wkv (default 2 buffers)
    b += 2 * (h + 2 * h + h * c + c * h + c) * f4  # bp, bkv, qT, Wbag, bbag
    b += tb * n * (h + 2 * h + h) * f4             # f32 intermediates (proj, kv, bcast)
    b += 2 * tb * n * h * bf                       # proj_bf + k_bf
    return b


def _choose_tb(b, n, din, h, c, *, budget_bytes, keep_even_grid):
    """Largest divisor of B whose residency fits; optionally keep G even >= 2."""
    best = 1
    for d in range(1, b + 1):
        if b % d:
            continue
        g = b // d
        if keep_even_grid and not (g >= 2 and g % 2 == 0):
            continue
        if _residency_bytes(d, n, din, h, c) <= budget_bytes:
            best = max(best, d)
    return best


# --------------------------------------------------------------------------
# Wrapper
# --------------------------------------------------------------------------
def abmil_mb_forward(features, params, *, n_samples, n_classes):
    """features: (1, T, input_dim) with T = n_samples * N (equal blocks)."""
    _, T, Din = features.shape
    B = n_samples
    assert T % B == 0, "equal block-diagonal blocks required (T % n_samples == 0)"
    N = T // B
    H = params["Wp"].shape[1]
    C = n_classes
    assert H % 128 == 0, "hidden_dim must be a multiple of 128 (lane-aligned K/V slices)"

    # bf16 MXU operands, f32 accumulation; biases stay f32.
    x = features.reshape(B, N, Din).astype(jnp.bfloat16)
    wp = params["Wp"].astype(jnp.bfloat16)
    bp = params["bp"].astype(jnp.float32)
    # Grid-invariant Q: computed once here; 1/sqrt(H) folded in; transposed for
    # the flat (TB*N, H) @ (H, C) scores matmul; bf16 MXU operand.
    qT = (((jnp.dot(params["cls"], params["Wq"]) + params["bq"])
           / math.sqrt(H)).T).astype(jnp.bfloat16)                    # (H, C)
    # Fused K/V weights.
    wkv = jnp.concatenate([params["Wk"], params["Wv"]], axis=1).astype(jnp.bfloat16)
    bkv = jnp.concatenate([params["bk"], params["bv"]], axis=1).astype(jnp.float32)
    wbag = params["Wbag"].astype(jnp.float32)
    bbag = params["bbag"].astype(jnp.float32)

    # Generation-aware VMEM budget / grid policy.
    vmem_cap = _tpu_vmem_bytes()
    if vmem_cap >= (96 << 20):      # v5e / v6e: 128 MiB VMEM, single TensorCore
        budget, limit_cap, keep_even_grid = 72 << 20, 100 << 20, False
    else:                           # v7x: 64 MiB VMEM, 2 TensorCores
        budget, limit_cap, keep_even_grid = 36 << 20, 44 << 20, True

    TB = _choose_tb(B, N, Din, H, C, budget_bytes=budget,
                    keep_even_grid=keep_even_grid)
    G = B // TB

    def const_spec(shape):
        nd = len(shape)
        return pl.BlockSpec(shape, lambda g, _nd=nd: (0,) * _nd)

    in_specs = [
        pl.BlockSpec((TB, N, Din), lambda g: (g, 0, 0)),   # features block
        const_spec((Din, H)), const_spec((1, H)),          # Wp, bp
        const_spec((H, C)),                                # precomputed/scaled Q^T
        const_spec((H, 2 * H)), const_spec((1, 2 * H)),    # fused Wkv, bkv
        const_spec((C, H)), const_spec((1, C)),            # Wbag, bbag
    ]
    out_specs = [
        pl.BlockSpec((1, TB, C), lambda g: (g, 0, 0)),         # logits (grouped)
        pl.BlockSpec((1, TB, C * N), lambda g: (g, 0, 0)),     # attention (lane-dense)
        pl.BlockSpec((TB, N, H), lambda g: (g, 0, 0)),         # projected features
    ]
    out_shape = [
        jax.ShapeDtypeStruct((G, TB, C), jnp.float32),
        jax.ShapeDtypeStruct((G, TB, C * N), jnp.float32),
        jax.ShapeDtypeStruct((B, N, H), jnp.bfloat16),
    ]

    vmem_limit = int(min(max(2 * _residency_bytes(TB, N, Din, H, C), 16 << 20),
                         limit_cap))

    # Advisory cost hint for XLA scheduling around this small kernel.
    flops = (2 * T * Din * H            # input projection
             + 2 * T * H * (2 * H)      # fused K/V projection
             + 2 * T * H * C            # class-attention scores
             + 2 * T * H * C            # class representations
             + 2 * B * C * H)           # bag classifiers
    bytes_accessed = (T * Din * 2 + (Din * H + H * 2 * H) * 2
                      + (H + 2 * H + H * C + C * H + C) * 4
                      + T * H * 2 + B * C * N * 4 + B * C * 4)
    cost = pl.CostEstimate(flops=flops, transcendentals=T * C,
                           bytes_accessed=bytes_accessed)

    logits, attn, proj = pl.pallas_call(
        functools.partial(_abmil_kernel, tb=TB, n=N, din=Din,
                          hidden_dim=H, n_classes=C),
        grid=(G,),
        in_specs=in_specs,
        out_specs=out_specs,
        out_shape=out_shape,
        compiler_params=pltpu.CompilerParams(
            dimension_semantics=("parallel",),
            vmem_limit_bytes=vmem_limit),
        cost_estimate=cost,
    )(x, wp, bp, qT, wkv, bkv, wbag, bbag)

    logits = logits.reshape(B, C)
    attn = attn.reshape(B, C, N)
    proj = proj.reshape(1, T, H)        # PyTorch layout (1, T, hidden_dim), bf16
    return logits, attn, proj


# --------------------------------------------------------------------------
# Pure-JAX reference (same bf16 operand casts) for a loose sanity check
# --------------------------------------------------------------------------
def _reference(features, params, *, n_samples, n_classes):
    _, T, Din = features.shape
    B = n_samples
    N = T // B
    H = params["Wp"].shape[1]
    hi = jax.lax.Precision.HIGHEST
    x = features.reshape(B, N, Din).astype(jnp.bfloat16)
    proj = jnp.maximum(
        jnp.einsum('bnd,dh->bnh', x, params["Wp"].astype(jnp.bfloat16),
                   preferred_element_type=jnp.float32) + params["bp"], 0.0)
    q = jnp.dot(params["cls"], params["Wq"]) + params["bq"]
    k = jnp.einsum('bnh,hk->bnk', proj.astype(jnp.bfloat16),
                   params["Wk"].astype(jnp.bfloat16),
                   preferred_element_type=jnp.float32) + params["bk"]
    v = jnp.einsum('bnh,hk->bnk', proj.astype(jnp.bfloat16),
                   params["Wv"].astype(jnp.bfloat16),
                   preferred_element_type=jnp.float32) + params["bv"]
    scores = jnp.einsum('ch,bnh->bcn', q, k, precision=hi) / math.sqrt(H)
    attn = jax.nn.softmax(scores, axis=-1)
    rep = jnp.einsum('bcn,bnh->bch', attn, v, precision=hi)
    logits = jnp.einsum('bch,ch->bc', rep, params["Wbag"], precision=hi) \
        + params["bbag"]
    return logits, attn, proj.reshape(1, T, H)


def init_params(key, input_dim, hidden_dim, n_classes):
    ks = jax.random.split(key, 8)
    s_in = 1.0 / math.sqrt(input_dim)
    s_h = 1.0 / math.sqrt(hidden_dim)
    f32 = jnp.float32
    return {
        "Wp":   jax.random.normal(ks[0], (input_dim, hidden_dim), f32) * s_in,
        "bp":   jnp.zeros((1, hidden_dim), f32),
        "cls":  jax.random.normal(ks[1], (n_classes, hidden_dim), f32) * s_h,
        "Wq":   jax.random.normal(ks[2], (hidden_dim, hidden_dim), f32) * s_h,
        "bq":   jnp.zeros((1, hidden_dim), f32),
        "Wk":   jax.random.normal(ks[3], (hidden_dim, hidden_dim), f32) * s_h,
        "bk":   jnp.zeros((1, hidden_dim), f32),
        "Wv":   jax.random.normal(ks[4], (hidden_dim, hidden_dim), f32) * s_h,
        "bv":   jnp.zeros((1, hidden_dim), f32),
        "Wbag": jax.random.normal(ks[5], (n_classes, hidden_dim), f32) * s_h,
        "bbag": jnp.zeros((1, n_classes), f32),
    }


if __name__ == "__main__":
    B = 16            # samples in the batch (block-diagonal blocks)
    N = 64            # instances per sample (equal block sizes)
    input_dim = 128
    hidden_dim = 128
    n_classes = 2

    key = jax.random.PRNGKey(0)
    k_feat, k_par = jax.random.split(key)
    features = jax.random.normal(k_feat, (1, B * N, input_dim), jnp.float32)
    params = init_params(k_par, input_dim, hidden_dim, n_classes)

    logits, attn_scores, projected = abmil_mb_forward(
        features, params, n_samples=B, n_classes=n_classes)
    jax.block_until_ready((logits, attn_scores, projected))

    assert logits.shape == (B, n_classes)
    assert attn_scores.shape == (B, n_classes, N)
    assert projected.shape == (1, B * N, hidden_dim)
    assert bool(jnp.isfinite(logits).all())
    assert bool(jnp.isfinite(attn_scores).all())

    # Loose numerical sanity check against a pure-JAX reference using the same
    # bf16 operand casts (tolerances cover bf16 MXU + approx reciprocal).
    ref_logits, ref_attn, _ = _reference(
        features, params, n_samples=B, n_classes=n_classes)
    assert bool(jnp.allclose(logits, ref_logits, atol=1e-1, rtol=1e-1))
    assert bool(jnp.allclose(attn_scores, ref_attn, atol=1e-1, rtol=1e-1))

    print("KERNEL_OK")
</pallas_src>

<mosaic_0001>
module attributes {stable_mosaic.version = 11 : i64} {
  func.func @_abmil_kernel(%arg0: i32, %arg1: memref<16x64x128xbf16, #tpu.memory_space<vmem>>, %arg2: memref<128x128xbf16, #tpu.memory_space<vmem>>, %arg3: memref<1x128xf32, #tpu.memory_space<vmem>>, %arg4: memref<128x2xbf16, #tpu.memory_space<vmem>>, %arg5: memref<128x256xbf16, #tpu.memory_space<vmem>>, %arg6: memref<1x256xf32, #tpu.memory_space<vmem>>, %arg7: memref<2x128xf32, #tpu.memory_space<vmem>>, %arg8: memref<1x2xf32, #tpu.memory_space<vmem>>, %arg9: memref<1x16x2xf32, #tpu.memory_space<vmem>>, %arg10: memref<1x16x128xf32, #tpu.memory_space<vmem>>, %arg11: memref<16x64x128xbf16, #tpu.memory_space<vmem>>) attributes {dimension_semantics = [#tpu.dimension_semantics<parallel>], iteration_bounds = array<i64: 1>, scalar_prefetch = 0 : i64, scratch_operands = 0 : i64, tpu.core_type = #tpu.core_type<tc>, window_params = [{transform_indices = @transform_0, window_bounds = array<i64: 16, 64, 128>}, {pipeline_mode = #tpu.pipeline_mode<synchronous>, transform_indices = @transform_1, window_bounds = array<i64: 128, 128>}, {pipeline_mode = #tpu.pipeline_mode<synchronous>, transform_indices = @transform_2, window_bounds = array<i64: 1, 128>}, {pipeline_mode = #tpu.pipeline_mode<synchronous>, transform_indices = @transform_3, window_bounds = array<i64: 128, 2>}, {pipeline_mode = #tpu.pipeline_mode<synchronous>, transform_indices = @transform_4, window_bounds = array<i64: 128, 256>}, {pipeline_mode = #tpu.pipeline_mode<synchronous>, transform_indices = @transform_5, window_bounds = array<i64: 1, 256>}, {pipeline_mode = #tpu.pipeline_mode<synchronous>, transform_indices = @transform_6, window_bounds = array<i64: 2, 128>}, {pipeline_mode = #tpu.pipeline_mode<synchronous>, transform_indices = @transform_7, window_bounds = array<i64: 1, 2>}, {transform_indices = @transform_8, window_bounds = array<i64: 1, 16, 2>}, {transform_indices = @transform_9, window_bounds = array<i64: 1, 16, 128>}, {transform_indices = @transform_10, window_bounds = array<i64: 16, 64, 128>}]} {
    %c0 = arith.constant 0 : index
    %c0_0 = arith.constant 0 : index
    %c0_1 = arith.constant 0 : index
    %0 = vector.load %arg1[%c0, %c0_0, %c0_1] : memref<16x64x128xbf16, #tpu.memory_space<vmem>>, vector<16x64x128xbf16>
    %1 = vector.shape_cast %0 : vector<16x64x128xbf16> to vector<1024x128xbf16>
    %c0_2 = arith.constant 0 : index
    %c0_3 = arith.constant 0 : index
    %2 = vector.load %arg2[%c0_2, %c0_3] : memref<128x128xbf16, #tpu.memory_space<vmem>>, vector<128x128xbf16>
    %cst = arith.constant dense<0.000000e+00> : vector<1024x128xf32>
    %3 = tpu.matmul %1, %2, %cst {dimension_numbers = #tpu.dot_dimension_numbers<[1], [0], [0], [1], [0, 0, 1, 1], [], []>} : vector<1024x128xbf16>, vector<128x128xbf16>, vector<1024x128xf32> -> vector<1024x128xf32>
    %c0_4 = arith.constant 0 : index
    %c0_5 = arith.constant 0 : index
    %4 = vector.load %arg3[%c0_4, %c0_5] : memref<1x128xf32, #tpu.memory_space<vmem>>, vector<1x128xf32>
    %5 = vector.broadcast %4 : vector<1x128xf32> to vector<1024x128xf32>
    %6 = arith.addf %3, %5 : vector<1024x128xf32>
    %cst_6 = arith.constant 0.000000e+00 : f32
    %7 = vector.broadcast %cst_6 : f32 to vector<1024x128xf32>
    %8 = arith.maximumf %6, %7 : vector<1024x128xf32>
    %9 = arith.truncf %8 : vector<1024x128xf32> to vector<1024x128xbf16>
    %10 = vector.shape_cast %9 : vector<1024x128xbf16> to vector<16x64x128xbf16>
    %c0_7 = arith.constant 0 : index
    %c0_8 = arith.constant 0 : index
    %c0_9 = arith.constant 0 : index
    %11 = vector.load %arg11[%c0_7, %c0_8, %c0_9] : memref<16x64x128xbf16, #tpu.memory_space<vmem>>, vector<16x64x128xbf16>
    tpu.vector_store %arg11[%c0_7, %c0_8, %c0_9], %10 {strides = array<i32>} : memref<16x64x128xbf16, #tpu.memory_space<vmem>>, vector<16x64x128xbf16>,
    %c0_10 = arith.constant 0 : index
    %c0_11 = arith.constant 0 : index
    %12 = vector.load %arg5[%c0_10, %c0_11] : memref<128x256xbf16, #tpu.memory_space<vmem>>, vector<128x256xbf16>
    %cst_12 = arith.constant dense<0.000000e+00> : vector<1024x256xf32>
    %13 = tpu.matmul %9, %12, %cst_12 {dimension_numbers = #tpu.dot_dimension_numbers<[1], [0], [0], [1], [0, 0, 1, 1], [], []>} : vector<1024x128xbf16>, vector<128x256xbf16>, vector<1024x256xf32> -> vector<1024x256xf32>
    %c0_13 = arith.constant 0 : index
    %c0_14 = arith.constant 0 : index
    %14 = vector.load %arg6[%c0_13, %c0_14] : memref<1x256xf32, #tpu.memory_space<vmem>>, vector<1x256xf32>
    %15 = vector.broadcast %14 : vector<1x256xf32> to vector<1024x256xf32>
    %16 = arith.addf %13, %15 : vector<1024x256xf32>
    %17 = vector.extract_strided_slice %16 {offsets = [0, 0], sizes = [1024, 128], strides = [1, 1]} : vector<1024x256xf32> to vector<1024x128xf32>
    %18 = arith.truncf %17 : vector<1024x128xf32> to vector<1024x128xbf16>
    %19 = vector.extract_strided_slice %16 {offsets = [0, 128], sizes = [1024, 128], strides = [1, 1]} : vector<1024x256xf32> to vector<1024x128xf32>
    %20 = vector.shape_cast %19 : vector<1024x128xf32> to vector<16x64x128xf32>
    %c0_15 = arith.constant 0 : index
    %c0_16 = arith.constant 0 : index
    %21 = vector.load %arg4[%c0_15, %c0_16] : memref<128x2xbf16, #tpu.memory_space<vmem>>, vector<128x2xbf16>
    %cst_17 = arith.constant dense<0.000000e+00> : vector<1024x2xf32>
    %22 = tpu.matmul %18, %21, %cst_17 {dimension_numbers = #tpu.dot_dimension_numbers<[1], [0], [0], [1], [0, 0, 1, 1], [], []>} : vector<1024x128xbf16>, vector<128x2xbf16>, vector<1024x2xf32> -> vector<1024x2xf32>
    %23 = vector.shape_cast %22 : vector<1024x2xf32> to vector<16x64x2xf32>
    %24 = tpu.transpose %23, [0, 2, 1] : vector<16x64x2xf32> -> vector<16x2x64xf32>
    %cst_18 = arith.constant dense<0xFF800000> : vector<16x2xf32>
    %25 = vector.multi_reduction <maximumf>, %24, %cst_18 [2] : vector<16x2x64xf32> to vector<16x2xf32>
    %26 = vector.shape_cast %25 : vector<16x2xf32> to vector<16x2x1xf32>
    %27 = vector.broadcast %26 : vector<16x2x1xf32> to vector<16x2x64xf32>
    %28 = arith.subf %24, %27 : vector<16x2x64xf32>
    %29 = math.exp %28 : vector<16x2x64xf32>
    %cst_19 = arith.constant dense<0.000000e+00> : vector<16x2xf32>
    %30 = vector.multi_reduction <add>, %29, %cst_19 [2] : vector<16x2x64xf32> to vector<16x2xf32>
    %31 = vector.shape_cast %30 : vector<16x2xf32> to vector<16x2x1xf32>
    %32 = tpu.reciprocal %31 {approx = true} : vector<16x2x1xf32> -> vector<16x2x1xf32>
    %33 = vector.broadcast %32 : vector<16x2x1xf32> to vector<16x2x64xf32>
    %34 = arith.mulf %29, %33 : vector<16x2x64xf32>
    %35 = vector.shape_cast %34 : vector<16x2x64xf32> to vector<16x128xf32>
    %c0_20 = arith.constant 0 : index
    %c0_21 = arith.constant 0 : index
    %c0_22 = arith.constant 0 : index
    %36 = vector.load %arg10[%c0_20, %c0_21, %c0_22] : memref<1x16x128xf32, #tpu.memory_space<vmem>>, vector<1x16x128xf32>
    %37 = vector.shape_cast %36 : vector<1x16x128xf32> to vector<16x128xf32>
    %38 = vector.shape_cast %35 : vector<16x128xf32> to vector<1x16x128xf32>
    tpu.vector_store %arg10[%c0_20, %c0_21, %c0_22], %38 {strides = array<i32>} : memref<1x16x128xf32, #tpu.memory_space<vmem>>, vector<1x16x128xf32>,
    %39 = vector.extract_strided_slice %34 {offsets = [0, 0, 0], sizes = [16, 1, 64], strides = [1, 1, 1]} : vector<16x2x64xf32> to vector<16x1x64xf32>
    %40 = vector.shape_cast %39 : vector<16x1x64xf32> to vector<16x64xf32>
    %41 = vector.shape_cast %40 : vector<16x64xf32> to vector<16x64x1xf32>
    %42 = vector.broadcast %41 : vector<16x64x1xf32> to vector<16x64x128xf32>
    %43 = arith.mulf %42, %20 : vector<16x64x128xf32>
    %cst_23 = arith.constant dense<0.000000e+00> : vector<16x128xf32>
    %44 = vector.multi_reduction <add>, %43, %cst_23 [1] : vector<16x64x128xf32> to vector<16x128xf32>
    %45 = vector.extract_strided_slice %34 {offsets = [0, 1, 0], sizes = [16, 1, 64], strides = [1, 1, 1]} : vector<16x2x64xf32> to vector<16x1x64xf32>
    %46 = vector.shape_cast %45 : vector<16x1x64xf32> to vector<16x64xf32>
    %47 = vector.shape_cast %46 : vector<16x64xf32> to vector<16x64x1xf32>
    %48 = vector.broadcast %47 : vector<16x64x1xf32> to vector<16x64x128xf32>
    %49 = arith.mulf %48, %20 : vector<16x64x128xf32>
    %cst_24 = arith.constant dense<0.000000e+00> : vector<16x128xf32>
    %50 = vector.multi_reduction <add>, %49, %cst_24 [1] : vector<16x64x128xf32> to vector<16x128xf32>
    %51 = vector.shape_cast %44 : vector<16x128xf32> to vector<16x1x128xf32>
    %52 = vector.shape_cast %50 : vector<16x128xf32> to vector<16x1x128xf32>
    %53 = tpu.concatenate %51, %52 in 1 : vector<16x1x128xf32>, vector<16x1x128xf32> -> vector<16x2x128xf32>
    %c0_25 = arith.constant 0 : index
    %c0_26 = arith.constant 0 : index
    %54 = vector.load %arg7[%c0_25, %c0_26] : memref<2x128xf32, #tpu.memory_space<vmem>>, vector<2x128xf32>
    %55 = vector.shape_cast %54 : vector<2x128xf32> to vector<1x2x128xf32>
    %56 = vector.broadcast %55 : vector<1x2x128xf32> to vector<16x2x128xf32>
    %57 = arith.mulf %53, %56 : vector<16x2x128xf32>
    %cst_27 = arith.constant dense<0.000000e+00> : vector<16x2xf32>
    %58 = vector.multi_reduction <add>, %57, %cst_27 [2] : vector<16x2x128xf32> to vector<16x2xf32>
    %c0_28 = arith.constant 0 : index
    %c0_29 = arith.constant 0 : index
    %59 = vector.load %arg8[%c0_28, %c0_29] : memref<1x2xf32, #tpu.memory_space<vmem>>, vector<1x2xf32>
    %60 = vector.broadcast %59 : vector<1x2xf32> to vector<16x2xf32>
    %61 = arith.addf %58, %60 : vector<16x2xf32>
    %c0_30 = arith.constant 0 : index
    %c0_31 = arith.constant 0 : index
    %c0_32 = arith.constant 0 : index
    %62 = vector.load %arg9[%c0_30, %c0_31, %c0_32] : memref<1x16x2xf32, #tpu.memory_space<vmem>>, vector<1x16x2xf32>
    %63 = vector.shape_cast %62 : vector<1x16x2xf32> to vector<16x2xf32>
    %64 = vector.shape_cast %61 : vector<16x2xf32> to vector<1x16x2xf32>
    tpu.vector_store %arg9[%c0_30, %c0_31, %c0_32], %64 {strides = array<i32>} : memref<1x16x2xf32, #tpu.memory_space<vmem>>, vector<1x16x2xf32>,
    return
  }
  func.func @transform_0(%arg0: i32) -> (i32, i32, i32) {
    %c0_i32 = arith.constant 0 : i32
    %c0_i32_0 = arith.constant 0 : i32
    %c0_i32_1 = arith.constant 0 : i32
    return %arg0, %c0_i32, %c0_i32_0 : i32, i32, i32
  }
  func.func @transform_1(%arg0: i32) -> (i32, i32) {
    %c0_i32 = arith.constant 0 : i32
    %c0_i32_0 = arith.constant 0 : i32
    %c0_i32_1 = arith.constant 0 : i32
    return %c0_i32, %c0_i32_0 : i32, i32
  }
  func.func @transform_2(%arg0: i32) -> (i32, i32) {
    %c0_i32 = arith.constant 0 : i32
    %c0_i32_0 = arith.constant 0 : i32
    %c0_i32_1 = arith.constant 0 : i32
    return %c0_i32, %c0_i32_0 : i32, i32
  }
  func.func @transform_3(%arg0: i32) -> (i32, i32) {
    %c0_i32 = arith.constant 0 : i32
    %c0_i32_0 = arith.constant 0 : i32
    %c0_i32_1 = arith.constant 0 : i32
    return %c0_i32, %c0_i32_0 : i32, i32
  }
  func.func @transform_4(%arg0: i32) -> (i32, i32) {
    %c0_i32 = arith.constant 0 : i32
    %c0_i32_0 = arith.constant 0 : i32
    %c0_i32_1 = arith.constant 0 : i32
    return %c0_i32, %c0_i32_0 : i32, i32
  }
  func.func @transform_5(%arg0: i32) -> (i32, i32) {
    %c0_i32 = arith.constant 0 : i32
    %c0_i32_0 = arith.constant 0 : i32
    %c0_i32_1 = arith.constant 0 : i32
    return %c0_i32, %c0_i32_0 : i32, i32
  }
  func.func @transform_6(%arg0: i32) -> (i32, i32) {
    %c0_i32 = arith.constant 0 : i32
    %c0_i32_0 = arith.constant 0 : i32
    %c0_i32_1 = arith.constant 0 : i32
    return %c0_i32, %c0_i32_0 : i32, i32
  }
  func.func @transform_7(%arg0: i32) -> (i32, i32) {
    %c0_i32 = arith.constant 0 : i32
    %c0_i32_0 = arith.constant 0 : i32
    %c0_i32_1 = arith.constant 0 : i32
    return %c0_i32, %c0_i32_0 : i32, i32
  }
  func.func @transform_8(%arg0: i32) -> (i32, i32, i32) {
    %c0_i32 = arith.constant 0 : i32
    %c0_i32_0 = arith.constant 0 : i32
    %c0_i32_1 = arith.constant 0 : i32
    return %arg0, %c0_i32, %c0_i32_0 : i32, i32, i32
  }
  func.func @transform_9(%arg0: i32) -> (i32, i32, i32) {
    %c0_i32 = arith.constant 0 : i32
    %c0_i32_0 = arith.constant 0 : i32
    %c0_i32_1 = arith.constant 0 : i32
    return %arg0, %c0_i32, %c0_i32_0 : i32, i32, i32
  }
  func.func @transform_10(%arg0: i32) -> (i32, i32, i32) {
    %c0_i32 = arith.constant 0 : i32
    %c0_i32_0 = arith.constant 0 : i32
    %c0_i32_1 = arith.constant 0 : i32
    return %arg0, %c0_i32, %c0_i32_0 : i32, i32, i32
  }
}

</mosaic_0001>

<bundles_post_ra>
// kernel: tpu_custom_call.1
= control target key start
LH: loop header
LB: loop body
LE: loop exit
PB: predicated region body
PF: predicated region fallthrough
CT: control target
= control target key end

     0   :  { %16 = vsyncpa [#allocation3], 0  ;;  %s9960_s0 = inlined_call_operand.hbm [shape: bf16[16,64,128], index: 0, kind: input, shape index: {}]   ;;  %s9961_s1 = inlined_call_operand.vmem [shape: bf16[128,128], index: 1, kind: input, shape index: {}]   ;;  %s9962_s2 = inlined_call_operand.hbm [shape: f32[1,128], index: 2, kind: input, shape index: {}]   ;;  %s9963_s3 = inlined_call_operand.vmem [shape: bf16[128,2], index: 3, kind: input, shape index: {}]   ;;  %s9964_s4 = inlined_call_operand.hbm [shape: bf16[128,256], index: 4, kind: input, shape index: {}]   ;;  %s9965_s5 = inlined_call_operand.vmem [shape: f32[1,256], index: 5, kind: input, shape index: {}]   ;;  %s9966_s6 = inlined_call_operand.vmem [shape: f32[2,128], index: 6, kind: input, shape index: {}]   ;;  %s9967_s7 = inlined_call_operand.vmem [shape: f32[1,2], index: 7, kind: input, shape index: {}]   ;;  %s9968_s8 = inlined_call_operand.vmem [shape: f32[1,16,2], index: 8, kind: output, shape index: {0}]   ;;  %s9969_s9 = inlined_call_operand.hbm [shape: f32[1,16,128], index: 9, kind: output, shape index: {1}]   ;;  %s9970_s10 = inlined_call_operand.hbm [shape: bf16[16,64,128], index: 10, kind: output, shape index: {2}]  }
   0x1   :  { %17 = vsyncpa [#allocation6], 0 }
   0x2   :  { %18 = vsyncpa [#allocation4], 0  ;;  %s40_s15 = sshll.u32 %s9962_s2, 4  ;;  %s41_s15 = int_to_ptr.hbm [resolvable:$true] %s40_s15 }
   0x3   :  { %19 = vsyncpa [#allocation10], 0  ;;  %s7588_s16 = smov [#allocation5]   ;;  %s24_s20 = sshll.u32 %s9960_s0, 4  ;;  %s25_s20 = int_to_ptr.hbm [resolvable:$true] %s24_s20 }
   0x4   :  { %s42_s17 = sshll.u32 %s7588_s16, 4  ;;  %s7589_s21 = smov [#allocation2]   ;;  %s43_s17 = int_to_ptr.vmem [resolvable:$true] %s42_s17 }
   0x5   :  { %45 = dma.hbm_to_vmem [thread:$0]  %s41_s15, 16, %s43_s17, [#allocation6]  }
   0x6   :  { %s26_s22 = sshll.u32 %s7589_s21, 4  ;;  %s7590_s23 = smov 64   ;;  %s27_s22 = int_to_ptr.vmem [resolvable:$true] %s26_s22 }
   0x7   :  { %s7591_s24 = smov 4   ;;  %s52_s26 = sshll.u32 %s9964_s4, 4  ;;  %s53_s26 = int_to_ptr.hbm [resolvable:$true] %s52_s26 }
   0x8   :  { %32 = dma.hbm_to_vmem [thread:$0]  %s25_s20, 8192, %s27_s22, [#allocation3], %s7590_s23, %s7590_s23, %s7591_s24  }
   0x9   :  { %s7592_s27 = smov [#allocation7]   ;;  %s7593_s0 = smov 128  }
   0xa   :  { %s54_s28 = sshll.u32 %s7592_s27, 4  ;;  %s7594_s29 = smov 8   ;;  %s55_s28 = int_to_ptr.vmem [resolvable:$true] %s54_s28 }
   0xb   :  { %60 = dma.hbm_to_vmem [thread:$0]  %s53_s26, 2048, %s55_s28, [#allocation6], %s7593_s0, %s7593_s0, %s7594_s29  }
   0xc   :  { %7580 = dma.done.wait [#allocation3], 8192  }
   0xd   :  { %7581 = vsyncadd [#allocation3], 4294959104 }
   0xe   :  { %7582 = dma.done.wait [#allocation6], 2064  }
   0xf   :  { %7583 = vsyncadd [#allocation6], 4294965232  ;;  %v6710_v0 = vld [vmem:[%s9961_s1 + $0x38] sm:$0xff]  ;;  %v6709_v1 = vld [vmem:[%s9961_s1 + $0x30] sm:$0xff]  ;;  %vm3485_vm0 = vcmask 517120   ;;  %vm5996_vm1 = vcmask 1040384  }
  0x10   :  { %659 = vmatpush.bf16.msra.mxu0 %v6710_v0  ;;  %v6708_v2 = vld [vmem:[%s9961_s1 + $0x28] sm:$0xff]  ;;  %v6707_v3 = vld [vmem:[%s9961_s1 + $0x20] sm:$0xff]  ;;  %v6706_v4 = vld [vmem:[%s9961_s1 + $0x18] sm:$0xff]  ;;  %vm6030_vm2 = vcmask 1041408   ;;  %vm3663_vm3 = vcmask 1047556   ;;  %vm3751_vm4 = vcmask 523264  }
  0x11   :  { %v6705_v5 = vld [vmem:[%s9961_s1 + $0x10] sm:$0xff]  ;;  %v6704_v6 = vld [vmem:[%s9961_s1 + $0x8] sm:$0xff]  ;;  %v6703_v7 = vld [vmem:[%s9961_s1] sm:$0xff]  ;;  %vm6187_vm5 = vcmask 1041409   ;;  %vm6189_vm6 = vcmask 1042434   ;;  %vm6191_vm7 = vcmask 1043459  }
  0x12   :  { %v6639_v8 = vld [vmem:[#allocation2] sm:$0xff]  ;;  %v6640_v9 = vld [vmem:[#allocation2 + $0x8] sm:$0xff]  ;;  %v6601_v10 = vld [vmem:[#allocation7 + $0x70] sm:$0xf]  ;;  %vm6193_vm8 = vcmask 1044484   ;;  %vm6195_vm9 = vcmask 1045509  }
  0x13   :  { %v6726_v11 = vld [vmem:[#allocation7 + $0x74] sm:$0xf0]  ;;  %v6725_v12 = vld [vmem:[#allocation7 + $0x74] sm:$0xf]  ;;  %v6603_v14 = vld [vmem:[#allocation7 + $0x78] sm:$0xf0] }
  0x14   :  { %660 = vmatpush.bf16.msra.mxu0 %v6709_v1  ;;  %v6602_v13 = vor.u32 %v6726_v11, %v6601_v10  ;;  %v6593_v15 = vld [vmem:[#allocation7 + $0x60] sm:$0xf]  ;;  %v6724_v16 = vld [vmem:[#allocation7 + $0x64] sm:$0xf0]  ;;  %v6606_v17 = vor.u32 %v6725_v12, %v6603_v14  ;;  %v6723_v18 = vld [vmem:[#allocation7 + $0x64] sm:$0xf] }
  0x15   :  { %v6595_v19 = vld [vmem:[#allocation7 + $0x68] sm:$0xf0]  ;;  %v6594_v20 = vor.u32 %v6724_v16, %v6593_v15  ;;  %v6585_v22 = vld [vmem:[#allocation7 + $0x50] sm:$0xf]  ;;  %v6722_v23 = vld [vmem:[#allocation7 + $0x54] sm:$0xf0] }
  0x16   :  { %1858 = vmatpush.bf16.msra.mxu1 %v6602_v13  ;;  %2187 = vmatpush.bf16.msra.mxu2 %v6606_v17  ;;  %v6598_v21 = vor.u32 %v6723_v18, %v6595_v19  ;;  %v6721_v24 = vld [vmem:[#allocation7 + $0x54] sm:$0xf]  ;;  %v6587_v25 = vld [vmem:[#allocation7 + $0x58] sm:$0xf0]  ;;  %v6586_v26 = vor.u32 %v6722_v23, %v6585_v22  ;;  %v6577_v30 = vld [vmem:[#allocation7 + $0x40] sm:$0xf] }
  0x17   :  { %v6590_v27 = vor.u32 %v6721_v24, %v6587_v25  ;;  %v6641_v28 = vld [vmem:[#allocation2 + $0x10] sm:$0xff]  ;;  %v6642_v29 = vld [vmem:[#allocation2 + $0x18] sm:$0xff]  ;;  %v6720_v31 = vld [vmem:[#allocation7 + $0x44] sm:$0xf0]  ;;  %vm6197_vm10 = vcmask 1046534   ;;  %vm6199_vm11 = vcmask 1047559  }
  0x18   :  { %661 = vmatpush.bf16.msra.mxu0 %v6708_v2  ;;  %v6719_v32 = vld [vmem:[#allocation7 + $0x44] sm:$0xf]  ;;  %v6578_v33 = vor.u32 %v6720_v31, %v6577_v30  ;;  %v6579_v34 = vld [vmem:[#allocation7 + $0x48] sm:$0xf0]  ;;  %v6569_v36 = vld [vmem:[#allocation7 + $0x30] sm:$0xf] }
  0x19   :  { %v6582_v35 = vor.u32 %v6719_v32, %v6579_v34  ;;  %v6718_v37 = vld [vmem:[#allocation7 + $0x34] sm:$0xf0]  ;;  %v6717_v38 = vld [vmem:[#allocation7 + $0x34] sm:$0xf]  ;;  %v6571_v40 = vld [vmem:[#allocation7 + $0x38] sm:$0xf0] }
  0x1a   :  { %1859 = vmatpush.bf16.msra.mxu1 %v6594_v20  ;;  %2188 = vmatpush.bf16.msra.mxu2 %v6598_v21  ;;  %v6570_v39 = vor.u32 %v6718_v37, %v6569_v36  ;;  %v6574_v41 = vor.u32 %v6717_v38, %v6571_v40  ;;  %v6561_v42 = vld [vmem:[#allocation7 + $0x20] sm:$0xf]  ;;  %v6716_v43 = vld [vmem:[#allocation7 + $0x24] sm:$0xf0]  ;;  %v6715_v44 = vld [vmem:[#allocation7 + $0x24] sm:$0xf] }
  0x1b   :  { %v6562_v45 = vor.u32 %v6716_v43, %v6561_v42  ;;  %v6563_v46 = vld [vmem:[#allocation7 + $0x28] sm:$0xf0]  ;;  %v6553_v48 = vld [vmem:[#allocation7 + $0x10] sm:$0xf]  ;;  %v6714_v49 = vld [vmem:[#allocation7 + $0x14] sm:$0xf0] }
  0x1c   :  { %662 = vmatpush.bf16.msra.mxu0 %v6707_v3  ;;  %v6566_v47 = vor.u32 %v6715_v44, %v6563_v46  ;;  %v6713_v50 = vld [vmem:[#allocation7 + $0x14] sm:$0xf]  ;;  %v6554_v51 = vor.u32 %v6714_v49, %v6553_v48  ;;  %v6555_v52 = vld [vmem:[#allocation7 + $0x18] sm:$0xf0]  ;;  %v6545_v54 = vld [vmem:[#allocation7] sm:$0xf] }
  0x1d   :  { %v6558_v53 = vor.u32 %v6713_v50, %v6555_v52  ;;  %v6712_v55 = vld [vmem:[#allocation7 + $0x4] sm:$0xf0]  ;;  %v6711_v56 = vld [vmem:[#allocation7 + $0x4] sm:$0xf]  ;;  %v6547_v58 = vld [vmem:[#allocation7 + $0x8] sm:$0xf0] }
  0x1e   :  { %1860 = vmatpush.bf16.msra.mxu1 %v6586_v26  ;;  %2189 = vmatpush.bf16.msra.mxu2 %v6590_v27  ;;  %v6546_v57 = vor.u32 %v6712_v55, %v6545_v54  ;;  %v6550_v59 = vor.u32 %v6711_v56, %v6547_v58  ;;  %v7694_v60 = vld [vmem:[#allocation5] ss:$0 sm:$0xff]  ;;  %v6734_v37 = vld [vmem:[%s9963_s3 + $0x38] sm:$0xff]  ;;  %v6732_v44 = vld [vmem:[%s9963_s3 + $0x28] sm:$0xff]  ;;  %vm6210_vm12 = vcmask 15360   ;;  %s7598_s15 = smov [#allocation8]  }
  0x1f   :  { %v6643_v23 = vld [vmem:[#allocation2 + $0x20] sm:$0xff]  ;;  %2644 = vmatpush.bf16.msra.mxu3 %v6734_v37  ;;  %v6730_v52 = vld [vmem:[%s9963_s3 + $0x18] sm:$0xff]  ;;  %v6729_v54 = vld [vmem:[%s9963_s3 + $0x10] sm:$0xff]  ;;  %s6219_s16 = sshll.u32 %s7598_s15, 4  ;;  %s6221_s19 = sshll.u32 %s9969_s9, 4  ;;  %s6220_s16 = int_to_ptr.vmem [resolvable:$true] %s6219_s16  ;;  %s6222_s19 = int_to_ptr.hbm [resolvable:$true] %s6221_s19 }
  0x20   :  { %663 = vmatpush.bf16.msra.mxu0 %v6706_v4  ;;  %v6731_v49 = vld [vmem:[%s9963_s3 + $0x20] sm:$0xff]  ;;  %v6728_v55 = vld [vmem:[%s9963_s3 + $0x8] sm:$0xff]  ;;  %s7599_s20 = smov [#allocation9]   ;;  %s6234_s2 = sshll.u32 %s9970_s10, 4  ;;  %s6235_s2 = int_to_ptr.hbm [resolvable:$true] %s6234_s2 }
  0x21   :  { %v6727_v56 = vld [vmem:[%s9963_s3] sm:$0xff]  ;;  %s6232_s21 = sshll.u32 %s7599_s20, 4  ;;  %s6233_s21 = int_to_ptr.vmem [resolvable:$true] %s6232_s21 }
  0x22   :  { %1861 = vmatpush.bf16.msra.mxu1 %v6578_v33  ;;  %2190 = vmatpush.bf16.msra.mxu2 %v6582_v35  ;;  %v6644_v35 = vld [vmem:[#allocation2 + $0x28] sm:$0xff]  ;;  %v1388_v58 = vld [vmem:[%s9965_s5] sm:$0x3] }
  0x24   :  { %664 = vmatpush.bf16.msra.mxu0 %v6705_v5 }
  0x26   :  { %1862 = vmatpush.bf16.msra.mxu1 %v6570_v39  ;;  %2191 = vmatpush.bf16.msra.mxu2 %v6574_v41  ;;  %v6733_v39 = vld [vmem:[%s9963_s3 + $0x30] sm:$0xff] }
  0x27   :  { %2645 = vmatpush.bf16.msra.mxu3 %v6733_v39 }
  0x28   :  { %665 = vmatpush.bf16.msra.mxu0 %v6704_v6 }
  0x2a   :  { %1863 = vmatpush.bf16.msra.mxu1 %v6562_v45  ;;  %2192 = vmatpush.bf16.msra.mxu2 %v6566_v47 }
  0x2b   :  { %2646 = vmatpush.bf16.msra.mxu3 %v6732_v44 }
  0x2c   :  { %666 = vmatpush.bf16.msra.mxu0 %v6703_v7 }
  0x2e   :  { %1864 = vmatpush.bf16.msra.mxu1 %v6554_v51  ;;  %2193 = vmatpush.bf16.msra.mxu2 %v6558_v53  ;;  %v6645_v51 = vld [vmem:[#allocation2 + $0x30] sm:$0xff]  ;;  %v6646_v53 = vld [vmem:[#allocation2 + $0x38] sm:$0xff] }
  0x2f   :  { %667 = vmatmul.bf16.vlgmr.msra.gmra.mxu0 %v6639_v8  ;;  %2647 = vmatpush.bf16.msra.mxu3 %v6731_v49 }
  0x32   :  { %1865 = vmatpush.bf16.msra.mxu1 %v6546_v57  ;;  %2194 = vmatpush.bf16.msra.mxu2 %v6550_v59  ;;  %v7731_v59 = vperm.slane %v1388_v58, 0 }
  0x33   :  { %2648 = vmatpush.bf16.msra.mxu3 %v6730_v52 }
  0x37   :  { %2649 = vmatpush.bf16.msra.mxu3 %v6729_v54 }
  0x3b   :  { %2650 = vmatpush.bf16.msra.mxu3 %v6728_v55 }
  0x3f   :  { %672 = vmatmul.bf16.gmra.mxu0 %v6640_v9  ;;  %2651 = vmatpush.bf16.msra.mxu3 %v6727_v56 }
  0x4f   :  { %677 = vmatmul.bf16.gmra.mxu0 %v6641_v28 }
  0x5f   :  { %682 = vmatmul.bf16.gmra.mxu0 %v6642_v29 }
  0x6f   :  { %687 = vmatmul.bf16.gmra.mxu0 %v6643_v23 }
  0x7f   :  { %692 = vmatmul.bf16.gmra.mxu0 %v6644_v35 }
  0x8f   :  { %697 = vmatmul.bf16.gmra.mxu0 %v6645_v51 }
  0x9f   :  { %702 = vmatmul.bf16.gmra.mxu0 %v6646_v53 }
  0xac   :  { %v668_v61 = vpop.f32.mrf.mxu0 }
  0xad   :  { %v669_v62 = vadd.f32 %v7694_v60, %v668_v61 }
  0xaf   :  { %v988_v63 = vmax.f32 %v669_v62, 0.0 }
  0xb1   :  { %v1116_v2 = vpack.c.bf16 %v988_v63, %v988_v63 }
  0xb3   :  { %v1522_v6 = vunpack.c.l.b16 %v1116_v2 }
  0xb4   :  { %v670_v0 = vpop.f32.mrf.mxu0 }
  0xb5   :  { %v671_v1 = vadd.f32 %v7694_v60, %v670_v0 }
  0xb7   :  { %v989_v3 = vmax.f32 %v671_v1, 0.0 }
  0xb9   :  { %v6738_v4 = vpack.c.bf16 %v989_v3, %v988_v63  ;;  %v1117_v5 = vpack.c.bf16 %v989_v3, %v989_v3 }
  0xbb   :  { %6739 = vst [vmem:[#allocation9] sm:$0xff] %v6738_v4   ;;  %v1523_v7 = vunpack.c.l.b16 %v1117_v5 }
  0xbc   :  { %v673_v8 = vpop.f32.mrf.mxu0 }
  0xbd   :  { %v1650_v9 = vpack.c.b16 %v1523_v7, %v1522_v6  ;;  %v674_v10 = vadd.f32 %v7694_v60, %v673_v8 }
  0xbf   :  { %1866 = vmatmul.bf16.vlgmr.msra.gmra.mxu1 %v1650_v9  ;;  %2195 = vmatmul.bf16.vlgmr.msra.gmra.mxu2 %v1650_v9  ;;  %v990_v11 = vmax.f32 %v674_v10, 0.0 }
  0xc1   :  { %v1118_v14 = vpack.c.bf16 %v990_v11, %v990_v11 }
  0xc3   :  { %v1524_v18 = vunpack.c.l.b16 %v1118_v14 }
  0xc4   :  { %v675_v12 = vpop.f32.mrf.mxu0 }
  0xc5   :  { %v676_v13 = vadd.f32 %v7694_v60, %v675_v12 }
  0xc7   :  { %v991_v15 = vmax.f32 %v676_v13, 0.0 }
  0xc9   :  { %v6743_v16 = vpack.c.bf16 %v991_v15, %v990_v11  ;;  %v1119_v17 = vpack.c.bf16 %v991_v15, %v991_v15 }
  0xcb   :  { %7055 = vst [vmem:[#allocation9 + $0x8] sm:$0xff] %v6743_v16   ;;  %v1525_v19 = vunpack.c.l.b16 %v1119_v17 }
  0xcc   :  { %v678_v20 = vpop.f32.mrf.mxu0 }
  0xcd   :  { %v1651_v21 = vpack.c.b16 %v1525_v19, %v1524_v18  ;;  %v679_v22 = vadd.f32 %v7694_v60, %v678_v20 }
  0xcf   :  { %1871 = vmatmul.bf16.gmra.mxu1 %v1651_v21  ;;  %2200 = vmatmul.bf16.gmra.mxu2 %v1651_v21  ;;  %v992_v24 = vmax.f32 %v679_v22, 0.0 }
  0xd1   :  { %v1120_v27 = vpack.c.bf16 %v992_v24, %v992_v24 }
  0xd3   :  { %v1526_v31 = vunpack.c.l.b16 %v1120_v27 }
  0xd4   :  { %v680_v25 = vpop.f32.mrf.mxu0 }
  0xd5   :  { %v681_v26 = vadd.f32 %v7694_v60, %v680_v25 }
  0xd7   :  { %v993_v28 = vmax.f32 %v681_v26, 0.0 }
  0xd9   :  { %v6748_v29 = vpack.c.bf16 %v993_v28, %v992_v24  ;;  %v1121_v30 = vpack.c.bf16 %v993_v28, %v993_v28 }
  0xdb   :  { %7056 = vst [vmem:[#allocation9 + $0x10] sm:$0xff] %v6748_v29   ;;  %v1527_v32 = vunpack.c.l.b16 %v1121_v30 }
  0xdc   :  { %v683_v33 = vpop.f32.mrf.mxu0 }
  0xdd   :  { %v1652_v34 = vpack.c.b16 %v1527_v32, %v1526_v31  ;;  %v684_v36 = vadd.f32 %v7694_v60, %v683_v33 }
  0xdf   :  { %1876 = vmatmul.bf16.gmra.mxu1 %v1652_v34  ;;  %2205 = vmatmul.bf16.gmra.mxu2 %v1652_v34  ;;  %v994_v38 = vmax.f32 %v684_v36, 0.0 }
  0xe1   :  { %v1122_v42 = vpack.c.bf16 %v994_v38, %v994_v38 }
  0xe3   :  { %v1528_v47 = vunpack.c.l.b16 %v1122_v42 }
  0xe4   :  { %v685_v40 = vpop.f32.mrf.mxu0 }
  0xe5   :  { %v686_v41 = vadd.f32 %v7694_v60, %v685_v40 }
  0xe7   :  { %v995_v43 = vmax.f32 %v686_v41, 0.0  ;;  %v6647_v41 = vld [vmem:[#allocation2 + $0x40] sm:$0xff] }
  0xe8   :  { %707 = vmatmul.bf16.gmra.mxu0 %v6647_v41 }
  0xe9   :  { %v6753_v45 = vpack.c.bf16 %v995_v43, %v994_v38  ;;  %v1123_v46 = vpack.c.bf16 %v995_v43, %v995_v43 }
  0xeb   :  { %7057 = vst [vmem:[#allocation9 + $0x18] sm:$0xff] %v6753_v45   ;;  %v1529_v48 = vunpack.c.l.b16 %v1123_v46 }
  0xec   :  { %v688_v2 = vpop.f32.mrf.mxu0 }
  0xed   :  { %v1653_v50 = vpack.c.b16 %v1529_v48, %v1528_v47  ;;  %v689_v4 = vadd.f32 %v7694_v60, %v688_v2 }
  0xef   :  { %1881 = vmatmul.bf16.gmra.mxu1 %v1653_v50  ;;  %2210 = vmatmul.bf16.gmra.mxu2 %v1653_v50  ;;  %v996_v8 = vmax.f32 %v689_v4, 0.0  ;;  %v6649_v4 = vld [vmem:[#allocation2 + $0x50] sm:$0xff] }
  0xf1   :  { %v1124_v11 = vpack.c.bf16 %v996_v8, %v996_v8 }
  0xf3   :  { %v1530_v16 = vunpack.c.l.b16 %v1124_v11 }
  0xf4   :  { %v690_v9 = vpop.f32.mrf.mxu0 }
  0xf5   :  { %v691_v12 = vadd.f32 %v7694_v60, %v690_v9 }
  0xf7   :  { %v997_v13 = vmax.f32 %v691_v12, 0.0 }
  0xf9   :  { %v6758_v14 = vpack.c.bf16 %v997_v13, %v996_v8  ;;  %v1125_v15 = vpack.c.bf16 %v997_v13, %v997_v13 }
  0xfb   :  { %7058 = vst [vmem:[#allocation9 + $0x20] sm:$0xff] %v6758_v14   ;;  %v1531_v17 = vunpack.c.l.b16 %v1125_v15 }
  0xfc   :  { %v693_v18 = vpop.f32.mrf.mxu0 }
  0xfd   :  { %v694_v20 = vadd.f32 %v7694_v60, %v693_v18  ;;  %v1654_v21 = vpack.c.b16 %v1531_v17, %v1530_v16 }
  0xff   :  { %1886 = vmatmul.bf16.gmra.mxu1 %v1654_v21  ;;  %2215 = vmatmul.bf16.gmra.mxu2 %v1654_v21  ;;  %v998_v25 = vmax.f32 %v694_v20, 0.0 }
 0x101   :  { %v1126_v28 = vpack.c.bf16 %v998_v25, %v998_v25 }
 0x103   :  { %v1532_v33 = vunpack.c.l.b16 %v1126_v28 }
 0x104   :  { %v695_v26 = vpop.f32.mrf.mxu0 }
 0x105   :  { %v696_v29 = vadd.f32 %v7694_v60, %v695_v26 }
 0x107   :  { %v999_v30 = vmax.f32 %v696_v29, 0.0 }
 0x109   :  { %v6763_v31 = vpack.c.bf16 %v999_v30, %v998_v25  ;;  %v1127_v32 = vpack.c.bf16 %v999_v30, %v999_v30 }
 0x10b   :  { %7059 = vst [vmem:[#allocation9 + $0x28] sm:$0xff] %v6763_v31   ;;  %v1533_v34 = vunpack.c.l.b16 %v1127_v32 }
 0x10c   :  { %v698_v35 = vpop.f32.mrf.mxu0 }
 0x10d   :  { %v699_v37 = vadd.f32 %v7694_v60, %v698_v35  ;;  %v1655_v38 = vpack.c.b16 %v1533_v34, %v1532_v33 }
 0x10f   :  { %1891 = vmatmul.bf16.gmra.mxu1 %v1655_v38  ;;  %2220 = vmatmul.bf16.gmra.mxu2 %v1655_v38  ;;  %v1000_v43 = vmax.f32 %v699_v37, 0.0 }
 0x111   :  { %v1128_v45 = vpack.c.bf16 %v1000_v43, %v1000_v43 }
 0x113   :  { %v1534_v50 = vunpack.c.l.b16 %v1128_v45 }
 0x114   :  { %v700_v44 = vpop.f32.mrf.mxu0 }
 0x115   :  { %v701_v46 = vadd.f32 %v7694_v60, %v700_v44 }
 0x117   :  { %v1001_v47 = vmax.f32 %v701_v46, 0.0 }
 0x119   :  { %v6768_v48 = vpack.c.bf16 %v1001_v47, %v1000_v43  ;;  %v1129_v49 = vpack.c.bf16 %v1001_v47, %v1001_v47 }
 0x11b   :  { %7060 = vst [vmem:[#allocation9 + $0x30] sm:$0xff] %v6768_v48   ;;  %v1535_v51 = vunpack.c.l.b16 %v1129_v49 }
 0x11c   :  { %v703_v52 = vpop.f32.mrf.mxu0 }
 0x11d   :  { %v704_v53 = vadd.f32 %v7694_v60, %v703_v52  ;;  %v1656_v54 = vpack.c.b16 %v1535_v51, %v1534_v50 }
 0x11f   :  { %1896 = vmatmul.bf16.gmra.mxu1 %v1656_v54  ;;  %2225 = vmatmul.bf16.gmra.mxu2 %v1656_v54  ;;  %v1002_v55 = vmax.f32 %v704_v53, 0.0 }
 0x124   :  { %v705_v56 = vpop.f32.mrf.mxu0 }
 0x125   :  { %v706_v58 = vadd.f32 %v7694_v60, %v705_v56 }
 0x13c   :  { %v1867_v57 = vpop.f32.mrf.mxu1 }
 0x13d   :  { %v1868_v62 = vadd.f32 %v1867_v57, %v7731_v59  ;;  %v1130_v57 = vpack.c.bf16 %v1002_v55, %v1002_v55 }
 0x144   :  { %v1869_v61 = vpop.f32.mrf.mxu1 }
 0x145   :  { %v1870_v63 = vadd.f32 %v1869_v61, %v7731_v59  ;;  %v1003_v61 = vmax.f32 %v706_v58, 0.0 }
 0x147   :  { %v2516_v0 = vpack.c.bf16 %v1870_v63, %v1868_v62  ;;  %v6773_v62 = vpack.c.bf16 %v1003_v61, %v1002_v55  ;;  %v1131_v63 = vpack.c.bf16 %v1003_v61, %v1003_v61 }
 0x149   :  { %2652 = vmatmul.bf16.vlgmr.msra.gmra.mxu3 %v2516_v0  ;;  %v1536_v0 = vunpack.c.l.b16 %v1130_v57  ;;  %7061 = vst [vmem:[#allocation9 + $0x38] sm:$0xff] %v6773_v62  }
 0x14c   :  { %v1872_v1 = vpop.f32.mrf.mxu1 }
 0x14d   :  { %v1873_v5 = vadd.f32 %v1872_v1, %v7731_v59  ;;  %v1537_v1 = vunpack.c.l.b16 %v1131_v63 }
 0x14f   :  { %v1657_v2 = vpack.c.b16 %v1537_v1, %v1536_v0 }
 0x151   :  { %1901 = vmatmul.bf16.gmra.mxu1 %v1657_v2  ;;  %2230 = vmatmul.bf16.gmra.mxu2 %v1657_v2 }
 0x154   :  { %v1874_v3 = vpop.f32.mrf.mxu1 }
 0x155   :  { %v1875_v6 = vadd.f32 %v1874_v3, %v7731_v59  ;;  %v6648_v3 = vld [vmem:[#allocation2 + $0x48] sm:$0xff] }
 0x156   :  { %712 = vmatmul.bf16.gmra.mxu0 %v6648_v3 }
 0x157   :  { %v2517_v7 = vpack.c.bf16 %v1875_v6, %v1873_v5 }
 0x159   :  { %2657 = vmatmul.bf16.gmra.mxu3 %v2517_v7  ;;  %v6650_v7 = vld [vmem:[#allocation2 + $0x58] sm:$0xff] }
 0x15c   :  { %v1877_v10 = vpop.f32.mrf.mxu1 }
 0x15d   :  { %v1878_v22 = vadd.f32 %v1877_v10, %v7731_v59 }
 0x164   :  { %v1879_v19 = vpop.f32.mrf.mxu1 }
 0x165   :  { %v1880_v23 = vadd.f32 %v1879_v19, %v7731_v59 }
 0x166   :  { %717 = vmatmul.bf16.gmra.mxu0 %v6649_v4 }
 0x167   :  { %v2518_v24 = vpack.c.bf16 %v1880_v23, %v1878_v22  ;;  %v708_v23 = vpop.f32.mrf.mxu0 }
 0x168   :  { %v709_v26 = vadd.f32 %v7694_v60, %v708_v23  ;;  %v6653_v23 = vld [vmem:[#allocation2 + $0x70] sm:$0xff] }
 0x169   :  { %2662 = vmatmul.bf16.gmra.mxu3 %v2518_v24 }
 0x16a   :  { %v1004_v31 = vmax.f32 %v709_v26, 0.0 }
 0x16c   :  { %v1882_v27 = vpop.f32.mrf.mxu1  ;;  %v1132_v37 = vpack.c.bf16 %v1004_v31, %v1004_v31 }
 0x16d   :  { %v1883_v39 = vadd.f32 %v1882_v27, %v7731_v59 }
 0x16f   :  { %v710_v27 = vpop.f32.mrf.mxu0 }
 0x170   :  { %v711_v28 = vadd.f32 %v7694_v60, %v710_v27 }
 0x172   :  { %v1005_v32 = vmax.f32 %v711_v28, 0.0 }
 0x174   :  { %v1884_v36 = vpop.f32.mrf.mxu1  ;;  %v6778_v34 = vpack.c.bf16 %v1005_v32, %v1004_v31  ;;  %v1133_v38 = vpack.c.bf16 %v1005_v32, %v1005_v32 }
 0x175   :  { %v1885_v40 = vadd.f32 %v1884_v36, %v7731_v59 }
 0x176   :  { %722 = vmatmul.bf16.gmra.mxu0 %v6650_v7  ;;  %7062 = vst [vmem:[#allocation9 + $0x40] sm:$0xff] %v6778_v34   ;;  %v1539_v41 = vunpack.c.l.b16 %v1133_v38 }
 0x177   :  { %v2519_v42 = vpack.c.bf16 %v1885_v40, %v1883_v39  ;;  %v1538_v39 = vunpack.c.l.b16 %v1132_v37 }
 0x179   :  { %2667 = vmatmul.bf16.gmra.mxu3 %v2519_v42  ;;  %v1658_v44 = vpack.c.b16 %v1539_v41, %v1538_v39 }
 0x17b   :  { %1906 = vmatmul.bf16.gmra.mxu1 %v1658_v44  ;;  %2235 = vmatmul.bf16.gmra.mxu2 %v1658_v44 }
 0x17c   :  { %v1887_v9 = vpop.f32.mrf.mxu1 }
 0x17d   :  { %v1888_v11 = vadd.f32 %v1887_v9, %v7731_v59 }
 0x184   :  { %v1889_v12 = vpop.f32.mrf.mxu1 }
 0x185   :  { %v1890_v14 = vadd.f32 %v1889_v12, %v7731_v59 }
 0x187   :  { %v2520_v15 = vpack.c.bf16 %v1890_v14, %v1888_v11 }
 0x189   :  { %2672 = vmatmul.bf16.gmra.mxu3 %v2520_v15 }
 0x18c   :  { %v1892_v16 = vpop.f32.mrf.mxu1 }
 0x18d   :  { %v1893_v18 = vadd.f32 %v1892_v16, %v7731_v59 }
 0x194   :  { %v1894_v19 = vpop.f32.mrf.mxu1 }
 0x195   :  { %v1895_v21 = vadd.f32 %v1894_v19, %v7731_v59  ;;  %v6652_v19 = vld [vmem:[#allocation2 + $0x68] sm:$0xff] }
 0x197   :  { %v2521_v22 = vpack.c.bf16 %v1895_v21, %v1893_v18 }
 0x199   :  { %2677 = vmatmul.bf16.gmra.mxu3 %v2521_v22 }
 0x19c   :  { %v1897_v24 = vpop.f32.mrf.mxu1 }
 0x19d   :  { %v1898_v29 = vadd.f32 %v1897_v24, %v7731_v59 }
 0x1a4   :  { %v1899_v30 = vpop.f32.mrf.mxu1 }
 0x1a5   :  { %v1900_v33 = vadd.f32 %v1899_v30, %v7731_v59 }
 0x1a7   :  { %v2522_v35 = vpack.c.bf16 %v1900_v33, %v1898_v29 }
 0x1a9   :  { %2682 = vmatmul.bf16.gmra.mxu3 %v2522_v35 }
 0x1cc   :  { %v2653_v5 = vpop.f32.mrf.mxu3 }
 0x1cd   :  { %2973 = vxpose.xlu0.b32.start [1/8] (short) (narrow) %v2653_v5, 8 }
 0x1ce   :  { %v1902_v36 = vpop.f32.mrf.mxu1 }
 0x1cf   :  { %v1903_v40 = vadd.f32 %v1902_v36, %v7731_v59 }
 0x1d3   :  { %v713_v46 = vpop.f32.mrf.mxu0 }
 0x1d4   :  { %v2655_v6 = vpop.f32.mrf.mxu3  ;;  %v714_v47 = vadd.f32 %v7694_v60, %v713_v46 }
 0x1d5   :  { %2974 = vxpose.xlu0.b32.cont [2/8] (short) (narrow) %v2655_v6, 8 }
 0x1d6   :  { %v1904_v42 = vpop.f32.mrf.mxu1  ;;  %v1006_v48 = vmax.f32 %v714_v47, 0.0 }
 0x1d7   :  { %v1905_v43 = vadd.f32 %v1904_v42, %v7731_v59 }
 0x1d8   :  { %v1134_v50 = vpack.c.bf16 %v1006_v48, %v1006_v48 }
 0x1d9   :  { %v2523_v45 = vpack.c.bf16 %v1905_v43, %v1903_v40 }
 0x1da   :  { %v1540_v55 = vunpack.c.l.b16 %v1134_v50 }
 0x1db   :  { %2687 = vmatmul.bf16.gmra.mxu3 %v2523_v45  ;;  %v715_v49 = vpop.f32.mrf.mxu0  ;;  %v7774_v45 = vpop.f32.mrf.mxu2 }
 0x1dc   :  { %v2658_v8 = vpop.f32.mrf.mxu3  ;;  %v716_v51 = vadd.f32 %v7694_v60, %v715_v49 }
 0x1dd   :  { %2975 = vxpose.xlu0.b32.cont [3/8] (short) (narrow) %v2658_v8, 8  ;;  %v6651_v8 = vld [vmem:[#allocation2 + $0x60] sm:$0xff] }
 0x1de   :  { %v1007_v52 = vmax.f32 %v716_v51, 0.0  ;;  %727 = vmatmul.bf16.gmra.mxu0 %v6651_v8 }
 0x1e0   :  { %v6783_v53 = vpack.c.bf16 %v1007_v52, %v1006_v48  ;;  %v1135_v54 = vpack.c.bf16 %v1007_v52, %v1007_v52 }
 0x1e2   :  { %7063 = vst [vmem:[#allocation9 + $0x48] sm:$0xff] %v6783_v53   ;;  %v1541_v56 = vunpack.c.l.b16 %v1135_v54 }
 0x1e3   :  { %v718_v57 = vpop.f32.mrf.mxu0 }
 0x1e4   :  { %v2660_v10 = vpop.f32.mrf.mxu3  ;;  %v1659_v58 = vpack.c.b16 %v1541_v56, %v1540_v55  ;;  %v719_v61 = vadd.f32 %v7694_v60, %v718_v57  ;;  %v7779_v55 = vpop.f32.mrf.mxu2 }
 0x1e5   :  { %2976 = vxpose.xlu0.b32.cont [4/8] (short) (narrow) %v2660_v10, 8 }
 0x1e6   :  { %1911 = vmatmul.bf16.gmra.mxu1 %v1659_v58  ;;  %2240 = vmatmul.bf16.gmra.mxu2 %v1659_v58  ;;  %v1008_v62 = vmax.f32 %v719_v61, 0.0 }
 0x1e8   :  { %v1136_v1 = vpack.c.bf16 %v1008_v62, %v1008_v62 }
 0x1ea   :  { %v1542_v5 = vunpack.c.l.b16 %v1136_v1 }
 0x1eb   :  { %v720_v63 = vpop.f32.mrf.mxu0 }
 0x1ec   :  { %v2663_v13 = vpop.f32.mrf.mxu3  ;;  %v721_v0 = vadd.f32 %v7694_v60, %v720_v63 }
 0x1ed   :  { %2977 = vxpose.xlu0.b32.cont [5/8] (short) (narrow) %v2663_v13, 8 }
 0x1ee   :  { %v1009_v2 = vmax.f32 %v721_v0, 0.0  ;;  %732 = vmatmul.bf16.gmra.mxu0 %v6652_v19 }
 0x1f0   :  { %v6788_v3 = vpack.c.bf16 %v1009_v2, %v1008_v62  ;;  %v1137_v4 = vpack.c.bf16 %v1009_v2, %v1009_v2 }
 0x1f2   :  { %7064 = vst [vmem:[#allocation9 + $0x50] sm:$0xff] %v6788_v3   ;;  %v1543_v6 = vunpack.c.l.b16 %v1137_v4 }
 0x1f3   :  { %v723_v7 = vpop.f32.mrf.mxu0 }
 0x1f4   :  { %v2665_v17 = vpop.f32.mrf.mxu3  ;;  %v724_v9 = vadd.f32 %v7694_v60, %v723_v7  ;;  %v1660_v10 = vpack.c.b16 %v1543_v6, %v1542_v5  ;;  %v7782_v5 = vpop.f32.mrf.mxu2 }
 0x1f5   :  { %2978 = vxpose.xlu0.b32.cont [6/8] (short) (narrow) %v2665_v17, 8 }
 0x1f6   :  { %1916 = vmatmul.bf16.gmra.mxu1 %v1660_v10  ;;  %2245 = vmatmul.bf16.gmra.mxu2 %v1660_v10  ;;  %v1010_v11 = vmax.f32 %v724_v9, 0.0 }
 0x1f8   :  { %v1138_v13 = vpack.c.bf16 %v1010_v11, %v1010_v11  ;;  %v1907_v28 = vpop.f32.mrf.mxu1 }
 0x1f9   :  { %v1908_v31 = vadd.f32 %v1907_v28, %v7731_v59 }
 0x1fa   :  { %v1544_v18 = vunpack.c.l.b16 %v1138_v13 }
 0x1fb   :  { %v725_v12 = vpop.f32.mrf.mxu0 }
 0x1fc   :  { %v2668_v20 = vpop.f32.mrf.mxu3  ;;  %v726_v14 = vadd.f32 %v7694_v60, %v725_v12 }
 0x1fd   :  { %2979 = vxpose.xlu0.b32.cont [7/8] (short) (narrow) %v2668_v20, 8 }
 0x1fe   :  { %v1011_v15 = vmax.f32 %v726_v14, 0.0  ;;  %737 = vmatmul.bf16.gmra.mxu0 %v6653_v23 }
 0x200   :  { %v6793_v16 = vpack.c.bf16 %v1011_v15, %v1010_v11  ;;  %v1139_v17 = vpack.c.bf16 %v1011_v15, %v1011_v15  ;;  %v1909_v30 = vpop.f32.mrf.mxu1 }
 0x201   :  { %v1910_v32 = vadd.f32 %v1909_v30, %v7731_v59 }
 0x202   :  { %7065 = vst [vmem:[#allocation9 + $0x58] sm:$0xff] %v6793_v16   ;;  %v1545_v20 = vunpack.c.l.b16 %v1139_v17 }
 0x203   :  { %v2524_v34 = vpack.c.bf16 %v1910_v32, %v1908_v31 }
 0x204   :  { %v2670_v25 = vpop.f32.mrf.mxu3  ;;  %v1661_v21 = vpack.c.b16 %v1545_v20, %v1544_v18  ;;  %v7787_v18 = vpop.f32.mrf.mxu2 }
 0x205   :  { %2980 = vxpose.xlu0.b32.end [8/8] (short) (narrow) %v2670_v25, 8  ;;  %v6654_v25 = vld [vmem:[#allocation2 + $0x78] sm:$0xff]  ;;  %2692 = vmatmul.bf16.gmra.mxu3 %v2524_v34 }
 0x206   :  { %1921 = vmatmul.bf16.gmra.mxu1 %v1661_v21  ;;  %2250 = vmatmul.bf16.gmra.mxu2 %v1661_v21 }
 0x20c   :  { %v2673_v26 = vpop.f32.mrf.mxu3 }
 0x20e   :  { %742 = vmatmul.bf16.gmra.mxu0 %v6654_v25 }
 0x214   :  { %v2675_v27 = vpop.f32.mrf.mxu3 }
 0x21c   :  { %v2678_v29 = vpop.f32.mrf.mxu3 }
 0x224   :  { %v2680_v33 = vpop.f32.mrf.mxu3 }
 0x22c   :  { %v2683_v36 = vpop.f32.mrf.mxu3 }
 0x234   :  { %v2685_v41 = vpop.f32.mrf.mxu3 }
 0x25b   :  { %v728_v42 = vpop.f32.mrf.mxu0 }
 0x25c   :  { %v729_v44 = vadd.f32 %v7694_v60, %v728_v42 }
 0x25e   :  { %v1012_v46 = vmax.f32 %v729_v44, 0.0  ;;  %v2688_v47 = vpop.f32.mrf.mxu3 }
 0x260   :  { %v1140_v51 = vpack.c.bf16 %v1012_v46, %v1012_v46 }
 0x262   :  { %v1546_v57 = vunpack.c.l.b16 %v1140_v51 }
 0x263   :  { %v1912_v35 = vpop.f32.mrf.mxu1  ;;  %v730_v49 = vpop.f32.mrf.mxu0 }
 0x264   :  { %v1913_v37 = vadd.f32 %v1912_v35, %v7731_v59  ;;  %v731_v52 = vadd.f32 %v7694_v60, %v730_v49 }
 0x266   :  { %v1013_v54 = vmax.f32 %v731_v52, 0.0  ;;  %v2690_v3 = vpop.f32.mrf.mxu3 }
 0x268   :  { %v1141_v58 = vpack.c.bf16 %v1013_v54, %v1013_v54  ;;  %v6798_v61 = vpack.c.bf16 %v1013_v54, %v1012_v46  ;;  %v6656_v54 = vld [vmem:[#allocation2 + $0x88] sm:$0xff] }
 0x26a   :  { %7066 = vst [vmem:[#allocation9 + $0x60] sm:$0xff] %v6798_v61   ;;  %v1547_v62 = vunpack.c.l.b16 %v1141_v58 }
 0x26b   :  { %v1914_v38 = vpop.f32.mrf.mxu1  ;;  %v733_v63 = vpop.f32.mrf.mxu0 }
 0x26c   :  { %v1915_v39 = vadd.f32 %v1914_v38, %v7731_v59  ;;  %v734_v1 = vadd.f32 %v7694_v60, %v733_v63  ;;  %v1662_v2 = vpack.c.b16 %v1547_v62, %v1546_v57 }
 0x26e   :  { %v2525_v40 = vpack.c.bf16 %v1915_v39, %v1913_v37  ;;  %1926 = vmatmul.bf16.gmra.mxu1 %v1662_v2  ;;  %2255 = vmatmul.bf16.gmra.mxu2 %v1662_v2  ;;  %v1014_v4 = vmax.f32 %v734_v1, 0.0 }
 0x270   :  { %2697 = vmatmul.bf16.gmra.mxu3 %v2525_v40  ;;  %v1142_v9 = vpack.c.bf16 %v1014_v4, %v1014_v4 }
 0x271   :  { %v7765_v22 = vpop.trf.xlu0 }
 0x272   :  { %v3486_v24 = vsel %vm3485_vm0, %v7765_v22, -inf  ;;  %v1548_v14 = vunpack.c.l.b16 %v1142_v9 }
 0x273   :  { %3487 = vmax.xlane.f32.xlu1 %v3486_v24  ;;  %v1917_v43 = vpop.f32.mrf.mxu1  ;;  %v735_v7 = vpop.f32.mrf.mxu0 }
 0x274   :  { %v1918_v48 = vadd.f32 %v1917_v43, %v7731_v59  ;;  %v736_v10 = vadd.f32 %v7694_v60, %v735_v7 }
 0x276   :  { %v1015_v12 = vmax.f32 %v736_v10, 0.0 }
 0x278   :  { %v1143_v15 = vpack.c.bf16 %v1015_v12, %v1015_v12  ;;  %v6803_v16 = vpack.c.bf16 %v1015_v12, %v1014_v4  ;;  %v6659_v12 = vld [vmem:[#allocation2 + $0xa0] sm:$0xff] }
 0x27a   :  { %7067 = vst [vmem:[#allocation9 + $0x68] sm:$0xff] %v6803_v16   ;;  %v1549_v17 = vunpack.c.l.b16 %v1143_v15 }
 0x27b   :  { %v1919_v50 = vpop.f32.mrf.mxu1  ;;  %v738_v19 = vpop.f32.mrf.mxu0 }
 0x27c   :  { %v1920_v53 = vadd.f32 %v1919_v50, %v7731_v59  ;;  %v739_v20 = vadd.f32 %v7694_v60, %v738_v19  ;;  %v1663_v21 = vpack.c.b16 %v1549_v17, %v1548_v14  ;;  %v6655_v50 = vld [vmem:[#allocation2 + $0x80] sm:$0xff] }
 0x27d   :  { %747 = vmatmul.bf16.gmra.mxu0 %v6655_v50  ;;  %v6663_v50 = vld [vmem:[#allocation2 + $0xc0] sm:$0xff] }
 0x27e   :  { %v2526_v56 = vpack.c.bf16 %v1920_v53, %v1918_v48  ;;  %1931 = vmatmul.bf16.gmra.mxu1 %v1663_v21  ;;  %2260 = vmatmul.bf16.gmra.mxu2 %v1663_v21  ;;  %v1016_v23 = vmax.f32 %v739_v20, 0.0  ;;  %v6660_v20 = vld [vmem:[#allocation2 + $0xa8] sm:$0xff] }
 0x280   :  { %2702 = vmatmul.bf16.gmra.mxu3 %v2526_v56  ;;  %v1144_v25 = vpack.c.bf16 %v1016_v23, %v1016_v23  ;;  %v6657_v56 = vld [vmem:[#allocation2 + $0x90] sm:$0xff] }
 0x283   :  { %v1922_v0 = vpop.f32.mrf.mxu1  ;;  %v740_v24 = vpop.f32.mrf.mxu0 }
 0x284   :  { %v1923_v6 = vadd.f32 %v1922_v0, %v7731_v59  ;;  %v6658_v0 = vld [vmem:[#allocation2 + $0x98] sm:$0xff] }
 0x288   :  { %v2693_v57 = vpop.f32.mrf.mxu3 }
 0x28b   :  { %v1924_v8 = vpop.f32.mrf.mxu1  ;;  %v743_v35 = vpop.f32.mrf.mxu0 }
 0x28c   :  { %v1925_v11 = vadd.f32 %v1924_v8, %v7731_v59 }
 0x28d   :  { %752 = vmatmul.bf16.gmra.mxu0 %v6656_v54 }
 0x28e   :  { %v2527_v13 = vpack.c.bf16 %v1925_v11, %v1923_v6 }
 0x290   :  { %2707 = vmatmul.bf16.gmra.mxu3 %v2527_v13  ;;  %v2695_v61 = vpop.f32.mrf.mxu3 }
 0x293   :  { %v745_v38 = vpop.f32.mrf.mxu0 }
 0x29d   :  { %757 = vmatmul.bf16.gmra.mxu0 %v6657_v56 }
 0x2ad   :  { %3005 = vxpose.xlu1.b32.start [1/8] (short) (narrow) %v2673_v26, 8  ;;  %v741_v26 = vadd.f32 %v7694_v60, %v740_v24  ;;  %762 = vmatmul.bf16.gmra.mxu0 %v6658_v0 }
 0x2af   :  { %v1017_v28 = vmax.f32 %v741_v26, 0.0 }
 0x2b1   :  { %v1145_v30 = vpack.c.bf16 %v1017_v28, %v1017_v28  ;;  %v6808_v31 = vpack.c.bf16 %v1017_v28, %v1016_v23 }
 0x2b3   :  { %7068 = vst [vmem:[#allocation9 + $0x70] sm:$0xff] %v6808_v31   ;;  %v1551_v32 = vunpack.c.l.b16 %v1145_v30 }
 0x2b5   :  { %3006 = vxpose.xlu1.b32.cont [2/8] (short) (narrow) %v2675_v27, 8  ;;  %v7791_v27 = vpop.f32.mrf.mxu2 }
 0x2bd   :  { %3007 = vxpose.xlu1.b32.cont [3/8] (short) (narrow) %v2678_v29, 8  ;;  %v1550_v29 = vunpack.c.l.b16 %v1144_v25  ;;  %v7793_v34 = vpop.f32.mrf.mxu2  ;;  %767 = vmatmul.bf16.gmra.mxu0 %v6659_v12 }
 0x2c5   :  { %3008 = vxpose.xlu1.b32.cont [4/8] (short) (narrow) %v2680_v33, 8  ;;  %v1664_v33 = vpack.c.b16 %v1551_v32, %v1550_v29  ;;  %v7796_v39 = vpop.f32.mrf.mxu2  ;;  %v6661_v32 = vld [vmem:[#allocation2 + $0xb0] sm:$0xff] }
 0x2c7   :  { %1936 = vmatmul.bf16.gmra.mxu1 %v1664_v33  ;;  %2265 = vmatmul.bf16.gmra.mxu2 %v1664_v33 }
 0x2cd   :  { %3009 = vxpose.xlu1.b32.cont [5/8] (short) (narrow) %v2683_v36, 8  ;;  %v744_v36 = vadd.f32 %v7694_v60, %v743_v35  ;;  %v7799_v49 = vpop.f32.mrf.mxu2  ;;  %772 = vmatmul.bf16.gmra.mxu0 %v6660_v20 }
 0x2cf   :  { %v1018_v37 = vmax.f32 %v744_v36, 0.0 }
 0x2d1   :  { %v1146_v40 = vpack.c.bf16 %v1018_v37, %v1018_v37 }
 0x2d3   :  { %v1552_v43 = vunpack.c.l.b16 %v1146_v40 }
 0x2d5   :  { %3010 = vxpose.xlu1.b32.cont [6/8] (short) (narrow) %v2685_v41, 8  ;;  %v746_v41 = vadd.f32 %v7694_v60, %v745_v38  ;;  %v7816_v36 = vpop.f32.mrf.mxu2 }
 0x2d7   :  { %v1019_v42 = vmax.f32 %v746_v41, 0.0 }
 0x2d9   :  { %v1147_v44 = vpack.c.bf16 %v1019_v42, %v1019_v42  ;;  %v6813_v46 = vpack.c.bf16 %v1019_v42, %v1018_v37 }
 0x2db   :  { %7069 = vst [vmem:[#allocation9 + $0x78] sm:$0xff] %v6813_v46  }
 0x2dd   :  { %3011 = vxpose.xlu1.b32.cont [7/8] (short) (narrow) %v2688_v47, 8  ;;  %v1553_v47 = vunpack.c.l.b16 %v1147_v44  ;;  %777 = vmatmul.bf16.gmra.mxu0 %v6661_v32 }
 0x2df   :  { %v1665_v48 = vpack.c.b16 %v1553_v47, %v1552_v43  ;;  %v6662_v47 = vld [vmem:[#allocation2 + $0xb8] sm:$0xff] }
 0x2e1   :  { %1941 = vmatmul.bf16.gmra.mxu1 %v1665_v48  ;;  %2270 = vmatmul.bf16.gmra.mxu2 %v1665_v48  ;;  %v7819_v48 = vpop.f32.mrf.mxu2 }
 0x2e5   :  { %3012 = vxpose.xlu1.b32.end [8/8] (short) (narrow) %v2690_v3, 8 }
 0x2e6   :  { %v7801_v51 = vpop.xlane.xlu1 %3487 }
 0x2eb   :  { %v1927_v58 = vpop.f32.mrf.mxu1 }
 0x2ec   :  { %v1928_v62 = vadd.f32 %v1927_v58, %v7731_v59 }
 0x2ed   :  { %782 = vmatmul.bf16.gmra.mxu0 %v6662_v47 }
 0x2f3   :  { %v1929_v63 = vpop.f32.mrf.mxu1  ;;  %v2698_v3 = vpop.f32.mrf.mxu3 }
 0x2f4   :  { %v1930_v1 = vadd.f32 %v1929_v63, %v7731_v59 }
 0x2f6   :  { %v2528_v2 = vpack.c.bf16 %v1930_v1, %v1928_v62 }
 0x2f8   :  { %2712 = vmatmul.bf16.gmra.mxu3 %v2528_v2 }
 0x2fa   :  { %v748_v29 = vpop.f32.mrf.mxu0 }
 0x2fb   :  { %v1932_v4 = vpop.f32.mrf.mxu1  ;;  %v2700_v6 = vpop.f32.mrf.mxu3  ;;  %v749_v31 = vadd.f32 %v7694_v60, %v748_v29 }
 0x2fc   :  { %v1933_v7 = vadd.f32 %v1932_v4, %v7731_v59 }
 0x2fd   :  { %v1020_v33 = vmax.f32 %v749_v31, 0.0  ;;  %787 = vmatmul.bf16.gmra.mxu0 %v6663_v50 }
 0x2ff   :  { %v1148_v37 = vpack.c.bf16 %v1020_v33, %v1020_v33 }
 0x301   :  { %v1554_v41 = vunpack.c.l.b16 %v1148_v37 }
 0x302   :  { %v750_v35 = vpop.f32.mrf.mxu0 }
 0x303   :  { %v1934_v8 = vpop.f32.mrf.mxu1  ;;  %v2703_v13 = vpop.f32.mrf.mxu3  ;;  %v751_v38 = vadd.f32 %v7694_v60, %v750_v35 }
 0x304   :  { %v1935_v9 = vadd.f32 %v1934_v8, %v7731_v59 }
 0x305   :  { %v1021_v40 = vmax.f32 %v751_v38, 0.0 }
 0x306   :  { %v2529_v10 = vpack.c.bf16 %v1935_v9, %v1933_v7 }
 0x307   :  { %v1149_v42 = vpack.c.bf16 %v1021_v40, %v1021_v40  ;;  %v6818_v43 = vpack.c.bf16 %v1021_v40, %v1020_v33 }
 0x308   :  { %2717 = vmatmul.bf16.gmra.mxu3 %v2529_v10 }
 0x309   :  { %7070 = vst [vmem:[#allocation9 + $0x80] sm:$0xff] %v6818_v43   ;;  %v1555_v44 = vunpack.c.l.b16 %v1149_v42 }
 0x30a   :  { %v753_v54 = vpop.f32.mrf.mxu0 }
 0x30b   :  { %v2705_v17 = vpop.f32.mrf.mxu3  ;;  %v1666_v46 = vpack.c.b16 %v1555_v44, %v1554_v41  ;;  %v754_v56 = vadd.f32 %v7694_v60, %v753_v54 }
 0x30d   :  { %1946 = vmatmul.bf16.gmra.mxu1 %v1666_v46  ;;  %2275 = vmatmul.bf16.gmra.mxu2 %v1666_v46  ;;  %v3534_v46 = vsub.f32 %v7765_v22, %v7801_v51  ;;  %v6666_v22 = vld [vmem:[#allocation2 + $0xd8] sm:$0xff] }
 0x313   :  { %v2708_v23 = vpop.f32.mrf.mxu3 }
 0x31b   :  { %v2710_v30 = vpop.f32.mrf.mxu3 }
 0x344   :  { %v1937_v11 = vpop.f32.mrf.mxu1 }
 0x345   :  { %v1938_v14 = vadd.f32 %v1937_v11, %v7731_v59 }
 0x34c   :  { %v1939_v15 = vpop.f32.mrf.mxu1 }
 0x34d   :  { %v1940_v16 = vadd.f32 %v1939_v15, %v7731_v59  ;;  %v6664_v15 = vld [vmem:[#allocation2 + $0xc8] sm:$0xff] }
 0x34e   :  { %792 = vmatmul.bf16.gmra.mxu0 %v6664_v15 }
 0x34f   :  { %v2530_v19 = vpack.c.bf16 %v1940_v16, %v1938_v14 }
 0x351   :  { %v7803_v52 = vpop.trf.xlu1  ;;  %2722 = vmatmul.bf16.gmra.mxu3 %v2530_v19 }
 0x352   :  { %v3489_v53 = vsel %vm3485_vm0, %v7803_v52, -inf }
 0x353   :  { %3490 = vmax.xlane.f32.xlu2 %v3489_v53  ;;  %v7821_v53 = vpop.f32.mrf.mxu2 }
 0x35b   :  { %v7824_v58 = vpop.f32.mrf.mxu2 }
 0x35e   :  { %v1942_v21 = vpop.f32.mrf.mxu1 }
 0x35f   :  { %v1943_v24 = vadd.f32 %v1942_v21, %v7731_v59 }
 0x363   :  { %v7827_v7 = vpop.f32.mrf.mxu2 }
 0x366   :  { %v1944_v25 = vpop.f32.mrf.mxu1 }
 0x367   :  { %v1945_v26 = vadd.f32 %v1944_v25, %v7731_v59 }
 0x369   :  { %v2531_v28 = vpack.c.bf16 %v1945_v26, %v1943_v24  ;;  %v7833_v24 = vld [vmem:[#allocation5] ss:$0 sm:$0xff] }
 0x36b   :  { %2727 = vmatmul.bf16.gmra.mxu3 %v2531_v28  ;;  %v7830_v12 = vpop.f32.mrf.mxu2 }
 0x373   :  { %v7836_v28 = vpop.f32.mrf.mxu2 }
 0x37b   :  { %v7839_v35 = vpop.f32.mrf.mxu2 }
 0x37c   :  { %3037 = vxpose.xlu2.b32.start [1/8] (short) (narrow) %v2693_v57, 8  ;;  %v1022_v57 = vmax.f32 %v754_v56, 0.0 }
 0x37e   :  { %v1150_v62 = vpack.c.bf16 %v1022_v57, %v1022_v57 }
 0x380   :  { %v1556_v1 = vunpack.c.l.b16 %v1150_v62 }
 0x383   :  { %v7843_v44 = vpop.f32.mrf.mxu2 }
 0x384   :  { %3038 = vxpose.xlu2.b32.cont [2/8] (short) (narrow) %v2695_v61, 8  ;;  %v755_v61 = vpop.f32.mrf.mxu0 }
 0x385   :  { %v756_v63 = vadd.f32 %v7694_v60, %v755_v61 }
 0x387   :  { %v1023_v0 = vmax.f32 %v756_v63, 0.0 }
 0x389   :  { %v1151_v2 = vpack.c.bf16 %v1023_v0, %v1023_v0 }
 0x38b   :  { %v1557_v4 = vunpack.c.l.b16 %v1151_v2  ;;  %v7852_v63 = vpop.f32.mrf.mxu2 }
 0x38c   :  { %3039 = vxpose.xlu2.b32.cont [3/8] (short) (narrow) %v2698_v3, 8  ;;  %v6823_v3 = vpack.c.bf16 %v1023_v0, %v1022_v57  ;;  %v3550_v57 = vmul.f32 1.442695, %v3534_v46 }
 0x38d   :  { %v1667_v8 = vpack.c.b16 %v1557_v4, %v1556_v1 }
 0x38e   :  { %7071 = vst [vmem:[#allocation9 + $0x88] sm:$0xff] %v6823_v3   ;;  %7387 = vpow2.f32 %v3550_v57 }
 0x38f   :  { %1951 = vmatmul.bf16.gmra.mxu1 %v1667_v8  ;;  %2280 = vmatmul.bf16.gmra.mxu2 %v1667_v8 }
 0x394   :  { %3040 = vxpose.xlu2.b32.cont [4/8] (short) (narrow) %v2700_v6, 8  ;;  %v758_v6 = vpop.f32.mrf.mxu0 }
 0x395   :  { %v759_v9 = vadd.f32 %v7694_v60, %v758_v6  ;;  %v7855_v6 = vpop.eup %7387 }
 0x397   :  { %v1024_v10 = vmax.f32 %v759_v9, 0.0  ;;  %v3582_v9 = vsel %vm3485_vm0, %v7855_v6, 0.0 }
 0x39c   :  { %3041 = vxpose.xlu2.b32.cont [5/8] (short) (narrow) %v2703_v13, 8  ;;  %v760_v11 = vpop.f32.mrf.mxu0  ;;  %v1152_v13 = vpack.c.bf16 %v1024_v10, %v1024_v10 }
 0x39d   :  { %v761_v14 = vadd.f32 %v7694_v60, %v760_v11 }
 0x39f   :  { %v1025_v16 = vmax.f32 %v761_v14, 0.0 }
 0x3a1   :  { %v1153_v19 = vpack.c.bf16 %v1025_v16, %v1025_v16  ;;  %v6828_v20 = vpack.c.bf16 %v1025_v16, %v1024_v10 }
 0x3a3   :  { %7072 = vst [vmem:[#allocation9 + $0x90] sm:$0xff] %v6828_v20   ;;  %v1559_v21 = vunpack.c.l.b16 %v1153_v19 }
 0x3a4   :  { %3042 = vxpose.xlu2.b32.cont [6/8] (short) (narrow) %v2705_v17, 8  ;;  %v1558_v17 = vunpack.c.l.b16 %v1152_v13  ;;  %v7859_v13 = vpop.f32.mrf.mxu2 }
 0x3a6   :  { %v1668_v26 = vpack.c.b16 %v1559_v21, %v1558_v17 }
 0x3a8   :  { %1956 = vmatmul.bf16.gmra.mxu1 %v1668_v26  ;;  %2285 = vmatmul.bf16.gmra.mxu2 %v1668_v26 }
 0x3ac   :  { %3043 = vxpose.xlu2.b32.cont [7/8] (short) (narrow) %v2708_v23, 8  ;;  %v763_v23 = vpop.f32.mrf.mxu0  ;;  %v7863_v20 = vpop.f32.mrf.mxu2 }
 0x3ad   :  { %v764_v25 = vadd.f32 %v7833_v24, %v763_v23  ;;  %v2713_v23 = vpop.f32.mrf.mxu3 }
 0x3af   :  { %v1026_v29 = vmax.f32 %v764_v25, 0.0 }
 0x3b1   :  { %v1154_v31 = vpack.c.bf16 %v1026_v29, %v1026_v29 }
 0x3b3   :  { %v1560_v37 = vunpack.c.l.b16 %v1154_v31 }
 0x3b4   :  { %3044 = vxpose.xlu2.b32.end [8/8] (short) (narrow) %v2710_v30, 8  ;;  %v765_v60 = vpop.f32.mrf.mxu0  ;;  %v6665_v30 = vld [vmem:[#allocation2 + $0xd0] sm:$0xff] }
 0x3b5   :  { %v766_v32 = vadd.f32 %v7833_v24, %v765_v60  ;;  %797 = vmatmul.bf16.gmra.mxu0 %v6665_v30 }
 0x3b7   :  { %v1027_v33 = vmax.f32 %v766_v32, 0.0 }
 0x3b9   :  { %v1155_v38 = vpack.c.bf16 %v1027_v33, %v1027_v33  ;;  %v6833_v40 = vpack.c.bf16 %v1027_v33, %v1026_v29  ;;  %v7866_v33 = vpop.f32.mrf.mxu2 }
 0x3ba   :  { %9974 = vst [vmem:[#allocation15_spill] sm:$0xff] %v7866_v33 }
 0x3bb   :  { %7073 = vst [vmem:[#allocation9 + $0x98] sm:$0xff] %v6833_v40   ;;  %v1561_v41 = vunpack.c.l.b16 %v1155_v38  ;;  %v2715_v38 = vpop.f32.mrf.mxu3 }
 0x3bc   :  { %v768_v47 = vpop.f32.mrf.mxu0 }
 0x3bd   :  { %v1669_v43 = vpack.c.b16 %v1561_v41, %v1560_v37  ;;  %v769_v50 = vadd.f32 %v7833_v24, %v768_v47 }
 0x3bf   :  { %1961 = vmatmul.bf16.gmra.mxu1 %v1669_v43  ;;  %2290 = vmatmul.bf16.gmra.mxu2 %v1669_v43  ;;  %v1028_v61 = vmax.f32 %v769_v50, 0.0 }
 0x3c1   :  { %v1156_v0 = vpack.c.bf16 %v1028_v61, %v1028_v61  ;;  %v7869_v57 = vpop.f32.mrf.mxu2 }
 0x3c2   :  { %9975 = vst [vmem:[#allocation16_spill] sm:$0xff] %v7869_v57 }
 0x3c3   :  { %v1562_v51 = vunpack.c.l.b16 %v1156_v0 }
 0x3c4   :  { %v770_v62 = vpop.f32.mrf.mxu0 }
 0x3c5   :  { %v771_v1 = vadd.f32 %v7833_v24, %v770_v62  ;;  %802 = vmatmul.bf16.gmra.mxu0 %v6666_v22  ;;  %v2718_v62 = vpop.f32.mrf.mxu3 }
 0x3c6   :  { %v7841_v42 = vpop.xlane.xlu2 %3490 }
 0x3c7   :  { %v1029_v2 = vmax.f32 %v771_v1, 0.0 }
 0x3c9   :  { %v1157_v3 = vpack.c.bf16 %v1029_v2, %v1029_v2  ;;  %v6838_v4 = vpack.c.bf16 %v1029_v2, %v1028_v61 }
 0x3cb   :  { %7074 = vst [vmem:[#allocation9 + $0xa0] sm:$0xff] %v6838_v4   ;;  %v1563_v8 = vunpack.c.l.b16 %v1157_v3 }
 0x3cc   :  { %v773_v11 = vpop.f32.mrf.mxu0 }
 0x3cd   :  { %v1670_v10 = vpack.c.b16 %v1563_v8, %v1562_v51  ;;  %v774_v14 = vadd.f32 %v7833_v24, %v773_v11  ;;  %v7873_v8 = vpop.f32.mrf.mxu2 }
 0x3ce   :  { %9976 = vst [vmem:[#allocation17_spill] sm:$0xff] %v7873_v8 }
 0x3cf   :  { %1966 = vmatmul.bf16.gmra.mxu1 %v1670_v10  ;;  %2295 = vmatmul.bf16.gmra.mxu2 %v1670_v10  ;;  %v1030_v15 = vmax.f32 %v774_v14, 0.0 }
 0x3d1   :  { %v1158_v17 = vpack.c.bf16 %v1030_v15, %v1030_v15 }
 0x3d3   :  { %v1564_v25 = vunpack.c.l.b16 %v1158_v17 }
 0x3d4   :  { %v775_v16 = vpop.f32.mrf.mxu0 }
 0x3d5   :  { %v776_v19 = vadd.f32 %v7833_v24, %v775_v16 }
 0x3d7   :  { %v1031_v21 = vmax.f32 %v776_v19, 0.0  ;;  %v1947_v19 = vpop.f32.mrf.mxu1 }
 0x3d9   :  { %v1159_v26 = vpack.c.bf16 %v1031_v21, %v1031_v21  ;;  %v6843_v29 = vpack.c.bf16 %v1031_v21, %v1030_v15  ;;  %v7875_v21 = vpop.f32.mrf.mxu2 }
 0x3da   :  { %9977 = vst [vmem:[#allocation18_spill] sm:$0xff] %v7875_v21 }
 0x3db   :  { %7075 = vst [vmem:[#allocation9 + $0xa8] sm:$0xff] %v6843_v29   ;;  %v1565_v60 = vunpack.c.l.b16 %v1159_v26 }
 0x3dc   :  { %v778_v30 = vpop.f32.mrf.mxu0 }
 0x3dd   :  { %v779_v31 = vadd.f32 %v7833_v24, %v778_v30  ;;  %v1671_v32 = vpack.c.b16 %v1565_v60, %v1564_v25  ;;  %v1948_v25 = vadd.f32 %v1947_v19, %v7731_v59 }
 0x3df   :  { %1971 = vmatmul.bf16.gmra.mxu1 %v1671_v32  ;;  %2300 = vmatmul.bf16.gmra.mxu2 %v1671_v32  ;;  %v1032_v37 = vmax.f32 %v779_v31, 0.0  ;;  %v1949_v26 = vpop.f32.mrf.mxu1 }
 0x3e0   :  { %v1950_v29 = vadd.f32 %v1949_v26, %v7731_v59 }
 0x3e1   :  { %v1160_v41 = vpack.c.bf16 %v1032_v37, %v1032_v37  ;;  %v7879_v31 = vpop.f32.mrf.mxu2 }
 0x3e2   :  { %v2532_v30 = vpack.c.bf16 %v1950_v29, %v1948_v25  ;;  %9978 = vst [vmem:[#allocation19_spill] sm:$0xff] %v7879_v31 }
 0x3e3   :  { %v1566_v47 = vunpack.c.l.b16 %v1160_v41 }
 0x3e4   :  { %v780_v40 = vpop.f32.mrf.mxu0  ;;  %2732 = vmatmul.bf16.gmra.mxu3 %v2532_v30 }
 0x3e5   :  { %v781_v43 = vadd.f32 %v7833_v24, %v780_v40 }
 0x3e7   :  { %v1033_v46 = vmax.f32 %v781_v43, 0.0 }
 0x3e9   :  { %v1161_v50 = vpack.c.bf16 %v1033_v46, %v1033_v46  ;;  %v7882_v43 = vpop.f32.mrf.mxu2 }
 0x3ea   :  { %9979 = vst [vmem:[#allocation20_spill] sm:$0xff] %v7882_v43 }
 0x3eb   :  { %v1567_v61 = vunpack.c.l.b16 %v1161_v50  ;;  %v9971_v50 = vlaneseq }
 0x3ec   :  { %v783_v0 = vpop.f32.mrf.mxu0 }
 0x3ed   :  { %v784_v1 = vadd.f32 %v7833_v24, %v783_v0  ;;  %v1672_v2 = vpack.c.b16 %v1567_v61, %v1566_v47 }
 0x3ef   :  { %1976 = vmatmul.bf16.gmra.mxu1 %v1672_v2  ;;  %2305 = vmatmul.bf16.gmra.mxu2 %v1672_v2  ;;  %v1034_v22 = vmax.f32 %v784_v1, 0.0  ;;  %v7888_v2 = vshrl.u32 %v9971_v50, 7 }
 0x3f1   :  { %v1162_v3 = vpack.c.bf16 %v1034_v22, %v1034_v22 }
 0x3f3   :  { %v1568_v11 = vunpack.c.l.b16 %v1162_v3  ;;  %v7891_v3 = vadd.s32 8, %v7888_v2 }
 0x3f4   :  { %v785_v51 = vpop.f32.mrf.mxu0 }
 0x3f5   :  { %v786_v4 = vadd.f32 %v7833_v24, %v785_v51 }
 0x3f7   :  { %v1035_v10 = vmax.f32 %v786_v4, 0.0 }
 0x3f9   :  { %v1163_v14 = vpack.c.bf16 %v1035_v10, %v1035_v10  ;;  %v6853_v15 = vpack.c.bf16 %v1035_v10, %v1034_v22 }
 0x3fb   :  { %7077 = vst [vmem:[#allocation9 + $0xb8] sm:$0xff] %v6853_v15   ;;  %v1569_v16 = vunpack.c.l.b16 %v1163_v14 }
 0x3fd   :  { %v1673_v17 = vpack.c.b16 %v1569_v16, %v1568_v11 }
 0x3ff   :  { %1981 = vmatmul.bf16.gmra.mxu1 %v1673_v17  ;;  %2310 = vmatmul.bf16.gmra.mxu2 %v1673_v17  ;;  %v7894_v17 = vpop.f32.mrf.mxu2 }
 0x400   :  { %9980 = vst [vmem:[#allocation21_spill] sm:$0xff] %v7894_v17 }
 0x40c   :  { %v1952_v40 = vpop.f32.mrf.mxu1 }
 0x414   :  { %v1954_v0 = vpop.f32.mrf.mxu1 }
 0x415   :  { %v7848_v54 = vpop.trf.xlu2  ;;  %v1955_v1 = vadd.f32 %v1954_v0, %v7731_v59 }
 0x416   :  { %v3492_v56 = vsel %vm3485_vm0, %v7848_v54, -inf  ;;  %7132 = vset.pattern.permute.xlu2 %v7891_v3 }
 0x417   :  { %3493 = vmax.xlane.f32.xlu0 %v3492_v56  ;;  %v6848_v56 = vpack.c.bf16 %v1033_v46, %v1032_v37  ;;  %v788_v37 = vpop.f32.mrf.mxu0  ;;  %v1953_v46 = vadd.f32 %v1952_v40, %v7731_v59 }
 0x419   :  { %7076 = vst [vmem:[#allocation9 + $0xb0] sm:$0xff] %v6848_v56   ;;  %v2533_v51 = vpack.c.bf16 %v1955_v1, %v1953_v46 }
 0x41b   :  { %2737 = vmatmul.bf16.gmra.mxu3 %v2533_v51 }
 0x41f   :  { %v790_v47 = vpop.f32.mrf.mxu0 }
 0x425   :  { %3583 = vadd.xlane.f32.xlu2 %v3582_v9  ;;  %v2720_v9 = vpop.f32.mrf.mxu3  ;;  %v1957_v15 = vpop.f32.mrf.mxu1 }
 0x426   :  { %v1958_v25 = vadd.f32 %v1957_v15, %v7731_v59 }
 0x427   :  { %v793_v14 = vpop.f32.mrf.mxu0 }
 0x428   :  { %v794_v19 = vadd.f32 %v7833_v24, %v793_v14 }
 0x42d   :  { %v1959_v30 = vpop.f32.mrf.mxu1 }
 0x42f   :  { %v795_v26 = vpop.f32.mrf.mxu0 }
 0x43c   :  { %v1962_v0 = vpop.f32.mrf.mxu1 }
 0x440   :  { %3069 = vxpose.xlu0.b32.start [1/8] (short) (narrow) %v2713_v23, 8  ;;  %v2723_v23 = vpop.f32.mrf.mxu3 }
 0x444   :  { %v1964_v14 = vpop.f32.mrf.mxu1 }
 0x448   :  { %3070 = vxpose.xlu0.b32.cont [2/8] (short) (narrow) %v2715_v38, 8  ;;  %v2725_v60 = vpop.f32.mrf.mxu3  ;;  %v789_v38 = vadd.f32 %v7833_v24, %v788_v37 }
 0x44a   :  { %v1036_v41 = vmax.f32 %v789_v38, 0.0  ;;  %v7900_v38 = vpop.f32.mrf.mxu2 }
 0x44b   :  { %9981 = vst [vmem:[#allocation22_spill] sm:$0xff] %v7900_v38 }
 0x44c   :  { %v1164_v61 = vpack.c.bf16 %v1036_v41, %v1036_v41 }
 0x44e   :  { %v1570_v4 = vunpack.c.l.b16 %v1164_v61  ;;  %v798_v61 = vpop.f32.mrf.mxu0 }
 0x450   :  { %3071 = vxpose.xlu0.b32.cont [3/8] (short) (narrow) %v2718_v62, 8  ;;  %v2728_v32 = vpop.f32.mrf.mxu3  ;;  %v791_v62 = vadd.f32 %v7833_v24, %v790_v47 }
 0x452   :  { %v1037_v22 = vmax.f32 %v791_v62, 0.0  ;;  %v799_v62 = vadd.f32 %v7833_v24, %v798_v61  ;;  %v7903_v51 = vpop.f32.mrf.mxu2  ;;  %v1967_v61 = vpop.f32.mrf.mxu1 }
 0x453   :  { %9982 = vst [vmem:[#allocation23_spill] sm:$0xff] %v7903_v51 }
 0x454   :  { %v6858_v10 = vpack.c.bf16 %v1037_v22, %v1036_v41 }
 0x456   :  { %7078 = vst [vmem:[#allocation9 + $0xc0] sm:$0xff] %v6858_v10  }
 0x458   :  { %3072 = vxpose.xlu0.b32.cont [4/8] (short) (narrow) %v2720_v9, 8  ;;  %v2730_v56 = vpop.f32.mrf.mxu3  ;;  %v1165_v9 = vpack.c.bf16 %v1037_v22, %v1037_v22  ;;  %v1040_v22 = vmax.f32 %v799_v62, 0.0 }
 0x45a   :  { %v1571_v11 = vunpack.c.l.b16 %v1165_v9  ;;  %v800_v9 = vpop.f32.mrf.mxu0  ;;  %v1168_v10 = vpack.c.bf16 %v1040_v22, %v1040_v22 }
 0x45c   :  { %v1674_v16 = vpack.c.b16 %v1571_v11, %v1570_v4  ;;  %v1963_v4 = vadd.f32 %v1962_v0, %v7731_v59  ;;  %v801_v11 = vadd.f32 %v7833_v24, %v800_v9 }
 0x45e   :  { %1986 = vmatmul.bf16.gmra.mxu1 %v1674_v16  ;;  %2315 = vmatmul.bf16.gmra.mxu2 %v1674_v16  ;;  %v1965_v16 = vadd.f32 %v1964_v14, %v7731_v59 }
 0x460   :  { %3073 = vxpose.xlu0.b32.cont [5/8] (short) (narrow) %v2723_v23, 8  ;;  %v1038_v23 = vmax.f32 %v794_v19, 0.0  ;;  %v1041_v19 = vmax.f32 %v801_v11, 0.0 }
 0x462   :  { %v1166_v29 = vpack.c.bf16 %v1038_v23, %v1038_v23 }
 0x464   :  { %v1572_v41 = vunpack.c.l.b16 %v1166_v29  ;;  %v6868_v29 = vpack.c.bf16 %v1041_v19, %v1040_v22 }
 0x466   :  { %7080 = vst [vmem:[#allocation9 + $0xd0] sm:$0xff] %v6868_v29  }
 0x468   :  { %3074 = vxpose.xlu0.b32.cont [6/8] (short) (narrow) %v2725_v60, 8  ;;  %v796_v60 = vadd.f32 %v7833_v24, %v795_v26  ;;  %v1169_v26 = vpack.c.bf16 %v1041_v19, %v1041_v19 }
 0x46a   :  { %v1039_v37 = vmax.f32 %v796_v60, 0.0  ;;  %v1575_v60 = vunpack.c.l.b16 %v1169_v26 }
 0x46c   :  { %v1167_v46 = vpack.c.bf16 %v1039_v37, %v1039_v37  ;;  %v6863_v47 = vpack.c.bf16 %v1039_v37, %v1038_v23  ;;  %v2535_v23 = vpack.c.bf16 %v1965_v16, %v1963_v4  ;;  %v7922_v4 = vadd.s32 24, %v7888_v2 }
 0x46e   :  { %7079 = vst [vmem:[#allocation9 + $0xc8] sm:$0xff] %v6863_v47  }
 0x470   :  { %3075 = vxpose.xlu0.b32.cont [7/8] (short) (narrow) %v2728_v32, 8  ;;  %v1960_v32 = vadd.f32 %v1959_v30, %v7731_v59  ;;  %v7908_v30 = vpop.f32.mrf.mxu2 }
 0x471   :  { %9983 = vst [vmem:[#allocation24_spill] sm:$0xff] %v7908_v30 }
 0x472   :  { %v2534_v40 = vpack.c.bf16 %v1960_v32, %v1958_v25  ;;  %v1574_v25 = vunpack.c.l.b16 %v1168_v10  ;;  %v803_v32 = vpop.f32.mrf.mxu0  ;;  %v1968_v10 = vadd.f32 %v1967_v61, %v7731_v59 }
 0x474   :  { %2742 = vmatmul.bf16.gmra.mxu3 %v2534_v40  ;;  %v804_v40 = vadd.f32 %v7833_v24, %v803_v32 }
 0x478   :  { %3076 = vxpose.xlu0.b32.end [8/8] (short) (narrow) %v2730_v56, 8  ;;  %v1573_v56 = vunpack.c.l.b16 %v1167_v46  ;;  %v7919_v22 = vpop.f32.mrf.mxu2 }
 0x479   :  { %9984 = vst [vmem:[#allocation25_spill] sm:$0xff] %v7919_v22 }
 0x47a   :  { %v1675_v1 = vpack.c.b16 %v1573_v56, %v1572_v41  ;;  %v1676_v41 = vpack.c.b16 %v1575_v60, %v1574_v25  ;;  %v1042_v56 = vmax.f32 %v804_v40, 0.0  ;;  %v805_v62 = vpop.f32.mrf.mxu0  ;;  %v7931_v60 = vadd.s32 40, %v7888_v2 }
 0x47c   :  { %1991 = vmatmul.bf16.gmra.mxu1 %v1675_v1  ;;  %2320 = vmatmul.bf16.gmra.mxu2 %v1675_v1  ;;  %v1170_v0 = vpack.c.bf16 %v1042_v56, %v1042_v56  ;;  %v806_v1 = vadd.f32 %v7833_v24, %v805_v62 }
 0x47e   :  { %v1576_v9 = vunpack.c.l.b16 %v1170_v0 }
 0x480   :  { %v7927_v26 = vpop.f32.mrf.mxu2 }
 0x481   :  { %9985 = vst [vmem:[#allocation26_spill] sm:$0xff] %v7927_v26 }
 0x484   :  { %2747 = vmatmul.bf16.gmra.mxu3 %v2535_v23 }
 0x48c   :  { %1996 = vmatmul.bf16.gmra.mxu1 %v1676_v41  ;;  %2325 = vmatmul.bf16.gmra.mxu2 %v1676_v41 }
 0x498   :  { %v3584_v15 = vpop.xlane.xlu2 %3583 }
 0x499   :  { %7389 = vrcp.f32 %v3584_v15  ;;  %v1969_v15 = vpop.f32.mrf.mxu1 }
 0x49a   :  { %v1970_v19 = vadd.f32 %v1969_v15, %v7731_v59 }
 0x49c   :  { %v2536_v23 = vpack.c.bf16 %v1970_v19, %v1968_v10  ;;  %v7945_v10 = vadd.s32 16, %v7888_v2 }
 0x49e   :  { %2752 = vmatmul.bf16.gmra.mxu3 %v2536_v23 }
 0x49f   :  { %v7390_v37 = vpop.eup %7389 }
 0x4a0   :  { %v7912_v46 = vmul.f32 %v7390_v37, %v7855_v6  ;;  %v1043_v6 = vmax.f32 %v806_v1, 0.0 }
 0x4a1   :  { %v1972_v29 = vpop.f32.mrf.mxu1 }
 0x4a2   :  { %v7915_v47 = vperm.slane %v7912_v46, 0  ;;  %v1171_v11 = vpack.c.bf16 %v1043_v6, %v1043_v6  ;;  %v6873_v14 = vpack.c.bf16 %v1043_v6, %v1042_v56  ;;  %v1973_v32 = vadd.f32 %v1972_v29, %v7731_v59 }
 0x4a3   :  { %v7941_v6 = vperm.slane %v7912_v46, 1 }
 0x4a4   :  { %3767 = vperm.xlu2 %7132, %v7915_v47   ;;  %7081 = vst [vmem:[#allocation9 + $0xd8] sm:$0xff] %v6873_v14   ;;  %v1577_v16 = vunpack.c.l.b16 %v1171_v11  ;;  %v3535_v11 = vsub.f32 %v7803_v52, %v7841_v42  ;;  %v3494_v14 = vpop.xlane.xlu0 %3493 }
 0x4a6   :  { %v1677_v25 = vpack.c.b16 %v1577_v16, %v1576_v9  ;;  %v3552_v23 = vmul.f32 1.442695, %v3535_v11 }
 0x4a8   :  { %2001 = vmatmul.bf16.gmra.mxu1 %v1677_v25  ;;  %2330 = vmatmul.bf16.gmra.mxu2 %v1677_v25  ;;  %7391 = vpow2.f32 %v3552_v23 }
 0x4a9   :  { %v1974_v37 = vpop.f32.mrf.mxu1 }
 0x4aa   :  { %v1975_v40 = vadd.f32 %v1974_v37, %v7731_v59 }
 0x4ac   :  { %7134 = vset.pattern.permute.xlu2 %v7922_v4  ;;  %v2537_v41 = vpack.c.bf16 %v1975_v40, %v1973_v32  ;;  %v7962_v32 = vadd.s32 48, %v7888_v2  ;;  %v2733_v40 = vpop.f32.mrf.mxu3 }
 0x4ae   :  { %2757 = vmatmul.bf16.gmra.mxu3 %v2537_v41  ;;  %v7959_v42 = vpop.eup %7391  ;;  %v7971_v41 = vadd.s32 56, %v7888_v2 }
 0x4af   :  { %v3585_v37 = vsel %vm3485_vm0, %v7959_v42, 0.0 }
 0x4b1   :  { %v1977_v56 = vpop.f32.mrf.mxu1 }
 0x4b2   :  { %v1978_v61 = vadd.f32 %v1977_v56, %v7731_v59 }
 0x4b4   :  { %3779 = vperm.xlu2 %7134, %v7915_v47  }
 0x4b9   :  { %v1979_v62 = vpop.f32.mrf.mxu1 }
 0x4ba   :  { %v1980_v0 = vadd.f32 %v1979_v62, %v7731_v59 }
 0x4bc   :  { %7136 = vset.pattern.permute.xlu2 %v7931_v60  ;;  %v2538_v1 = vpack.c.bf16 %v1980_v0, %v1978_v61  ;;  %v2735_v61 = vpop.f32.mrf.mxu3 }
 0x4be   :  { %2762 = vmatmul.bf16.gmra.mxu3 %v2538_v1 }
 0x4c1   :  { %v1982_v9 = vpop.f32.mrf.mxu1 }
 0x4c2   :  { %v1983_v15 = vadd.f32 %v1982_v9, %v7731_v59 }
 0x4c4   :  { %3791 = vperm.xlu2 %7136, %v7915_v47   ;;  %v2738_v11 = vpop.f32.mrf.mxu3 }
 0x4c9   :  { %v1984_v16 = vpop.f32.mrf.mxu1 }
 0x4ca   :  { %v1985_v19 = vadd.f32 %v1984_v16, %v7731_v59 }
 0x4cc   :  { %7139 = vset.pattern.permute.xlu2 %v7888_v2  ;;  %v2539_v25 = vpack.c.bf16 %v1985_v19, %v1983_v15  ;;  %v2740_v16 = vpop.f32.mrf.mxu3 }
 0x4ce   :  { %2767 = vmatmul.bf16.gmra.mxu3 %v2539_v25 }
 0x4d4   :  { %4881 = vperm.xlu2 %7139, %v7941_v6  }
 0x4db   :  { %v1987_v56 = vpop.f32.mrf.mxu1 }
 0x4dc   :  { %7141 = vset.pattern.permute.xlu2 %v7945_v10  ;;  %v1988_v62 = vadd.f32 %v1987_v56, %v7731_v59 }
 0x4df   :  { %7131 = vset.pattern.permute.xlu0 %v7888_v2 }
 0x4e3   :  { %v1989_v0 = vpop.f32.mrf.mxu1 }
 0x4e4   :  { %4893 = vperm.xlu2 %7141, %v7941_v6   ;;  %v7954_v29 = vpop.trf.xlu0  ;;  %v1990_v1 = vadd.f32 %v1989_v0, %v7731_v59 }
 0x4e5   :  { %v3495_v52 = vsel %vm3485_vm0, %v7954_v29, -inf }
 0x4e6   :  { %3496 = vmax.xlane.f32.xlu1 %v3495_v52  ;;  %v2540_v9 = vpack.c.bf16 %v1990_v1, %v1988_v62 }
 0x4e7   :  { %3761 = vperm.xlu0 %7131, %v7915_v47  }
 0x4e8   :  { %2772 = vmatmul.bf16.gmra.mxu3 %v2540_v9 }
 0x4ec   :  { %7144 = vset.pattern.permute.xlu2 %v7931_v60 }
 0x4ee   :  { %3586 = vadd.xlane.f32.xlu1 %v3585_v37  ;;  %v3536_v37 = vsub.f32 %v7848_v54, %v3494_v14 }
 0x4ef   :  { %7137 = vset.pattern.permute.xlu0 %v7962_v32 }
 0x4f0   :  { %v3554_v50 = vmul.f32 1.442695, %v3536_v37 }
 0x4f2   :  { %7393 = vpow2.f32 %v3554_v50 }
 0x4f4   :  { %4911 = vperm.xlu2 %7144, %v7941_v6  }
 0x4f7   :  { %3797 = vperm.xlu0 %7137, %v7915_v47   ;;  %v2743_v26 = vpop.f32.mrf.mxu3 }
 0x4f8   :  { %v7984_v9 = vpop.eup %7393 }
 0x4f9   :  { %v1992_v15 = vpop.f32.mrf.mxu1 }
 0x4fa   :  { %v1993_v19 = vadd.f32 %v1992_v15, %v7731_v59 }
 0x4fc   :  { %7146 = vset.pattern.permute.xlu2 %v7971_v41 }
 0x4ff   :  { %7142 = vset.pattern.permute.xlu0 %v7922_v4  ;;  %v2745_v15 = vpop.f32.mrf.mxu3 }
 0x501   :  { %v1994_v23 = vpop.f32.mrf.mxu1 }
 0x502   :  { %v1995_v25 = vadd.f32 %v1994_v23, %v7731_v59 }
 0x504   :  { %4923 = vperm.xlu2 %7146, %v7941_v6   ;;  %v2541_v52 = vpack.c.bf16 %v1995_v25, %v1993_v19  ;;  %v3588_v19 = vsel %vm3485_vm0, %v7984_v9, 0.0 }
 0x506   :  { %2777 = vmatmul.bf16.gmra.mxu3 %v2541_v52 }
 0x507   :  { %4899 = vperm.xlu0 %7142, %v7941_v6   ;;  %v2748_v14 = vpop.f32.mrf.mxu3 }
 0x509   :  { %v1997_v56 = vpop.f32.mrf.mxu1 }
 0x50a   :  { %v1998_v0 = vadd.f32 %v1997_v56, %v7731_v59 }
 0x511   :  { %v1999_v62 = vpop.f32.mrf.mxu1 }
 0x512   :  { %v2000_v1 = vadd.f32 %v1999_v62, %v7731_v59 }
 0x514   :  { %v2542_v22 = vpack.c.bf16 %v2000_v1, %v1998_v0 }
 0x516   :  { %2782 = vmatmul.bf16.gmra.mxu3 %v2542_v22 }
 0x525   :  { %v2002_v54 = vpop.f32.mrf.mxu1 }
 0x526   :  { %v2003_v50 = vadd.f32 %v2002_v54, %v7731_v59 }
 0x528   :  { %3101 = vxpose.xlu1.b32.start [1/8] (short) (narrow) %v2733_v40, 8  ;;  %v2750_v40 = vpop.f32.mrf.mxu3 }
 0x52d   :  { %3589 = vadd.xlane.f32.xlu2 %v3588_v19  ;;  %v2004_v23 = vpop.f32.mrf.mxu1 }
 0x52e   :  { %v2005_v25 = vadd.f32 %v2004_v23, %v7731_v59  ;;  %v6668_v23 = vld [vmem:[#allocation2 + $0xe8] sm:$0xff] }
 0x530   :  { %3102 = vxpose.xlu1.b32.cont [2/8] (short) (narrow) %v2735_v61, 8  ;;  %v2543_v52 = vpack.c.bf16 %v2005_v25, %v2003_v50  ;;  %v2753_v37 = vpop.f32.mrf.mxu3 }
 0x532   :  { %2787 = vmatmul.bf16.gmra.mxu3 %v2543_v52 }
 0x538   :  { %3103 = vxpose.xlu1.b32.cont [3/8] (short) (narrow) %v2738_v11, 8  ;;  %v2755_v22 = vpop.f32.mrf.mxu3 }
 0x540   :  { %3104 = vxpose.xlu1.b32.cont [4/8] (short) (narrow) %v2740_v16, 8  ;;  %v2758_v61 = vpop.f32.mrf.mxu3 }
 0x548   :  { %3105 = vxpose.xlu1.b32.cont [5/8] (short) (narrow) %v2743_v26, 8  ;;  %v2760_v62 = vpop.f32.mrf.mxu3 }
 0x550   :  { %3106 = vxpose.xlu1.b32.cont [6/8] (short) (narrow) %v2745_v15, 8  ;;  %v2763_v26 = vpop.f32.mrf.mxu3 }
 0x556   :  { %3133 = vxpose.xlu2.b32.start [1/8] (short) (narrow) %v2753_v37, 8 }
 0x558   :  { %3107 = vxpose.xlu1.b32.cont [7/8] (short) (narrow) %v2748_v14, 8  ;;  %v2765_v15 = vpop.f32.mrf.mxu3  ;;  %v6667_v14 = vld [vmem:[#allocation2 + $0xe0] sm:$0xff] }
 0x559   :  { %v7990_v56 = vpop.xlane.xlu1 %3496  ;;  %807 = vmatmul.bf16.gmra.mxu0 %v6667_v14 }
 0x55e   :  { %3134 = vxpose.xlu2.b32.cont [2/8] (short) (narrow) %v2755_v22, 8  ;;  %v8009_v22 = vadd.s32 32, %v7888_v2 }
 0x560   :  { %3108 = vxpose.xlu1.b32.end [8/8] (short) (narrow) %v2750_v40, 8  ;;  %v2768_v54 = vpop.f32.mrf.mxu3  ;;  %v6669_v40 = vld [vmem:[#allocation2 + $0xf0] sm:$0xff] }
 0x561   :  { %v3587_v0 = vpop.xlane.xlu1 %3586 }
 0x562   :  { %7395 = vrcp.f32 %v3587_v0  ;;  %v6670_v0 = vld [vmem:[#allocation2 + $0xf8] sm:$0xff] }
 0x566   :  { %3135 = vxpose.xlu2.b32.cont [3/8] (short) (narrow) %v2758_v61, 8 }
 0x568   :  { %v7396_v11 = vpop.eup %7395 }
 0x569   :  { %v7993_v1 = vmul.f32 %v7396_v11, %v7959_v42  ;;  %v2770_v42 = vpop.f32.mrf.mxu3  ;;  %812 = vmatmul.bf16.gmra.mxu0 %v6668_v23 }
 0x56b   :  { %v7996_v16 = vperm.slane %v7993_v1, 0  ;;  %v8001_v19 = vperm.slane %v7993_v1, 1 }
 0x56d   :  { %3828 = vperm.xlu0 %7142, %v7996_v16  }
 0x56e   :  { %3136 = vxpose.xlu2.b32.cont [4/8] (short) (narrow) %v2760_v62, 8 }
 0x571   :  { %v2773_v50 = vpop.f32.mrf.mxu3 }
 0x575   :  { %7154 = vset.pattern.permute.xlu0 %v7888_v2 }
 0x576   :  { %3137 = vxpose.xlu2.b32.cont [5/8] (short) (narrow) %v2763_v26, 8 }
 0x579   :  { %v2775_v25 = vpop.f32.mrf.mxu3  ;;  %817 = vmatmul.bf16.gmra.mxu0 %v6669_v40 }
 0x57d   :  { %4930 = vperm.xlu0 %7154, %v8001_v19  }
 0x57e   :  { %3138 = vxpose.xlu2.b32.cont [6/8] (short) (narrow) %v2765_v15, 8  ;;  %v6671_v15 = vld [vmem:[#allocation2 + $0x100] sm:$0xff] }
 0x585   :  { %7159 = vset.pattern.permute.xlu0 %v7931_v60 }
 0x586   :  { %3139 = vxpose.xlu2.b32.cont [7/8] (short) (narrow) %v2768_v54, 8  ;;  %v8026_v54 = vpop.f32.mrf.mxu2 }
 0x587   :  { %9986 = vst [vmem:[#allocation27_spill] sm:$0xff] %v8026_v54 }
 0x589   :  { %v2778_v52 = vpop.f32.mrf.mxu3  ;;  %822 = vmatmul.bf16.gmra.mxu0 %v6670_v0 }
 0x58d   :  { %4960 = vperm.xlu0 %7159, %v8001_v19  }
 0x58e   :  { %3140 = vxpose.xlu2.b32.end [8/8] (short) (narrow) %v2770_v42, 8 }
 0x591   :  { %v2780_v37 = vpop.f32.mrf.mxu3 }
 0x599   :  { %v2783_v61 = vpop.f32.mrf.mxu3  ;;  %827 = vmatmul.bf16.gmra.mxu0 %v6671_v15 }
 0x5a1   :  { %v2785_v62 = vpop.f32.mrf.mxu3 }
 0x5af   :  { %3165 = vxpose.xlu0.b32.start [1/8] (short) (narrow) %v2773_v50, 8  ;;  %v6672_v50 = vld [vmem:[#allocation2 + $0x108] sm:$0xff] }
 0x5b0   :  { %832 = vmatmul.bf16.gmra.mxu0 %v6672_v50  ;;  %v7452_v50 = vld [vmem:[%s9965_s5] sm:$0x3] }
 0x5b3   :  { %7133 = vset.pattern.permute.xlu1 %v7945_v10 }
 0x5b5   :  { %v2788_v11 = vpop.f32.mrf.mxu3 }
 0x5b7   :  { %3166 = vxpose.xlu0.b32.cont [2/8] (short) (narrow) %v2775_v25, 8 }
 0x5bb   :  { %3773 = vperm.xlu1 %7133, %v7915_v47  }
 0x5bd   :  { %v2790_v26 = vpop.f32.mrf.mxu3 }
 0x5bf   :  { %3167 = vxpose.xlu0.b32.cont [3/8] (short) (narrow) %v2778_v52, 8 }
 0x5c3   :  { %7135 = vset.pattern.permute.xlu1 %v8009_v22 }
 0x5c7   :  { %3168 = vxpose.xlu0.b32.cont [4/8] (short) (narrow) %v2780_v37, 8 }
 0x5cb   :  { %3785 = vperm.xlu1 %7135, %v7915_v47  }
 0x5cc   :  { %v8039_v15 = vpop.trf.xlu1 }
 0x5cf   :  { %3169 = vxpose.xlu0.b32.cont [5/8] (short) (narrow) %v2783_v61, 8 }
 0x5d3   :  { %7138 = vset.pattern.permute.xlu1 %v7971_v41 }
 0x5d6   :  { %v808_v14 = vpop.f32.mrf.mxu0 }
 0x5d7   :  { %3170 = vxpose.xlu0.b32.cont [6/8] (short) (narrow) %v2785_v62, 8  ;;  %v809_v23 = vadd.f32 %v7833_v24, %v808_v14  ;;  %v6673_v14 = vld [vmem:[#allocation2 + $0x110] sm:$0xff] }
 0x5d8   :  { %837 = vmatmul.bf16.gmra.mxu0 %v6673_v14 }
 0x5d9   :  { %v1044_v25 = vmax.f32 %v809_v23, 0.0  ;;  %v8044_v23 = vperm.slane %v7452_v50, 1 }
 0x5db   :  { %3803 = vperm.xlu1 %7138, %v7915_v47   ;;  %v3768_v47 = vpop.permute.xlu2 %3767  ;;  %v1172_v37 = vpack.c.bf16 %v1044_v25, %v1044_v25 }
 0x5dd   :  { %v1578_v62 = vunpack.c.l.b16 %v1172_v37 }
 0x5de   :  { %v810_v40 = vpop.f32.mrf.mxu0 }
 0x5df   :  { %3171 = vxpose.xlu0.b32.cont [7/8] (short) (narrow) %v2788_v11, 8  ;;  %v811_v61 = vadd.f32 %v7833_v24, %v810_v40 }
 0x5e1   :  { %v1045_v0 = vmax.f32 %v811_v61, 0.0 }
 0x5e3   :  { %7140 = vset.pattern.permute.xlu1 %v7891_v3  ;;  %v8029_v42 = vpop.permute.xlu2 %3779  ;;  %v1173_v11 = vpack.c.bf16 %v1045_v0, %v1045_v0 }
 0x5e5   :  { %v1579_v54 = vunpack.c.l.b16 %v1173_v11 }
 0x5e6   :  { %v813_v40 = vpop.f32.mrf.mxu0 }
 0x5e7   :  { %3172 = vxpose.xlu0.b32.end [8/8] (short) (narrow) %v2790_v26, 8  ;;  %v6878_v26 = vpack.c.bf16 %v1045_v0, %v1044_v25  ;;  %v814_v30 = vadd.f32 %v7833_v24, %v813_v40  ;;  %v1678_v61 = vpack.c.b16 %v1579_v54, %v1578_v62  ;;  %v3762_v25 = vpop.permute.xlu0 %3761  ;;  %v8053_v0 = vadd.f32 %v7774_v45, %v8044_v23 }
 0x5e8   :  { %v8063_v54 = vadd.f32 %v7782_v5, %v8044_v23  ;;  %v3498_v5 = vsel %vm3485_vm0, %v8039_v15, -inf }
 0x5e9   :  { %7082 = vst [vmem:[#allocation9 + $0xe0] sm:$0xff] %v6878_v26   ;;  %2006 = vmatmul.bf16.gmra.mxu1 %v1678_v61  ;;  %v8058_v26 = vadd.f32 %v7779_v55, %v8044_v23  ;;  %v4540_v11 = vmul.f32 %v3762_v25, %v8053_v0  ;;  %v1046_v50 = vmax.f32 %v814_v30, 0.0 }
 0x5eb   :  { %4887 = vperm.xlu1 %7140, %v7941_v6   ;;  %v8033_v52 = vpop.permute.xlu2 %3791  ;;  %v4541_v62 = vmul.f32 %v3768_v47, %v8058_v26  ;;  %v1174_v51 = vpack.c.bf16 %v1046_v50, %v1046_v50 }
 0x5ed   :  { %v1580_v47 = vunpack.c.l.b16 %v1174_v51 }
 0x5ee   :  { %v815_v40 = vpop.f32.mrf.mxu0 }
 0x5ef   :  { %v816_v55 = vadd.f32 %v7833_v24, %v815_v40 }
 0x5f0   :  { %7147 = vset.pattern.permute.xlu2 %v7888_v2 }
 0x5f1   :  { %v1047_v30 = vmax.f32 %v816_v55, 0.0 }
 0x5f3   :  { %7143 = vset.pattern.permute.xlu1 %v8009_v22  ;;  %v1175_v17 = vpack.c.bf16 %v1047_v30, %v1047_v30  ;;  %v6883_v43 = vpack.c.bf16 %v1047_v30, %v1046_v50  ;;  %v8095_v30 = vadd.f32 %v7793_v34, %v8044_v23 }
 0x5f5   :  { %7083 = vst [vmem:[#allocation9 + $0xe8] sm:$0xff] %v6883_v43   ;;  %v8087_v43 = vadd.f32 %v7791_v27, %v8044_v23 }
 0x5f8   :  { %3810 = vperm.xlu2 %7147, %v7996_v16  }
 0x5fb   :  { %4905 = vperm.xlu1 %7143, %v7941_v6  }
 0x600   :  { %7149 = vset.pattern.permute.xlu2 %v7945_v10 }
 0x603   :  { %7145 = vset.pattern.permute.xlu1 %v7962_v32 }
 0x608   :  { %3822 = vperm.xlu2 %7149, %v7996_v16  }
 0x60b   :  { %4917 = vperm.xlu1 %7145, %v7941_v6   ;;  %v8035_v6 = vpop.f32.mrf.mxu2  ;;  %2335 = vmatmul.bf16.gmra.mxu2 %v1678_v61 }
 0x60c   :  { %9987 = vst [vmem:[#allocation28_spill] sm:$0xff] %v8035_v6  ;;  %v8046_v6 = vpop.permute.xlu2 %4881 }
 0x610   :  { %7151 = vset.pattern.permute.xlu2 %v7931_v60 }
 0x613   :  { %7148 = vset.pattern.permute.xlu1 %v7891_v3  ;;  %v8049_v37 = vpop.f32.mrf.mxu2 }
 0x614   :  { %9988 = vst [vmem:[#allocation29_spill] sm:$0xff] %v8049_v37  ;;  %v8066_v14 = vpop.permute.xlu2 %4893  ;;  %v4668_v37 = vadd.f32 %v4541_v62, %v4540_v11  ;;  %v1581_v11 = vunpack.c.l.b16 %v1175_v17  ;;  %v818_v62 = vpop.f32.mrf.mxu0 }
 0x615   :  { %v819_v51 = vadd.f32 %v7833_v24, %v818_v62 }
 0x616   :  { %v1679_v40 = vpack.c.b16 %v1581_v11, %v1580_v47  ;;  %v3798_v47 = vpop.permute.xlu0 %3797 }
 0x617   :  { %v1048_v55 = vmax.f32 %v819_v51, 0.0 }
 0x618   :  { %3840 = vperm.xlu2 %7151, %v7996_v16   ;;  %2011 = vmatmul.bf16.gmra.mxu1 %v1679_v40 }
 0x61b   :  { %v8071_v25 = vpop.f32.mrf.mxu2  ;;  %2340 = vmatmul.bf16.gmra.mxu2 %v1679_v40  ;;  %v8101_v40 = vadd.f32 %v7796_v39, %v8044_v23 }
 0x61c   :  { %9989 = vst [vmem:[#allocation30_spill] sm:$0xff] %v8071_v25  ;;  %v8075_v31 = vpop.permute.xlu2 %4911 }
 0x620   :  { %7153 = vset.pattern.permute.xlu2 %v7971_v41 }
 0x623   :  { %v8083_v50 = vpop.f32.mrf.mxu2 }
 0x624   :  { %9990 = vst [vmem:[#allocation31_spill] sm:$0xff] %v8083_v50  ;;  %v4546_v50 = vmul.f32 %v3798_v47, %v8101_v40 }
 0x628   :  { %3852 = vperm.xlu2 %7153, %v7996_v16  }
 0x62b   :  { %v8107_v57 = vpop.f32.mrf.mxu2 }
 0x62d   :  { %v3774_v45 = vpop.permute.xlu1 %3773 }
 0x62e   :  { %v4542_v61 = vmul.f32 %v3774_v45, %v8063_v54  ;;  %v6674_v45 = vld [vmem:[#allocation2 + $0x118] sm:$0xff] }
 0x62f   :  { %842 = vmatmul.bf16.gmra.mxu0 %v6674_v45  ;;  %v1176_v45 = vpack.c.bf16 %v1048_v55, %v1048_v55 }
 0x630   :  { %v4669_v38 = vadd.f32 %v4668_v37, %v4542_v61  ;;  %7156 = vset.pattern.permute.xlu2 %v7945_v10  ;;  %v8080_v37 = vadd.f32 %v7787_v18, %v8044_v23  ;;  %v8091_v61 = vpop.permute.xlu2 %4923 }
 0x632   :  { %v4543_v17 = vmul.f32 %v8029_v42, %v8080_v37  ;;  %v4545_v42 = vmul.f32 %v8033_v52, %v8095_v30 }
 0x634   :  { %v4670_v11 = vadd.f32 %v4669_v38, %v4543_v17  ;;  %v1582_v38 = vunpack.c.l.b16 %v1176_v45 }
 0x635   :  { %3499 = vmax.xlane.f32.xlu1 %v3498_v5  ;;  %v820_v5 = vpop.f32.mrf.mxu0 }
 0x636   :  { %v821_v27 = vadd.f32 %v7833_v24, %v820_v5 }
 0x638   :  { %4942 = vperm.xlu2 %7156, %v8001_v19   ;;  %v1049_v34 = vmax.f32 %v821_v27, 0.0  ;;  %v3590_v21 = vpop.xlane.xlu2 %3589 }
 0x639   :  { %7397 = vrcp.f32 %v3590_v21 }
 0x63a   :  { %v1177_v17 = vpack.c.bf16 %v1049_v34, %v1049_v34 }
 0x63c   :  { %v1583_v5 = vunpack.c.l.b16 %v1177_v17 }
 0x63d   :  { %v3786_v18 = vpop.permute.xlu1 %3785  ;;  %v823_v39 = vpop.f32.mrf.mxu0 }
 0x63e   :  { %v4544_v62 = vmul.f32 %v3786_v18, %v8087_v43  ;;  %v6888_v18 = vpack.c.bf16 %v1049_v34, %v1048_v55  ;;  %v824_v33 = vadd.f32 %v7833_v24, %v823_v39  ;;  %v1680_v52 = vpack.c.b16 %v1583_v5, %v1582_v38  ;;  %v8114_v55 = vpop.f32.mrf.mxu2 }
 0x63f   :  { %v5662_v39 = vmul.f32 %v8066_v14, %v8063_v54  ;;  %v2214_v54 = vadd.f32 %v7799_v49, %v8044_v23 }
 0x640   :  { %v4671_v51 = vadd.f32 %v4670_v11, %v4544_v62  ;;  %7158 = vset.pattern.permute.xlu2 %v8009_v22  ;;  %7084 = vst [vmem:[#allocation9 + $0xf0] sm:$0xff] %v6888_v18   ;;  %2016 = vmatmul.bf16.gmra.mxu1 %v1680_v52  ;;  %v1050_v47 = vmax.f32 %v824_v33, 0.0  ;;  %v7398_v11 = vpop.eup %7397  ;;  %v5660_v18 = vmul.f32 %v8046_v6, %v8053_v0  ;;  %v4900_v6 = vpop.permute.xlu0 %4899 }
 0x641   :  { %2345 = vmatmul.bf16.gmra.mxu2 %v1680_v52  ;;  %v8117_v45 = vmul.f32 %v7398_v11, %v7984_v9  ;;  %v5663_v0 = vmul.f32 %v4900_v6, %v8080_v37  ;;  %v5665_v37 = vmul.f32 %v8075_v31, %v8095_v30  ;;  %v8161_v30 = vld [vmem:[#allocation5] ss:$0 sm:$0xff] }
 0x642   :  { %v4672_v25 = vadd.f32 %v4671_v51, %v4545_v42 }
 0x643   :  { %v8121_v51 = vperm.slane %v8117_v45, 0 }
 0x644   :  { %v4673_v8 = vadd.f32 %v4672_v25, %v4546_v50  ;;  %v1178_v25 = vpack.c.bf16 %v1050_v47, %v1050_v47 }
 0x645   :  { %v825_v62 = vpop.f32.mrf.mxu0 }
 0x646   :  { %v826_v50 = vadd.f32 %v7833_v24, %v825_v62  ;;  %v1584_v27 = vunpack.c.l.b16 %v1178_v25  ;;  %v8126_v9 = vpop.f32.mrf.mxu2 }
 0x648   :  { %4954 = vperm.xlu2 %7158, %v8001_v19   ;;  %v1051_v21 = vmax.f32 %v826_v50, 0.0  ;;  %v8147_v50 = vperm.slane %v8117_v45, 1 }
 0x64a   :  { %v1179_v42 = vpack.c.bf16 %v1051_v21, %v1051_v21  ;;  %v6893_v33 = vpack.c.bf16 %v1051_v21, %v1050_v47 }
 0x64c   :  { %7085 = vst [vmem:[#allocation9 + $0xf8] sm:$0xff] %v6893_v33   ;;  %v1585_v34 = vunpack.c.l.b16 %v1179_v42 }
 0x64d   :  { %v3804_v38 = vpop.permute.xlu1 %3803 }
 0x64e   :  { %3816 = vperm.xlu1 %7148, %v7996_v16   ;;  %7162 = vset.pattern.permute.xlu0 %v7888_v2  ;;  %v1681_v24 = vpack.c.b16 %v1585_v34, %v1584_v27  ;;  %v4547_v25 = vmul.f32 %v3804_v38, %v2214_v54  ;;  %v8159_v34 = vpop.f32.mrf.mxu2 }
 0x650   :  { %7161 = vset.pattern.permute.xlu2 %v7971_v41  ;;  %2021 = vmatmul.bf16.gmra.mxu1 %v1681_v24  ;;  %v4674_v21 = vadd.f32 %v4673_v8, %v4547_v25  ;;  %v5667_v8 = vmul.f32 %v8091_v61, %v2214_v54 }
 0x651   :  { %2350 = vmatmul.bf16.gmra.mxu2 %v1681_v24 }
 0x656   :  { %7150 = vset.pattern.permute.xlu1 %v8009_v22  ;;  %3859 = vperm.xlu0 %7162, %v8121_v51   ;;  %v8167_v6 = vpop.f32.mrf.mxu2 }
 0x658   :  { %4972 = vperm.xlu2 %7161, %v8001_v19  }
 0x65d   :  { %v4888_v17 = vpop.permute.xlu1 %4887 }
 0x65e   :  { %v5661_v5 = vmul.f32 %v4888_v17, %v8058_v26  ;;  %3834 = vperm.xlu1 %7150, %v7996_v16   ;;  %7167 = vset.pattern.permute.xlu0 %v7931_v60  ;;  %v828_v17 = vpop.f32.mrf.mxu0 }
 0x660   :  { %v5788_v52 = vadd.f32 %v5661_v5, %v5660_v18  ;;  %7164 = vset.pattern.permute.xlu2 %v7945_v10  ;;  %v829_v18 = vadd.f32 %v8161_v30, %v828_v17 }
 0x662   :  { %v5789_v47 = vadd.f32 %v5788_v52, %v5662_v39  ;;  %v1052_v39 = vmax.f32 %v829_v18, 0.0 }
 0x664   :  { %v5790_v11 = vadd.f32 %v5789_v47, %v5663_v0 }
 0x666   :  { %7152 = vset.pattern.permute.xlu1 %v7962_v32  ;;  %3889 = vperm.xlu0 %7167, %v8121_v51   ;;  %v830_v0 = vpop.f32.mrf.mxu0 }
 0x668   :  { %3871 = vperm.xlu2 %7164, %v8121_v51  }
 0x66d   :  { %v4906_v26 = vpop.permute.xlu1 %4905 }
 0x66e   :  { %v5664_v62 = vmul.f32 %v4906_v26, %v8087_v43  ;;  %3846 = vperm.xlu1 %7152, %v7996_v16   ;;  %7172 = vset.pattern.permute.xlu0 %v7945_v10  ;;  %v4675_v16 = vrot.slane %v4674_v21, 4 }
 0x670   :  { %v5791_v14 = vadd.f32 %v5790_v11, %v5664_v62  ;;  %7166 = vset.pattern.permute.xlu2 %v8009_v22  ;;  %v4676_v49 = vadd.f32 %v4675_v16, %v4674_v21  ;;  %v1180_v11 = vpack.c.bf16 %v1052_v39, %v1052_v39  ;;  %v831_v62 = vadd.f32 %v8161_v30, %v830_v0 }
 0x672   :  { %v5792_v27 = vadd.f32 %v5791_v14, %v5665_v37  ;;  %v4677_v38 = vrot.slane %v4676_v49, 2  ;;  %v1053_v25 = vmax.f32 %v831_v62, 0.0  ;;  %v1586_v16 = vunpack.c.l.b16 %v1180_v11 }
 0x674   :  { %v1181_v37 = vpack.c.bf16 %v1053_v25, %v1053_v25 }
 0x676   :  { %7155 = vset.pattern.permute.xlu1 %v7891_v3  ;;  %4991 = vperm.xlu0 %7172, %v8147_v50  }
 0x678   :  { %3883 = vperm.xlu2 %7166, %v8121_v51  }
 0x67d   :  { %v4918_v43 = vpop.permute.xlu1 %4917 }
 0x67e   :  { %v5666_v42 = vmul.f32 %v4918_v43, %v8101_v40  ;;  %4936 = vperm.xlu1 %7155, %v8001_v19   ;;  %7177 = vset.pattern.permute.xlu0 %v7971_v41  ;;  %v4678_v40 = vadd.f32 %v4677_v38, %v4676_v49  ;;  %v6898_v43 = vpack.c.bf16 %v1053_v25, %v1052_v39  ;;  %v1587_v49 = vunpack.c.l.b16 %v1181_v37 }
 0x680   :  { %v5793_v33 = vadd.f32 %v5792_v27, %v5666_v42  ;;  %7169 = vset.pattern.permute.xlu2 %v7971_v41  ;;  %v4679_v52 = vrot.slane %v4678_v40, 1  ;;  %7086 = vst [vmem:[#allocation9 + $0x100] sm:$0xff] %v6898_v43   ;;  %v833_v27 = vpop.f32.mrf.mxu0  ;;  %v8174_v42 = vpop.f32.mrf.mxu2 }
 0x682   :  { %v5794_v24 = vadd.f32 %v5793_v33, %v5667_v8  ;;  %v4680_v54 = vadd.f32 %v4679_v52, %v4678_v40  ;;  %v834_v8 = vadd.f32 %v8161_v30, %v833_v27  ;;  %v1682_v33 = vpack.c.b16 %v1587_v49, %v1586_v16 }
 0x684   :  { %v5795_v31 = vrot.slane %v5794_v24, 4  ;;  %2026 = vmatmul.bf16.gmra.mxu1 %v1682_v33  ;;  %2355 = vmatmul.bf16.gmra.mxu2 %v1682_v33  ;;  %v1054_v38 = vmax.f32 %v834_v8, 0.0  ;;  %v8194_v8 = vpop.trf.xlu2 }
 0x686   :  { %v5796_v5 = vadd.f32 %v5795_v31, %v5794_v24  ;;  %7157 = vset.pattern.permute.xlu1 %v7922_v4  ;;  %5021 = vperm.xlu0 %7177, %v8147_v50   ;;  %v1182_v17 = vpack.c.bf16 %v1054_v38, %v1054_v38 }
 0x688   :  { %v5797_v61 = vrot.slane %v5796_v5, 2  ;;  %3901 = vperm.xlu2 %7169, %v8121_v51   ;;  %v835_v24 = vpop.f32.mrf.mxu0  ;;  %v8181_v18 = vpop.f32.mrf.mxu2 }
 0x689   :  { %v836_v31 = vadd.f32 %v8161_v30, %v835_v24 }
 0x68a   :  { %v5798_v47 = vadd.f32 %v5797_v61, %v5796_v5  ;;  %v1588_v5 = vunpack.c.l.b16 %v1182_v17 }
 0x68b   :  { %v1055_v40 = vmax.f32 %v836_v31, 0.0 }
 0x68c   :  { %v5799_v26 = vrot.slane %v5798_v47, 1 }
 0x68d   :  { %v1183_v61 = vpack.c.bf16 %v1055_v40, %v1055_v40  ;;  %v6903_v39 = vpack.c.bf16 %v1055_v40, %v1054_v38 }
 0x68e   :  { %4948 = vperm.xlu1 %7157, %v8001_v19   ;;  %v5800_v14 = vadd.f32 %v5799_v26, %v5798_v47  ;;  %7180 = vset.pattern.permute.xlu0 %v7945_v10  ;;  %v2007_v26 = vpop.f32.mrf.mxu1 }
 0x68f   :  { %7087 = vst [vmem:[#allocation9 + $0x108] sm:$0xff] %v6903_v39   ;;  %v1589_v52 = vunpack.c.l.b16 %v1183_v61  ;;  %v2008_v16 = vadd.f32 %v2007_v26, %v7731_v59  ;;  %v3811_v26 = vpop.permute.xlu2 %3810 }
 0x690   :  { %7171 = vset.pattern.permute.xlu2 %v7891_v3  ;;  %v5997_v21 = vsel %vm5996_vm1, %v4680_v54, %v5800_v14  ;;  %v838_v47 = vpop.f32.mrf.mxu0  ;;  %v8190_v62 = vpop.f32.mrf.mxu2  ;;  %v6675_v14 = vld [vmem:[#allocation2 + $0x120] sm:$0xff] }
 0x691   :  { %v839_v0 = vadd.f32 %v8161_v30, %v838_v47  ;;  %v1683_v11 = vpack.c.b16 %v1589_v52, %v1588_v5  ;;  %847 = vmatmul.bf16.gmra.mxu0 %v6675_v14  ;;  %v6676_v14 = vld [vmem:[#allocation2 + $0x128] sm:$0xff] }
 0x693   :  { %v1056_v54 = vmax.f32 %v839_v0, 0.0 }
 0x694   :  { %2031 = vmatmul.bf16.gmra.mxu1 %v1683_v11  ;;  %2360 = vmatmul.bf16.gmra.mxu2 %v1683_v11 }
 0x695   :  { %v1184_v43 = vpack.c.bf16 %v1056_v54, %v1056_v54 }
 0x696   :  { %7160 = vset.pattern.permute.xlu1 %v7962_v32  ;;  %v2009_v27 = vpop.f32.mrf.mxu1 }
 0x697   :  { %v2010_v33 = vadd.f32 %v2009_v27, %v7731_v59  ;;  %v1590_v17 = vunpack.c.l.b16 %v1184_v43  ;;  %v8211_v27 = vadd.f32 %v7816_v36, %v8044_v23 }
 0x698   :  { %4985 = vperm.xlu2 %7171, %v8147_v50   ;;  %v840_v37 = vpop.f32.mrf.mxu0  ;;  %v8199_v5 = vpop.f32.mrf.mxu2 }
 0x699   :  { %v841_v49 = vadd.f32 %v8161_v30, %v840_v37 }
 0x69b   :  { %v1057_v24 = vmax.f32 %v841_v49, 0.0 }
 0x69d   :  { %v1185_v31 = vpack.c.bf16 %v1057_v24, %v1057_v24  ;;  %v6908_v40 = vpack.c.bf16 %v1057_v24, %v1056_v54  ;;  %v8218_v24 = vadd.f32 %v7819_v48, %v8044_v23 }
 0x69e   :  { %4966 = vperm.xlu1 %7160, %v8001_v19   ;;  %v6013_v19 = vld [vmem:[%s9966_s6] sm:$0x3]  ;;  %v2012_v47 = vpop.f32.mrf.mxu1 }
 0x69f   :  { %v6014_v25 = vmul.f32 %v6013_v19, %v5997_v21  ;;  %v2544_v21 = vpack.c.bf16 %v2010_v33, %v2008_v16  ;;  %7088 = vst [vmem:[#allocation9 + $0x110] sm:$0xff] %v6908_v40   ;;  %v1591_v61 = vunpack.c.l.b16 %v1185_v31  ;;  %v2013_v54 = vadd.f32 %v2012_v47, %v7731_v59  ;;  %v3823_v40 = vpop.permute.xlu2 %3822 }
 0x6a0   :  { %7174 = vset.pattern.permute.xlu2 %v8009_v22  ;;  %v8206_v16 = vpop.f32.mrf.mxu2  ;;  %v3537_v33 = vsub.f32 %v7954_v29, %v7990_v56  ;;  %v4548_v31 = vmul.f32 %v3811_v26, %v8211_v27  ;;  %v3501_v26 = vsel %vm3485_vm0, %v8194_v8, -inf }
 0x6a1   :  { %v6031_v38 = vsel %vm6030_vm2, %v6014_v25, 0.0  ;;  %2792 = vmatmul.bf16.gmra.mxu3 %v2544_v21  ;;  %v1684_v0 = vpack.c.b16 %v1591_v61, %v1590_v17  ;;  %852 = vmatmul.bf16.gmra.mxu0 %v6676_v14  ;;  %v8222_v17 = vadd.f32 %v7821_v53, %v8044_v23  ;;  %v3829_v14 = vpop.permute.xlu0 %3828 }
 0x6a2   :  { %v3556_v47 = vmul.f32 1.442695, %v3537_v33  ;;  %v2224_v33 = vadd.f32 %v7824_v58, %v8044_v23 }
 0x6a3   :  { %v4550_v48 = vmul.f32 %v3823_v40, %v8222_v17 }
 0x6a4   :  { %2036 = vmatmul.bf16.gmra.mxu1 %v1684_v0  ;;  %2365 = vmatmul.bf16.gmra.mxu2 %v1684_v0  ;;  %7399 = vpow2.f32 %v3556_v47 }
 0x6a6   :  { %7163 = vset.pattern.permute.xlu1 %v7891_v3  ;;  %v2014_v49 = vpop.f32.mrf.mxu1 }
 0x6a8   :  { %5003 = vperm.xlu2 %7174, %v8147_v50   ;;  %v8202_v11 = vpop.xlane.xlu1 %3499 }
 0x6ac   :  { %v843_v39 = vpop.f32.mrf.mxu0 }
 0x6ad   :  { %v844_v52 = vadd.f32 %v8161_v30, %v843_v39 }
 0x6af   :  { %v1058_v19 = vmax.f32 %v844_v52, 0.0 }
 0x6b0   :  { %7176 = vset.pattern.permute.xlu2 %v7962_v32  ;;  %6032 = vadd.xlane.f32.xlu0 %v6031_v38  ;;  %v2015_v38 = vadd.f32 %v2014_v49, %v7731_v59  ;;  %v8230_v49 = vpop.f32.mrf.mxu2 }
 0x6b1   :  { %v1186_v37 = vpack.c.bf16 %v1058_v19, %v1058_v19 }
 0x6b2   :  { %v2545_v36 = vpack.c.bf16 %v2015_v38, %v2013_v54  ;;  %v4931_v38 = vpop.permute.xlu0 %4930 }
 0x6b3   :  { %v1592_v56 = vunpack.c.l.b16 %v1186_v37  ;;  %v8232_v37 = vpop.eup %7399 }
 0x6b4   :  { %v845_v25 = vpop.f32.mrf.mxu0  ;;  %2797 = vmatmul.bf16.gmra.mxu3 %v2545_v36  ;;  %v4551_v36 = vmul.f32 %v3829_v14, %v2224_v33  ;;  %v2229_v14 = vadd.f32 %v7830_v12, %v8044_v23 }
 0x6b5   :  { %v846_v43 = vadd.f32 %v8161_v30, %v845_v25 }
 0x6b7   :  { %v1059_v21 = vmax.f32 %v846_v43, 0.0 }
 0x6b8   :  { %5015 = vperm.xlu2 %7176, %v8147_v50  }
 0x6b9   :  { %v1187_v39 = vpack.c.bf16 %v1059_v21, %v1059_v21  ;;  %v6913_v52 = vpack.c.bf16 %v1059_v21, %v1058_v19  ;;  %v6677_v19 = vld [vmem:[#allocation2 + $0x130] sm:$0xff] }
 0x6ba   :  { %857 = vmatmul.bf16.gmra.mxu0 %v6677_v19 }
 0x6bb   :  { %7089 = vst [vmem:[#allocation9 + $0x118] sm:$0xff] %v6913_v52   ;;  %v1593_v53 = vunpack.c.l.b16 %v1187_v39 }
 0x6bd   :  { %v2017_v54 = vpop.f32.mrf.mxu1  ;;  %v1685_v43 = vpack.c.b16 %v1593_v53, %v1592_v56  ;;  %v3538_v53 = vsub.f32 %v8039_v15, %v8202_v11  ;;  %v2232_v15 = vadd.f32 %v7836_v28, %v8044_v23 }
 0x6be   :  { %v2018_v21 = vadd.f32 %v2017_v54, %v7731_v59 }
 0x6bf   :  { %2041 = vmatmul.bf16.gmra.mxu1 %v1685_v43  ;;  %2370 = vmatmul.bf16.gmra.mxu2 %v1685_v43  ;;  %v3558_v54 = vmul.f32 1.442695, %v3538_v53  ;;  %v3841_v43 = vpop.permute.xlu2 %3840  ;;  %v5668_v53 = vmul.f32 %v4931_v38, %v8211_v27  ;;  %v2234_v27 = vadd.f32 %v7839_v35, %v8044_v23 }
 0x6c0   :  { %v3817_v61 = vpop.permute.xlu1 %3816  ;;  %7179 = vset.pattern.permute.xlu2 %v7891_v3  ;;  %v4553_v11 = vmul.f32 %v3841_v43, %v2229_v14 }
 0x6c1   :  { %v4549_v29 = vmul.f32 %v3817_v61, %v8218_v24  ;;  %v2227_v61 = vadd.f32 %v7827_v7, %v8044_v23  ;;  %7401 = vpow2.f32 %v3558_v54 }
 0x6c3   :  { %v4681_v0 = vadd.f32 %v4549_v29, %v4548_v31  ;;  %v3591_v29 = vsel %vm3485_vm0, %v8232_v37, 0.0 }
 0x6c5   :  { %v4682_v25 = vadd.f32 %v4681_v0, %v4550_v48  ;;  %v2019_v31 = vpop.f32.mrf.mxu1  ;;  %v4961_v48 = vpop.permute.xlu0 %4960 }
 0x6c6   :  { %v2020_v40 = vadd.f32 %v2019_v31, %v7731_v59 }
 0x6c7   :  { %v4683_v47 = vadd.f32 %v4682_v25, %v4551_v36 }
 0x6c8   :  { %3502 = vmax.xlane.f32.xlu1 %v3501_v26  ;;  %v2546_v39 = vpack.c.bf16 %v2020_v40, %v2018_v21  ;;  %v6678_v26 = vld [vmem:[#allocation2 + $0x138] sm:$0xff] }
 0x6ca   :  { %2802 = vmatmul.bf16.gmra.mxu3 %v2546_v39  ;;  %862 = vmatmul.bf16.gmra.mxu0 %v6678_v26  ;;  %v8254_v39 = vpop.eup %7401 }
 0x6cd   :  { %v2022_v0 = vpop.f32.mrf.mxu1  ;;  %v8247_v19 = vpop.trf.xlu0 }
 0x6ce   :  { %v2023_v7 = vadd.f32 %v2022_v0, %v7731_v59  ;;  %v3504_v25 = vsel %vm3485_vm0, %v8247_v19, -inf }
 0x6d0   :  { %v3835_v56 = vpop.permute.xlu1 %3834  ;;  %3592 = vadd.xlane.f32.xlu1 %v3591_v29 }
 0x6d1   :  { %v4552_v52 = vmul.f32 %v3835_v56, %v2227_v61 }
 0x6d3   :  { %v4684_v58 = vadd.f32 %v4683_v47, %v4552_v52  ;;  %v3853_v52 = vpop.permute.xlu2 %3852  ;;  %v3594_v47 = vsel %vm3485_vm0, %v8254_v39, 0.0 }
 0x6d5   :  { %v2024_v21 = vpop.f32.mrf.mxu1  ;;  %v4685_v56 = vadd.f32 %v4684_v58, %v4553_v11 }
 0x6d6   :  { %v2025_v31 = vadd.f32 %v2024_v21, %v7731_v59 }
 0x6d8   :  { %v2547_v36 = vpack.c.bf16 %v2025_v31, %v2023_v7 }
 0x6da   :  { %2807 = vmatmul.bf16.gmra.mxu3 %v2547_v36  ;;  %v5673_v36 = vmul.f32 %v4961_v48, %v2229_v14 }
 0x6db   :  { %v4943_v0 = vpop.permute.xlu2 %4942 }
 0x6dc   :  { %v5670_v58 = vmul.f32 %v4943_v0, %v8222_v17 }
 0x6e0   :  { %v3847_v40 = vpop.permute.xlu1 %3846 }
 0x6e1   :  { %v4554_v29 = vmul.f32 %v3847_v40, %v2232_v15  ;;  %3505 = vmax.xlane.f32.xlu2 %v3504_v25 }
 0x6e3   :  { %v4686_v12 = vadd.f32 %v4685_v56, %v4554_v29  ;;  %v4955_v7 = vpop.permute.xlu2 %4954 }
 0x6e4   :  { %v5672_v31 = vmul.f32 %v4955_v7, %v2227_v61 }
 0x6e9   :  { %3865 = vperm.xlu1 %7163, %v8121_v51   ;;  %3595 = vadd.xlane.f32.xlu2 %v3594_v47 }
 0x6eb   :  { %v4973_v29 = vpop.permute.xlu2 %4972 }
 0x6f0   :  { %v4937_v28 = vpop.permute.xlu1 %4936 }
 0x6f1   :  { %v5669_v26 = vmul.f32 %v4937_v28, %v8218_v24  ;;  %7165 = vset.pattern.permute.xlu1 %v7922_v4  ;;  %v4555_v24 = vmul.f32 %v3853_v52, %v2234_v27 }
 0x6f3   :  { %v5801_v54 = vadd.f32 %v5669_v26, %v5668_v53  ;;  %v4687_v40 = vadd.f32 %v4686_v12, %v4555_v24 }
 0x6f5   :  { %v5802_v43 = vadd.f32 %v5801_v54, %v5670_v58  ;;  %v4688_v17 = vrot.slane %v4687_v40, 4 }
 0x6f7   :  { %v4689_v47 = vadd.f32 %v4688_v17, %v4687_v40  ;;  %v8279_v40 = vpop.permute.xlu2 %3871 }
 0x6f9   :  { %3877 = vperm.xlu1 %7165, %v8121_v51   ;;  %v4690_v26 = vrot.slane %v4689_v47, 2 }
 0x6fb   :  { %v4691_v54 = vadd.f32 %v4690_v26, %v4689_v47 }
 0x700   :  { %v4949_v21 = vpop.permute.xlu1 %4948 }
 0x701   :  { %v5671_v25 = vmul.f32 %v4949_v21, %v2224_v33  ;;  %7168 = vset.pattern.permute.xlu1 %v7962_v32  ;;  %v5675_v33 = vmul.f32 %v4973_v29, %v2234_v27  ;;  %v2027_v53 = vpop.f32.mrf.mxu1 }
 0x702   :  { %v2028_v48 = vadd.f32 %v2027_v53, %v7731_v59 }
 0x703   :  { %v5803_v11 = vadd.f32 %v5802_v43, %v5671_v25  ;;  %v4692_v43 = vrot.slane %v4691_v54, 1 }
 0x705   :  { %v5804_v38 = vadd.f32 %v5803_v11, %v5672_v31  ;;  %v4693_v25 = vadd.f32 %v4692_v43, %v4691_v54 }
 0x707   :  { %v5805_v28 = vadd.f32 %v5804_v38, %v5673_v36  ;;  %v8276_v38 = vpop.f32.mrf.mxu2 }
 0x709   :  { %3895 = vperm.xlu1 %7168, %v8121_v51   ;;  %v2029_v14 = vpop.f32.mrf.mxu1 }
 0x70e   :  { %v848_v24 = vpop.f32.mrf.mxu0 }
 0x70f   :  { %v849_v29 = vadd.f32 %v8161_v30, %v848_v24 }
 0x710   :  { %v4967_v56 = vpop.permute.xlu1 %4966 }
 0x711   :  { %v5674_v0 = vmul.f32 %v4967_v56, %v2232_v15  ;;  %7170 = vset.pattern.permute.xlu1 %v7888_v2  ;;  %v2030_v15 = vadd.f32 %v2029_v14, %v7731_v59  ;;  %v2032_v27 = vpop.f32.mrf.mxu1  ;;  %v1060_v47 = vmax.f32 %v849_v29, 0.0 }
 0x712   :  { %v2033_v36 = vadd.f32 %v2032_v27, %v7731_v59 }
 0x713   :  { %v5806_v61 = vadd.f32 %v5805_v28, %v5674_v0  ;;  %v2548_v7 = vpack.c.bf16 %v2030_v15, %v2028_v48  ;;  %v8284_v28 = vpop.f32.mrf.mxu2  ;;  %v1188_v53 = vpack.c.bf16 %v1060_v47, %v1060_v47 }
 0x715   :  { %v5807_v58 = vadd.f32 %v5806_v61, %v5675_v33  ;;  %2812 = vmatmul.bf16.gmra.mxu3 %v2548_v7  ;;  %v8287_v61 = vpop.permute.xlu2 %3883  ;;  %v1594_v54 = vunpack.c.l.b16 %v1188_v53 }
 0x716   :  { %v850_v33 = vpop.f32.mrf.mxu0 }
 0x717   :  { %v5808_v35 = vrot.slane %v5807_v58, 4  ;;  %v851_v26 = vadd.f32 %v8161_v30, %v850_v33 }
 0x719   :  { %v5809_v52 = vadd.f32 %v5808_v35, %v5807_v58  ;;  %4979 = vperm.xlu1 %7170, %v8147_v50   ;;  %v2034_v17 = vpop.f32.mrf.mxu1  ;;  %v1061_v35 = vmax.f32 %v851_v26, 0.0 }
 0x71a   :  { %v2035_v56 = vadd.f32 %v2034_v17, %v7731_v59 }
 0x71b   :  { %v5810_v51 = vrot.slane %v5809_v52, 2  ;;  %v8291_v14 = vpop.f32.mrf.mxu2 }
 0x71c   :  { %v2549_v0 = vpack.c.bf16 %v2035_v56, %v2033_v36 }
 0x71d   :  { %v5811_v12 = vadd.f32 %v5810_v51, %v5809_v52  ;;  %v1189_v52 = vpack.c.bf16 %v1061_v35, %v1061_v35  ;;  %v6918_v51 = vpack.c.bf16 %v1061_v35, %v1060_v47  ;;  %v8293_v15 = vpop.permute.xlu2 %3901 }
 0x71f   :  { %v5812_v21 = vrot.slane %v5811_v12, 1  ;;  %7090 = vst [vmem:[#allocation9 + $0x120] sm:$0xff] %v6918_v51   ;;  %v1595_v48 = vunpack.c.l.b16 %v1189_v52 }
 0x721   :  { %7173 = vset.pattern.permute.xlu1 %v7922_v4  ;;  %v5813_v31 = vadd.f32 %v5812_v21, %v5811_v12  ;;  %v2037_v58 = vpop.f32.mrf.mxu1  ;;  %v853_v12 = vpop.f32.mrf.mxu0 }
 0x722   :  { %v2038_v7 = vadd.f32 %v2037_v58, %v7731_v59  ;;  %v854_v21 = vadd.f32 %v8161_v30, %v853_v12 }
 0x723   :  { %v8274_v11 = vsel %vm5996_vm1, %v4693_v25, %v5813_v31  ;;  %v1686_v25 = vpack.c.b16 %v1595_v48, %v1594_v54  ;;  %v8303_v33 = vpop.f32.mrf.mxu2  ;;  %v7595_v48 = vmov 1983009808  }
 0x724   :  { %9991 = vst [vmem:[#allocation32_spill] sm:$0xff] %v8303_v33  ;;  %v3666_v12 = vunpack.c.l.s4 %v7595_v48 }
 0x725   :  { %2817 = vmatmul.bf16.gmra.mxu3 %v2549_v0  ;;  %2046 = vmatmul.bf16.gmra.mxu1 %v1686_v25  ;;  %v8300_v36 = vpop.permute.xlu2 %4985 }
 0x726   :  { %2375 = vmatmul.bf16.gmra.mxu2 %v1686_v25 }
 0x729   :  { %4997 = vperm.xlu1 %7173, %v8147_v50   ;;  %v2039_v31 = vpop.f32.mrf.mxu1  ;;  %v855_v17 = vpop.f32.mrf.mxu0 }
 0x72a   :  { %v2040_v27 = vadd.f32 %v2039_v31, %v7731_v59  ;;  %v856_v47 = vadd.f32 %v8161_v30, %v855_v17 }
 0x72c   :  { %v2550_v24 = vpack.c.bf16 %v2040_v27, %v2038_v7  ;;  %v1063_v53 = vmax.f32 %v856_v47, 0.0  ;;  %v3662_v7 = vrot.slane %v8117_v45, 4 }
 0x72e   :  { %v1191_v58 = vpack.c.bf16 %v1063_v53, %v1063_v53 }
 0x730   :  { %v1597_v54 = vunpack.c.l.b16 %v1191_v58 }
 0x731   :  { %7175 = vset.pattern.permute.xlu1 %v7931_v60 }
 0x735   :  { %2822 = vmatmul.bf16.gmra.mxu3 %v2550_v24 }
 0x737   :  { %v858_v51 = vpop.f32.mrf.mxu0 }
 0x738   :  { %v859_v31 = vadd.f32 %v8161_v30, %v858_v51 }
 0x739   :  { %5009 = vperm.xlu1 %7175, %v8147_v50   ;;  %v1062_v50 = vmax.f32 %v854_v21, 0.0  ;;  %v8306_v21 = vpop.permute.xlu2 %5003 }
 0x73a   :  { %v1064_v47 = vmax.f32 %v859_v31, 0.0 }
 0x73b   :  { %v8295_v43 = vpop.xlane.xlu1 %3502  ;;  %v1190_v56 = vpack.c.bf16 %v1062_v50, %v1062_v50  ;;  %v6923_v35 = vpack.c.bf16 %v1063_v53, %v1062_v50 }
 0x73c   :  { %v2042_v0 = vpop.f32.mrf.mxu1  ;;  %v1192_v48 = vpack.c.bf16 %v1064_v47, %v1064_v47 }
 0x73d   :  { %v1596_v26 = vunpack.c.l.b16 %v1190_v56  ;;  %7091 = vst [vmem:[#allocation9 + $0x128] sm:$0xff] %v6923_v35   ;;  %v2043_v24 = vadd.f32 %v2042_v0, %v7731_v59  ;;  %v8318_v56 = vunpack.c.0.s8 %v3666_v12  ;;  %v3664_v0 = vsel %vm3663_vm3, %v3662_v7, %v7912_v46 }
 0x73f   :  { %v1687_v27 = vpack.c.b16 %v1597_v54, %v1596_v26  ;;  %v860_v35 = vpop.f32.mrf.mxu0  ;;  %v3668_v54 = vperm.slane %v3664_v0, %v8318_v56  ;;  %v8346_v0 = vadd.f32 %v7852_v63, %v8044_v23 }
 0x740   :  { %v861_v12 = vadd.f32 %v8161_v30, %v860_v35 }
 0x741   :  { %2051 = vmatmul.bf16.gmra.mxu1 %v1687_v27  ;;  %2380 = vmatmul.bf16.gmra.mxu2 %v1687_v27  ;;  %v8330_v51 = vpop.permute.xlu2 %5015 }
 0x742   :  { %v1065_v46 = vmax.f32 %v861_v12, 0.0  ;;  %v2793_v12 = vpop.f32.mrf.mxu3 }
 0x743   :  { %v3593_v29 = vpop.xlane.xlu1 %3592 }
 0x744   :  { %7403 = vrcp.f32 %v3593_v29  ;;  %v2044_v17 = vpop.f32.mrf.mxu1  ;;  %v1193_v7 = vpack.c.bf16 %v1065_v46, %v1065_v46  ;;  %v6928_v27 = vpack.c.bf16 %v1065_v46, %v1064_v47 }
 0x745   :  { %v2045_v45 = vadd.f32 %v2044_v17, %v7731_v59  ;;  %v3860_v17 = vpop.permute.xlu0 %3859 }
 0x746   :  { %7092 = vst [vmem:[#allocation9 + $0x130] sm:$0xff] %v6928_v27  }
 0x747   :  { %v2551_v26 = vpack.c.bf16 %v2045_v45, %v2043_v24  ;;  %v8342_v45 = vadd.f32 %v7843_v44, %v8044_v23 }
 0x749   :  { %2827 = vmatmul.bf16.gmra.mxu3 %v2551_v26 }
 0x74a   :  { %v7404_v52 = vpop.eup %7403 }
 0x74b   :  { %v8309_v25 = vmul.f32 %v7404_v52, %v8232_v37  ;;  %v8320_v37 = vpop.f32.mrf.mxu2 }
 0x74c   :  { %9992 = vst [vmem:[#allocation33_spill] sm:$0xff] %v8320_v37 }
 0x74d   :  { %v3669_v50 = vrot.slane %v8309_v25, 4  ;;  %v8315_v29 = vperm.slane %v8309_v25, 0 }
 0x74f   :  { %3920 = vperm.xlu0 %7180, %v8315_v29   ;;  %3914 = vperm.xlu2 %7179, %v8315_v29   ;;  %v3670_v53 = vsel %vm3663_vm3, %v3669_v50, %v7993_v1  ;;  %v1598_v1 = vunpack.c.l.b16 %v1192_v48  ;;  %v1599_v50 = vunpack.c.l.b16 %v1193_v7 }
 0x750   :  { %v3674_v58 = vperm.slane %v3670_v53, %v8318_v56  ;;  %v863_v53 = vpop.f32.mrf.mxu0 }
 0x751   :  { %v864_v35 = vadd.f32 %v8161_v30, %v863_v53  ;;  %v1688_v47 = vpack.c.b16 %v1599_v50, %v1598_v1 }
 0x752   :  { %v3687_v52 = vrot.slane %v3674_v58, 4 }
 0x753   :  { %v8338_v24 = vpop.f32.mrf.mxu2  ;;  %2056 = vmatmul.bf16.gmra.mxu1 %v1688_v47  ;;  %2385 = vmatmul.bf16.gmra.mxu2 %v1688_v47  ;;  %v1066_v46 = vmax.f32 %v864_v35, 0.0  ;;  %v2244_v35 = vadd.f32 %v7863_v20, %v8044_v23 }
 0x754   :  { %v8334_v31 = vsel %vm3663_vm3, %v3687_v52, %v3668_v54  ;;  %9994 = vst [vmem:[#allocation35_spill] sm:$0xff] %v8338_v24  ;;  %v8348_v26 = vpop.xlane.xlu2 %3505  ;;  %v8353_v54 = vadd.f32 %v7859_v13, %v8044_v23  ;;  %v4556_v52 = vmul.f32 %v3860_v17, %v8342_v45 }
 0x755   :  { %9993 = vst [vmem:[#allocation34_spill] sm:$0xff] %v8334_v31  ;;  %v1194_v27 = vpack.c.bf16 %v1066_v46, %v1066_v46 }
 0x756   :  { %v4558_v63 = vmul.f32 %v8279_v40, %v8353_v54 }
 0x757   :  { %7185 = vset.pattern.permute.xlu0 %v7971_v41  ;;  %7182 = vset.pattern.permute.xlu2 %v8009_v22  ;;  %v1600_v40 = vunpack.c.l.b16 %v1194_v27 }
 0x758   :  { %v865_v7 = vpop.f32.mrf.mxu0 }
 0x759   :  { %v866_v17 = vadd.f32 %v8161_v30, %v865_v7  ;;  %v9996_v30 = vld [vmem:[#allocation15_spill] sm:$0xff] }
 0x75a   :  { %v2247_v7 = vadd.f32 %v9996_v30, %v8044_v23 }
 0x75b   :  { %v3866_v58 = vpop.permute.xlu1 %3865  ;;  %v8361_v13 = vpop.f32.mrf.mxu2  ;;  %v1067_v53 = vmax.f32 %v866_v17, 0.0 }
 0x75c   :  { %v4557_v44 = vmul.f32 %v3866_v58, %v8346_v0  ;;  %9995 = vst [vmem:[#allocation36_spill] sm:$0xff] %v8361_v13  ;;  %v3596_v50 = vpop.xlane.xlu2 %3595  ;;  %v8373_v13 = vperm.slane %v8309_v25, 1  ;;  %v4560_v27 = vmul.f32 %v8287_v61, %v2247_v7  ;;  %v3890_v25 = vpop.permute.xlu0 %3889  ;;  %v9998_v61 = vld [vmem:[#allocation16_spill] sm:$0xff] }
 0x75d   :  { %v1195_v58 = vpack.c.bf16 %v1067_v53, %v1067_v53  ;;  %7405 = vrcp.f32 %v3596_v50  ;;  %v6933_v47 = vpack.c.bf16 %v1067_v53, %v1066_v46 }
 0x75e   :  { %v4694_v48 = vadd.f32 %v4557_v44, %v4556_v52  ;;  %v2795_v52 = vpop.f32.mrf.mxu3 }
 0x75f   :  { %3950 = vperm.xlu0 %7185, %v8315_v29   ;;  %3932 = vperm.xlu2 %7182, %v8315_v29   ;;  %v1601_v44 = vunpack.c.l.b16 %v1195_v58  ;;  %7093 = vst [vmem:[#allocation9 + $0x138] sm:$0xff] %v6933_v47  }
 0x760   :  { %v4695_v1 = vadd.f32 %v4694_v48, %v4558_v63 }
 0x761   :  { %v1689_v48 = vpack.c.b16 %v1601_v44, %v1600_v40 }
 0x763   :  { %v8370_v31 = vpop.f32.mrf.mxu2  ;;  %2061 = vmatmul.bf16.gmra.mxu1 %v1689_v48  ;;  %2390 = vmatmul.bf16.gmra.mxu2 %v1689_v48  ;;  %v7406_v46 = vpop.eup %7405 }
 0x764   :  { %9997 = vst [vmem:[#allocation15_spill] sm:$0xff] %v8370_v31  ;;  %v8379_v53 = vmul.f32 %v7406_v46, %v8254_v39 }
 0x766   :  { %v2798_v40 = vpop.f32.mrf.mxu3  ;;  %v8382_v58 = vperm.slane %v8379_v53, 0 }
 0x767   :  { %7190 = vset.pattern.permute.xlu0 %v8009_v22  ;;  %7184 = vset.pattern.permute.xlu2 %v7962_v32 }
 0x76b   :  { %v3878_v63 = vpop.permute.xlu1 %3877 }
 0x76c   :  { %v4559_v17 = vmul.f32 %v3878_v63, %v2244_v35 }
 0x76e   :  { %v4696_v50 = vadd.f32 %v4695_v1, %v4559_v17  ;;  %3197 = vxpose.xlu1.b32.start [1/8] (short) (narrow) %v2793_v12, 8  ;;  %v2249_v12 = vadd.f32 %v9998_v61, %v8044_v23  ;;  %v9999_v1 = vld [vmem:[#allocation17_spill] sm:$0xff]  ;;  %v2800_v30 = vpop.f32.mrf.mxu3 }
 0x76f   :  { %5052 = vperm.xlu0 %7190, %v8373_v13   ;;  %3944 = vperm.xlu2 %7184, %v8315_v29   ;;  %v2252_v47 = vadd.f32 %v9999_v1, %v8044_v23 }
 0x770   :  { %v4697_v20 = vadd.f32 %v4696_v50, %v4560_v27  ;;  %v4561_v44 = vmul.f32 %v3890_v25, %v2249_v12  ;;  %v4992_v27 = vpop.permute.xlu0 %4991 }
 0x771   :  { %v5678_v25 = vmul.f32 %v4992_v27, %v8353_v54 }
 0x772   :  { %v4698_v48 = vadd.f32 %v4697_v20, %v4561_v44  ;;  %v5677_v20 = vmul.f32 %v8300_v36, %v8346_v0 }
 0x776   :  { %3198 = vxpose.xlu1.b32.cont [2/8] (short) (narrow) %v2795_v52, 8  ;;  %v8393_v52 = vperm.slane %v8379_v53, 1  ;;  %v2803_v46 = vpop.f32.mrf.mxu3 }
 0x777   :  { %7187 = vset.pattern.permute.xlu2 %v7891_v3  ;;  %3981 = vperm.xlu0 %7190, %v8382_v58  }
 0x77b   :  { %v3896_v63 = vpop.permute.xlu1 %3895 }
 0x77c   :  { %v4562_v39 = vmul.f32 %v3896_v63, %v2252_v47 }
 0x77e   :  { %v4699_v17 = vadd.f32 %v4698_v48, %v4562_v39  ;;  %3199 = vxpose.xlu1.b32.cont [3/8] (short) (narrow) %v2798_v40, 8  ;;  %v2805_v44 = vpop.f32.mrf.mxu3  ;;  %v10000_v48 = vld [vmem:[#allocation18_spill] sm:$0xff] }
 0x77f   :  { %5034 = vperm.xlu2 %7187, %v8373_v13   ;;  %7202 = vset.pattern.permute.xlu0 %v7891_v3 }
 0x786   :  { %3200 = vxpose.xlu1.b32.cont [4/8] (short) (narrow) %v2800_v30, 8  ;;  %v2808_v63 = vpop.f32.mrf.mxu3  ;;  %v2254_v30 = vadd.f32 %v10000_v48, %v8044_v23 }
 0x787   :  { %7189 = vset.pattern.permute.xlu2 %v7922_v4  ;;  %5083 = vperm.xlu0 %7202, %v8393_v52  }
 0x78b   :  { %v4980_v50 = vpop.permute.xlu1 %4979 }
 0x78c   :  { %v5676_v40 = vmul.f32 %v4980_v50, %v8342_v45  ;;  %v5680_v45 = vmul.f32 %v8306_v21, %v2247_v7 }
 0x78e   :  { %v5814_v61 = vadd.f32 %v5677_v20, %v5676_v40  ;;  %3201 = vxpose.xlu1.b32.cont [5/8] (short) (narrow) %v2803_v46, 8  ;;  %v4563_v46 = vmul.f32 %v8293_v15, %v2254_v30  ;;  %v2810_v27 = vpop.f32.mrf.mxu3 }
 0x78f   :  { %5046 = vperm.xlu2 %7189, %v8373_v13   ;;  %7207 = vset.pattern.permute.xlu0 %v7962_v32 }
 0x790   :  { %v5815_v1 = vadd.f32 %v5814_v61, %v5678_v25  ;;  %v4700_v50 = vadd.f32 %v4699_v17, %v4563_v46  ;;  %v5022_v61 = vpop.permute.xlu0 %5021 }
 0x792   :  { %v4701_v20 = vrot.slane %v4700_v50, 4 }
 0x794   :  { %v4702_v21 = vadd.f32 %v4701_v20, %v4700_v50 }
 0x796   :  { %3202 = vxpose.xlu1.b32.cont [6/8] (short) (narrow) %v2805_v44, 8  ;;  %v5683_v44 = vmul.f32 %v5022_v61, %v2254_v30 }
 0x797   :  { %7192 = vset.pattern.permute.xlu2 %v7962_v32  ;;  %5113 = vperm.xlu0 %7207, %v8393_v52  }
 0x79b   :  { %v4998_v39 = vpop.permute.xlu1 %4997 }
 0x79c   :  { %v5679_v36 = vmul.f32 %v4998_v39, %v2244_v35  ;;  %v5682_v35 = vmul.f32 %v8330_v51, %v2252_v47  ;;  %v4703_v39 = vrot.slane %v4702_v21, 2 }
 0x79e   :  { %v5816_v0 = vadd.f32 %v5815_v1, %v5679_v36  ;;  %3203 = vxpose.xlu1.b32.cont [7/8] (short) (narrow) %v2808_v63, 8  ;;  %v3540_v1 = vsub.f32 %v8247_v19, %v8348_v26  ;;  %v4704_v17 = vadd.f32 %v4703_v39, %v4702_v21 }
 0x79f   :  { %5064 = vperm.xlu2 %7192, %v8373_v13  }
 0x7a0   :  { %v5817_v54 = vadd.f32 %v5816_v0, %v5680_v45  ;;  %v3562_v45 = vmul.f32 1.442695, %v3540_v1  ;;  %v2813_v0 = vpop.f32.mrf.mxu3 }
 0x7a2   :  { %7407 = vpow2.f32 %v3562_v45 }
 0x7a6   :  { %3204 = vxpose.xlu1.b32.end [8/8] (short) (narrow) %v2810_v27, 8  ;;  %v4705_v27 = vrot.slane %v4704_v17, 1 }
 0x7a8   :  { %v8413_v47 = vpop.eup %7407  ;;  %v4706_v50 = vadd.f32 %v4705_v27, %v4704_v17 }
 0x7a9   :  { %v3600_v26 = vsel %vm3485_vm0, %v8413_v47, 0.0 }
 0x7ab   :  { %v5010_v40 = vpop.permute.xlu1 %5009 }
 0x7ac   :  { %v5681_v25 = vmul.f32 %v5010_v40, %v2249_v12  ;;  %v2047_v12 = vpop.f32.mrf.mxu1 }
 0x7ad   :  { %v2048_v20 = vadd.f32 %v2047_v12, %v7731_v59 }
 0x7ae   :  { %v5818_v7 = vadd.f32 %v5817_v54, %v5681_v25  ;;  %v2815_v54 = vpop.f32.mrf.mxu3 }
 0x7b0   :  { %v5819_v63 = vadd.f32 %v5818_v7, %v5682_v35 }
 0x7b2   :  { %v5820_v36 = vadd.f32 %v5819_v63, %v5683_v44 }
 0x7b4   :  { %v5821_v15 = vrot.slane %v5820_v36, 4  ;;  %v2049_v25 = vpop.f32.mrf.mxu1 }
 0x7b5   :  { %v2050_v61 = vadd.f32 %v2049_v25, %v7731_v59  ;;  %v6680_v25 = vld [vmem:[#allocation2 + $0x148] sm:$0xff] }
 0x7b6   :  { %v5822_v48 = vadd.f32 %v5821_v15, %v5820_v36  ;;  %v2818_v21 = vpop.f32.mrf.mxu3 }
 0x7b7   :  { %v2552_v35 = vpack.c.bf16 %v2050_v61, %v2048_v20  ;;  %v6679_v20 = vld [vmem:[#allocation2 + $0x140] sm:$0xff]  ;;  %v6681_v61 = vld [vmem:[#allocation2 + $0x150] sm:$0xff] }
 0x7b8   :  { %v5823_v46 = vrot.slane %v5822_v48, 2  ;;  %867 = vmatmul.bf16.gmra.mxu0 %v6679_v20  ;;  %v8466_v20 = vpop.f32.mrf.mxu2 }
 0x7b9   :  { %2832 = vmatmul.bf16.gmra.mxu3 %v2552_v35  ;;  %v6682_v35 = vld [vmem:[#allocation2 + $0x158] sm:$0xff] }
 0x7ba   :  { %v5824_v40 = vadd.f32 %v5823_v46, %v5822_v48 }
 0x7bc   :  { %v5825_v51 = vrot.slane %v5824_v40, 1 }
 0x7be   :  { %v5826_v19 = vadd.f32 %v5825_v51, %v5824_v40  ;;  %v2052_v7 = vpop.f32.mrf.mxu1  ;;  %v2820_v44 = vpop.f32.mrf.mxu3 }
 0x7bf   :  { %v2053_v1 = vadd.f32 %v2052_v7, %v7731_v59 }
 0x7c0   :  { %v8418_v30 = vsel %vm5996_vm1, %v4706_v50, %v5826_v19 }
 0x7c1   :  { %3601 = vadd.xlane.f32.xlu0 %v3600_v26 }
 0x7c5   :  { %3229 = vxpose.xlu2.b32.start [1/8] (short) (narrow) %v2813_v0, 8 }
 0x7c6   :  { %v2054_v63 = vpop.f32.mrf.mxu1  ;;  %v2823_v15 = vpop.f32.mrf.mxu3 }
 0x7c7   :  { %v2055_v39 = vadd.f32 %v2054_v63, %v7731_v59 }
 0x7c8   :  { %872 = vmatmul.bf16.gmra.mxu0 %v6680_v25 }
 0x7c9   :  { %v2553_v36 = vpack.c.bf16 %v2055_v39, %v2053_v1  ;;  %v8447_v39 = vpop.xlane.xlu0 %6032 }
 0x7ca   :  { %10001 = vst [vmem:[#allocation16_spill] sm:$0xff] %v8447_v39 }
 0x7cb   :  { %2837 = vmatmul.bf16.gmra.mxu3 %v2553_v36  ;;  %v3915_v36 = vpop.permute.xlu2 %3914 }
 0x7cd   :  { %3230 = vxpose.xlu2.b32.cont [2/8] (short) (narrow) %v2815_v54, 8 }
 0x7ce   :  { %v2825_v12 = vpop.f32.mrf.mxu3 }
 0x7d0   :  { %v2057_v45 = vpop.f32.mrf.mxu1 }
 0x7d1   :  { %v2058_v17 = vadd.f32 %v2057_v45, %v7731_v59  ;;  %v10002_v45 = vld [vmem:[#allocation19_spill] sm:$0xff] }
 0x7d5   :  { %3231 = vxpose.xlu2.b32.cont [3/8] (short) (narrow) %v2818_v21, 8 }
 0x7d6   :  { %v2828_v40 = vpop.f32.mrf.mxu3 }
 0x7d8   :  { %v2059_v0 = vpop.f32.mrf.mxu1  ;;  %877 = vmatmul.bf16.gmra.mxu0 %v6681_v61  ;;  %v8469_v61 = vld [vmem:[#allocation5] ss:$0 sm:$0xff] }
 0x7d9   :  { %v2060_v48 = vadd.f32 %v2059_v0, %v7731_v59 }
 0x7db   :  { %v2554_v46 = vpack.c.bf16 %v2060_v48, %v2058_v17  ;;  %v3921_v48 = vpop.permute.xlu0 %3920 }
 0x7dd   :  { %3232 = vxpose.xlu2.b32.cont [4/8] (short) (narrow) %v2820_v44, 8  ;;  %2842 = vmatmul.bf16.gmra.mxu3 %v2554_v46 }
 0x7de   :  { %v2830_v26 = vpop.f32.mrf.mxu3 }
 0x7e0   :  { %v2062_v27 = vpop.f32.mrf.mxu1 }
 0x7e1   :  { %v2063_v51 = vadd.f32 %v2062_v27, %v7731_v59 }
 0x7e3   :  { %v3951_v31 = vpop.permute.xlu0 %3950 }
 0x7e5   :  { %3233 = vxpose.xlu2.b32.cont [5/8] (short) (narrow) %v2823_v15, 8  ;;  %v8452_v15 = vadd.f32 %v10002_v45, %v8044_v23  ;;  %v10006_v45 = vld [vmem:[#allocation23_spill] sm:$0xff] }
 0x7e8   :  { %v2064_v54 = vpop.f32.mrf.mxu1  ;;  %882 = vmatmul.bf16.gmra.mxu0 %v6682_v35 }
 0x7e9   :  { %v2065_v50 = vadd.f32 %v2064_v54, %v7731_v59 }
 0x7eb   :  { %v2555_v19 = vpack.c.bf16 %v2065_v50, %v2063_v51 }
 0x7ed   :  { %3234 = vxpose.xlu2.b32.cont [6/8] (short) (narrow) %v2825_v12, 8  ;;  %2847 = vmatmul.bf16.gmra.mxu3 %v2555_v19  ;;  %v10004_v12 = vld [vmem:[#allocation21_spill] sm:$0xff] }
 0x7ee   :  { %v8460_v27 = vadd.f32 %v10004_v12, %v8044_v23  ;;  %v8483_v12 = vpop.f32.mrf.mxu2 }
 0x7ef   :  { %10007 = vst [vmem:[#allocation17_spill] sm:$0xff] %v8483_v12 }
 0x7f0   :  { %v4566_v54 = vmul.f32 %v3921_v48, %v8460_v27 }
 0x7f5   :  { %3235 = vxpose.xlu2.b32.cont [7/8] (short) (narrow) %v2828_v40, 8 }
 0x7f9   :  { %7178 = vset.pattern.permute.xlu1 %v7888_v2 }
 0x7fd   :  { %3236 = vxpose.xlu2.b32.end [8/8] (short) (narrow) %v2830_v26, 8 }
 0x801   :  { %3908 = vperm.xlu1 %7178, %v8315_v29  }
 0x809   :  { %7181 = vset.pattern.permute.xlu1 %v7922_v4 }
 0x811   :  { %3926 = vperm.xlu1 %7181, %v8315_v29  }
 0x812   :  { %v8444_v44 = vpop.trf.xlu1 }
 0x819   :  { %7183 = vset.pattern.permute.xlu1 %v7931_v60 }
 0x821   :  { %3938 = vperm.xlu1 %7183, %v8315_v29  }
 0x829   :  { %7186 = vset.pattern.permute.xlu1 %v7888_v2 }
 0x831   :  { %5028 = vperm.xlu1 %7186, %v8373_v13  }
 0x835   :  { %v868_v25 = vpop.f32.mrf.mxu0 }
 0x836   :  { %v869_v35 = vadd.f32 %v8469_v61, %v868_v25 }
 0x838   :  { %v1068_v48 = vmax.f32 %v869_v35, 0.0 }
 0x839   :  { %7188 = vset.pattern.permute.xlu1 %v7945_v10 }
 0x83c   :  { %v2833_v21 = vpop.f32.mrf.mxu3 }
 0x83d   :  { %3261 = vxpose.xlu0.b32.start [1/8] (short) (narrow) %v2833_v21, 8  ;;  %v3539_v21 = vsub.f32 %v8194_v8, %v8295_v43 }
 0x841   :  { %5040 = vperm.xlu1 %7188, %v8373_v13  }
 0x844   :  { %v2835_v7 = vpop.f32.mrf.mxu3 }
 0x845   :  { %3262 = vxpose.xlu0.b32.cont [2/8] (short) (narrow) %v2835_v7, 8  ;;  %v10005_v7 = vld [vmem:[#allocation22_spill] sm:$0xff] }
 0x849   :  { %7191 = vset.pattern.permute.xlu1 %v7931_v60 }
 0x84e   :  { %v2838_v29 = vpop.f32.mrf.mxu3 }
 0x84f   :  { %3263 = vxpose.xlu0.b32.cont [3/8] (short) (narrow) %v2838_v29, 8  ;;  %v8476_v29 = vadd.f32 %v10005_v7, %v8044_v23 }
 0x851   :  { %5058 = vperm.xlu1 %7191, %v8373_v13  }
 0x856   :  { %v2840_v1 = vpop.f32.mrf.mxu3 }
 0x857   :  { %3264 = vxpose.xlu0.b32.cont [4/8] (short) (narrow) %v2840_v1, 8 }
 0x859   :  { %7193 = vset.pattern.permute.xlu1 %v7971_v41 }
 0x85f   :  { %7195 = vset.pattern.permute.xlu2 %v7891_v3 }
 0x860   :  { %v2843_v63 = vpop.f32.mrf.mxu3 }
 0x861   :  { %5070 = vperm.xlu1 %7193, %v8373_v13   ;;  %3265 = vxpose.xlu0.b32.cont [5/8] (short) (narrow) %v2843_v63, 8  ;;  %v10003_v13 = vld [vmem:[#allocation20_spill] sm:$0xff]  ;;  %v3933_v63 = vpop.permute.xlu2 %3932 }
 0x862   :  { %v8456_v17 = vadd.f32 %v10003_v13, %v8044_v23  ;;  %v8480_v13 = vadd.f32 %v10006_v45, %v8044_v23 }
 0x864   :  { %v4565_v40 = vmul.f32 %v3915_v36, %v8456_v17  ;;  %v4568_v8 = vmul.f32 %v3933_v63, %v8480_v13 }
 0x867   :  { %3963 = vperm.xlu2 %7195, %v8382_v58  }
 0x868   :  { %v2845_v0 = vpop.f32.mrf.mxu3 }
 0x869   :  { %7194 = vset.pattern.permute.xlu1 %v7888_v2  ;;  %3266 = vxpose.xlu0.b32.cont [6/8] (short) (narrow) %v2845_v0, 8 }
 0x86f   :  { %7197 = vset.pattern.permute.xlu2 %v7922_v4 }
 0x870   :  { %v2848_v26 = vpop.f32.mrf.mxu3 }
 0x871   :  { %3267 = vxpose.xlu0.b32.cont [7/8] (short) (narrow) %v2848_v26, 8 }
 0x873   :  { %v3909_v46 = vpop.permute.xlu1 %3908 }
 0x874   :  { %v4564_v51 = vmul.f32 %v3909_v46, %v8452_v15  ;;  %v3560_v46 = vmul.f32 1.442695, %v3539_v21 }
 0x876   :  { %v4707_v50 = vadd.f32 %v4565_v40, %v4564_v51  ;;  %v870_v40 = vpop.f32.mrf.mxu0  ;;  %v3507_v51 = vsel %vm3485_vm0, %v8444_v44, -inf  ;;  %7409 = vpow2.f32 %v3560_v46 }
 0x877   :  { %3975 = vperm.xlu2 %7197, %v8382_v58   ;;  %v871_v26 = vadd.f32 %v8469_v61, %v870_v40 }
 0x878   :  { %v4708_v19 = vadd.f32 %v4707_v50, %v4566_v54  ;;  %v2850_v1 = vpop.f32.mrf.mxu3  ;;  %v1196_v50 = vpack.c.bf16 %v1068_v48, %v1068_v48 }
 0x879   :  { %3268 = vxpose.xlu0.b32.end [8/8] (short) (narrow) %v2850_v1, 8  ;;  %v1069_v25 = vmax.f32 %v871_v26, 0.0 }
 0x87a   :  { %v1602_v35 = vunpack.c.l.b16 %v1196_v50 }
 0x87b   :  { %v1197_v21 = vpack.c.bf16 %v1069_v25, %v1069_v25  ;;  %v6938_v7 = vpack.c.bf16 %v1069_v25, %v1068_v48  ;;  %v3945_v48 = vpop.permute.xlu2 %3944 }
 0x87c   :  { %v8490_v63 = vpop.eup %7409 }
 0x87d   :  { %7094 = vst [vmem:[#allocation9 + $0x140] sm:$0xff] %v6938_v7   ;;  %v1603_v1 = vunpack.c.l.b16 %v1197_v21  ;;  %v8511_v7 = vld [vmem:[%s9966_s6] sm:$0x3] }
 0x87f   :  { %7199 = vset.pattern.permute.xlu2 %v7962_v32 }
 0x883   :  { %v3927_v36 = vpop.permute.xlu1 %3926 }
 0x884   :  { %v4567_v0 = vmul.f32 %v3927_v36, %v8476_v29  ;;  %v8493_v36 = vpop.f32.mrf.mxu2 }
 0x886   :  { %v4709_v43 = vadd.f32 %v4708_v19, %v4567_v0  ;;  %v873_v19 = vpop.f32.mrf.mxu0  ;;  %v1690_v0 = vpack.c.b16 %v1603_v1, %v1602_v35  ;;  %v6015_v1 = vmul.f32 %v8511_v7, %v8274_v11 }
 0x887   :  { %3993 = vperm.xlu2 %7199, %v8382_v58   ;;  %v874_v45 = vadd.f32 %v8469_v61, %v873_v19 }
 0x888   :  { %v4710_v54 = vadd.f32 %v4709_v43, %v4568_v8  ;;  %v10008_v8 = vld [vmem:[#allocation24_spill] sm:$0xff]  ;;  %v3597_v43 = vsel %vm3485_vm0, %v8490_v63, 0.0  ;;  %2066 = vmatmul.bf16.gmra.mxu1 %v1690_v0  ;;  %2395 = vmatmul.bf16.gmra.mxu2 %v1690_v0 }
 0x889   :  { %v8498_v46 = vadd.f32 %v10008_v8, %v8044_v23  ;;  %v1070_v25 = vmax.f32 %v874_v45, 0.0 }
 0x88b   :  { %3508 = vmax.xlane.f32.xlu1 %v3507_v51  ;;  %v10009_v51 = vld [vmem:[#allocation25_spill] sm:$0xff]  ;;  %v1198_v8 = vpack.c.bf16 %v1070_v25, %v1070_v25 }
 0x88c   :  { %v8504_v50 = vadd.f32 %v10009_v51, %v8044_v23  ;;  %v8519_v45 = vpop.f32.mrf.mxu2 }
 0x88d   :  { %10010 = vst [vmem:[#allocation18_spill] sm:$0xff] %v8519_v45 }
 0x88e   :  { %v4570_v35 = vmul.f32 %v3945_v48, %v8504_v50  ;;  %v875_v19 = vpop.f32.mrf.mxu0 }
 0x88f   :  { %7201 = vset.pattern.permute.xlu2 %v7888_v2 }
 0x893   :  { %3598 = vadd.xlane.f32.xlu1 %v3597_v43  ;;  %v3939_v40 = vpop.permute.xlu1 %3938  ;;  %v876_v43 = vadd.f32 %v8469_v61, %v875_v19 }
 0x894   :  { %v4569_v26 = vmul.f32 %v3939_v40, %v8498_v46  ;;  %v1604_v40 = vunpack.c.l.b16 %v1198_v8  ;;  %v8524_v19 = vpop.f32.mrf.mxu2 }
 0x895   :  { %v1071_v48 = vmax.f32 %v876_v43, 0.0  ;;  %10011 = vst [vmem:[#allocation19_spill] sm:$0xff] %v8524_v19 }
 0x896   :  { %v4711_v21 = vadd.f32 %v4710_v54, %v4569_v26  ;;  %v6034_v54 = vsel %vm6030_vm2, %v6015_v1, 0.0  ;;  %v878_v11 = vpop.f32.mrf.mxu0 }
 0x897   :  { %5077 = vperm.xlu2 %7201, %v8393_v52   ;;  %v1199_v51 = vpack.c.bf16 %v1071_v48, %v1071_v48  ;;  %v6943_v26 = vpack.c.bf16 %v1071_v48, %v1070_v25 }
 0x898   :  { %v8516_v0 = vadd.f32 %v4711_v21, %v4570_v35  ;;  %v879_v35 = vadd.f32 %v8469_v61, %v878_v11 }
 0x899   :  { %7095 = vst [vmem:[#allocation9 + $0x148] sm:$0xff] %v6943_v26   ;;  %v1605_v39 = vunpack.c.l.b16 %v1199_v51 }
 0x89a   :  { %v1072_v45 = vmax.f32 %v879_v35, 0.0 }
 0x89b   :  { %6035 = vadd.xlane.f32.xlu1 %v6034_v54  ;;  %v1691_v21 = vpack.c.b16 %v1605_v39, %v1604_v40  ;;  %v5035_v54 = vpop.permute.xlu2 %5034 }
 0x89c   :  { %v1200_v43 = vpack.c.bf16 %v1072_v45, %v1072_v45  ;;  %v8528_v11 = vpop.f32.mrf.mxu2 }
 0x89d   :  { %2071 = vmatmul.bf16.gmra.mxu1 %v1691_v21  ;;  %2400 = vmatmul.bf16.gmra.mxu2 %v1691_v21  ;;  %10012 = vst [vmem:[#allocation20_spill] sm:$0xff] %v8528_v11 }
 0x89e   :  { %v880_v1 = vpop.f32.mrf.mxu0  ;;  %v1606_v51 = vunpack.c.l.b16 %v1200_v43 }
 0x89f   :  { %7204 = vset.pattern.permute.xlu2 %v7922_v4  ;;  %v881_v8 = vadd.f32 %v8469_v61, %v880_v1  ;;  %v5685_v1 = vmul.f32 %v5035_v54, %v8456_v17 }
 0x8a1   :  { %v1073_v25 = vmax.f32 %v881_v8, 0.0 }
 0x8a3   :  { %v5029_v48 = vpop.permute.xlu1 %5028  ;;  %v1201_v26 = vpack.c.bf16 %v1073_v25, %v1073_v25  ;;  %v6948_v12 = vpack.c.bf16 %v1073_v25, %v1072_v45  ;;  %v5047_v43 = vpop.permute.xlu2 %5046 }
 0x8a4   :  { %v5684_v35 = vmul.f32 %v5029_v48, %v8452_v15  ;;  %v5687_v11 = vmul.f32 %v5047_v43, %v8476_v29  ;;  %v8538_v48 = vpop.f32.mrf.mxu2 }
 0x8a5   :  { %7096 = vst [vmem:[#allocation9 + $0x150] sm:$0xff] %v6948_v12   ;;  %v1607_v39 = vunpack.c.l.b16 %v1201_v26  ;;  %v5053_v26 = vpop.permute.xlu0 %5052 }
 0x8a6   :  { %v883_v40 = vpop.f32.mrf.mxu0  ;;  %v5827_v45 = vadd.f32 %v5685_v1, %v5684_v35  ;;  %10013 = vst [vmem:[#allocation21_spill] sm:$0xff] %v8538_v48  ;;  %v5688_v17 = vmul.f32 %v5053_v26, %v8480_v13 }
 0x8a7   :  { %5095 = vperm.xlu2 %7204, %v8393_v52   ;;  %v884_v21 = vadd.f32 %v8469_v61, %v883_v40  ;;  %v1692_v19 = vpack.c.b16 %v1607_v39, %v1606_v51 }
 0x8a9   :  { %v1074_v12 = vmax.f32 %v884_v21, 0.0  ;;  %v6683_v21 = vld [vmem:[#allocation2 + $0x160] sm:$0xff] }
 0x8aa   :  { %887 = vmatmul.bf16.gmra.mxu0 %v6683_v21 }
 0x8ab   :  { %v1202_v54 = vpack.c.bf16 %v1074_v12, %v1074_v12 }
 0x8ad   :  { %2076 = vmatmul.bf16.gmra.mxu1 %v1692_v19  ;;  %2405 = vmatmul.bf16.gmra.mxu2 %v1692_v19  ;;  %v1608_v40 = vunpack.c.l.b16 %v1202_v54  ;;  %v6684_v54 = vld [vmem:[#allocation2 + $0x168] sm:$0xff] }
 0x8ae   :  { %v885_v15 = vpop.f32.mrf.mxu0 }
 0x8af   :  { %7206 = vset.pattern.permute.xlu2 %v7931_v60  ;;  %v886_v51 = vadd.f32 %v8469_v61, %v885_v15 }
 0x8b3   :  { %v5041_v8 = vpop.permute.xlu1 %5040 }
 0x8b4   :  { %v5686_v25 = vmul.f32 %v5041_v8, %v8460_v27  ;;  %3957 = vperm.xlu1 %7194, %v8382_v58   ;;  %v1075_v27 = vmax.f32 %v886_v51, 0.0  ;;  %v8544_v8 = vpop.f32.mrf.mxu2 }
 0x8b5   :  { %10014 = vst [vmem:[#allocation22_spill] sm:$0xff] %v8544_v8 }
 0x8b6   :  { %v5828_v24 = vadd.f32 %v5827_v45, %v5686_v25  ;;  %v1203_v35 = vpack.c.bf16 %v1075_v27, %v1075_v27  ;;  %v6953_v1 = vpack.c.bf16 %v1075_v27, %v1074_v12  ;;  %v10015_v45 = vld [vmem:[#allocation26_spill] sm:$0xff] }
 0x8b7   :  { %5107 = vperm.xlu2 %7206, %v8393_v52   ;;  %v2274_v25 = vadd.f32 %v10015_v45, %v8044_v23 }
 0x8b8   :  { %v5829_v19 = vadd.f32 %v5828_v24, %v5687_v11  ;;  %v1609_v29 = vunpack.c.l.b16 %v1203_v35  ;;  %7097 = vst [vmem:[#allocation9 + $0x158] sm:$0xff] %v6953_v1   ;;  %v5065_v24 = vpop.permute.xlu2 %5064 }
 0x8b9   :  { %v5690_v26 = vmul.f32 %v5065_v24, %v8504_v50 }
 0x8ba   :  { %v5830_v39 = vadd.f32 %v5829_v19, %v5688_v17  ;;  %v1693_v43 = vpack.c.b16 %v1609_v29, %v1608_v40  ;;  %v4571_v17 = vmul.f32 %v3951_v31, %v2274_v25  ;;  %892 = vmatmul.bf16.gmra.mxu0 %v6684_v54  ;;  %v6688_v54 = vld [vmem:[#allocation2 + $0x188] sm:$0xff] }
 0x8bc   :  { %7196 = vset.pattern.permute.xlu1 %v7945_v10  ;;  %v4713_v19 = vadd.f32 %v8516_v0, %v4571_v17 }
 0x8bd   :  { %2081 = vmatmul.bf16.gmra.mxu1 %v1693_v43  ;;  %2410 = vmatmul.bf16.gmra.mxu2 %v1693_v43  ;;  %v6685_v43 = vld [vmem:[#allocation2 + $0x170] sm:$0xff] }
 0x8be   :  { %v4714_v51 = vrot.slane %v4713_v19, 4 }
 0x8bf   :  { %7209 = vset.pattern.permute.xlu2 %v7888_v2 }
 0x8c0   :  { %v4715_v27 = vadd.f32 %v4714_v51, %v4713_v19  ;;  %v6687_v19 = vld [vmem:[#allocation2 + $0x180] sm:$0xff] }
 0x8c2   :  { %v4716_v35 = vrot.slane %v4715_v27, 2 }
 0x8c3   :  { %v5059_v13 = vpop.permute.xlu1 %5058 }
 0x8c4   :  { %v5689_v11 = vmul.f32 %v5059_v13, %v8498_v46  ;;  %3969 = vperm.xlu1 %7196, %v8382_v58   ;;  %v4717_v50 = vadd.f32 %v4716_v35, %v4715_v27 }
 0x8c6   :  { %v5831_v15 = vadd.f32 %v5830_v39, %v5689_v11  ;;  %v8554_v39 = vpop.trf.xlu2  ;;  %v4718_v13 = vrot.slane %v4717_v50, 1 }
 0x8c7   :  { %v3510_v0 = vsel %vm3485_vm0, %v8554_v39, -inf }
 0x8c8   :  { %v5832_v12 = vadd.f32 %v5831_v15, %v5690_v26  ;;  %v4719_v45 = vadd.f32 %v4718_v13, %v4717_v50  ;;  %v6016_v26 = vmul.f32 %v8511_v7, %v8418_v30 }
 0x8ca   :  { %897 = vmatmul.bf16.gmra.mxu0 %v6685_v43  ;;  %v6037_v17 = vsel %vm6030_vm2, %v6016_v26, 0.0  ;;  %v8603_v26 = vpop.f32.mrf.mxu2 }
 0x8cb   :  { %10017 = vst [vmem:[#allocation24_spill] sm:$0xff] %v8603_v26 }
 0x8cc   :  { %7198 = vset.pattern.permute.xlu1 %v7931_v60 }
 0x8d3   :  { %v5071_v40 = vpop.permute.xlu1 %5070 }
 0x8d4   :  { %v5691_v46 = vmul.f32 %v5071_v40, %v2274_v25  ;;  %3987 = vperm.xlu1 %7198, %v8382_v58  }
 0x8d6   :  { %v5833_v21 = vadd.f32 %v5832_v12, %v5691_v46  ;;  %v6686_v12 = vld [vmem:[#allocation2 + $0x178] sm:$0xff]  ;;  %v8577_v46 = vpop.permute.xlu0 %3981 }
 0x8d8   :  { %v5834_v29 = vrot.slane %v5833_v21, 4 }
 0x8da   :  { %v5835_v1 = vadd.f32 %v5834_v29, %v5833_v21  ;;  %902 = vmatmul.bf16.gmra.mxu0 %v6686_v12  ;;  %v3964_v12 = vpop.permute.xlu2 %3963 }
 0x8dc   :  { %v5836_v31 = vrot.slane %v5835_v1, 2  ;;  %7200 = vset.pattern.permute.xlu1 %v7971_v41 }
 0x8de   :  { %v5837_v24 = vadd.f32 %v5836_v31, %v5835_v1  ;;  %v8586_v1 = vpop.permute.xlu0 %5083  ;;  %v6689_v31 = vld [vmem:[#allocation2 + $0x190] sm:$0xff] }
 0x8e0   :  { %v5838_v11 = vrot.slane %v5837_v24, 1  ;;  %3511 = vmax.xlane.f32.xlu2 %v3510_v0  ;;  %7210 = vset.pattern.permute.xlu0 %v7891_v3 }
 0x8e2   :  { %v5839_v25 = vadd.f32 %v5838_v11, %v5837_v24 }
 0x8e4   :  { %3999 = vperm.xlu1 %7200, %v8382_v58   ;;  %v8563_v15 = vsel %vm5996_vm1, %v4719_v45, %v5839_v25 }
 0x8e6   :  { %v8592_v43 = vpop.permute.xlu0 %5113 }
 0x8e8   :  { %6038 = vadd.xlane.f32.xlu2 %v6037_v17  ;;  %v6690_v17 = vld [vmem:[#allocation2 + $0x198] sm:$0xff] }
 0x8ea   :  { %907 = vmatmul.bf16.gmra.mxu0 %v6687_v19 }
 0x8ec   :  { %7203 = vset.pattern.permute.xlu1 %v7945_v10 }
 0x8ee   :  { %v3602_v11 = vpop.xlane.xlu0 %3601 }
 0x8f4   :  { %5089 = vperm.xlu1 %7203, %v8393_v52  }
 0x8fa   :  { %912 = vmatmul.bf16.gmra.mxu0 %v6688_v54 }
 0x8fc   :  { %7205 = vset.pattern.permute.xlu1 %v8009_v22 }
 0x8fe   :  { %v8570_v30 = vpop.xlane.xlu1 %3508 }
 0x904   :  { %5101 = vperm.xlu1 %7205, %v8393_v52  }
 0x905   :  { %v2067_v40 = vpop.f32.mrf.mxu1 }
 0x906   :  { %v3599_v58 = vpop.xlane.xlu1 %3598  ;;  %v2068_v21 = vadd.f32 %v2067_v40, %v7731_v59  ;;  %v10018_v40 = vld [vmem:[#allocation27_spill] sm:$0xff] }
 0x907   :  { %7411 = vrcp.f32 %v3599_v58 }
 0x908   :  { %7413 = vrcp.f32 %v3602_v11 }
 0x90a   :  { %917 = vmatmul.bf16.gmra.mxu0 %v6689_v31 }
 0x90c   :  { %7208 = vset.pattern.permute.xlu1 %v7971_v41 }
 0x90d   :  { %v7412_v51 = vpop.eup %7411  ;;  %v2069_v29 = vpop.f32.mrf.mxu1 }
 0x90e   :  { %v8575_v27 = vmul.f32 %v7412_v51, %v8490_v63  ;;  %v2070_v63 = vadd.f32 %v2069_v29, %v7731_v59  ;;  %v7414_v51 = vpop.eup %7413  ;;  %v10019_v29 = vld [vmem:[#allocation28_spill] sm:$0xff] }
 0x90f   :  { %v8621_v31 = vmul.f32 %v7414_v51, %v8413_v47 }
 0x910   :  { %v8580_v35 = vperm.slane %v8575_v27, 0  ;;  %v2556_v50 = vpack.c.bf16 %v2070_v63, %v2068_v21  ;;  %v8607_v54 = vperm.slane %v8575_v27, 1  ;;  %v8611_v21 = vadd.f32 %v10018_v40, %v8044_v23  ;;  %v10022_v40 = vld [vmem:[#allocation30_spill] sm:$0xff] }
 0x911   :  { %v8617_v63 = vadd.f32 %v10019_v29, %v8044_v23 }
 0x912   :  { %4006 = vperm.xlu2 %7209, %v8580_v35   ;;  %4012 = vperm.xlu0 %7210, %v8580_v35  }
 0x913   :  { %2852 = vmatmul.bf16.gmra.mxu3 %v2556_v50  ;;  %v4573_v11 = vmul.f32 %v3964_v12, %v8617_v63 }
 0x914   :  { %5119 = vperm.xlu1 %7208, %v8393_v52   ;;  %v8597_v52 = vpop.xlane.xlu1 %6035 }
 0x915   :  { %10016 = vst [vmem:[#allocation23_spill] sm:$0xff] %v8597_v52  ;;  %v8638_v52 = vperm.slane %v8621_v31, 0 }
 0x91a   :  { %7212 = vset.pattern.permute.xlu2 %v7922_v4  ;;  %7215 = vset.pattern.permute.xlu0 %v7962_v32  ;;  %v2072_v0 = vpop.f32.mrf.mxu1 }
 0x91b   :  { %v2073_v24 = vadd.f32 %v2072_v0, %v7731_v59  ;;  %922 = vmatmul.bf16.gmra.mxu0 %v6690_v17  ;;  %v10020_v0 = vld [vmem:[#allocation29_spill] sm:$0xff] }
 0x91c   :  { %7211 = vset.pattern.permute.xlu1 %v7945_v10 }
 0x922   :  { %4024 = vperm.xlu2 %7212, %v8580_v35   ;;  %4042 = vperm.xlu0 %7215, %v8580_v35   ;;  %v2074_v13 = vpop.f32.mrf.mxu1 }
 0x923   :  { %v2075_v45 = vadd.f32 %v2074_v13, %v7731_v59  ;;  %v8628_v13 = vpop.f32.mrf.mxu2 }
 0x924   :  { %4018 = vperm.xlu1 %7211, %v8580_v35   ;;  %10021 = vst [vmem:[#allocation25_spill] sm:$0xff] %v8628_v13  ;;  %v10023_v13 = vld [vmem:[#allocation31_spill] sm:$0xff] }
 0x925   :  { %v2557_v25 = vpack.c.bf16 %v2075_v45, %v2073_v24  ;;  %v8626_v24 = vadd.f32 %v10020_v0, %v8044_v23  ;;  %v3976_v45 = vpop.permute.xlu2 %3975  ;;  %v8643_v12 = vadd.f32 %v10023_v13, %v8044_v23 }
 0x926   :  { %v3958_v19 = vpop.permute.xlu1 %3957 }
 0x927   :  { %2857 = vmatmul.bf16.gmra.mxu3 %v2557_v25  ;;  %v4572_v50 = vmul.f32 %v3958_v19, %v8611_v21  ;;  %v8634_v19 = vadd.f32 %v10022_v40, %v8044_v23  ;;  %v888_v40 = vpop.f32.mrf.mxu0 }
 0x929   :  { %v4720_v47 = vadd.f32 %v4573_v11, %v4572_v50  ;;  %v4575_v26 = vmul.f32 %v3976_v45, %v8634_v19  ;;  %v4576_v11 = vmul.f32 %v8577_v46, %v8643_v12  ;;  %v889_v45 = vadd.f32 %v8469_v61, %v888_v40 }
 0x92a   :  { %7214 = vset.pattern.permute.xlu2 %v7931_v60  ;;  %7220 = vset.pattern.permute.xlu0 %v7922_v4  ;;  %v2077_v58 = vpop.f32.mrf.mxu1  ;;  %v8659_v46 = vadd.f32 %v8107_v57, %v8044_v23 }
 0x92b   :  { %v2078_v17 = vadd.f32 %v2077_v58, %v7731_v59  ;;  %v8651_v13 = vpop.f32.mrf.mxu2 }
 0x92c   :  { %7213 = vset.pattern.permute.xlu1 %v8009_v22  ;;  %10024 = vst [vmem:[#allocation26_spill] sm:$0xff] %v8651_v13  ;;  %v8669_v13 = vperm.slane %v8621_v31, 1 }
 0x932   :  { %4036 = vperm.xlu2 %7214, %v8580_v35   ;;  %5144 = vperm.xlu0 %7220, %v8607_v54   ;;  %v2079_v29 = vpop.f32.mrf.mxu1 }
 0x933   :  { %v2080_v0 = vadd.f32 %v2079_v29, %v7731_v59  ;;  %v8673_v33 = vpop.f32.mrf.mxu2 }
 0x934   :  { %4030 = vperm.xlu1 %7213, %v8580_v35  }
 0x935   :  { %v2558_v50 = vpack.c.bf16 %v2080_v0, %v2078_v17  ;;  %v890_v17 = vpop.f32.mrf.mxu0  ;;  %v8664_v0 = vadd.f32 %v8114_v55, %v8044_v23 }
 0x936   :  { %v3970_v25 = vpop.permute.xlu1 %3969 }
 0x937   :  { %v4574_v51 = vmul.f32 %v3970_v25, %v8626_v24  ;;  %2862 = vmatmul.bf16.gmra.mxu3 %v2558_v50 }
 0x939   :  { %v4721_v58 = vadd.f32 %v4720_v47, %v4574_v51  ;;  %v1076_v47 = vmax.f32 %v889_v45, 0.0  ;;  %v891_v51 = vadd.f32 %v8469_v61, %v890_v17 }
 0x93a   :  { %7217 = vset.pattern.permute.xlu2 %v7888_v2  ;;  %4073 = vperm.xlu0 %7220, %v8638_v52   ;;  %v2082_v8 = vpop.f32.mrf.mxu1 }
 0x93b   :  { %v4722_v25 = vadd.f32 %v4721_v58, %v4575_v26  ;;  %v3994_v26 = vpop.permute.xlu2 %3993  ;;  %v2083_v50 = vadd.f32 %v2082_v8, %v7731_v59 }
 0x93c   :  { %7216 = vset.pattern.permute.xlu1 %v7971_v41  ;;  %v4578_v57 = vmul.f32 %v3994_v26, %v8664_v0 }
 0x93d   :  { %v4723_v29 = vadd.f32 %v4722_v25, %v4576_v11  ;;  %v1204_v25 = vpack.c.bf16 %v1076_v47, %v1076_v47  ;;  %v893_v26 = vpop.f32.mrf.mxu0 }
 0x93f   :  { %v1610_v48 = vunpack.c.l.b16 %v1204_v25  ;;  %v8683_v25 = vpop.f32.mrf.mxu2 }
 0x940   :  { %10025 = vst [vmem:[#allocation27_spill] sm:$0xff] %v8683_v25 }
 0x942   :  { %5126 = vperm.xlu2 %7217, %v8607_v54   ;;  %7232 = vset.pattern.permute.xlu0 %v7888_v2  ;;  %v2084_v40 = vpop.f32.mrf.mxu1 }
 0x943   :  { %v2085_v45 = vadd.f32 %v2084_v40, %v7731_v59 }
 0x944   :  { %4048 = vperm.xlu1 %7216, %v8580_v35   ;;  %v1077_v35 = vmax.f32 %v891_v51, 0.0 }
 0x945   :  { %v2559_v8 = vpack.c.bf16 %v2085_v45, %v2083_v50  ;;  %v895_v50 = vpop.f32.mrf.mxu0 }
 0x946   :  { %v3988_v58 = vpop.permute.xlu1 %3987  ;;  %v1205_v37 = vpack.c.bf16 %v1077_v35, %v1077_v35  ;;  %v6958_v55 = vpack.c.bf16 %v1077_v35, %v1076_v47  ;;  %v896_v35 = vadd.f32 %v8469_v61, %v895_v50 }
 0x947   :  { %v4577_v11 = vmul.f32 %v3988_v58, %v8659_v46  ;;  %2867 = vmatmul.bf16.gmra.mxu3 %v2559_v8 }
 0x948   :  { %7098 = vst [vmem:[#allocation9 + $0x160] sm:$0xff] %v6958_v55   ;;  %v1611_v58 = vunpack.c.l.b16 %v1205_v37  ;;  %v1079_v40 = vmax.f32 %v896_v35, 0.0  ;;  %v5693_v35 = vmul.f32 %v8586_v1, %v8617_v63 }
 0x949   :  { %v4724_v17 = vadd.f32 %v4723_v29, %v4577_v11  ;;  %v894_v29 = vadd.f32 %v8469_v61, %v893_v26  ;;  %v8691_v26 = vpop.f32.mrf.mxu2 }
 0x94a   :  { %7219 = vset.pattern.permute.xlu2 %v7945_v10  ;;  %5175 = vperm.xlu0 %7232, %v8669_v13   ;;  %v1694_v11 = vpack.c.b16 %v1611_v58, %v1610_v48  ;;  %v1207_v45 = vpack.c.bf16 %v1079_v40, %v1079_v40  ;;  %10026 = vst [vmem:[#allocation28_spill] sm:$0xff] %v8691_v26 }
 0x94b   :  { %v8677_v51 = vadd.f32 %v4724_v17, %v4578_v57  ;;  %v1078_v47 = vmax.f32 %v894_v29, 0.0 }
 0x94c   :  { %7218 = vset.pattern.permute.xlu1 %v7891_v3  ;;  %2086 = vmatmul.bf16.gmra.mxu1 %v1694_v11  ;;  %v1613_v48 = vunpack.c.l.b16 %v1207_v45 }
 0x94d   :  { %2415 = vmatmul.bf16.gmra.mxu2 %v1694_v11  ;;  %v1206_v37 = vpack.c.bf16 %v1078_v47, %v1078_v47  ;;  %v6963_v17 = vpack.c.bf16 %v1079_v40, %v1078_v47  ;;  %v898_v55 = vpop.f32.mrf.mxu0  ;;  %v5078_v11 = vpop.permute.xlu2 %5077 }
 0x94e   :  { %v899_v8 = vadd.f32 %v8469_v61, %v898_v55  ;;  %v5692_v47 = vmul.f32 %v5078_v11, %v8611_v21 }
 0x94f   :  { %v1612_v57 = vunpack.c.l.b16 %v1206_v37  ;;  %7099 = vst [vmem:[#allocation9 + $0x168] sm:$0xff] %v6963_v17  }
 0x950   :  { %v1080_v50 = vmax.f32 %v899_v8, 0.0  ;;  %v5840_v17 = vadd.f32 %v5693_v35, %v5692_v47 }
 0x951   :  { %v1695_v58 = vpack.c.b16 %v1613_v48, %v1612_v57  ;;  %v8701_v8 = vpop.f32.mrf.mxu2 }
 0x952   :  { %5138 = vperm.xlu2 %7219, %v8607_v54   ;;  %7237 = vset.pattern.permute.xlu0 %v7931_v60  ;;  %v1208_v40 = vpack.c.bf16 %v1080_v50, %v1080_v50 }
 0x954   :  { %5132 = vperm.xlu1 %7218, %v8607_v54   ;;  %v1614_v26 = vunpack.c.l.b16 %v1208_v40 }
 0x955   :  { %v900_v37 = vpop.f32.mrf.mxu0 }
 0x956   :  { %v4000_v29 = vpop.permute.xlu1 %3999  ;;  %v901_v57 = vadd.f32 %v8469_v61, %v900_v37  ;;  %v5096_v37 = vpop.permute.xlu2 %5095 }
 0x957   :  { %v5695_v35 = vmul.f32 %v5096_v37, %v8634_v19 }
 0x958   :  { %v1081_v55 = vmax.f32 %v901_v57, 0.0 }
 0x959   :  { %v8705_v47 = vpop.f32.mrf.mxu2 }
 0x95a   :  { %7222 = vset.pattern.permute.xlu2 %v7931_v60  ;;  %5205 = vperm.xlu0 %7237, %v8669_v13   ;;  %v1209_v25 = vpack.c.bf16 %v1081_v55, %v1081_v55  ;;  %v6968_v21 = vpack.c.bf16 %v1081_v55, %v1080_v50  ;;  %10027 = vst [vmem:[#allocation29_spill] sm:$0xff] %v8705_v47 }
 0x95c   :  { %7221 = vset.pattern.permute.xlu1 %v8009_v22  ;;  %2091 = vmatmul.bf16.gmra.mxu1 %v1695_v58  ;;  %7100 = vst [vmem:[#allocation9 + $0x170] sm:$0xff] %v6968_v21   ;;  %v1615_v11 = vunpack.c.l.b16 %v1209_v25 }
 0x95d   :  { %2420 = vmatmul.bf16.gmra.mxu2 %v1695_v58  ;;  %v903_v1 = vpop.f32.mrf.mxu0 }
 0x95e   :  { %v1696_v63 = vpack.c.b16 %v1615_v11, %v1614_v26  ;;  %v2294_v26 = vadd.f32 %v8126_v9, %v8044_v23  ;;  %v5108_v57 = vpop.permute.xlu2 %5107  ;;  %v5698_v9 = vmul.f32 %v8592_v43, %v8664_v0 }
 0x960   :  { %v4579_v11 = vmul.f32 %v4000_v29, %v2294_v26 }
 0x961   :  { %v8716_v19 = vpop.f32.mrf.mxu2 }
 0x962   :  { %5156 = vperm.xlu2 %7222, %v8607_v54   ;;  %7240 = vset.pattern.permute.xlu0 %v7888_v2 }
 0x964   :  { %5150 = vperm.xlu1 %7221, %v8607_v54  }
 0x965   :  { %v905_v50 = vpop.f32.mrf.mxu0 }
 0x966   :  { %v5090_v45 = vpop.permute.xlu1 %5089  ;;  %v906_v25 = vadd.f32 %v8469_v61, %v905_v50 }
 0x967   :  { %v5694_v48 = vmul.f32 %v5090_v45, %v8626_v24  ;;  %v904_v24 = vadd.f32 %v8469_v61, %v903_v1  ;;  %v5697_v1 = vmul.f32 %v5108_v57, %v8659_v46 }
 0x968   :  { %v1083_v21 = vmax.f32 %v906_v25, 0.0  ;;  %v8723_v25 = vpop.xlane.xlu2 %3511 }
 0x969   :  { %v5841_v58 = vadd.f32 %v5840_v17, %v5694_v48  ;;  %v1082_v40 = vmax.f32 %v904_v24, 0.0 }
 0x96a   :  { %7224 = vset.pattern.permute.xlu2 %v7971_v41 }
 0x96b   :  { %v5842_v48 = vadd.f32 %v5841_v58, %v5695_v35  ;;  %v1210_v55 = vpack.c.bf16 %v1082_v40, %v1082_v40  ;;  %v6973_v47 = vpack.c.bf16 %v1083_v21, %v1082_v40  ;;  %v4726_v58 = vadd.f32 %v8677_v51, %v4579_v11 }
 0x96c   :  { %7223 = vset.pattern.permute.xlu1 %v7962_v32  ;;  %2096 = vmatmul.bf16.gmra.mxu1 %v1696_v63  ;;  %v3541_v11 = vsub.f32 %v8444_v44, %v8570_v30 }
 0x96d   :  { %2425 = vmatmul.bf16.gmra.mxu2 %v1696_v63  ;;  %v1211_v63 = vpack.c.bf16 %v1083_v21, %v1083_v21  ;;  %v1616_v37 = vunpack.c.l.b16 %v1210_v55  ;;  %7101 = vst [vmem:[#allocation9 + $0x178] sm:$0xff] %v6973_v47   ;;  %v908_v50 = vpop.f32.mrf.mxu0  ;;  %v4727_v40 = vrot.slane %v4726_v58, 4 }
 0x96e   :  { %v909_v46 = vadd.f32 %v8469_v61, %v908_v50 }
 0x970   :  { %v1084_v57 = vmax.f32 %v909_v46, 0.0 }
 0x972   :  { %5168 = vperm.xlu2 %7224, %v8607_v54   ;;  %v1212_v0 = vpack.c.bf16 %v1084_v57, %v1084_v57 }
 0x974   :  { %5162 = vperm.xlu1 %7223, %v8607_v54  }
 0x975   :  { %v910_v43 = vpop.f32.mrf.mxu0 }
 0x976   :  { %v5102_v45 = vpop.permute.xlu1 %5101  ;;  %v911_v47 = vadd.f32 %v8469_v61, %v910_v43 }
 0x977   :  { %v5696_v17 = vmul.f32 %v5102_v45, %v8643_v12  ;;  %v1617_v12 = vunpack.c.l.b16 %v1211_v63  ;;  %v8725_v45 = vpop.f32.mrf.mxu2  ;;  %v1618_v63 = vunpack.c.l.b16 %v1212_v0 }
 0x978   :  { %v1085_v21 = vmax.f32 %v911_v47, 0.0 }
 0x979   :  { %v5843_v54 = vadd.f32 %v5842_v48, %v5696_v17  ;;  %v1697_v35 = vpack.c.b16 %v1617_v12, %v1616_v37  ;;  %v4728_v17 = vadd.f32 %v4727_v40, %v4726_v58  ;;  %v8728_v48 = vpop.trf.xlu0 }
 0x97a   :  { %7225 = vset.pattern.permute.xlu2 %v7888_v2  ;;  %v1213_v37 = vpack.c.bf16 %v1085_v21, %v1085_v21 }
 0x97b   :  { %v5844_v24 = vadd.f32 %v5843_v54, %v5697_v1  ;;  %v4729_v1 = vrot.slane %v4728_v17, 2 }
 0x97c   :  { %2101 = vmatmul.bf16.gmra.mxu1 %v1697_v35  ;;  %v1619_v58 = vunpack.c.l.b16 %v1213_v37 }
 0x97d   :  { %v5845_v29 = vadd.f32 %v5844_v24, %v5698_v9  ;;  %2430 = vmatmul.bf16.gmra.mxu2 %v1697_v35  ;;  %v6978_v9 = vpack.c.bf16 %v1085_v21, %v1084_v57  ;;  %v8732_v24 = vpop.xlane.xlu2 %6038  ;;  %v4730_v50 = vadd.f32 %v4729_v1, %v4728_v17  ;;  %v913_v46 = vpop.f32.mrf.mxu0  ;;  %v3564_v35 = vmul.f32 1.442695, %v3541_v11 }
 0x97e   :  { %10028 = vst [vmem:[#allocation30_spill] sm:$0xff] %v8732_v24  ;;  %v1698_v43 = vpack.c.b16 %v1619_v58, %v1618_v63  ;;  %v8739_v57 = vadd.f32 %v8167_v6, %v8044_v23  ;;  %v8748_v1 = vadd.f32 %v8174_v42, %v8044_v23 }
 0x97f   :  { %7102 = vst [vmem:[#allocation9 + $0x180] sm:$0xff] %v6978_v9   ;;  %v8735_v47 = vpop.f32.mrf.mxu2  ;;  %v4731_v30 = vrot.slane %v4730_v50, 1  ;;  %7415 = vpow2.f32 %v3564_v35 }
 0x985   :  { %v915_v63 = vpop.f32.mrf.mxu0 }
 0x986   :  { %v5120_v51 = vpop.permute.xlu1 %5119 }
 0x987   :  { %v5699_v55 = vmul.f32 %v5120_v51, %v2294_v26  ;;  %v914_v26 = vadd.f32 %v8469_v61, %v913_v46  ;;  %v4007_v51 = vpop.permute.xlu2 %4006  ;;  %v8752_v46 = vpop.eup %7415 }
 0x989   :  { %v5846_v54 = vadd.f32 %v5845_v29, %v5699_v55  ;;  %v4013_v29 = vpop.permute.xlu0 %4012  ;;  %v1086_v17 = vmax.f32 %v914_v26, 0.0  ;;  %v8743_v55 = vadd.f32 %v8159_v34, %v8044_v23 }
 0x98a   :  { %v4581_v21 = vmul.f32 %v4013_v29, %v8739_v57 }
 0x98b   :  { %v5847_v12 = vrot.slane %v5846_v54, 4  ;;  %v4580_v6 = vmul.f32 %v4007_v51, %v8743_v55  ;;  %v1214_v9 = vpack.c.bf16 %v1086_v17, %v1086_v17 }
 0x98c   :  { %2106 = vmatmul.bf16.gmra.mxu1 %v1698_v43 }
 0x98d   :  { %v5848_v40 = vadd.f32 %v5847_v12, %v5846_v54  ;;  %2435 = vmatmul.bf16.gmra.mxu2 %v1698_v43  ;;  %v4732_v54 = vadd.f32 %v4731_v30, %v4730_v50  ;;  %v916_v12 = vadd.f32 %v8469_v61, %v915_v63  ;;  %v4733_v34 = vadd.f32 %v4581_v21, %v4580_v6  ;;  %v8756_v43 = vpop.f32.mrf.mxu2 }
 0x98e   :  { %v3513_v21 = vsel %vm3485_vm0, %v8728_v48, -inf }
 0x98f   :  { %v5849_v44 = vrot.slane %v5848_v40, 2  ;;  %v1087_v26 = vmax.f32 %v916_v12, 0.0  ;;  %v4025_v63 = vpop.permute.xlu2 %4024 }
 0x991   :  { %v5850_v0 = vadd.f32 %v5849_v44, %v5848_v40  ;;  %v1620_v44 = vunpack.c.l.b16 %v1214_v9  ;;  %v1215_v30 = vpack.c.bf16 %v1087_v26, %v1087_v26  ;;  %v6983_v29 = vpack.c.bf16 %v1087_v26, %v1086_v17 }
 0x993   :  { %v5851_v11 = vrot.slane %v5850_v0, 1  ;;  %7103 = vst [vmem:[#allocation9 + $0x188] sm:$0xff] %v6983_v29  }
 0x994   :  { %v4043_v9 = vpop.permute.xlu0 %4042 }
 0x995   :  { %v5852_v37 = vadd.f32 %v5851_v11, %v5850_v0  ;;  %v3603_v0 = vsel %vm3485_vm0, %v8752_v46, 0.0  ;;  %v1621_v11 = vunpack.c.l.b16 %v1215_v30  ;;  %v8766_v17 = vpop.f32.mrf.mxu2 }
 0x996   :  { %v4019_v58 = vpop.permute.xlu1 %4018 }
 0x997   :  { %v4582_v35 = vmul.f32 %v4019_v58, %v8748_v1  ;;  %v6001_v40 = vsel %vm5996_vm1, %v4732_v54, %v5852_v37  ;;  %v918_v54 = vpop.f32.mrf.mxu0  ;;  %v1699_v6 = vpack.c.b16 %v1621_v11, %v1620_v44  ;;  %v6017_v37 = vmul.f32 %v8511_v7, %v8563_v15  ;;  %v4037_v15 = vpop.permute.xlu2 %4036 }
 0x998   :  { %v6018_v42 = vmul.f32 %v8511_v7, %v6001_v40  ;;  %v8771_v58 = vadd.f32 %v8181_v18, %v8044_v23  ;;  %v8776_v40 = vadd.f32 %v8190_v62, %v8044_v23  ;;  %v8782_v44 = vadd.f32 %v8199_v5, %v8044_v23 }
 0x999   :  { %v4734_v50 = vadd.f32 %v4733_v34, %v4582_v35  ;;  %v6040_v12 = vsel %vm6030_vm2, %v6017_v37, 0.0  ;;  %v919_v34 = vadd.f32 %v8469_v61, %v918_v54  ;;  %v8787_v62 = vadd.f32 %v8206_v16, %v8044_v23 }
 0x99a   :  { %v6043_v51 = vsel %vm6030_vm2, %v6018_v42, 0.0  ;;  %v4583_v7 = vmul.f32 %v4025_v63, %v8771_v58 }
 0x99b   :  { %3604 = vadd.xlane.f32.xlu2 %v3603_v0  ;;  %6044 = vadd.xlane.f32.xlu0 %v6043_v51  ;;  %v1088_v26 = vmax.f32 %v919_v34, 0.0  ;;  %v4586_v5 = vmul.f32 %v4043_v9, %v8787_v62 }
 0x99c   :  { %2111 = vmatmul.bf16.gmra.mxu1 %v1699_v6  ;;  %v4735_v29 = vadd.f32 %v4734_v50, %v4583_v7 }
 0x99d   :  { %2440 = vmatmul.bf16.gmra.mxu2 %v1699_v6  ;;  %v1216_v0 = vpack.c.bf16 %v1088_v26, %v1088_v26 }
 0x99e   :  { %3514 = vmax.xlane.f32.xlu1 %v3513_v21  ;;  %v4585_v21 = vmul.f32 %v4037_v15, %v8782_v44 }
 0x99f   :  { %v920_v35 = vpop.f32.mrf.mxu0  ;;  %v1622_v54 = vunpack.c.l.b16 %v1216_v0 }
 0x9a0   :  { %v921_v42 = vadd.f32 %v8469_v61, %v920_v35  ;;  %v8791_v35 = vpop.f32.mrf.mxu2 }
 0x9a2   :  { %v1089_v51 = vmax.f32 %v921_v42, 0.0 }
 0x9a3   :  { %6041 = vadd.xlane.f32.xlu2 %v6040_v12 }
 0x9a4   :  { %v1217_v63 = vpack.c.bf16 %v1089_v51, %v1089_v51  ;;  %v6988_v6 = vpack.c.bf16 %v1089_v51, %v1088_v26  ;;  %v5145_v37 = vpop.permute.xlu0 %5144 }
 0x9a6   :  { %v4031_v18 = vpop.permute.xlu1 %4030  ;;  %7104 = vst [vmem:[#allocation9 + $0x190] sm:$0xff] %v6988_v6   ;;  %v1623_v34 = vunpack.c.l.b16 %v1217_v63 }
 0x9a7   :  { %v4584_v30 = vmul.f32 %v4031_v18, %v8776_v40  ;;  %v923_v7 = vpop.f32.mrf.mxu0 }
 0x9a8   :  { %v1700_v42 = vpack.c.b16 %v1623_v34, %v1622_v54  ;;  %v924_v16 = vadd.f32 %v8469_v61, %v923_v7  ;;  %v8796_v26 = vpop.f32.mrf.mxu2  ;;  %v8801_v54 = vadd.f32 %v8276_v38, %v8044_v23 }
 0x9a9   :  { %v4736_v11 = vadd.f32 %v4735_v29, %v4584_v30 }
 0x9aa   :  { %v1090_v15 = vmax.f32 %v924_v16, 0.0 }
 0x9ab   :  { %v4737_v12 = vadd.f32 %v4736_v11, %v4585_v21 }
 0x9ac   :  { %2116 = vmatmul.bf16.gmra.mxu1 %v1700_v42  ;;  %v8794_v18 = vpop.permute.xlu0 %4073  ;;  %v1218_v29 = vpack.c.bf16 %v1090_v15, %v1090_v15 }
 0x9ad   :  { %v4738_v50 = vadd.f32 %v4737_v12, %v4586_v5  ;;  %2445 = vmatmul.bf16.gmra.mxu2 %v1700_v42  ;;  %v5127_v12 = vpop.permute.xlu2 %5126 }
 0x9ae   :  { %v1624_v51 = vunpack.c.l.b16 %v1218_v29  ;;  %v5700_v16 = vmul.f32 %v5127_v12, %v8743_v55  ;;  %v2853_v29 = vpop.f32.mrf.mxu3 }
 0x9af   :  { %v925_v30 = vpop.f32.mrf.mxu0 }
 0x9b0   :  { %v926_v9 = vadd.f32 %v8469_v61, %v925_v30  ;;  %v8807_v61 = vpop.f32.mrf.mxu2 }
 0x9b2   :  { %v1091_v0 = vmax.f32 %v926_v9, 0.0 }
 0x9b4   :  { %v1219_v21 = vpack.c.bf16 %v1091_v0, %v1091_v0  ;;  %v6993_v11 = vpack.c.bf16 %v1091_v0, %v1090_v15 }
 0x9b5   :  { %v5139_v42 = vpop.permute.xlu2 %5138 }
 0x9b6   :  { %7105 = vst [vmem:[#allocation9 + $0x198] sm:$0xff] %v6993_v11   ;;  %v1625_v6 = vunpack.c.l.b16 %v1219_v21  ;;  %v4049_v34 = vpop.permute.xlu1 %4048  ;;  %v5702_v30 = vmul.f32 %v5139_v42, %v8748_v1  ;;  %v2855_v21 = vpop.f32.mrf.mxu3  ;;  %v2314_v42 = vadd.f32 %v8230_v49, %v8044_v23 }
 0x9b8   :  { %v1701_v7 = vpack.c.b16 %v1625_v6, %v1624_v51 }
 0x9bb   :  { %4055 = vperm.xlu2 %7225, %v8638_v52  }
 0x9bc   :  { %v5176_v63 = vpop.permute.xlu0 %5175  ;;  %2121 = vmatmul.bf16.gmra.mxu1 %v1701_v7 }
 0x9bd   :  { %v8805_v5 = vmul.f32 %v5176_v63, %v8801_v54  ;;  %2450 = vmatmul.bf16.gmra.mxu2 %v1701_v7  ;;  %v5703_v63 = vmul.f32 %v5145_v37, %v8771_v58  ;;  %v5157_v58 = vpop.permute.xlu2 %5156 }
 0x9c3   :  { %7227 = vset.pattern.permute.xlu2 %v7945_v10 }
 0x9c6   :  { %v5133_v38 = vpop.permute.xlu1 %5132 }
 0x9c7   :  { %v5701_v15 = vmul.f32 %v5133_v38, %v8739_v57 }
 0x9c9   :  { %v5853_v9 = vadd.f32 %v5701_v15, %v5700_v16  ;;  %v2087_v51 = vpop.f32.mrf.mxu1  ;;  %v4587_v16 = vmul.f32 %v4049_v34, %v2314_v42  ;;  %v2858_v15 = vpop.f32.mrf.mxu3 }
 0x9ca   :  { %v2088_v11 = vadd.f32 %v2087_v51, %v7731_v59 }
 0x9cb   :  { %v5854_v0 = vadd.f32 %v5853_v9, %v5702_v30  ;;  %4067 = vperm.xlu2 %7227, %v8638_v52   ;;  %v4739_v37 = vadd.f32 %v4738_v50, %v4587_v16 }
 0x9cc   :  { %v5169_v51 = vpop.permute.xlu2 %5168 }
 0x9cd   :  { %v5855_v1 = vadd.f32 %v5854_v0, %v5703_v63  ;;  %v4740_v9 = vrot.slane %v4739_v37, 4 }
 0x9cf   :  { %v4741_v34 = vadd.f32 %v4740_v9, %v4739_v37 }
 0x9d1   :  { %v2089_v6 = vpop.f32.mrf.mxu1  ;;  %v2860_v63 = vpop.f32.mrf.mxu3 }
 0x9d2   :  { %v2090_v55 = vadd.f32 %v2089_v6, %v7731_v59 }
 0x9d3   :  { %7229 = vset.pattern.permute.xlu2 %v7931_v60 }
 0x9d4   :  { %v2560_v12 = vpack.c.bf16 %v2090_v55, %v2088_v11 }
 0x9d6   :  { %v5151_v7 = vpop.permute.xlu1 %5150  ;;  %2872 = vmatmul.bf16.gmra.mxu3 %v2560_v12 }
 0x9d7   :  { %v5704_v57 = vmul.f32 %v5151_v7, %v8776_v40 }
 0x9d8   :  { %3293 = vxpose.xlu1.b32.start [1/8] (short) (narrow) %v2853_v29, 8  ;;  %v5705_v29 = vmul.f32 %v5157_v58, %v8782_v44 }
 0x9d9   :  { %v5856_v38 = vadd.f32 %v5855_v1, %v5704_v57  ;;  %v2092_v30 = vpop.f32.mrf.mxu1  ;;  %v4742_v57 = vrot.slane %v4741_v34, 2  ;;  %v2863_v58 = vpop.f32.mrf.mxu3 }
 0x9da   :  { %v2093_v40 = vadd.f32 %v2092_v30, %v7731_v59 }
 0x9db   :  { %4085 = vperm.xlu2 %7229, %v8638_v52   ;;  %v5857_v7 = vadd.f32 %v5856_v38, %v5705_v29  ;;  %v4743_v16 = vadd.f32 %v4742_v57, %v4741_v34 }
 0x9dd   :  { %v4744_v9 = vrot.slane %v4743_v16, 1 }
 0x9e0   :  { %3294 = vxpose.xlu1.b32.cont [2/8] (short) (narrow) %v2855_v21, 8  ;;  %v5707_v21 = vmul.f32 %v5169_v51, %v2314_v42 }
 0x9e1   :  { %v2094_v0 = vpop.f32.mrf.mxu1 }
 0x9e2   :  { %v2095_v11 = vadd.f32 %v2094_v0, %v7731_v59 }
 0x9e3   :  { %7231 = vset.pattern.permute.xlu2 %v7971_v41 }
 0x9e4   :  { %v2561_v50 = vpack.c.bf16 %v2095_v11, %v2093_v40  ;;  %v4745_v40 = vadd.f32 %v4744_v9, %v4743_v16  ;;  %v2865_v11 = vpop.f32.mrf.mxu3 }
 0x9e6   :  { %v5163_v49 = vpop.permute.xlu1 %5162  ;;  %2877 = vmatmul.bf16.gmra.mxu3 %v2561_v50 }
 0x9e7   :  { %v5706_v6 = vmul.f32 %v5163_v49, %v8787_v62 }
 0x9e8   :  { %3295 = vxpose.xlu1.b32.cont [3/8] (short) (narrow) %v2858_v15, 8 }
 0x9e9   :  { %v5858_v55 = vadd.f32 %v5857_v7, %v5706_v6  ;;  %v2097_v12 = vpop.f32.mrf.mxu1 }
 0x9ea   :  { %v2098_v62 = vadd.f32 %v2097_v12, %v7731_v59 }
 0x9eb   :  { %v5859_v1 = vadd.f32 %v5858_v55, %v5707_v21  ;;  %4097 = vperm.xlu2 %7231, %v8638_v52  }
 0x9ec   :  { %v2868_v6 = vpop.f32.mrf.mxu3 }
 0x9ed   :  { %v5860_v44 = vrot.slane %v5859_v1, 4 }
 0x9ef   :  { %v5861_v30 = vadd.f32 %v5860_v44, %v5859_v1 }
 0x9f0   :  { %3296 = vxpose.xlu1.b32.cont [4/8] (short) (narrow) %v2860_v63, 8 }
 0x9f1   :  { %v5862_v37 = vrot.slane %v5861_v30, 2  ;;  %v2099_v42 = vpop.f32.mrf.mxu1 }
 0x9f2   :  { %v2100_v15 = vadd.f32 %v2099_v42, %v7731_v59 }
 0x9f3   :  { %v5863_v0 = vadd.f32 %v5862_v37, %v5861_v30  ;;  %7234 = vset.pattern.permute.xlu2 %v7945_v10  ;;  %v3675_v30 = vrot.slane %v8621_v31, 4 }
 0x9f4   :  { %v2562_v51 = vpack.c.bf16 %v2100_v15, %v2098_v62  ;;  %v2870_v1 = vpop.f32.mrf.mxu3 }
 0x9f5   :  { %v5864_v38 = vrot.slane %v5863_v0, 1  ;;  %v3676_v42 = vsel %vm3663_vm3, %v3675_v30, %v8379_v53 }
 0x9f6   :  { %2882 = vmatmul.bf16.gmra.mxu3 %v2562_v51  ;;  %v3680_v15 = vperm.slane %v3676_v42, %v8318_v56  ;;  %v6691_v42 = vld [vmem:[#allocation2 + $0x1a0] sm:$0xff] }
 0x9f7   :  { %v5865_v29 = vadd.f32 %v5864_v38, %v5863_v0  ;;  %927 = vmatmul.bf16.gmra.mxu0 %v6691_v42 }
 0x9f8   :  { %3297 = vxpose.xlu1.b32.cont [5/8] (short) (narrow) %v2863_v58, 8 }
 0x9f9   :  { %v8832_v49 = vsel %vm5996_vm1, %v4745_v40, %v5865_v29  ;;  %v2102_v34 = vpop.f32.mrf.mxu1 }
 0x9fa   :  { %v2103_v63 = vadd.f32 %v2102_v34, %v7731_v59 }
 0x9fb   :  { %5187 = vperm.xlu2 %7234, %v8669_v13  }
 0xa00   :  { %3298 = vxpose.xlu1.b32.cont [6/8] (short) (narrow) %v2865_v11, 8 }
 0xa01   :  { %v2104_v7 = vpop.f32.mrf.mxu1 }
 0xa02   :  { %v2105_v50 = vadd.f32 %v2104_v7, %v7731_v59 }
 0xa03   :  { %7236 = vset.pattern.permute.xlu2 %v8009_v22 }
 0xa04   :  { %v2563_v21 = vpack.c.bf16 %v2105_v50, %v2103_v63 }
 0xa06   :  { %2887 = vmatmul.bf16.gmra.mxu3 %v2563_v21 }
 0xa08   :  { %3299 = vxpose.xlu1.b32.cont [7/8] (short) (narrow) %v2868_v6, 8 }
 0xa09   :  { %v2107_v55 = vpop.f32.mrf.mxu1 }
 0xa0a   :  { %v2108_v44 = vadd.f32 %v2107_v55, %v7731_v59 }
 0xa0b   :  { %5199 = vperm.xlu2 %7236, %v8669_v13  }
 0xa0e   :  { %v3605_v57 = vpop.xlane.xlu2 %3604 }
 0xa0f   :  { %7417 = vrcp.f32 %v3605_v57 }
 0xa10   :  { %3300 = vxpose.xlu1.b32.end [8/8] (short) (narrow) %v2870_v1, 8 }
 0xa11   :  { %v2109_v16 = vpop.f32.mrf.mxu1  ;;  %v3515_v30 = vpop.xlane.xlu1 %3514 }
 0xa12   :  { %v2110_v37 = vadd.f32 %v2109_v16, %v7731_v59 }
 0xa13   :  { %7239 = vset.pattern.permute.xlu2 %v7971_v41 }
 0xa14   :  { %v2564_v62 = vpack.c.bf16 %v2110_v37, %v2108_v44 }
 0xa15   :  { %v7418_v12 = vpop.eup %7417 }
 0xa16   :  { %v3653_v58 = vmul.f32 %v7418_v12, %v8752_v46  ;;  %2892 = vmatmul.bf16.gmra.mxu3 %v2564_v62  ;;  %v8913_v42 = vpop.xlane.xlu2 %6041 }
 0xa17   :  { %10030 = vst [vmem:[#allocation37_spill] sm:$0xff] %v8913_v42 }
 0xa18   :  { %v3681_v9 = vrot.slane %v3653_v58, 4  ;;  %v8844_v0 = vperm.slane %v3653_v58, 0  ;;  %v8864_v50 = vperm.slane %v3653_v58, 1  ;;  %v3543_v58 = vsub.f32 %v8728_v48, %v3515_v30  ;;  %v8880_v48 = vpop.permute.xlu0 %5205 }
 0xa19   :  { %v2112_v46 = vpop.f32.mrf.mxu1 }
 0xa1a   :  { %4104 = vperm.xlu0 %7240, %v8844_v0   ;;  %v3682_v38 = vsel %vm3663_vm3, %v3681_v9, %v8575_v27  ;;  %v2113_v51 = vadd.f32 %v2112_v46, %v7731_v59  ;;  %v3568_v9 = vmul.f32 1.442695, %v3543_v58 }
 0xa1b   :  { %5217 = vperm.xlu2 %7239, %v8669_v13   ;;  %v3686_v31 = vperm.slane %v3682_v38, %v8318_v56 }
 0xa1c   :  { %7419 = vpow2.f32 %v3568_v9 }
 0xa1d   :  { %v3693_v40 = vrot.slane %v3686_v31, 4 }
 0xa1f   :  { %v8855_v29 = vsel %vm3663_vm3, %v3693_v40, %v3680_v15 }
 0xa21   :  { %v2114_v11 = vpop.f32.mrf.mxu1 }
 0xa22   :  { %7245 = vset.pattern.permute.xlu0 %v7931_v60  ;;  %v2115_v53 = vadd.f32 %v2114_v11, %v7731_v59  ;;  %v8874_v38 = vpop.eup %7419  ;;  %v6692_v11 = vld [vmem:[#allocation2 + $0x1a8] sm:$0xff] }
 0xa23   :  { %v3609_v31 = vsel %vm3485_vm0, %v8874_v38, 0.0  ;;  %932 = vmatmul.bf16.gmra.mxu0 %v6692_v11 }
 0xa24   :  { %v2565_v34 = vpack.c.bf16 %v2115_v53, %v2113_v51  ;;  %v8887_v53 = vpop.xlane.xlu0 %6044 }
 0xa25   :  { %10029 = vst [vmem:[#allocation31_spill] sm:$0xff] %v8887_v53  ;;  %v6697_v53 = vld [vmem:[#allocation2 + $0x1d0] sm:$0xff] }
 0xa26   :  { %2897 = vmatmul.bf16.gmra.mxu3 %v2565_v34 }
 0xa29   :  { %v2117_v27 = vpop.f32.mrf.mxu1 }
 0xa2a   :  { %4134 = vperm.xlu0 %7245, %v8844_v0   ;;  %v2118_v63 = vadd.f32 %v2117_v27, %v7731_v59  ;;  %v8891_v27 = vadd.f32 %v8466_v20, %v8044_v23 }
 0xa31   :  { %v2119_v6 = vpop.f32.mrf.mxu1 }
 0xa32   :  { %7250 = vset.pattern.permute.xlu0 %v7945_v10  ;;  %v2120_v7 = vadd.f32 %v2119_v6, %v7731_v59 }
 0xa34   :  { %v2566_v21 = vpack.c.bf16 %v2120_v7, %v2118_v63 }
 0xa36   :  { %2902 = vmatmul.bf16.gmra.mxu3 %v2566_v21  ;;  %v6693_v21 = vld [vmem:[#allocation2 + $0x1b0] sm:$0xff] }
 0xa37   :  { %937 = vmatmul.bf16.gmra.mxu0 %v6693_v21 }
 0xa39   :  { %v2122_v55 = vpop.f32.mrf.mxu1 }
 0xa3a   :  { %5236 = vperm.xlu0 %7250, %v8864_v50   ;;  %v2123_v57 = vadd.f32 %v2122_v55, %v7731_v59 }
 0xa41   :  { %v2124_v1 = vpop.f32.mrf.mxu1 }
 0xa42   :  { %7255 = vset.pattern.permute.xlu0 %v7971_v41  ;;  %v2125_v44 = vadd.f32 %v2124_v1, %v7731_v59  ;;  %v6694_v1 = vld [vmem:[#allocation2 + $0x1b8] sm:$0xff] }
 0xa44   :  { %v2567_v12 = vpack.c.bf16 %v2125_v44, %v2123_v57  ;;  %v8904_v44 = vadd.f32 %v8493_v36, %v8044_v23 }
 0xa46   :  { %2907 = vmatmul.bf16.gmra.mxu3 %v2567_v12 }
 0xa47   :  { %942 = vmatmul.bf16.gmra.mxu0 %v6694_v1 }
 0xa4a   :  { %5266 = vperm.xlu0 %7255, %v8864_v50  }
 0xa59   :  { %v2873_v16 = vpop.f32.mrf.mxu3 }
 0xa61   :  { %v2875_v37 = vpop.f32.mrf.mxu3 }
 0xa63   :  { %7226 = vset.pattern.permute.xlu1 %v7891_v3 }
 0xa69   :  { %v2878_v62 = vpop.f32.mrf.mxu3 }
 0xa6b   :  { %4061 = vperm.xlu1 %7226, %v8638_v52  }
 0xa71   :  { %v2880_v46 = vpop.f32.mrf.mxu3 }
 0xa73   :  { %7228 = vset.pattern.permute.xlu1 %v8009_v22 }
 0xa74   :  { %3610 = vadd.xlane.f32.xlu0 %v3609_v31 }
 0xa79   :  { %v2883_v51 = vpop.f32.mrf.mxu3 }
 0xa7b   :  { %4079 = vperm.xlu1 %7228, %v8638_v52  }
 0xa7c   :  { %v8882_v15 = vpop.trf.xlu1 }
 0xa7d   :  { %v3516_v40 = vsel %vm3485_vm0, %v8882_v15, -inf }
 0xa7e   :  { %3517 = vmax.xlane.f32.xlu2 %v3516_v40  ;;  %v4056_v40 = vpop.permute.xlu2 %4055 }
 0xa81   :  { %v2885_v34 = vpop.f32.mrf.mxu3 }
 0xa83   :  { %7230 = vset.pattern.permute.xlu1 %v7962_v32 }
 0xa86   :  { %v4068_v11 = vpop.permute.xlu2 %4067 }
 0xa89   :  { %v2888_v7 = vpop.f32.mrf.mxu3 }
 0xa8b   :  { %4091 = vperm.xlu1 %7230, %v8638_v52  }
 0xa8c   :  { %v4105_v63 = vpop.permute.xlu0 %4104 }
 0xa8d   :  { %v8895_v6 = vmul.f32 %v4105_v63, %v8891_v27  ;;  %v8923_v63 = vadd.f32 %v8291_v14, %v8044_v23 }
 0xa91   :  { %v2890_v55 = vpop.f32.mrf.mxu3 }
 0xa93   :  { %7233 = vset.pattern.permute.xlu1 %v7891_v3 }
 0xa99   :  { %v2893_v57 = vpop.f32.mrf.mxu3 }
 0xa9b   :  { %5181 = vperm.xlu1 %7233, %v8669_v13  }
 0xa9c   :  { %v8900_v20 = vpop.permute.xlu0 %4134 }
 0xa9d   :  { %3357 = vxpose.xlu0.b32.start [1/8] (short) (narrow) %v2893_v57, 8 }
 0xaa1   :  { %v2895_v52 = vpop.f32.mrf.mxu3 }
 0xaa3   :  { %7235 = vset.pattern.permute.xlu1 %v7922_v4 }
 0xaa5   :  { %3358 = vxpose.xlu0.b32.cont [2/8] (short) (narrow) %v2895_v52, 8 }
 0xaa7   :  { %3325 = vxpose.xlu2.b32.start [1/8] (short) (narrow) %v2873_v16, 8 }
 0xaa9   :  { %v2898_v58 = vpop.f32.mrf.mxu3 }
 0xaab   :  { %5193 = vperm.xlu1 %7235, %v8669_v13  }
 0xaac   :  { %v5237_v12 = vpop.permute.xlu0 %5236 }
 0xaad   :  { %v8908_v30 = vmul.f32 %v5237_v12, %v8904_v44  ;;  %3359 = vxpose.xlu0.b32.cont [3/8] (short) (narrow) %v2898_v58, 8  ;;  %v6695_v12 = vld [vmem:[#allocation2 + $0x1c0] sm:$0xff] }
 0xaae   :  { %947 = vmatmul.bf16.gmra.mxu0 %v6695_v12  ;;  %v10032_v58 = vld [vmem:[#allocation33_spill] sm:$0xff] }
 0xaaf   :  { %3326 = vxpose.xlu2.b32.cont [2/8] (short) (narrow) %v2875_v37, 8  ;;  %v3542_v37 = vsub.f32 %v8554_v39, %v8723_v25  ;;  %v10031_v25 = vld [vmem:[#allocation32_spill] sm:$0xff] }
 0xab0   :  { %v8929_v21 = vadd.f32 %v10031_v25, %v8044_v23 }
 0xab1   :  { %v2900_v9 = vpop.f32.mrf.mxu3 }
 0xab2   :  { %v4591_v1 = vmul.f32 %v8794_v18, %v8929_v21 }
 0xab3   :  { %7238 = vset.pattern.permute.xlu1 %v7962_v32 }
 0xab5   :  { %3360 = vxpose.xlu0.b32.cont [4/8] (short) (narrow) %v2900_v9, 8  ;;  %v8942_v9 = vadd.f32 %v10032_v58, %v8044_v23  ;;  %v10034_v58 = vld [vmem:[#allocation36_spill] sm:$0xff] }
 0xab7   :  { %3327 = vxpose.xlu2.b32.cont [3/8] (short) (narrow) %v2878_v62, 8 }
 0xab9   :  { %v2903_v16 = vpop.f32.mrf.mxu3 }
 0xabb   :  { %5211 = vperm.xlu1 %7238, %v8669_v13   ;;  %v3566_v13 = vmul.f32 1.442695, %v3542_v37  ;;  %v8945_v37 = vld [vmem:[#allocation5] ss:$0 sm:$0xff] }
 0xabd   :  { %3361 = vxpose.xlu0.b32.cont [5/8] (short) (narrow) %v2903_v16, 8  ;;  %7421 = vpow2.f32 %v3566_v13  ;;  %v928_v16 = vpop.f32.mrf.mxu0 }
 0xabe   :  { %v929_v18 = vadd.f32 %v8945_v37, %v928_v16  ;;  %v8957_v16 = vadd.f32 %v10034_v58, %v8044_v23 }
 0xabf   :  { %3328 = vxpose.xlu2.b32.cont [4/8] (short) (narrow) %v2880_v46, 8  ;;  %v8919_v46 = vadd.f32 %v8284_v28, %v8044_v23 }
 0xac1   :  { %v2905_v36 = vpop.f32.mrf.mxu3 }
 0xac3   :  { %7241 = vset.pattern.permute.xlu1 %v7891_v3  ;;  %v8932_v28 = vpop.eup %7421 }
 0xac4   :  { %v3606_v14 = vsel %vm3485_vm0, %v8932_v28, 0.0 }
 0xac5   :  { %3362 = vxpose.xlu0.b32.cont [6/8] (short) (narrow) %v2905_v36, 8 }
 0xac7   :  { %3329 = vxpose.xlu2.b32.cont [5/8] (short) (narrow) %v2883_v51, 8 }
 0xac9   :  { %v2908_v31 = vpop.f32.mrf.mxu3 }
 0xacd   :  { %3363 = vxpose.xlu0.b32.cont [7/8] (short) (narrow) %v2908_v31, 8 }
 0xacf   :  { %3330 = vxpose.xlu2.b32.cont [6/8] (short) (narrow) %v2885_v34, 8  ;;  %v4588_v34 = vmul.f32 %v4056_v40, %v8801_v54 }
 0xad1   :  { %v2910_v62 = vpop.f32.mrf.mxu3 }
 0xad5   :  { %3364 = vxpose.xlu0.b32.end [8/8] (short) (narrow) %v2910_v62, 8  ;;  %v1092_v62 = vmax.f32 %v929_v18, 0.0 }
 0xad7   :  { %3331 = vxpose.xlu2.b32.cont [7/8] (short) (narrow) %v2888_v7, 8  ;;  %v4590_v7 = vmul.f32 %v4068_v11, %v8923_v63  ;;  %v930_v11 = vpop.f32.mrf.mxu0 }
 0xadd   :  { %v4062_v51 = vpop.permute.xlu1 %4061 }
 0xade   :  { %v4589_v39 = vmul.f32 %v4062_v51, %v8919_v46  ;;  %v931_v51 = vadd.f32 %v8945_v37, %v930_v11 }
 0xadf   :  { %3332 = vxpose.xlu2.b32.end [8/8] (short) (narrow) %v2890_v55, 8  ;;  %v8938_v55 = vpop.f32.mrf.mxu2 }
 0xae0   :  { %v4746_v57 = vadd.f32 %v4589_v39, %v4588_v34  ;;  %v1220_v34 = vpack.c.bf16 %v1092_v62, %v1092_v62  ;;  %v6696_v39 = vld [vmem:[#allocation2 + $0x1c8] sm:$0xff]  ;;  %v1093_v25 = vmax.f32 %v931_v51, 0.0 }
 0xae1   :  { %952 = vmatmul.bf16.gmra.mxu0 %v6696_v39 }
 0xae2   :  { %v4747_v52 = vadd.f32 %v4746_v57, %v4590_v7  ;;  %v4086_v7 = vpop.permute.xlu2 %4085  ;;  %v1221_v57 = vpack.c.bf16 %v1093_v25, %v1093_v25  ;;  %v1626_v12 = vunpack.c.l.b16 %v1220_v34 }
 0xae4   :  { %v4748_v54 = vadd.f32 %v4747_v52, %v4591_v1  ;;  %v6998_v1 = vpack.c.bf16 %v1093_v25, %v1092_v62  ;;  %v10033_v52 = vld [vmem:[#allocation35_spill] sm:$0xff] }
 0xae5   :  { %3607 = vadd.xlane.f32.xlu1 %v3606_v14  ;;  %v8953_v14 = vadd.f32 %v10033_v52, %v8044_v23 }
 0xae6   :  { %7106 = vst [vmem:[#allocation9 + $0x1a0] sm:$0xff] %v6998_v1  }
 0xae7   :  { %v8948_v13 = vpop.f32.mrf.mxu2 }
 0xaea   :  { %v4098_v1 = vpop.permute.xlu2 %4097 }
 0xaed   :  { %v4080_v36 = vpop.permute.xlu1 %4079 }
 0xaee   :  { %v4592_v31 = vmul.f32 %v4080_v36, %v8942_v9  ;;  %v4593_v36 = vmul.f32 %v4086_v7, %v8953_v14 }
 0xaef   :  { %v8960_v11 = vpop.f32.mrf.mxu2 }
 0xaf0   :  { %v4749_v40 = vadd.f32 %v4748_v54, %v4592_v31  ;;  %v1627_v54 = vunpack.c.l.b16 %v1221_v57  ;;  %v933_v31 = vpop.f32.mrf.mxu0  ;;  %10035 = vst [vmem:[#allocation32_spill] sm:$0xff] %v8960_v11 }
 0xaf1   :  { %v934_v34 = vadd.f32 %v8945_v37, %v933_v31  ;;  %957 = vmatmul.bf16.gmra.mxu0 %v6697_v53 }
 0xaf2   :  { %v4750_v51 = vadd.f32 %v4749_v40, %v4593_v36  ;;  %v1702_v39 = vpack.c.b16 %v1627_v54, %v1626_v12  ;;  %v5188_v54 = vpop.permute.xlu2 %5187 }
 0xaf3   :  { %v1094_v57 = vmax.f32 %v934_v34, 0.0 }
 0xaf4   :  { %2126 = vmatmul.bf16.gmra.mxu1 %v1702_v39  ;;  %2455 = vmatmul.bf16.gmra.mxu2 %v1702_v39 }
 0xaf5   :  { %v1222_v58 = vpack.c.bf16 %v1094_v57, %v1094_v57 }
 0xaf7   :  { %v8967_v36 = vpop.f32.mrf.mxu2  ;;  %v1628_v42 = vunpack.c.l.b16 %v1222_v58 }
 0xaf8   :  { %v935_v52 = vpop.f32.mrf.mxu0  ;;  %10036 = vst [vmem:[#allocation33_spill] sm:$0xff] %v8967_v36 }
 0xaf9   :  { %v936_v7 = vadd.f32 %v8945_v37, %v935_v52  ;;  %v5710_v52 = vmul.f32 %v5188_v54, %v8923_v63 }
 0xafb   :  { %v1095_v40 = vmax.f32 %v936_v7, 0.0 }
 0xafd   :  { %v4092_v18 = vpop.permute.xlu1 %4091  ;;  %v7003_v24 = vpack.c.bf16 %v1095_v40, %v1094_v57 }
 0xafe   :  { %v4594_v62 = vmul.f32 %v4092_v18, %v8957_v16  ;;  %4110 = vperm.xlu1 %7241, %v8844_v0   ;;  %v1223_v18 = vpack.c.bf16 %v1095_v40, %v1095_v40 }
 0xaff   :  { %7107 = vst [vmem:[#allocation9 + $0x1a8] sm:$0xff] %v7003_v24   ;;  %v8974_v57 = vpop.f32.mrf.mxu2 }
 0xb00   :  { %v4751_v25 = vadd.f32 %v4750_v51, %v4594_v62  ;;  %v1629_v12 = vunpack.c.l.b16 %v1223_v18  ;;  %v938_v51 = vpop.f32.mrf.mxu0  ;;  %10037 = vst [vmem:[#allocation35_spill] sm:$0xff] %v8974_v57 }
 0xb01   :  { %v939_v34 = vadd.f32 %v8945_v37, %v938_v51 }
 0xb02   :  { %v1703_v39 = vpack.c.b16 %v1629_v12, %v1628_v42 }
 0xb03   :  { %v1096_v53 = vmax.f32 %v939_v34, 0.0 }
 0xb04   :  { %2131 = vmatmul.bf16.gmra.mxu1 %v1703_v39  ;;  %2460 = vmatmul.bf16.gmra.mxu2 %v1703_v39 }
 0xb05   :  { %v1224_v40 = vpack.c.bf16 %v1096_v53, %v1096_v53 }
 0xb06   :  { %7243 = vset.pattern.permute.xlu1 %v7922_v4 }
 0xb07   :  { %v1630_v51 = vunpack.c.l.b16 %v1224_v40  ;;  %v8978_v63 = vpop.f32.mrf.mxu2 }
 0xb08   :  { %v940_v58 = vpop.f32.mrf.mxu0  ;;  %10038 = vst [vmem:[#allocation36_spill] sm:$0xff] %v8978_v63 }
 0xb0d   :  { %v5182_v31 = vpop.permute.xlu1 %5181 }
 0xb0e   :  { %v5709_v62 = vmul.f32 %v5182_v31, %v8919_v46  ;;  %4122 = vperm.xlu1 %7243, %v8844_v0   ;;  %v941_v46 = vadd.f32 %v8945_v37, %v940_v58  ;;  %v6698_v31 = vld [vmem:[#allocation2 + $0x1d8] sm:$0xff] }
 0xb0f   :  { %962 = vmatmul.bf16.gmra.mxu0 %v6698_v31  ;;  %v8986_v63 = vpop.f32.mrf.mxu2 }
 0xb10   :  { %v5866_v7 = vadd.f32 %v5709_v62, %v8805_v5  ;;  %v1097_v18 = vmax.f32 %v941_v46, 0.0  ;;  %v5200_v5 = vpop.permute.xlu2 %5199  ;;  %v943_v39 = vpop.f32.mrf.mxu0 }
 0xb11   :  { %v5712_v58 = vmul.f32 %v5200_v5, %v8942_v9 }
 0xb12   :  { %v5867_v24 = vadd.f32 %v5866_v7, %v5710_v52  ;;  %v1225_v42 = vpack.c.bf16 %v1097_v18, %v1097_v18  ;;  %v7008_v12 = vpack.c.bf16 %v1097_v18, %v1096_v53  ;;  %v944_v52 = vadd.f32 %v8945_v37, %v943_v39  ;;  %v10039_v53 = vld [vmem:[#allocation15_spill] sm:$0xff] }
 0xb13   :  { %v2334_v46 = vadd.f32 %v10039_v53, %v8044_v23 }
 0xb14   :  { %7108 = vst [vmem:[#allocation9 + $0x1b0] sm:$0xff] %v7008_v12   ;;  %v1631_v54 = vunpack.c.l.b16 %v1225_v42  ;;  %v1098_v31 = vmax.f32 %v944_v52, 0.0 }
 0xb15   :  { %v4595_v42 = vmul.f32 %v4098_v1, %v2334_v46 }
 0xb16   :  { %7246 = vset.pattern.permute.xlu1 %v7962_v32  ;;  %v1704_v7 = vpack.c.b16 %v1631_v54, %v1630_v51 }
 0xb18   :  { %2136 = vmatmul.bf16.gmra.mxu1 %v1704_v7  ;;  %2465 = vmatmul.bf16.gmra.mxu2 %v1704_v7  ;;  %v945_v12 = vpop.f32.mrf.mxu0  ;;  %v5218_v1 = vpop.permute.xlu2 %5217 }
 0xb19   :  { %v946_v51 = vadd.f32 %v8945_v37, %v945_v12  ;;  %v5715_v12 = vmul.f32 %v5218_v1, %v2334_v46 }
 0xb1b   :  { %v1099_v54 = vmax.f32 %v946_v51, 0.0 }
 0xb1d   :  { %v5194_v62 = vpop.permute.xlu1 %5193  ;;  %v1227_v5 = vpack.c.bf16 %v1099_v54, %v1099_v54  ;;  %v7013_v39 = vpack.c.bf16 %v1099_v54, %v1098_v31 }
 0xb1e   :  { %v5711_v34 = vmul.f32 %v5194_v62, %v8929_v21  ;;  %4140 = vperm.xlu1 %7246, %v8844_v0   ;;  %v4752_v21 = vadd.f32 %v4751_v25, %v4595_v42  ;;  %v1226_v62 = vpack.c.bf16 %v1098_v31, %v1098_v31  ;;  %v8994_v42 = vpop.f32.mrf.mxu2 }
 0xb1f   :  { %7109 = vst [vmem:[#allocation9 + $0x1b8] sm:$0xff] %v7013_v39   ;;  %v1633_v52 = vunpack.c.l.b16 %v1227_v5 }
 0xb20   :  { %v5868_v40 = vadd.f32 %v5867_v24, %v5711_v34  ;;  %v4753_v9 = vrot.slane %v4752_v21, 4  ;;  %v1632_v24 = vunpack.c.l.b16 %v1226_v62  ;;  %v5713_v34 = vmul.f32 %v8880_v48, %v8953_v14  ;;  %10040 = vst [vmem:[#allocation15_spill] sm:$0xff] %v8994_v42 }
 0xb22   :  { %v5869_v18 = vadd.f32 %v5868_v40, %v5712_v58  ;;  %v4754_v58 = vadd.f32 %v4753_v9, %v4752_v21  ;;  %v1705_v53 = vpack.c.b16 %v1633_v52, %v1632_v24 }
 0xb24   :  { %v5870_v40 = vadd.f32 %v5869_v18, %v5713_v34  ;;  %v4755_v31 = vrot.slane %v4754_v58, 2 }
 0xb26   :  { %7248 = vset.pattern.permute.xlu1 %v7888_v2  ;;  %v4756_v14 = vadd.f32 %v4755_v31, %v4754_v58 }
 0xb28   :  { %2141 = vmatmul.bf16.gmra.mxu1 %v1705_v53  ;;  %2470 = vmatmul.bf16.gmra.mxu2 %v1705_v53  ;;  %v4757_v9 = vrot.slane %v4756_v14, 1  ;;  %v6699_v53 = vld [vmem:[#allocation2 + $0x1e0] sm:$0xff] }
 0xb29   :  { %967 = vmatmul.bf16.gmra.mxu0 %v6699_v53  ;;  %v6700_v53 = vld [vmem:[#allocation2 + $0x1e8] sm:$0xff] }
 0xb2a   :  { %v4758_v24 = vadd.f32 %v4757_v9, %v4756_v14 }
 0xb2b   :  { %v948_v58 = vpop.f32.mrf.mxu0 }
 0xb2d   :  { %v5212_v7 = vpop.permute.xlu1 %5211 }
 0xb2e   :  { %v5714_v25 = vmul.f32 %v5212_v7, %v8957_v16  ;;  %5224 = vperm.xlu1 %7248, %v8864_v50   ;;  %v9017_v7 = vpop.f32.mrf.mxu2 }
 0xb2f   :  { %10041 = vst [vmem:[#allocation38_spill] sm:$0xff] %v9017_v7 }
 0xb30   :  { %v5871_v62 = vadd.f32 %v5870_v40, %v5714_v25  ;;  %v949_v40 = vadd.f32 %v8945_v37, %v948_v58  ;;  %v9021_v25 = vpop.xlane.xlu2 %3517 }
 0xb32   :  { %v5872_v51 = vadd.f32 %v5871_v62, %v5715_v12 }
 0xb33   :  { %v950_v12 = vpop.f32.mrf.mxu0 }
 0xb34   :  { %v5873_v48 = vrot.slane %v5872_v51, 4 }
 0xb36   :  { %v5874_v54 = vadd.f32 %v5873_v48, %v5872_v51  ;;  %7251 = vset.pattern.permute.xlu1 %v7922_v4  ;;  %v9024_v62 = vpop.f32.mrf.mxu2  ;;  %v951_v51 = vadd.f32 %v8945_v37, %v950_v12  ;;  %v9028_v48 = vpop.permute.xlu0 %5266 }
 0xb37   :  { %10042 = vst [vmem:[#allocation39_spill] sm:$0xff] %v9024_v62 }
 0xb38   :  { %v5875_v21 = vrot.slane %v5874_v54, 2 }
 0xb39   :  { %972 = vmatmul.bf16.gmra.mxu0 %v6700_v53 }
 0xb3a   :  { %v5876_v18 = vadd.f32 %v5875_v21, %v5874_v54 }
 0xb3c   :  { %v5877_v16 = vrot.slane %v5876_v18, 1  ;;  %7258 = vset.pattern.permute.xlu0 %v7945_v10 }
 0xb3e   :  { %5242 = vperm.xlu1 %7251, %v8864_v50   ;;  %v5878_v46 = vadd.f32 %v5877_v16, %v5876_v18  ;;  %v3611_v58 = vpop.xlane.xlu0 %3610 }
 0xb40   :  { %v9000_v5 = vsel %vm5996_vm1, %v4758_v24, %v5878_v46  ;;  %v9030_v14 = vpop.trf.xlu2 }
 0xb41   :  { %7242 = vset.pattern.permute.xlu2 %v7945_v10  ;;  %v3519_v9 = vsel %vm3485_vm0, %v9030_v14, -inf }
 0xb46   :  { %7253 = vset.pattern.permute.xlu1 %v7931_v60 }
 0xb49   :  { %4116 = vperm.xlu2 %7242, %v8844_v0  }
 0xb4e   :  { %5254 = vperm.xlu1 %7253, %v8864_v50  }
 0xb51   :  { %7244 = vset.pattern.permute.xlu2 %v8009_v22 }
 0xb56   :  { %7256 = vset.pattern.permute.xlu1 %v7888_v2 }
 0xb58   :  { %v3608_v39 = vpop.xlane.xlu1 %3607 }
 0xb59   :  { %7423 = vrcp.f32 %v3608_v39  ;;  %4128 = vperm.xlu2 %7244, %v8844_v0  }
 0xb5a   :  { %7425 = vrcp.f32 %v3611_v58 }
 0xb5e   :  { %v953_v24 = vpop.f32.mrf.mxu0 }
 0xb5f   :  { %v7424_v34 = vpop.eup %7423  ;;  %v954_v39 = vadd.f32 %v8945_v37, %v953_v24 }
 0xb60   :  { %v9010_v52 = vmul.f32 %v7424_v34, %v8932_v28  ;;  %v1100_v28 = vmax.f32 %v949_v40, 0.0  ;;  %v9037_v34 = vpop.f32.mrf.mxu2  ;;  %v9042_v40 = vld [vmem:[%s9966_s6] sm:$0x3] }
 0xb61   :  { %7247 = vset.pattern.permute.xlu2 %v7971_v41  ;;  %10043 = vst [vmem:[#allocation40_spill] sm:$0xff] %v9037_v34  ;;  %v1102_v12 = vmax.f32 %v954_v39, 0.0 }
 0xb62   :  { %v9014_v1 = vperm.slane %v9010_v52, 0  ;;  %v1228_v31 = vpack.c.bf16 %v1100_v28, %v1100_v28 }
 0xb64   :  { %4165 = vperm.xlu0 %7258, %v9014_v1   ;;  %v1634_v54 = vunpack.c.l.b16 %v1228_v31 }
 0xb69   :  { %4146 = vperm.xlu2 %7247, %v8844_v0   ;;  %v1101_v0 = vmax.f32 %v951_v51, 0.0 }
 0xb6b   :  { %v1229_v21 = vpack.c.bf16 %v1101_v0, %v1101_v0  ;;  %v7018_v18 = vpack.c.bf16 %v1101_v0, %v1100_v28  ;;  %v6019_v28 = vmul.f32 %v9042_v40, %v8832_v49  ;;  %v955_v0 = vpop.f32.mrf.mxu0 }
 0xb6c   :  { %7263 = vset.pattern.permute.xlu0 %v7971_v41 }
 0xb6d   :  { %7110 = vst [vmem:[#allocation9 + $0x1c0] sm:$0xff] %v7018_v18   ;;  %v1635_v16 = vunpack.c.l.b16 %v1229_v21  ;;  %v6046_v51 = vsel %vm6030_vm2, %v6019_v28, 0.0  ;;  %v1230_v21 = vpack.c.bf16 %v1102_v12, %v1102_v12  ;;  %v9051_v18 = vperm.slane %v9010_v52, 1 }
 0xb6f   :  { %v1706_v46 = vpack.c.b16 %v1635_v16, %v1634_v54  ;;  %v956_v54 = vadd.f32 %v8945_v37, %v955_v0  ;;  %v9053_v16 = vpop.f32.mrf.mxu2  ;;  %v1636_v39 = vunpack.c.l.b16 %v1230_v21 }
 0xb70   :  { %10044 = vst [vmem:[#allocation41_spill] sm:$0xff] %v9053_v16 }
 0xb71   :  { %7249 = vset.pattern.permute.xlu2 %v7891_v3  ;;  %2146 = vmatmul.bf16.gmra.mxu1 %v1706_v46  ;;  %v2127_v31 = vpop.f32.mrf.mxu1  ;;  %v1103_v49 = vmax.f32 %v956_v54, 0.0 }
 0xb72   :  { %2475 = vmatmul.bf16.gmra.mxu2 %v1706_v46  ;;  %v2128_v58 = vadd.f32 %v2127_v31, %v7731_v59 }
 0xb73   :  { %v1231_v24 = vpack.c.bf16 %v1103_v49, %v1103_v49  ;;  %v7023_v46 = vpack.c.bf16 %v1103_v49, %v1102_v12  ;;  %v958_v62 = vpop.f32.mrf.mxu0 }
 0xb74   :  { %4195 = vperm.xlu0 %7263, %v9014_v1   ;;  %v959_v16 = vadd.f32 %v8945_v37, %v958_v62 }
 0xb75   :  { %7111 = vst [vmem:[#allocation9 + $0x1c8] sm:$0xff] %v7023_v46   ;;  %v1637_v53 = vunpack.c.l.b16 %v1231_v24 }
 0xb76   :  { %v1104_v31 = vmax.f32 %v959_v16, 0.0 }
 0xb77   :  { %v1707_v34 = vpack.c.b16 %v1637_v53, %v1636_v39  ;;  %v9067_v21 = vpop.f32.mrf.mxu2  ;;  %v7596_v39 = vmov 1934713408  }
 0xb78   :  { %3520 = vmax.xlane.f32.xlu1 %v3519_v9  ;;  %v7426_v9 = vpop.eup %7425  ;;  %10045 = vst [vmem:[#allocation42_spill] sm:$0xff] %v9067_v21  ;;  %v1232_v62 = vpack.c.bf16 %v1104_v31, %v1104_v31 }
 0xb79   :  { %5230 = vperm.xlu2 %7249, %v8864_v50   ;;  %v9058_v28 = vmul.f32 %v7426_v9, %v8874_v38  ;;  %v6701_v38 = vld [vmem:[#allocation2 + $0x1f0] sm:$0xff] }
 0xb7a   :  { %977 = vmatmul.bf16.gmra.mxu0 %v6701_v38 }
 0xb7b   :  { %v9064_v12 = vperm.slane %v9058_v28, 0  ;;  %v960_v9 = vpop.f32.mrf.mxu0 }
 0xb7c   :  { %7268 = vset.pattern.permute.xlu0 %v8009_v22  ;;  %v961_v24 = vadd.f32 %v8945_v37, %v960_v9 }
 0xb7e   :  { %v1105_v46 = vmax.f32 %v961_v24, 0.0 }
 0xb7f   :  { %v9076_v21 = vpop.f32.mrf.mxu2 }
 0xb80   :  { %6047 = vadd.xlane.f32.xlu1 %v6046_v51  ;;  %v2129_v51 = vpop.f32.mrf.mxu1  ;;  %v1233_v53 = vpack.c.bf16 %v1105_v46, %v1105_v46  ;;  %10047 = vst [vmem:[#allocation44_spill] sm:$0xff] %v9076_v21 }
 0xb81   :  { %7252 = vset.pattern.permute.xlu2 %v8009_v22  ;;  %v2130_v0 = vadd.f32 %v2129_v51, %v7731_v59  ;;  %2151 = vmatmul.bf16.gmra.mxu1 %v1707_v34  ;;  %v7028_v51 = vpack.c.bf16 %v1105_v46, %v1104_v31  ;;  %v6702_v46 = vld [vmem:[#allocation2 + $0x1f8] sm:$0xff] }
 0xb82   :  { %2480 = vmatmul.bf16.gmra.mxu2 %v1707_v34  ;;  %v1639_v16 = vunpack.c.l.b16 %v1233_v53 }
 0xb83   :  { %v2568_v54 = vpack.c.bf16 %v2130_v0, %v2128_v58  ;;  %v3690_v58 = vunpack.c.l.s4 %v7596_v39  ;;  %v1638_v0 = vunpack.c.l.b16 %v1232_v62  ;;  %7112 = vst [vmem:[#allocation9 + $0x1d0] sm:$0xff] %v7028_v51   ;;  %v10048_v39 = vld [vmem:[#allocation34_spill] sm:$0xff]  ;;  %v10049_v51 = vld [vmem:[#allocation17_spill] sm:$0xff] }
 0xb84   :  { %5297 = vperm.xlu0 %7268, %v9051_v18  }
 0xb85   :  { %2912 = vmatmul.bf16.gmra.mxu3 %v2568_v54  ;;  %v9073_v38 = vunpack.c.0.s8 %v3690_v58  ;;  %v1708_v62 = vpack.c.b16 %v1639_v16, %v1638_v0  ;;  %v9095_v0 = vadd.f32 %v10049_v51, %v8044_v23 }
 0xb87   :  { %10046 = vst [vmem:[#allocation43_spill] sm:$0xff] %v9073_v38  ;;  %v9086_v58 = vperm.slane %v10048_v39, %v9073_v38  ;;  %v9091_v53 = vperm.slane %v8855_v29, %v9073_v38 }
 0xb88   :  { %v2132_v49 = vpop.f32.mrf.mxu1 }
 0xb89   :  { %5248 = vperm.xlu2 %7252, %v8864_v50   ;;  %v2133_v34 = vadd.f32 %v2132_v49, %v7731_v59  ;;  %v9082_v49 = vperm.slane %v9058_v28, 1  ;;  %v3701_v16 = vrot.slane %v9086_v58, 4 }
 0xb8a   :  { %982 = vmatmul.bf16.gmra.mxu0 %v6702_v46 }
 0xb8c   :  { %4226 = vperm.xlu0 %7268, %v9064_v12   ;;  %v963_v7 = vpop.f32.mrf.mxu0 }
 0xb8d   :  { %v964_v31 = vadd.f32 %v8945_v37, %v963_v7 }
 0xb8f   :  { %v1106_v7 = vmax.f32 %v964_v31, 0.0 }
 0xb90   :  { %v2134_v54 = vpop.f32.mrf.mxu1 }
 0xb91   :  { %7254 = vset.pattern.permute.xlu2 %v7962_v32  ;;  %v2135_v9 = vadd.f32 %v2134_v54, %v7731_v59  ;;  %2156 = vmatmul.bf16.gmra.mxu1 %v1708_v62  ;;  %v1234_v29 = vpack.c.bf16 %v1106_v7, %v1106_v7 }
 0xb92   :  { %2485 = vmatmul.bf16.gmra.mxu2 %v1708_v62  ;;  %v9104_v62 = vpop.f32.mrf.mxu2 }
 0xb93   :  { %v2569_v24 = vpack.c.bf16 %v2135_v9, %v2133_v34  ;;  %10050 = vst [vmem:[#allocation34_spill] sm:$0xff] %v9104_v62  ;;  %v1640_v38 = vunpack.c.l.b16 %v1234_v29  ;;  %v10054_v29 = vld [vmem:[#allocation20_spill] sm:$0xff] }
 0xb94   :  { %7280 = vset.pattern.permute.xlu0 %v7891_v3  ;;  %v965_v9 = vpop.f32.mrf.mxu0 }
 0xb95   :  { %2917 = vmatmul.bf16.gmra.mxu3 %v2569_v24  ;;  %v3702_v24 = vsel %vm3663_vm3, %v9091_v53, %v3701_v16  ;;  %v966_v31 = vadd.f32 %v8945_v37, %v965_v9 }
 0xb97   :  { %v1107_v39 = vmax.f32 %v966_v31, 0.0 }
 0xb98   :  { %v2137_v34 = vpop.f32.mrf.mxu1 }
 0xb99   :  { %5260 = vperm.xlu2 %7254, %v8864_v50   ;;  %4153 = vperm.xlu1 %7256, %v9014_v1   ;;  %v4111_v50 = vpop.permute.xlu1 %4110  ;;  %v2138_v16 = vadd.f32 %v2137_v34, %v7731_v59  ;;  %v1235_v21 = vpack.c.bf16 %v1107_v39, %v1107_v39  ;;  %v7033_v42 = vpack.c.bf16 %v1107_v39, %v1106_v7 }
 0xb9a   :  { %v4597_v54 = vmul.f32 %v4111_v50, %v9095_v0 }
 0xb9b   :  { %7113 = vst [vmem:[#allocation9 + $0x1d8] sm:$0xff] %v7033_v42   ;;  %v1641_v9 = vunpack.c.l.b16 %v1235_v21  ;;  %v10052_v42 = vld [vmem:[#allocation18_spill] sm:$0xff] }
 0xb9c   :  { %5328 = vperm.xlu0 %7280, %v9082_v49   ;;  %v4759_v51 = vadd.f32 %v4597_v54, %v8895_v6  ;;  %v9114_v6 = vpop.f32.mrf.mxu2  ;;  %v2344_v21 = vadd.f32 %v10052_v42, %v8044_v23 }
 0xb9d   :  { %v1709_v31 = vpack.c.b16 %v1641_v9, %v1640_v38  ;;  %10051 = vst [vmem:[#allocation17_spill] sm:$0xff] %v9114_v6 }
 0xba0   :  { %v2139_v36 = vpop.f32.mrf.mxu1 }
 0xba1   :  { %7257 = vset.pattern.permute.xlu2 %v7891_v3  ;;  %7259 = vset.pattern.permute.xlu1 %v7922_v4  ;;  %v2140_v62 = vadd.f32 %v2139_v36, %v7731_v59  ;;  %v10053_v36 = vld [vmem:[#allocation19_spill] sm:$0xff] }
 0xba2   :  { %3745 = vrot.lane.b32.xlu2 %v3702_v24, %s7590_s23  ;;  %2161 = vmatmul.bf16.gmra.mxu1 %v1709_v31  ;;  %v2347_v34 = vadd.f32 %v10053_v36, %v8044_v23 }
 0xba3   :  { %v4117_v46 = vpop.permute.xlu2 %4116  ;;  %v2570_v24 = vpack.c.bf16 %v2140_v62, %v2138_v16  ;;  %2490 = vmatmul.bf16.gmra.mxu2 %v1709_v31  ;;  %v2349_v62 = vadd.f32 %v10054_v29, %v8044_v23  ;;  %v10055_v16 = vld [vmem:[#allocation21_spill] sm:$0xff] }
 0xba4   :  { %v4598_v50 = vmul.f32 %v4117_v46, %v8904_v44  ;;  %7285 = vset.pattern.permute.xlu0 %v7962_v32  ;;  %v4123_v44 = vpop.permute.xlu1 %4122  ;;  %v2352_v9 = vadd.f32 %v10055_v16, %v8044_v23 }
 0xba5   :  { %2922 = vmatmul.bf16.gmra.mxu3 %v2570_v24  ;;  %v4599_v38 = vmul.f32 %v4123_v44, %v2344_v21  ;;  %v4601_v24 = vmul.f32 %v8900_v20, %v2349_v62 }
 0xba6   :  { %v4760_v57 = vadd.f32 %v4759_v51, %v4598_v50 }
 0xba8   :  { %v2142_v7 = vpop.f32.mrf.mxu1  ;;  %v4761_v46 = vadd.f32 %v4760_v57, %v4599_v38 }
 0xba9   :  { %4171 = vperm.xlu1 %7259, %v9014_v1   ;;  %v2143_v50 = vadd.f32 %v2142_v7, %v7731_v59 }
 0xbaa   :  { %4159 = vperm.xlu2 %7257, %v9014_v1  }
 0xbac   :  { %5358 = vperm.xlu0 %7285, %v9082_v49   ;;  %v4141_v51 = vpop.permute.xlu1 %4140 }
 0xbad   :  { %v4602_v36 = vmul.f32 %v4141_v51, %v2352_v9  ;;  %v9144_v51 = vpop.trf.xlu0 }
 0xbb0   :  { %v2144_v44 = vpop.f32.mrf.mxu1 }
 0xbb1   :  { %7261 = vset.pattern.permute.xlu1 %v7931_v60  ;;  %v2145_v42 = vadd.f32 %v2144_v44, %v7731_v59 }
 0xbb2   :  { %7260 = vset.pattern.permute.xlu2 %v8009_v22 }
 0xbb3   :  { %v4129_v54 = vpop.permute.xlu2 %4128  ;;  %v2571_v57 = vpack.c.bf16 %v2145_v42, %v2143_v50  ;;  %v9152_v42 = vpop.f32.mrf.mxu2 }
 0xbb4   :  { %v4600_v39 = vmul.f32 %v4129_v54, %v2347_v34  ;;  %7288 = vset.pattern.permute.xlu0 %v7891_v3  ;;  %v5225_v7 = vpop.permute.xlu1 %5224  ;;  %10057 = vst [vmem:[#allocation18_spill] sm:$0xff] %v9152_v42 }
 0xbb5   :  { %2927 = vmatmul.bf16.gmra.mxu3 %v2571_v57  ;;  %v5716_v29 = vmul.f32 %v5225_v7, %v8891_v27  ;;  %v968_v57 = vpop.f32.mrf.mxu0 }
 0xbb6   :  { %v4762_v31 = vadd.f32 %v4761_v46, %v4600_v39  ;;  %v969_v7 = vadd.f32 %v8945_v37, %v968_v57 }
 0xbb8   :  { %v4763_v6 = vadd.f32 %v4762_v31, %v4601_v24 }
 0xbb9   :  { %4183 = vperm.xlu1 %7261, %v9014_v1  }
 0xbba   :  { %4177 = vperm.xlu2 %7260, %v9014_v1   ;;  %v4764_v38 = vadd.f32 %v4763_v6, %v4602_v36 }
 0xbc1   :  { %7264 = vset.pattern.permute.xlu1 %v7888_v2 }
 0xbc2   :  { %7262 = vset.pattern.permute.xlu2 %v7962_v32 }
 0xbc3   :  { %v4147_v20 = vpop.permute.xlu2 %4146 }
 0xbc9   :  { %5273 = vperm.xlu1 %7264, %v9051_v18  }
 0xbca   :  { %4189 = vperm.xlu2 %7262, %v9014_v1   ;;  %v5243_v1 = vpop.permute.xlu1 %5242 }
 0xbcb   :  { %v5719_v50 = vmul.f32 %v5243_v1, %v2344_v21 }
 0xbd1   :  { %7266 = vset.pattern.permute.xlu1 %v7945_v10 }
 0xbd2   :  { %7265 = vset.pattern.permute.xlu2 %v7891_v3 }
 0xbd3   :  { %v5231_v54 = vpop.permute.xlu2 %5230 }
 0xbd4   :  { %v5717_v6 = vmul.f32 %v5231_v54, %v9095_v0  ;;  %v10056_v0 = vld [vmem:[#allocation22_spill] sm:$0xff] }
 0xbd5   :  { %v2354_v31 = vadd.f32 %v10056_v0, %v8044_v23 }
 0xbd6   :  { %v5879_v46 = vadd.f32 %v5717_v6, %v5716_v29  ;;  %v9150_v44 = vpop.permute.xlu0 %4165  ;;  %v9159_v6 = vpop.f32.mrf.mxu2 }
 0xbd7   :  { %v4603_v36 = vmul.f32 %v4147_v20, %v2354_v31  ;;  %10058 = vst [vmem:[#allocation19_spill] sm:$0xff] %v9159_v6  ;;  %v5723_v0 = vmul.f32 %v9028_v48, %v2354_v31 }
 0xbd8   :  { %v5880_v39 = vadd.f32 %v5879_v46, %v8908_v30  ;;  %v1108_v46 = vmax.f32 %v969_v7, 0.0  ;;  %v3699_v7 = vrot.slane %v9091_v53, 4 }
 0xbd9   :  { %5285 = vperm.xlu1 %7266, %v9051_v18   ;;  %v4765_v21 = vadd.f32 %v4764_v38, %v4603_v36 }
 0xbda   :  { %5279 = vperm.xlu2 %7265, %v9051_v18   ;;  %v5881_v24 = vadd.f32 %v5880_v39, %v5719_v50  ;;  %v1236_v38 = vpack.c.bf16 %v1108_v46, %v1108_v46  ;;  %v3700_v53 = vsel %vm3663_vm3, %v3699_v7, %v9086_v58 }
 0xbdb   :  { %v4766_v29 = vrot.slane %v4765_v21, 4 }
 0xbdd   :  { %v4767_v1 = vadd.f32 %v4766_v29, %v4765_v21 }
 0xbde   :  { %v9172_v48 = vpop.f32.mrf.mxu2 }
 0xbe1   :  { %7269 = vset.pattern.permute.xlu1 %v7931_v60 }
 0xbe2   :  { %7267 = vset.pattern.permute.xlu2 %v7922_v4 }
 0xbe3   :  { %v5249_v16 = vpop.permute.xlu2 %5248 }
 0xbe4   :  { %v5720_v27 = vmul.f32 %v5249_v16, %v2347_v34  ;;  %v5255_v34 = vpop.permute.xlu1 %5254 }
 0xbe5   :  { %v5721_v39 = vmul.f32 %v5255_v34, %v2349_v62  ;;  %v4768_v62 = vrot.slane %v4767_v1, 2 }
 0xbe6   :  { %v5882_v30 = vadd.f32 %v5881_v24, %v5720_v27  ;;  %v9157_v54 = vpop.permute.xlu0 %4195  ;;  %v970_v24 = vpop.f32.mrf.mxu0 }
 0xbe7   :  { %v971_v27 = vadd.f32 %v8945_v37, %v970_v24  ;;  %v9178_v24 = vadd.f32 %v8766_v17, %v8044_v23 }
 0xbe8   :  { %v5883_v50 = vadd.f32 %v5882_v30, %v5721_v39  ;;  %v4769_v39 = vadd.f32 %v4768_v62, %v4767_v1 }
 0xbe9   :  { %5303 = vperm.xlu1 %7269, %v9051_v18   ;;  %v1109_v6 = vmax.f32 %v971_v27, 0.0 }
 0xbea   :  { %5291 = vperm.xlu2 %7267, %v9051_v18  }
 0xbeb   :  { %v1237_v30 = vpack.c.bf16 %v1109_v6, %v1109_v6  ;;  %v7038_v21 = vpack.c.bf16 %v1109_v6, %v1108_v46 }
 0xbec   :  { %v9168_v11 = vpop.xlane.xlu1 %3520 }
 0xbed   :  { %7114 = vst [vmem:[#allocation9 + $0x1e0] sm:$0xff] %v7038_v21   ;;  %v1643_v31 = vunpack.c.l.b16 %v1237_v30 }
 0xbee   :  { %v2147_v42 = vpop.f32.mrf.mxu1 }
 0xbef   :  { %v2148_v1 = vadd.f32 %v2147_v42, %v7731_v59 }
 0xbf1   :  { %7271 = vset.pattern.permute.xlu1 %v7971_v41 }
 0xbf2   :  { %7270 = vset.pattern.permute.xlu2 %v7962_v32 }
 0xbf3   :  { %v5261_v20 = vpop.permute.xlu2 %5260 }
 0xbf4   :  { %v5722_v16 = vmul.f32 %v5261_v20, %v2352_v9  ;;  %v1642_v9 = vunpack.c.l.b16 %v1236_v38 }
 0xbf6   :  { %v5884_v36 = vadd.f32 %v5883_v50, %v5722_v16  ;;  %v9165_v57 = vpop.permute.xlu0 %5297  ;;  %v973_v16 = vpop.f32.mrf.mxu0  ;;  %v1710_v46 = vpack.c.b16 %v1643_v31, %v1642_v9 }
 0xbf7   :  { %v2149_v58 = vpop.f32.mrf.mxu1  ;;  %v9188_v9 = vpop.xlane.xlu1 %6047 }
 0xbf8   :  { %v5885_v34 = vadd.f32 %v5884_v36, %v5723_v0  ;;  %2166 = vmatmul.bf16.gmra.mxu1 %v1710_v46  ;;  %2495 = vmatmul.bf16.gmra.mxu2 %v1710_v46  ;;  %v4770_v36 = vrot.slane %v4769_v39, 1  ;;  %v2150_v17 = vadd.f32 %v2149_v58, %v7731_v59  ;;  %10059 = vst [vmem:[#allocation20_spill] sm:$0xff] %v9188_v9  ;;  %v10060_v58 = vld [vmem:[#allocation24_spill] sm:$0xff] }
 0xbf9   :  { %5315 = vperm.xlu1 %7271, %v9051_v18  }
 0xbfa   :  { %v5886_v29 = vrot.slane %v5885_v34, 4  ;;  %5309 = vperm.xlu2 %7270, %v9051_v18   ;;  %v974_v18 = vadd.f32 %v8945_v37, %v973_v16  ;;  %v2572_v30 = vpack.c.bf16 %v2150_v17, %v2148_v1  ;;  %v4771_v21 = vadd.f32 %v4770_v36, %v4769_v39 }
 0xbfb   :  { %v9198_v36 = vadd.f32 %v10060_v58, %v8044_v23 }
 0xbfc   :  { %v5887_v20 = vadd.f32 %v5886_v29, %v5885_v34  ;;  %v3746_v50 = vpop.permute.xlu2 %3745  ;;  %v1110_v62 = vmax.f32 %v974_v18, 0.0  ;;  %2932 = vmatmul.bf16.gmra.mxu3 %v2572_v30 }
 0xbfd   :  { %v3752_v6 = vsel %vm3751_vm4, %v3700_v53, %v3746_v50  ;;  %v9191_v50 = vpop.f32.mrf.mxu2 }
 0xbfe   :  { %v5888_v38 = vrot.slane %v5887_v20, 2  ;;  %3754 = vst [vmem:[#allocation8] sm:$0xff] %v3752_v6  ;;  %v4227_v27 = vpop.permute.xlu0 %4226  ;;  %v975_v42 = vpop.f32.mrf.mxu0  ;;  %v1238_v31 = vpack.c.bf16 %v1110_v62, %v1110_v62 }
 0xbff   :  { %v9184_v0 = vmul.f32 %v4227_v27, %v9178_v24  ;;  %v976_v53 = vadd.f32 %v8945_v37, %v975_v42  ;;  %v2152_v18 = vpop.f32.mrf.mxu1 }
 0xc00   :  { %v5889_v7 = vadd.f32 %v5888_v38, %v5887_v20  ;;  %v1644_v27 = vunpack.c.l.b16 %v1238_v31 }
 0xc01   :  { %v1111_v6 = vmax.f32 %v976_v53, 0.0 }
 0xc02   :  { %v5890_v34 = vrot.slane %v5889_v7, 1  ;;  %7273 = vset.pattern.permute.xlu2 %v7891_v3 }
 0xc03   :  { %v1239_v1 = vpack.c.bf16 %v1111_v6, %v1111_v6  ;;  %v7043_v39 = vpack.c.bf16 %v1111_v6, %v1110_v62 }
 0xc04   :  { %v5891_v29 = vadd.f32 %v5890_v34, %v5889_v7  ;;  %v4160_v46 = vpop.permute.xlu2 %4159  ;;  %v10061_v7 = vld [vmem:[#allocation25_spill] sm:$0xff] }
 0xc05   :  { %v9202_v17 = vadd.f32 %v10061_v7, %v8044_v23  ;;  %7115 = vst [vmem:[#allocation9 + $0x1e8] sm:$0xff] %v7043_v39   ;;  %v1645_v30 = vunpack.c.l.b16 %v1239_v1  ;;  %v9214_v1 = vpop.f32.mrf.mxu2 }
 0xc06   :  { %v6004_v20 = vsel %vm5996_vm1, %v4771_v21, %v5891_v29  ;;  %v10062_v21 = vld [vmem:[#allocation26_spill] sm:$0xff]  ;;  %v978_v31 = vpop.f32.mrf.mxu0  ;;  %10063 = vst [vmem:[#allocation21_spill] sm:$0xff] %v9214_v1 }
 0xc07   :  { %v6021_v16 = vmul.f32 %v9042_v40, %v6004_v20  ;;  %v9206_v29 = vadd.f32 %v10062_v21, %v8044_v23  ;;  %v4605_v42 = vmul.f32 %v4160_v46, %v9202_v17  ;;  %v979_v53 = vadd.f32 %v8945_v37, %v978_v31  ;;  %v2154_v58 = vpop.f32.mrf.mxu1 }
 0xc08   :  { %v1711_v20 = vpack.c.b16 %v1645_v30, %v1644_v27  ;;  %v2155_v46 = vadd.f32 %v2154_v58, %v7731_v59  ;;  %v10065_v58 = vld [vmem:[#allocation27_spill] sm:$0xff] }
 0xc09   :  { %v6052_v38 = vsel %vm6030_vm2, %v6021_v16, 0.0  ;;  %v4606_v16 = vmul.f32 %v9150_v44, %v9206_v29  ;;  %v1112_v7 = vmax.f32 %v979_v53, 0.0 }
 0xc0a   :  { %6053 = vadd.xlane.f32.xlu0 %v6052_v38  ;;  %v2153_v38 = vadd.f32 %v2152_v18, %v7731_v59  ;;  %2171 = vmatmul.bf16.gmra.mxu1 %v1711_v20  ;;  %v3544_v18 = vsub.f32 %v8882_v15, %v9021_v25 }
 0xc0b   :  { %v4154_v34 = vpop.permute.xlu1 %4153  ;;  %2500 = vmatmul.bf16.gmra.mxu2 %v1711_v20  ;;  %v1240_v9 = vpack.c.bf16 %v1112_v7, %v1112_v7  ;;  %v9222_v20 = vadd.f32 %v8673_v33, %v8044_v23 }
 0xc0c   :  { %v4604_v62 = vmul.f32 %v4154_v34, %v9198_v36  ;;  %v2573_v34 = vpack.c.bf16 %v2155_v46, %v2153_v38  ;;  %v9228_v46 = vadd.f32 %v10065_v58, %v8044_v23  ;;  %v3570_v25 = vmul.f32 1.442695, %v3544_v18 }
 0xc0d   :  { %v9224_v53 = vpop.f32.mrf.mxu2 }
 0xc0e   :  { %v4772_v6 = vadd.f32 %v4605_v42, %v4604_v62  ;;  %v980_v21 = vpop.f32.mrf.mxu0  ;;  %2937 = vmatmul.bf16.gmra.mxu3 %v2573_v34  ;;  %v1646_v42 = vunpack.c.l.b16 %v1240_v9  ;;  %10064 = vst [vmem:[#allocation22_spill] sm:$0xff] %v9224_v53  ;;  %v2913_v9 = vpop.f32.mrf.mxu3  ;;  %7427 = vpow2.f32 %v3570_v25 }
 0xc0f   :  { %v981_v27 = vadd.f32 %v8945_v37, %v980_v21  ;;  %v2157_v44 = vpop.f32.mrf.mxu1 }
 0xc10   :  { %v4773_v39 = vadd.f32 %v4772_v6, %v4606_v16 }
 0xc11   :  { %v1113_v30 = vmax.f32 %v981_v27, 0.0 }
 0xc13   :  { %v1241_v62 = vpack.c.bf16 %v1113_v30, %v1113_v30  ;;  %v7048_v31 = vpack.c.bf16 %v1113_v30, %v1112_v7  ;;  %v2158_v30 = vadd.f32 %v2157_v44, %v7731_v59 }
 0xc14   :  { %v4178_v16 = vpop.permute.xlu2 %4177  ;;  %v9240_v44 = vpop.eup %7427 }
 0xc15   :  { %7116 = vst [vmem:[#allocation9 + $0x1f0] sm:$0xff] %v7048_v31   ;;  %v1647_v38 = vunpack.c.l.b16 %v1241_v62  ;;  %v4608_v33 = vmul.f32 %v4178_v16, %v9228_v46  ;;  %v3522_v62 = vsel %vm3485_vm0, %v9144_v51, -inf }
 0xc16   :  { %v983_v15 = vpop.f32.mrf.mxu0 }
 0xc17   :  { %v984_v7 = vadd.f32 %v8945_v37, %v983_v15  ;;  %v1712_v21 = vpack.c.b16 %v1647_v38, %v1646_v42  ;;  %v2159_v58 = vpop.f32.mrf.mxu1  ;;  %v9237_v42 = vpop.f32.mrf.mxu2 }
 0xc18   :  { %v2160_v18 = vadd.f32 %v2159_v58, %v7731_v59  ;;  %10066 = vst [vmem:[#allocation24_spill] sm:$0xff] %v9237_v42  ;;  %v2915_v38 = vpop.f32.mrf.mxu3 }
 0xc1a   :  { %2176 = vmatmul.bf16.gmra.mxu1 %v1712_v21  ;;  %v2574_v53 = vpack.c.bf16 %v2160_v18, %v2158_v30  ;;  %v3612_v30 = vsel %vm3485_vm0, %v9240_v44, 0.0 }
 0xc1b   :  { %v4172_v6 = vpop.permute.xlu1 %4171  ;;  %2505 = vmatmul.bf16.gmra.mxu2 %v1712_v21 }
 0xc1c   :  { %v4607_v34 = vmul.f32 %v4172_v6, %v9222_v20  ;;  %v1114_v6 = vmax.f32 %v984_v7, 0.0  ;;  %v10067_v7 = vld [vmem:[#allocation28_spill] sm:$0xff] }
 0xc1d   :  { %v2369_v58 = vadd.f32 %v10067_v7, %v8044_v23 }
 0xc1e   :  { %v4774_v27 = vadd.f32 %v4773_v39, %v4607_v34  ;;  %v985_v15 = vpop.f32.mrf.mxu0  ;;  %v1242_v16 = vpack.c.bf16 %v1114_v6, %v1114_v6  ;;  %2942 = vmatmul.bf16.gmra.mxu3 %v2574_v53  ;;  %v2372_v53 = vadd.f32 %v8701_v8, %v8044_v23 }
 0xc1f   :  { %v986_v39 = vadd.f32 %v8945_v37, %v985_v15  ;;  %v2162_v21 = vpop.f32.mrf.mxu1 }
 0xc20   :  { %v4775_v31 = vadd.f32 %v4774_v27, %v4608_v33  ;;  %v1648_v33 = vunpack.c.l.b16 %v1242_v16  ;;  %v2163_v7 = vadd.f32 %v2162_v21, %v7731_v59 }
 0xc21   :  { %v1115_v34 = vmax.f32 %v986_v39, 0.0 }
 0xc23   :  { %3523 = vmax.xlane.f32.xlu2 %v3522_v62  ;;  %v1243_v27 = vpack.c.bf16 %v1115_v34, %v1115_v34  ;;  %v7053_v25 = vpack.c.bf16 %v1115_v34, %v1114_v6  ;;  %v6020_v6 = vmul.f32 %v9042_v40, %v9000_v5  ;;  %v9250_v34 = vpop.f32.mrf.mxu2 }
 0xc24   :  { %v4190_v62 = vpop.permute.xlu2 %4189 }
 0xc25   :  { %7117 = vst [vmem:[#allocation9 + $0x1f8] sm:$0xff] %v7053_v25   ;;  %v1649_v37 = vunpack.c.l.b16 %v1243_v27  ;;  %v4610_v42 = vmul.f32 %v4190_v62, %v2372_v53  ;;  %v2918_v27 = vpop.f32.mrf.mxu3  ;;  %v6049_v8 = vsel %vm6030_vm2, %v6020_v6, 0.0 }
 0xc26   :  { %6240 = dma.vmem_to_hbm [thread:$0]  %s6233_s21, 8192, %s6235_s2, [#allocation10], %s7590_s23, %s7590_s23, %s7591_s24  }
 0xc27   :  { %v1713_v39 = vpack.c.b16 %v1649_v37, %v1648_v33  ;;  %v2164_v25 = vpop.f32.mrf.mxu1 }
 0xc28   :  { %v2165_v1 = vadd.f32 %v2164_v25, %v7731_v59 }
 0xc2a   :  { %2181 = vmatmul.bf16.gmra.mxu1 %v1713_v39  ;;  %v2575_v33 = vpack.c.bf16 %v2165_v1, %v2163_v7 }
 0xc2b   :  { %3613 = vadd.xlane.f32.xlu2 %v3612_v30  ;;  %v4184_v18 = vpop.permute.xlu1 %4183  ;;  %2510 = vmatmul.bf16.gmra.mxu2 %v1713_v39 }
 0xc2c   :  { %v4609_v15 = vmul.f32 %v4184_v18, %v2369_v58 }
 0xc2e   :  { %v4776_v16 = vadd.f32 %v4775_v31, %v4609_v15  ;;  %3389 = vxpose.xlu1.b32.start [1/8] (short) (narrow) %v2913_v9, 8  ;;  %2947 = vmatmul.bf16.gmra.mxu3 %v2575_v33  ;;  %v2920_v9 = vpop.f32.mrf.mxu3 }
 0xc30   :  { %v4777_v30 = vadd.f32 %v4776_v16, %v4610_v42  ;;  %v5728_v16 = vmul.f32 %v9165_v57, %v9228_v46 }
 0xc33   :  { %6050 = vadd.xlane.f32.xlu2 %v6049_v8 }
 0xc34   :  { %v5280_v5 = vpop.permute.xlu2 %5279 }
 0xc35   :  { %v5725_v42 = vmul.f32 %v5280_v5, %v9202_v17 }
 0xc36   :  { %3390 = vxpose.xlu1.b32.cont [2/8] (short) (narrow) %v2915_v38, 8  ;;  %v2923_v31 = vpop.f32.mrf.mxu3 }
 0xc3b   :  { %v5274_v40 = vpop.permute.xlu1 %5273 }
 0xc3c   :  { %v5724_v21 = vmul.f32 %v5274_v40, %v9198_v36 }
 0xc3e   :  { %3391 = vxpose.xlu1.b32.cont [3/8] (short) (narrow) %v2918_v27, 8  ;;  %v5892_v37 = vadd.f32 %v5725_v42, %v5724_v21  ;;  %v2925_v39 = vpop.f32.mrf.mxu3 }
 0xc44   :  { %v5292_v62 = vpop.permute.xlu2 %5291 }
 0xc45   :  { %v5727_v1 = vmul.f32 %v5292_v62, %v9222_v20 }
 0xc46   :  { %3392 = vxpose.xlu1.b32.cont [4/8] (short) (narrow) %v2920_v9, 8  ;;  %v2928_v36 = vpop.f32.mrf.mxu3 }
 0xc4b   :  { %4208 = vperm.xlu2 %7273, %v9064_v12   ;;  %v5286_v18 = vpop.permute.xlu1 %5285 }
 0xc4c   :  { %v5726_v15 = vmul.f32 %v5286_v18, %v9206_v29  ;;  %v10068_v29 = vld [vmem:[#allocation29_spill] sm:$0xff] }
 0xc4d   :  { %v2374_v20 = vadd.f32 %v10068_v29, %v8044_v23 }
 0xc4e   :  { %v5893_v38 = vadd.f32 %v5892_v37, %v5726_v15  ;;  %3393 = vxpose.xlu1.b32.cont [5/8] (short) (narrow) %v2923_v31, 8  ;;  %v2930_v5 = vpop.f32.mrf.mxu3 }
 0xc4f   :  { %v4611_v9 = vmul.f32 %v9157_v54, %v2374_v20 }
 0xc50   :  { %v5894_v6 = vadd.f32 %v5893_v38, %v5727_v1 }
 0xc51   :  { %v4778_v46 = vadd.f32 %v4777_v30, %v4611_v9 }
 0xc52   :  { %v5895_v7 = vadd.f32 %v5894_v6, %v5728_v16 }
 0xc53   :  { %7275 = vset.pattern.permute.xlu2 %v7922_v4  ;;  %v4779_v40 = vrot.slane %v4778_v46, 4 }
 0xc54   :  { %v5310_v17 = vpop.permute.xlu2 %5309 }
 0xc55   :  { %v5730_v8 = vmul.f32 %v5310_v17, %v2372_v53  ;;  %v4780_v31 = vadd.f32 %v4779_v40, %v4778_v46 }
 0xc56   :  { %3394 = vxpose.xlu1.b32.cont [6/8] (short) (narrow) %v2925_v39, 8 }
 0xc57   :  { %v4781_v42 = vrot.slane %v4780_v31, 2 }
 0xc59   :  { %v4782_v37 = vadd.f32 %v4781_v42, %v4780_v31 }
 0xc5b   :  { %4220 = vperm.xlu2 %7275, %v9064_v12   ;;  %v5304_v25 = vpop.permute.xlu1 %5303  ;;  %v4783_v30 = vrot.slane %v4782_v37, 1 }
 0xc5c   :  { %v5729_v27 = vmul.f32 %v5304_v25, %v2369_v58 }
 0xc5d   :  { %v4784_v38 = vadd.f32 %v4783_v30, %v4782_v37 }
 0xc5e   :  { %v5896_v33 = vadd.f32 %v5895_v7, %v5729_v27  ;;  %3395 = vxpose.xlu1.b32.cont [7/8] (short) (narrow) %v2928_v36, 8 }
 0xc60   :  { %v5897_v57 = vadd.f32 %v5896_v33, %v5730_v8 }
 0xc63   :  { %7277 = vset.pattern.permute.xlu2 %v7962_v32 }
 0xc66   :  { %3396 = vxpose.xlu1.b32.end [8/8] (short) (narrow) %v2930_v5, 8 }
 0xc6b   :  { %4238 = vperm.xlu2 %7277, %v9064_v12   ;;  %v5316_v21 = vpop.permute.xlu1 %5315 }
 0xc6c   :  { %v5731_v58 = vmul.f32 %v5316_v21, %v2374_v20 }
 0xc6e   :  { %v5898_v62 = vadd.f32 %v5897_v57, %v5731_v58 }
 0xc70   :  { %v5899_v18 = vrot.slane %v5898_v62, 4 }
 0xc72   :  { %v5900_v53 = vadd.f32 %v5899_v18, %v5898_v62 }
 0xc73   :  { %7279 = vset.pattern.permute.xlu2 %v7888_v2 }
 0xc74   :  { %v5901_v54 = vrot.slane %v5900_v53, 2 }
 0xc75   :  { %v2167_v16 = vpop.f32.mrf.mxu1 }
 0xc76   :  { %v5902_v15 = vadd.f32 %v5901_v54, %v5900_v53  ;;  %v2168_v7 = vadd.f32 %v2167_v16, %v7731_v59 }
 0xc78   :  { %v5903_v1 = vrot.slane %v5902_v15, 1 }
 0xc7a   :  { %v5904_v39 = vadd.f32 %v5903_v1, %v5902_v15 }
 0xc7b   :  { %5322 = vperm.xlu2 %7279, %v9082_v49  }
 0xc7c   :  { %v9272_v6 = vsel %vm5996_vm1, %v4784_v38, %v5904_v39 }
 0xc7d   :  { %v2169_v36 = vpop.f32.mrf.mxu1 }
 0xc7e   :  { %v2170_v17 = vadd.f32 %v2169_v36, %v7731_v59 }
 0xc7f   :  { %v2933_v37 = vpop.f32.mrf.mxu3 }
 0xc80   :  { %v2576_v25 = vpack.c.bf16 %v2170_v17, %v2168_v7  ;;  %v5329_v17 = vpop.permute.xlu0 %5328 }
 0xc82   :  { %2952 = vmatmul.bf16.gmra.mxu3 %v2576_v25  ;;  %v2377_v25 = vadd.f32 %v8716_v19, %v8044_v23 }
 0xc83   :  { %7282 = vset.pattern.permute.xlu2 %v7922_v4 }
 0xc87   :  { %v2172_v27 = vpop.f32.mrf.mxu1  ;;  %v2935_v38 = vpop.f32.mrf.mxu3 }
 0xc88   :  { %v2173_v29 = vadd.f32 %v2172_v27, %v7731_v59  ;;  %v2379_v27 = vadd.f32 %v8725_v45, %v8044_v23 }
 0xc8b   :  { %5340 = vperm.xlu2 %7282, %v9082_v49  }
 0xc8f   :  { %v2174_v20 = vpop.f32.mrf.mxu1 }
 0xc90   :  { %v2175_v8 = vadd.f32 %v2174_v20, %v7731_v59  ;;  %v5733_v20 = vmul.f32 %v5329_v17, %v2379_v27 }
 0xc91   :  { %v2938_v16 = vpop.f32.mrf.mxu3 }
 0xc92   :  { %v2577_v9 = vpack.c.bf16 %v2175_v8, %v2173_v29 }
 0xc93   :  { %7284 = vset.pattern.permute.xlu2 %v7931_v60 }
 0xc94   :  { %2957 = vmatmul.bf16.gmra.mxu3 %v2577_v9 }
 0xc96   :  { %v3524_v33 = vpop.xlane.xlu2 %3523 }
 0xc97   :  { %v2177_v57 = vpop.f32.mrf.mxu1 }
 0xc98   :  { %v2178_v5 = vadd.f32 %v2177_v57, %v7731_v59 }
 0xc99   :  { %v2940_v36 = vpop.f32.mrf.mxu3 }
 0xc9b   :  { %5352 = vperm.xlu2 %7284, %v9082_v49  }
 0xc9e   :  { %v3614_v46 = vpop.xlane.xlu2 %3613 }
 0xc9f   :  { %7429 = vrcp.f32 %v3614_v46  ;;  %v2179_v40 = vpop.f32.mrf.mxu1  ;;  %v3546_v46 = vsub.f32 %v9144_v51, %v3524_v33  ;;  %v9331_v33 = vpop.permute.xlu0 %5358 }
 0xca0   :  { %v2180_v21 = vadd.f32 %v2179_v40, %v7731_v59 }
 0xca1   :  { %v2943_v57 = vpop.f32.mrf.mxu3  ;;  %v3574_v40 = vmul.f32 1.442695, %v3546_v46 }
 0xca2   :  { %v2578_v42 = vpack.c.bf16 %v2180_v21, %v2178_v5 }
 0xca3   :  { %7431 = vpow2.f32 %v3574_v40 }
 0xca4   :  { %2962 = vmatmul.bf16.gmra.mxu3 %v2578_v42 }
 0xca5   :  { %v7430_v31 = vpop.eup %7429 }
 0xca6   :  { %v9285_v58 = vmul.f32 %v7430_v31, %v9240_v44  ;;  %v9291_v53 = vpop.xlane.xlu2 %6050 }
 0xca7   :  { %v2182_v18 = vpop.f32.mrf.mxu1 }
 0xca8   :  { %v9288_v62 = vperm.slane %v9285_v58, 0  ;;  %v2183_v54 = vadd.f32 %v2182_v18, %v7731_v59  ;;  %v9305_v7 = vperm.slane %v9285_v58, 1 }
 0xca9   :  { %v2945_v5 = vpop.f32.mrf.mxu3  ;;  %v9322_v45 = vpop.eup %7431 }
 0xcaa   :  { %4257 = vperm.xlu0 %7288, %v9288_v62   ;;  %v3618_v31 = vsel %vm3485_vm0, %v9322_v45, 0.0 }
 0xcae   :  { %v9298_v1 = vpop.permute.xlu2 %4208 }
 0xcaf   :  { %v2184_v15 = vpop.f32.mrf.mxu1 }
 0xcb0   :  { %v2185_v30 = vadd.f32 %v2184_v15, %v7731_v59  ;;  %v9342_v15 = vadd.f32 %v8986_v63, %v8044_v23  ;;  %v2382_v63 = vadd.f32 %v8735_v47, %v8044_v23 }
 0xcb1   :  { %v2948_v19 = vpop.f32.mrf.mxu3 }
 0xcb2   :  { %7293 = vset.pattern.permute.xlu0 %v7962_v32  ;;  %v2579_v44 = vpack.c.bf16 %v2185_v30, %v2183_v54 }
 0xcb4   :  { %2967 = vmatmul.bf16.gmra.mxu3 %v2579_v44 }
 0xcb6   :  { %v9302_v39 = vpop.permute.xlu2 %4220 }
 0xcb9   :  { %7272 = vset.pattern.permute.xlu1 %v7888_v2  ;;  %v2950_v21 = vpop.f32.mrf.mxu3 }
 0xcba   :  { %4287 = vperm.xlu0 %7293, %v9288_v62  }
 0xcc1   :  { %3421 = vxpose.xlu2.b32.start [1/8] (short) (narrow) %v2933_v37, 8  ;;  %4202 = vperm.xlu1 %7272, %v9064_v12  }
 0xcc2   :  { %7298 = vset.pattern.permute.xlu0 %v7922_v4 }
 0xcc5   :  { %v9309_v59 = vpop.permute.xlu2 %4238 }
 0xcc9   :  { %3422 = vxpose.xlu2.b32.cont [2/8] (short) (narrow) %v2935_v38, 8  ;;  %7274 = vset.pattern.permute.xlu1 %v7945_v10 }
 0xcca   :  { %5389 = vperm.xlu0 %7298, %v9305_v7  }
 0xcd1   :  { %3423 = vxpose.xlu2.b32.cont [3/8] (short) (narrow) %v2938_v16, 8  ;;  %4214 = vperm.xlu1 %7274, %v9064_v12  }
 0xcd2   :  { %v9347_v38 = vpop.trf.xlu1 }
 0xcd5   :  { %v5323_v29 = vpop.permute.xlu2 %5322 }
 0xcd6   :  { %v5732_v8 = vmul.f32 %v5323_v29, %v2377_v25  ;;  %v3545_v29 = vsub.f32 %v9030_v14, %v9168_v11  ;;  %v3525_v11 = vsel %vm3485_vm0, %v9347_v38, -inf }
 0xcd8   :  { %v9316_v9 = vadd.f32 %v5733_v20, %v5732_v8  ;;  %v4613_v20 = vmul.f32 %v9298_v1, %v2379_v27  ;;  %v3572_v40 = vmul.f32 1.442695, %v3545_v29  ;;  %v2394_v29 = vadd.f32 %v8807_v61, %v8044_v23 }
 0xcd9   :  { %3424 = vxpose.xlu2.b32.cont [4/8] (short) (narrow) %v2940_v36, 8  ;;  %7276 = vset.pattern.permute.xlu1 %v7931_v60 }
 0xcda   :  { %7433 = vpow2.f32 %v3572_v40 }
 0xce0   :  { %v9360_v1 = vpop.eup %7433 }
 0xce1   :  { %3425 = vxpose.xlu2.b32.cont [5/8] (short) (narrow) %v2943_v57, 8  ;;  %4232 = vperm.xlu1 %7276, %v9064_v12   ;;  %v2384_v57 = vadd.f32 %v8756_v43, %v8044_v23  ;;  %v2389_v43 = vadd.f32 %v8791_v35, %v8044_v23  ;;  %v3615_v27 = vsel %vm3485_vm0, %v9360_v1, 0.0 }
 0xce9   :  { %3426 = vxpose.xlu2.b32.cont [6/8] (short) (narrow) %v2945_v5, 8  ;;  %7278 = vset.pattern.permute.xlu1 %v7971_v41 }
 0xcf1   :  { %3427 = vxpose.xlu2.b32.cont [7/8] (short) (narrow) %v2948_v19, 8  ;;  %4244 = vperm.xlu1 %7278, %v9064_v12   ;;  %v9334_v12 = vpop.xlane.xlu0 %6053  ;;  %v4615_v19 = vmul.f32 %v9302_v39, %v2384_v57 }
 0xcf4   :  { %3619 = vadd.xlane.f32.xlu0 %v3618_v31 }
 0xcf9   :  { %3428 = vxpose.xlu2.b32.end [8/8] (short) (narrow) %v2950_v21, 8  ;;  %7281 = vset.pattern.permute.xlu1 %v7945_v10 }
 0xd01   :  { %5334 = vperm.xlu1 %7281, %v9082_v49  }
 0xd05   :  { %v2953_v51 = vpop.f32.mrf.mxu3 }
 0xd09   :  { %7283 = vset.pattern.permute.xlu1 %v8009_v22 }
 0xd0d   :  { %v2955_v42 = vpop.f32.mrf.mxu3 }
 0xd11   :  { %5346 = vperm.xlu1 %7283, %v9082_v49  }
 0xd17   :  { %v2958_v18 = vpop.f32.mrf.mxu3 }
 0xd19   :  { %7286 = vset.pattern.permute.xlu1 %v7971_v41 }
 0xd1c   :  { %v9337_v37 = vpop.permute.xlu0 %4257 }
 0xd1d   :  { %3453 = vxpose.xlu0.b32.start [1/8] (short) (narrow) %v2953_v51, 8  ;;  %v2392_v51 = vadd.f32 %v8796_v26, %v8044_v23 }
 0xd1f   :  { %v2960_v54 = vpop.f32.mrf.mxu3 }
 0xd21   :  { %5364 = vperm.xlu1 %7286, %v9082_v49  }
 0xd25   :  { %3454 = vxpose.xlu0.b32.cont [2/8] (short) (narrow) %v2955_v42, 8 }
 0xd27   :  { %v2963_v16 = vpop.f32.mrf.mxu3 }
 0xd29   :  { %7289 = vset.pattern.permute.xlu1 %v7945_v10 }
 0xd2c   :  { %v4288_v30 = vpop.permute.xlu0 %4287 }
 0xd2d   :  { %v9345_v44 = vmul.f32 %v4288_v30, %v9342_v15  ;;  %3455 = vxpose.xlu0.b32.cont [3/8] (short) (narrow) %v2958_v18, 8 }
 0xd2f   :  { %v2965_v36 = vpop.f32.mrf.mxu3 }
 0xd33   :  { %v4203_v49 = vpop.permute.xlu1 %4202 }
 0xd34   :  { %v4612_v17 = vmul.f32 %v4203_v49, %v2377_v25 }
 0xd35   :  { %3456 = vxpose.xlu0.b32.cont [4/8] (short) (narrow) %v2960_v54, 8 }
 0xd36   :  { %v4785_v46 = vadd.f32 %v4613_v20, %v4612_v17 }
 0xd37   :  { %v2968_v14 = vpop.f32.mrf.mxu3 }
 0xd3d   :  { %3457 = vxpose.xlu0.b32.cont [5/8] (short) (narrow) %v2963_v16, 8 }
 0xd3f   :  { %v2970_v39 = vpop.f32.mrf.mxu3 }
 0xd43   :  { %v4215_v8 = vpop.permute.xlu1 %4214 }
 0xd44   :  { %v4614_v5 = vmul.f32 %v4215_v8, %v2382_v63 }
 0xd45   :  { %3458 = vxpose.xlu0.b32.cont [6/8] (short) (narrow) %v2965_v36, 8 }
 0xd46   :  { %v4786_v31 = vadd.f32 %v4785_v46, %v4614_v5  ;;  %v5738_v5 = vmul.f32 %v9331_v33, %v2392_v51 }
 0xd48   :  { %v4787_v25 = vadd.f32 %v4786_v31, %v4615_v19 }
 0xd4a   :  { %v4788_v47 = vadd.f32 %v4787_v25, %v9184_v0  ;;  %v4618_v0 = vmul.f32 %v9309_v59, %v2392_v51  ;;  %v5341_v59 = vpop.permute.xlu2 %5340 }
 0xd4b   :  { %3526 = vmax.xlane.f32.xlu1 %v3525_v11  ;;  %v5735_v49 = vmul.f32 %v5341_v59, %v2384_v57 }
 0xd4d   :  { %3459 = vxpose.xlu0.b32.cont [7/8] (short) (narrow) %v2968_v14, 8 }
 0xd52   :  { %v5353_v36 = vpop.permute.xlu2 %5352 }
 0xd53   :  { %3616 = vadd.xlane.f32.xlu1 %v3615_v27  ;;  %v4233_v21 = vpop.permute.xlu1 %4232  ;;  %v5737_v8 = vmul.f32 %v5353_v36, %v2389_v43 }
 0xd54   :  { %v4617_v42 = vmul.f32 %v4233_v21, %v2389_v43 }
 0xd55   :  { %3460 = vxpose.xlu0.b32.end [8/8] (short) (narrow) %v2970_v39, 8 }
 0xd56   :  { %v4789_v18 = vadd.f32 %v4788_v47, %v4617_v42 }
 0xd58   :  { %v4790_v54 = vadd.f32 %v4789_v18, %v4618_v0 }
 0xd5a   :  { %v9398_v18 = vpop.trf.xlu2 }
 0xd5b   :  { %7287 = vset.pattern.permute.xlu2 %v7888_v2 }
 0xd63   :  { %4251 = vperm.xlu2 %7287, %v9288_v62   ;;  %v4245_v35 = vpop.permute.xlu1 %4244 }
 0xd6b   :  { %7290 = vset.pattern.permute.xlu2 %v7922_v4 }
 0xd6c   :  { %4263 = vperm.xlu1 %7289, %v9288_v62  }
 0xd73   :  { %4269 = vperm.xlu2 %7290, %v9288_v62   ;;  %v5335_v30 = vpop.permute.xlu1 %5334 }
 0xd74   :  { %v5734_v16 = vmul.f32 %v5335_v30, %v2382_v63  ;;  %7291 = vset.pattern.permute.xlu1 %v8009_v22 }
 0xd76   :  { %v5906_v26 = vadd.f32 %v9316_v9, %v5734_v16  ;;  %v4619_v9 = vmul.f32 %v4245_v35, %v2394_v29  ;;  %v9406_v35 = vadd.f32 %v8948_v13, %v8044_v23  ;;  %v3703_v13 = vrot.slane %v9285_v58, 4 }
 0xd78   :  { %v5907_v20 = vadd.f32 %v5906_v26, %v5735_v49  ;;  %v4791_v19 = vadd.f32 %v4790_v54, %v4619_v9  ;;  %v2397_v54 = vadd.f32 %v8938_v55, %v8044_v23  ;;  %v4621_v16 = vmul.f32 %v9337_v37, %v9406_v35 }
 0xd79   :  { %v3704_v37 = vsel %vm3663_vm3, %v3703_v13, %v9010_v52  ;;  %v10070_v52 = vld [vmem:[#allocation33_spill] sm:$0xff] }
 0xd7a   :  { %v4792_v31 = vrot.slane %v4791_v19, 4 }
 0xd7b   :  { %7292 = vset.pattern.permute.xlu2 %v7931_v60 }
 0xd7c   :  { %4275 = vperm.xlu1 %7291, %v9288_v62   ;;  %v4793_v25 = vadd.f32 %v4792_v31, %v4791_v19  ;;  %v2404_v19 = vadd.f32 %v10070_v52, %v8044_v23 }
 0xd7e   :  { %v4794_v11 = vrot.slane %v4793_v25, 2 }
 0xd80   :  { %v4795_v43 = vadd.f32 %v4794_v11, %v4793_v25 }
 0xd82   :  { %v4796_v39 = vrot.slane %v4795_v43, 1 }
 0xd83   :  { %4281 = vperm.xlu2 %7292, %v9288_v62   ;;  %v5347_v17 = vpop.permute.xlu1 %5346 }
 0xd84   :  { %v5736_v63 = vmul.f32 %v5347_v17, %v9178_v24  ;;  %7294 = vset.pattern.permute.xlu1 %v7971_v41  ;;  %v4797_v51 = vadd.f32 %v4796_v39, %v4795_v43  ;;  %v5390_v43 = vpop.permute.xlu0 %5389 }
 0xd86   :  { %v5908_v46 = vadd.f32 %v5907_v20, %v5736_v63 }
 0xd88   :  { %v5909_v40 = vadd.f32 %v5908_v46, %v5737_v8  ;;  %v3708_v8 = vperm.slane %v3704_v37, %v8318_v56 }
 0xd8a   :  { %v5910_v57 = vadd.f32 %v5909_v40, %v5738_v5 }
 0xd8b   :  { %7295 = vset.pattern.permute.xlu2 %v7888_v2 }
 0xd8c   :  { %4293 = vperm.xlu1 %7294, %v9288_v62  }
 0xd93   :  { %5371 = vperm.xlu2 %7295, %v9305_v7   ;;  %v5365_v61 = vpop.permute.xlu1 %5364 }
 0xd94   :  { %v5739_v24 = vmul.f32 %v5365_v61, %v2394_v29  ;;  %7296 = vset.pattern.permute.xlu1 %v7891_v3  ;;  %v9440_v61 = vld [vmem:[%s9966_s6] sm:$0x3] }
 0xd96   :  { %v5911_v14 = vadd.f32 %v5910_v57, %v5739_v24  ;;  %v6022_v24 = vmul.f32 %v9440_v61, %v9272_v6 }
 0xd98   :  { %v5912_v47 = vrot.slane %v5911_v14, 4 }
 0xd9a   :  { %v5913_v33 = vadd.f32 %v5912_v47, %v5911_v14  ;;  %v6055_v47 = vsel %vm6030_vm2, %v6022_v24, 0.0 }
 0xd9b   :  { %7297 = vset.pattern.permute.xlu2 %v7945_v10 }
 0xd9c   :  { %v5914_v27 = vrot.slane %v5913_v33, 2  ;;  %5377 = vperm.xlu1 %7296, %v9305_v7  }
 0xd9e   :  { %v5915_v62 = vadd.f32 %v5914_v27, %v5913_v33  ;;  %v3528_v33 = vsel %vm3485_vm0, %v9398_v18, -inf  ;;  %v10071_v27 = vld [vmem:[#allocation35_spill] sm:$0xff] }
 0xd9f   :  { %v2407_v39 = vadd.f32 %v10071_v27, %v8044_v23 }
 0xda0   :  { %v5916_v21 = vrot.slane %v5915_v62, 1 }
 0xda2   :  { %v5917_v42 = vadd.f32 %v5916_v21, %v5915_v62 }
 0xda3   :  { %5383 = vperm.xlu2 %7297, %v9305_v7  }
 0xda4   :  { %7299 = vset.pattern.permute.xlu1 %v8009_v22  ;;  %v9393_v0 = vsel %vm5996_vm1, %v4797_v51, %v5917_v42  ;;  %v10072_v51 = vld [vmem:[#allocation36_spill] sm:$0xff] }
 0xda5   :  { %v2409_v42 = vadd.f32 %v10072_v51, %v8044_v23 }
 0xdab   :  { %7300 = vset.pattern.permute.xlu2 %v7931_v60 }
 0xdac   :  { %5395 = vperm.xlu1 %7299, %v9305_v7  }
 0xdb3   :  { %5401 = vperm.xlu2 %7300, %v9305_v7  }
 0xdb4   :  { %7301 = vset.pattern.permute.xlu1 %v7962_v32 }
 0xdbb   :  { %7302 = vset.pattern.permute.xlu2 %v7971_v41 }
 0xdbc   :  { %5407 = vperm.xlu1 %7301, %v9305_v7  }
 0xdbd   :  { %v4252_v30 = vpop.permute.xlu2 %4251 }
 0xdbe   :  { %v4620_v26 = vmul.f32 %v4252_v30, %v2397_v54  ;;  %v9411_v59 = vpop.xlane.xlu1 %3526 }
 0xdc0   :  { %v4798_v49 = vadd.f32 %v4621_v16, %v4620_v26  ;;  %v3620_v16 = vpop.xlane.xlu0 %3619 }
 0xdc3   :  { %5413 = vperm.xlu2 %7302, %v9305_v7  }
 0xdc4   :  { %7304 = vset.pattern.permute.xlu1 %v7891_v3 }
 0xdc6   :  { %v3617_v36 = vpop.xlane.xlu1 %3616 }
 0xdc7   :  { %7435 = vrcp.f32 %v3617_v36 }
 0xdc8   :  { %7437 = vrcp.f32 %v3620_v16 }
 0xdcb   :  { %7303 = vset.pattern.permute.xlu2 %v7888_v2 }
 0xdcd   :  { %v7436_v55 = vpop.eup %7435  ;;  %v4270_v5 = vpop.permute.xlu2 %4269 }
 0xdce   :  { %v3657_v17 = vmul.f32 %v7436_v55, %v9360_v1  ;;  %v10069_v1 = vld [vmem:[#allocation32_spill] sm:$0xff]  ;;  %v4623_v31 = vmul.f32 %v4270_v5, %v2404_v19  ;;  %v7438_v13 = vpop.eup %7437  ;;  %v5743_v5 = vmul.f32 %v5390_v43, %v2404_v19 }
 0xdcf   :  { %v2402_v46 = vadd.f32 %v10069_v1, %v8044_v23 }
 0xdd0   :  { %v3709_v29 = vrot.slane %v3657_v17, 4  ;;  %v9418_v20 = vperm.slane %v3657_v17, 0 }
 0xdd2   :  { %4318 = vperm.xlu0 %7298, %v9418_v20   ;;  %v3710_v7 = vsel %vm3663_vm3, %v3709_v29, %v9058_v28  ;;  %v9435_v28 = vperm.slane %v3657_v17, 1  ;;  %v9457_v17 = vmul.f32 %v7438_v13, %v9322_v45 }
 0xdd3   :  { %v3714_v63 = vperm.slane %v3710_v7, %v8318_v56 }
 0xdd5   :  { %v3727_v9 = vrot.slane %v3714_v63, 4 }
 0xdd7   :  { %v9428_v58 = vsel %vm3663_vm3, %v3727_v9, %v3708_v8  ;;  %v9463_v9 = vperm.slane %v9457_v17, 0 }
 0xdda   :  { %7310 = vset.pattern.permute.xlu0 %v7888_v2 }
 0xddd   :  { %v4282_v14 = vpop.permute.xlu2 %4281 }
 0xdde   :  { %v4264_v40 = vpop.permute.xlu1 %4263  ;;  %v4625_v26 = vmul.f32 %v4282_v14, %v2409_v42 }
 0xddf   :  { %v4622_v57 = vmul.f32 %v4264_v40, %v2402_v46 }
 0xde1   :  { %v4799_v25 = vadd.f32 %v4798_v49, %v4622_v57 }
 0xde2   :  { %5420 = vperm.xlu0 %7310, %v9435_v28  }
 0xde3   :  { %v4800_v11 = vadd.f32 %v4799_v25, %v4623_v31 }
 0xde6   :  { %6056 = vadd.xlane.f32.xlu1 %v6055_v47 }
 0xdea   :  { %7315 = vset.pattern.permute.xlu0 %v7931_v60 }
 0xdec   :  { %3529 = vmax.xlane.f32.xlu2 %v3528_v33 }
 0xded   :  { %v5372_v62 = vpop.permute.xlu2 %5371 }
 0xdee   :  { %v5740_v21 = vmul.f32 %v5372_v62, %v2397_v54  ;;  %v4276_v6 = vpop.permute.xlu1 %4275  ;;  %v10073_v54 = vld [vmem:[#allocation15_spill] sm:$0xff] }
 0xdef   :  { %v4624_v30 = vmul.f32 %v4276_v6, %v2407_v39  ;;  %v2414_v29 = vadd.f32 %v10073_v54, %v8044_v23 }
 0xdf1   :  { %v4801_v49 = vadd.f32 %v4800_v11, %v4624_v30 }
 0xdf2   :  { %5450 = vperm.xlu0 %7315, %v9435_v28  }
 0xdf3   :  { %v4802_v36 = vadd.f32 %v4801_v49, %v4625_v26 }
 0xdf5   :  { %v4803_v55 = vadd.f32 %v4802_v36, %v9345_v44 }
 0xdfa   :  { %7318 = vset.pattern.permute.xlu0 %v7888_v2 }
 0xdfd   :  { %v5384_v37 = vpop.permute.xlu2 %5383 }
 0xdfe   :  { %v5742_v7 = vmul.f32 %v5384_v37, %v2402_v46  ;;  %v4294_v63 = vpop.permute.xlu1 %4293 }
 0xdff   :  { %v4627_v8 = vmul.f32 %v4294_v63, %v2414_v29  ;;  %4306 = vperm.xlu1 %7304, %v9418_v20  }
 0xe01   :  { %v4804_v1 = vadd.f32 %v4803_v55, %v4627_v8 }
 0xe02   :  { %4349 = vperm.xlu0 %7318, %v9463_v9  }
 0xe03   :  { %v4805_v14 = vrot.slane %v4804_v1, 4 }
 0xe04   :  { %4300 = vperm.xlu2 %7303, %v9418_v20  }
 0xe05   :  { %v4806_v33 = vadd.f32 %v4805_v14, %v4804_v1  ;;  %v10078_v14 = vld [vmem:[#allocation41_spill] sm:$0xff] }
 0xe07   :  { %7306 = vset.pattern.permute.xlu1 %v8009_v22 }
 0xe0a   :  { %7323 = vset.pattern.permute.xlu0 %v7931_v60 }
 0xe0c   :  { %7305 = vset.pattern.permute.xlu2 %v7945_v10 }
 0xe0d   :  { %v5402_v57 = vpop.permute.xlu2 %5401 }
 0xe0e   :  { %v5378_v45 = vpop.permute.xlu1 %5377  ;;  %v5745_v24 = vmul.f32 %v5402_v57, %v2409_v42  ;;  %v10076_v57 = vld [vmem:[#allocation39_spill] sm:$0xff] }
 0xe0f   :  { %v5741_v44 = vmul.f32 %v5378_v45, %v9406_v35  ;;  %4324 = vperm.xlu1 %7306, %v9418_v20   ;;  %v9479_v35 = vperm.slane %v9457_v17, 1 }
 0xe11   :  { %v5918_v46 = vadd.f32 %v5741_v44, %v5740_v21  ;;  %v4807_v21 = vrot.slane %v4806_v33, 2 }
 0xe12   :  { %4379 = vperm.xlu0 %7323, %v9463_v9  }
 0xe13   :  { %v5919_v40 = vadd.f32 %v5918_v46, %v5742_v7  ;;  %v4808_v42 = vadd.f32 %v4807_v21, %v4806_v33 }
 0xe14   :  { %4312 = vperm.xlu2 %7305, %v9418_v20  }
 0xe15   :  { %v5920_v52 = vadd.f32 %v5919_v40, %v5743_v5  ;;  %v4809_v26 = vrot.slane %v4808_v42, 1  ;;  %v10075_v5 = vld [vmem:[#allocation40_spill] sm:$0xff] }
 0xe16   :  { %v2422_v40 = vadd.f32 %v10075_v5, %v8044_v23  ;;  %v6023_v5 = vmul.f32 %v9440_v61, %v9393_v0 }
 0xe17   :  { %7308 = vset.pattern.permute.xlu1 %v7962_v32  ;;  %v4810_v36 = vadd.f32 %v4809_v26, %v4808_v42 }
 0xe1a   :  { %7328 = vset.pattern.permute.xlu0 %v7945_v10 }
 0xe1c   :  { %7307 = vset.pattern.permute.xlu2 %v7931_v60 }
 0xe1d   :  { %v5414_v47 = vpop.permute.xlu2 %5413 }
 0xe1e   :  { %v5396_v31 = vpop.permute.xlu1 %5395 }
 0xe1f   :  { %v5744_v25 = vmul.f32 %v5396_v31, %v2407_v39  ;;  %4336 = vperm.xlu1 %7308, %v9418_v20   ;;  %v5747_v39 = vmul.f32 %v5414_v47, %v2414_v29  ;;  %v10074_v29 = vld [vmem:[#allocation38_spill] sm:$0xff]  ;;  %v2419_v31 = vadd.f32 %v10076_v57, %v8044_v23  ;;  %v2424_v47 = vadd.f32 %v10078_v14, %v8044_v23 }
 0xe20   :  { %v2417_v37 = vadd.f32 %v10074_v29, %v8044_v23 }
 0xe21   :  { %v5921_v19 = vadd.f32 %v5920_v52, %v5744_v25 }
 0xe22   :  { %5481 = vperm.xlu0 %7328, %v9479_v35  }
 0xe23   :  { %v5922_v11 = vadd.f32 %v5921_v19, %v5745_v24 }
 0xe24   :  { %4330 = vperm.xlu2 %7307, %v9418_v20  }
 0xe27   :  { %7311 = vset.pattern.permute.xlu1 %v7891_v3 }
 0xe2a   :  { %7333 = vset.pattern.permute.xlu0 %v7971_v41 }
 0xe2c   :  { %7309 = vset.pattern.permute.xlu2 %v7971_v41 }
 0xe2e   :  { %v5408_v43 = vpop.permute.xlu1 %5407 }
 0xe2f   :  { %v5746_v27 = vmul.f32 %v5408_v43, %v9342_v15  ;;  %5426 = vperm.xlu1 %7311, %v9435_v28  }
 0xe31   :  { %v5923_v62 = vadd.f32 %v5922_v11, %v5746_v27 }
 0xe32   :  { %5511 = vperm.xlu0 %7333, %v9479_v35  }
 0xe33   :  { %v5924_v6 = vadd.f32 %v5923_v62, %v5747_v39 }
 0xe34   :  { %4342 = vperm.xlu2 %7309, %v9418_v20   ;;  %v9497_v20 = vpop.trf.xlu0 }
 0xe35   :  { %v5925_v51 = vrot.slane %v5924_v6, 4  ;;  %v3531_v21 = vsel %vm3485_vm0, %v9497_v20, -inf }
 0xe37   :  { %v5926_v30 = vadd.f32 %v5925_v51, %v5924_v6  ;;  %7313 = vset.pattern.permute.xlu1 %v7922_v4  ;;  %v3547_v51 = vsub.f32 %v9347_v38, %v9411_v59  ;;  %v10081_v59 = vld [vmem:[#allocation34_spill] sm:$0xff] }
 0xe39   :  { %v5927_v16 = vrot.slane %v5926_v30, 2  ;;  %v3576_v42 = vmul.f32 1.442695, %v3547_v51 }
 0xe3a   :  { %7336 = vset.pattern.permute.xlu0 %v7945_v10 }
 0xe3b   :  { %v5928_v15 = vadd.f32 %v5927_v16, %v5926_v30  ;;  %v10079_v30 = vld [vmem:[#allocation42_spill] sm:$0xff]  ;;  %7439 = vpow2.f32 %v3576_v42 }
 0xe3c   :  { %7312 = vset.pattern.permute.xlu2 %v7945_v10  ;;  %v2427_v16 = vadd.f32 %v10079_v30, %v8044_v23 }
 0xe3d   :  { %v5929_v49 = vrot.slane %v5928_v15, 1 }
 0xe3f   :  { %5438 = vperm.xlu1 %7313, %v9435_v28   ;;  %v5930_v55 = vadd.f32 %v5929_v49, %v5928_v15  ;;  %v10080_v49 = vld [vmem:[#allocation44_spill] sm:$0xff] }
 0xe41   :  { %v9495_v13 = vsel %vm5996_vm1, %v4810_v36, %v5930_v55  ;;  %v2429_v36 = vadd.f32 %v10080_v49, %v8044_v23 }
 0xe44   :  { %5432 = vperm.xlu2 %7312, %v9435_v28   ;;  %v4319_v54 = vpop.permute.xlu0 %4318 }
 0xe45   :  { %v4631_v39 = vmul.f32 %v4319_v54, %v2424_v47 }
 0xe47   :  { %7316 = vset.pattern.permute.xlu1 %v7962_v32 }
 0xe4c   :  { %7314 = vset.pattern.permute.xlu2 %v8009_v22 }
 0xe4f   :  { %5456 = vperm.xlu1 %7316, %v9435_v28  }
 0xe54   :  { %5444 = vperm.xlu2 %7314, %v9435_v28   ;;  %v5421_v7 = vpop.permute.xlu0 %5420 }
 0xe55   :  { %v5748_v63 = vmul.f32 %v5421_v7, %v2417_v37  ;;  %v9537_v7 = vpop.eup %7439 }
 0xe56   :  { %v3621_v38 = vsel %vm3485_vm0, %v9537_v7, 0.0 }
 0xe57   :  { %7319 = vset.pattern.permute.xlu1 %v7891_v3 }
 0xe59   :  { %v9511_v44 = vpop.xlane.xlu1 %6056 }
 0xe5c   :  { %7317 = vset.pattern.permute.xlu2 %v7971_v41 }
 0xe5f   :  { %v9508_v8 = vpop.xlane.xlu2 %3529 }
 0xe64   :  { %5462 = vperm.xlu2 %7317, %v9435_v28   ;;  %v9513_v46 = vpop.permute.xlu0 %5450  ;;  %v10077_v28 = vld [vmem:[#allocation18_spill] sm:$0xff] }
 0xe65   :  { %v9522_v11 = vadd.f32 %v10077_v28, %v8044_v23  ;;  %v9552_v28 = vadd.f32 %v9172_v48, %v8044_v23 }
 0xe67   :  { %v4301_v1 = vpop.permute.xlu2 %4300 }
 0xe68   :  { %v4628_v45 = vmul.f32 %v4301_v1, %v2417_v37 }
 0xe6c   :  { %7320 = vset.pattern.permute.xlu2 %v7945_v10 }
 0xe6f   :  { %v4313_v52 = vpop.permute.xlu2 %4312 }
 0xe70   :  { %v4630_v25 = vmul.f32 %v4313_v52, %v2422_v40 }
 0xe71   :  { %v4307_v24 = vpop.permute.xlu1 %4306 }
 0xe72   :  { %v4629_v19 = vmul.f32 %v4307_v24, %v2419_v31 }
 0xe74   :  { %v4811_v43 = vadd.f32 %v4629_v19, %v4628_v45  ;;  %v4350_v33 = vpop.permute.xlu0 %4349  ;;  %v2432_v45 = vadd.f32 %v10081_v59, %v8044_v23 }
 0xe75   :  { %v9527_v27 = vmul.f32 %v4350_v33, %v9522_v11  ;;  %v6058_v33 = vsel %vm6030_vm2, %v6023_v5, 0.0 }
 0xe76   :  { %v4812_v62 = vadd.f32 %v4811_v43, %v4630_v25  ;;  %v10082_v25 = vld [vmem:[#allocation17_spill] sm:$0xff] }
 0xe77   :  { %v2434_v24 = vadd.f32 %v10082_v25, %v8044_v23 }
 0xe78   :  { %v4813_v6 = vadd.f32 %v4812_v62, %v4631_v39 }
 0xe79   :  { %3532 = vmax.xlane.f32.xlu1 %v3531_v21 }
 0xe7e   :  { %v4331_v26 = vpop.permute.xlu2 %4330 }
 0xe7f   :  { %v4633_v54 = vmul.f32 %v4331_v26, %v2429_v36 }
 0xe81   :  { %v4325_v15 = vpop.permute.xlu1 %4324 }
 0xe82   :  { %v4632_v55 = vmul.f32 %v4325_v15, %v2427_v16 }
 0xe84   :  { %v4814_v29 = vadd.f32 %v4813_v6, %v4632_v55  ;;  %v9539_v1 = vpop.permute.xlu0 %4379 }
 0xe86   :  { %v4815_v37 = vadd.f32 %v4814_v29, %v4633_v54 }
 0xe8d   :  { %3622 = vadd.xlane.f32.xlu2 %v3621_v38 }
 0xe8e   :  { %v4343_v52 = vpop.permute.xlu2 %4342 }
 0xe8f   :  { %v4635_v14 = vmul.f32 %v4343_v52, %v2434_v24 }
 0xe91   :  { %v4337_v57 = vpop.permute.xlu1 %4336 }
 0xe92   :  { %v4634_v19 = vmul.f32 %v4337_v57, %v2432_v45  ;;  %4355 = vperm.xlu1 %7319, %v9463_v9  }
 0xe94   :  { %v4816_v43 = vadd.f32 %v4815_v37, %v4634_v19  ;;  %v5482_v39 = vpop.permute.xlu0 %5481 }
 0xe95   :  { %6059 = vadd.xlane.f32.xlu2 %v6058_v33  ;;  %v9556_v0 = vmul.f32 %v5482_v39, %v9552_v28 }
 0xe96   :  { %v4817_v62 = vadd.f32 %v4816_v43, %v4635_v14 }
 0xe9a   :  { %7321 = vset.pattern.permute.xlu1 %v7922_v4 }
 0xe9e   :  { %v5433_v21 = vpop.permute.xlu2 %5432 }
 0xe9f   :  { %v5750_v6 = vmul.f32 %v5433_v21, %v2422_v40  ;;  %v5753_v40 = vmul.f32 %v9513_v46, %v2429_v36 }
 0xea1   :  { %v5427_v51 = vpop.permute.xlu1 %5426 }
 0xea2   :  { %v5749_v42 = vmul.f32 %v5427_v51, %v2419_v31  ;;  %4367 = vperm.xlu1 %7321, %v9463_v9   ;;  %v10083_v51 = vld [vmem:[#allocation19_spill] sm:$0xff] }
 0xea4   :  { %v5931_v48 = vadd.f32 %v5749_v42, %v5748_v63  ;;  %v4818_v63 = vrot.slane %v4817_v62, 4  ;;  %v2439_v42 = vadd.f32 %v10083_v51, %v8044_v23 }
 0xea6   :  { %v5932_v30 = vadd.f32 %v5931_v48, %v5750_v6  ;;  %v4819_v59 = vadd.f32 %v4818_v63, %v4817_v62  ;;  %v10084_v63 = vld [vmem:[#allocation21_spill] sm:$0xff] }
 0xea8   :  { %v4820_v52 = vrot.slane %v4819_v59, 2 }
 0xeaa   :  { %7324 = vset.pattern.permute.xlu1 %v7962_v32  ;;  %v4821_v36 = vadd.f32 %v4820_v52, %v4819_v59 }
 0xeac   :  { %v4822_v14 = vrot.slane %v4821_v36, 1 }
 0xead   :  { %4361 = vperm.xlu2 %7320, %v9463_v9  }
 0xeae   :  { %v5445_v26 = vpop.permute.xlu2 %5444 }
 0xeaf   :  { %v5752_v15 = vmul.f32 %v5445_v26, %v2427_v16 }
 0xeb1   :  { %v5439_v49 = vpop.permute.xlu1 %5438 }
 0xeb2   :  { %v5751_v55 = vmul.f32 %v5439_v49, %v2424_v47  ;;  %4385 = vperm.xlu1 %7324, %v9463_v9  }
 0xeb4   :  { %v5933_v54 = vadd.f32 %v5932_v30, %v5751_v55 }
 0xeb5   :  { %7322 = vset.pattern.permute.xlu2 %v8009_v22 }
 0xeb6   :  { %v5934_v31 = vadd.f32 %v5933_v54, %v5752_v15 }
 0xeb8   :  { %v5935_v29 = vadd.f32 %v5934_v31, %v5753_v40 }
 0xeba   :  { %7326 = vset.pattern.permute.xlu1 %v7888_v2 }
 0xebd   :  { %4373 = vperm.xlu2 %7322, %v9463_v9  }
 0xebe   :  { %v5463_v37 = vpop.permute.xlu2 %5462 }
 0xebf   :  { %v5755_v47 = vmul.f32 %v5463_v37, %v2434_v24  ;;  %v2447_v37 = vadd.f32 %v10084_v63, %v8044_v23 }
 0xec1   :  { %v5457_v38 = vpop.permute.xlu1 %5456 }
 0xec2   :  { %v5754_v16 = vmul.f32 %v5457_v38, %v2432_v45  ;;  %5469 = vperm.xlu1 %7326, %v9479_v35   ;;  %v4823_v45 = vadd.f32 %v4822_v14, %v4821_v36 }
 0xec4   :  { %v5936_v5 = vadd.f32 %v5935_v29, %v5754_v16  ;;  %v10085_v16 = vld [vmem:[#allocation22_spill] sm:$0xff] }
 0xec5   :  { %7325 = vset.pattern.permute.xlu2 %v7971_v41 }
 0xec6   :  { %v5937_v57 = vadd.f32 %v5936_v5, %v5755_v47  ;;  %v2449_v47 = vadd.f32 %v10085_v16, %v8044_v23 }
 0xec8   :  { %v5938_v46 = vrot.slane %v5937_v57, 4 }
 0xeca   :  { %v5939_v25 = vadd.f32 %v5938_v46, %v5937_v57  ;;  %7329 = vset.pattern.permute.xlu1 %v7922_v4  ;;  %v10086_v57 = vld [vmem:[#allocation24_spill] sm:$0xff] }
 0xecb   :  { %v2452_v46 = vadd.f32 %v10086_v57, %v8044_v23 }
 0xecc   :  { %v5940_v19 = vrot.slane %v5939_v25, 2 }
 0xecd   :  { %4391 = vperm.xlu2 %7325, %v9463_v9   ;;  %v3548_v9 = vsub.f32 %v9398_v18, %v9508_v8 }
 0xece   :  { %v5941_v43 = vadd.f32 %v5940_v19, %v5939_v25 }
 0xecf   :  { %v3578_v21 = vmul.f32 1.442695, %v3548_v9 }
 0xed0   :  { %v5942_v33 = vrot.slane %v5941_v43, 1 }
 0xed2   :  { %5487 = vperm.xlu1 %7329, %v9479_v35   ;;  %v5943_v24 = vadd.f32 %v5942_v33, %v5941_v43 }
 0xed4   :  { %v9573_v39 = vsel %vm5996_vm1, %v4823_v45, %v5943_v24 }
 0xed5   :  { %7327 = vset.pattern.permute.xlu2 %v7891_v3 }
 0xeda   :  { %7331 = vset.pattern.permute.xlu1 %v7931_v60 }
 0xedd   :  { %5475 = vperm.xlu2 %7327, %v9479_v35  }
 0xee2   :  { %5499 = vperm.xlu1 %7331, %v9479_v35  }
 0xee5   :  { %7330 = vset.pattern.permute.xlu2 %v8009_v22 }
 0xeea   :  { %7334 = vset.pattern.permute.xlu1 %v7888_v2 }
 0xeec   :  { %v9585_v62 = vpop.xlane.xlu1 %3532 }
 0xeed   :  { %5493 = vperm.xlu2 %7330, %v9479_v35  }
 0xef5   :  { %7332 = vset.pattern.permute.xlu2 %v7962_v32 }
 0xefd   :  { %5505 = vperm.xlu2 %7332, %v9479_v35  }
 0xf00   :  { %v3623_v6 = vpop.xlane.xlu2 %3622 }
 0xf01   :  { %7441 = vrcp.f32 %v3623_v6  ;;  %v3549_v6 = vsub.f32 %v9497_v20, %v9585_v62 }
 0xf02   :  { %7443 = vpow2.f32 %v3578_v21 }
 0xf04   :  { %v4356_v48 = vpop.permute.xlu1 %4355 }
 0xf05   :  { %7335 = vset.pattern.permute.xlu2 %v7891_v3  ;;  %v4637_v30 = vmul.f32 %v4356_v48, %v2439_v42 }
 0xf07   :  { %v7442_v26 = vpop.eup %7441  ;;  %v4824_v15 = vadd.f32 %v4637_v30, %v9527_v27  ;;  %v2444_v27 = vadd.f32 %v9191_v50, %v8044_v23 }
 0xf08   :  { %v9592_v49 = vpop.eup %7443  ;;  %v9595_v18 = vmul.f32 %v7442_v26, %v9537_v7  ;;  %v9597_v35 = vpop.xlane.xlu2 %6059  ;;  %v3580_v26 = vmul.f32 1.442695, %v3549_v6 }
 0xf09   :  { %v3624_v55 = vsel %vm3485_vm0, %v9592_v49, 0.0 }
 0xf0a   :  { %v4393_v8 = vperm.slane %v9595_v18, 0  ;;  %v9617_v14 = vperm.slane %v9595_v18, 1  ;;  %7445 = vpow2.f32 %v3580_v26 }
 0xf0c   :  { %4410 = vperm.xlu0 %7336, %v4393_v8   ;;  %3625 = vadd.xlane.f32.xlu1 %v3624_v55 }
 0xf0d   :  { %4404 = vperm.xlu2 %7335, %v4393_v8  }
 0xf10   :  { %v4362_v54 = vpop.permute.xlu2 %4361  ;;  %v9633_v62 = vpop.eup %7445 }
 0xf11   :  { %v4638_v40 = vmul.f32 %v4362_v54, %v9552_v28  ;;  %v4641_v28 = vmul.f32 %v9539_v1, %v2449_v47 }
 0xf13   :  { %v4825_v31 = vadd.f32 %v4824_v15, %v4638_v40 }
 0xf14   :  { %7341 = vset.pattern.permute.xlu0 %v7971_v41  ;;  %v4368_v7 = vpop.permute.xlu1 %4367 }
 0xf15   :  { %7338 = vset.pattern.permute.xlu2 %v8009_v22  ;;  %v4639_v29 = vmul.f32 %v4368_v7, %v2444_v27 }
 0xf17   :  { %v4826_v38 = vadd.f32 %v4825_v31, %v4639_v29 }
 0xf18   :  { %v4374_v59 = vpop.permute.xlu2 %4373 }
 0xf19   :  { %v4640_v5 = vmul.f32 %v4374_v59, %v2447_v37 }
 0xf1b   :  { %v4827_v52 = vadd.f32 %v4826_v38, %v4640_v5 }
 0xf1c   :  { %4440 = vperm.xlu0 %7341, %v4393_v8  }
 0xf1d   :  { %4422 = vperm.xlu2 %7338, %v4393_v8   ;;  %v4828_v50 = vadd.f32 %v4827_v52, %v4641_v28 }
 0xf24   :  { %7346 = vset.pattern.permute.xlu0 %v8009_v22  ;;  %v4386_v36 = vpop.permute.xlu1 %4385 }
 0xf25   :  { %7340 = vset.pattern.permute.xlu2 %v7962_v32  ;;  %v4642_v25 = vmul.f32 %v4386_v36, %v2452_v46  ;;  %4398 = vperm.xlu1 %7334, %v4393_v8  }
 0xf27   :  { %v4829_v19 = vadd.f32 %v4828_v50, %v4642_v25  ;;  %v4392_v1 = vpop.permute.xlu2 %4391 }
 0xf2c   :  { %5542 = vperm.xlu0 %7346, %v9617_v14  }
 0xf2d   :  { %4434 = vperm.xlu2 %7340, %v4393_v8   ;;  %7337 = vset.pattern.permute.xlu1 %v7922_v4 }
 0xf34   :  { %v5470_v43 = vpop.permute.xlu1 %5469 }
 0xf35   :  { %7343 = vset.pattern.permute.xlu2 %v7891_v3  ;;  %v5756_v33 = vmul.f32 %v5470_v43, %v9522_v11  ;;  %4416 = vperm.xlu1 %7337, %v4393_v8  }
 0xf37   :  { %v5476_v45 = vpop.permute.xlu2 %5475 }
 0xf38   :  { %v5757_v24 = vmul.f32 %v5476_v45, %v2439_v42  ;;  %v2454_v42 = vadd.f32 %v9250_v34, %v8044_v23  ;;  %v3627_v34 = vsel %vm3485_vm0, %v9633_v62, 0.0 }
 0xf3a   :  { %v5944_v9 = vadd.f32 %v5757_v24, %v5756_v33  ;;  %v4643_v55 = vmul.f32 %v4392_v1, %v2454_v42  ;;  %v2456_v1 = vpop.f32.mrf.mxu2 }
 0xf3c   :  { %v5945_v21 = vadd.f32 %v5944_v9, %v9556_v0  ;;  %v4830_v20 = vadd.f32 %v4829_v19, %v4643_v55 }
 0xf3d   :  { %5524 = vperm.xlu2 %7343, %v9617_v14   ;;  %7339 = vset.pattern.permute.xlu1 %v7931_v60 }
 0xf3e   :  { %v4831_v54 = vrot.slane %v4830_v20, 4 }
 0xf40   :  { %v4832_v29 = vadd.f32 %v4831_v54, %v4830_v20 }
 0xf42   :  { %v4833_v59 = vrot.slane %v4832_v29, 2  ;;  %v2458_v43 = vpop.f32.mrf.mxu2 }
 0xf44   :  { %v5488_v51 = vpop.permute.xlu1 %5487  ;;  %v4834_v5 = vadd.f32 %v4833_v59, %v4832_v29 }
 0xf45   :  { %7345 = vset.pattern.permute.xlu2 %v7922_v4  ;;  %v5759_v48 = vmul.f32 %v5488_v51, %v2444_v27  ;;  %4428 = vperm.xlu1 %7339, %v4393_v8   ;;  %v5512_v27 = vpop.permute.xlu0 %5511 }
 0xf46   :  { %v4835_v50 = vrot.slane %v4834_v5, 1 }
 0xf47   :  { %v5946_v30 = vadd.f32 %v5945_v21, %v5759_v48  ;;  %v5494_v11 = vpop.permute.xlu2 %5493  ;;  %v9658_v48 = vadd.f32 %v2456_v1, %v8044_v23 }
 0xf48   :  { %v5760_v15 = vmul.f32 %v5494_v11, %v2447_v37  ;;  %v5763_v37 = vmul.f32 %v5512_v27, %v2454_v42 }
 0xf4a   :  { %v5947_v0 = vadd.f32 %v5946_v30, %v5760_v15  ;;  %v2461_v45 = vpop.f32.mrf.mxu2 }
 0xf4b   :  { %v9664_v11 = vadd.f32 %v2461_v45, %v8044_v23 }
 0xf4d   :  { %5536 = vperm.xlu2 %7345, %v9617_v14   ;;  %7342 = vset.pattern.permute.xlu1 %v7888_v2 }
 0xf52   :  { %v2463_v6 = vpop.f32.mrf.mxu2 }
 0xf54   :  { %v5500_v40 = vpop.permute.xlu1 %5499 }
 0xf55   :  { %7348 = vset.pattern.permute.xlu2 %v7962_v32  ;;  %v5761_v8 = vmul.f32 %v5500_v40, %v2449_v47  ;;  %5518 = vperm.xlu1 %7342, %v9617_v14  }
 0xf56   :  { %3628 = vadd.xlane.f32.xlu0 %v3627_v34 }
 0xf57   :  { %v5948_v31 = vadd.f32 %v5947_v0, %v5761_v8  ;;  %v5506_v7 = vpop.permute.xlu2 %5505  ;;  %v2464_v8 = vadd.f32 %v2463_v6, %v8044_v23 }
 0xf58   :  { %v5762_v63 = vmul.f32 %v5506_v7, %v2452_v46  ;;  %v4836_v46 = vadd.f32 %v4835_v50, %v4834_v5 }
 0xf5a   :  { %v5949_v38 = vadd.f32 %v5948_v31, %v5762_v63  ;;  %v2466_v26 = vpop.f32.mrf.mxu2 }
 0xf5b   :  { %v2467_v63 = vadd.f32 %v2466_v26, %v8044_v23 }
 0xf5c   :  { %v5950_v16 = vadd.f32 %v5949_v38, %v5763_v37 }
 0xf5d   :  { %5554 = vperm.xlu2 %7348, %v9617_v14   ;;  %7344 = vset.pattern.permute.xlu1 %v7945_v10 }
 0xf5e   :  { %v5951_v47 = vrot.slane %v5950_v16, 4 }
 0xf60   :  { %v5952_v28 = vadd.f32 %v5951_v47, %v5950_v16 }
 0xf62   :  { %v5953_v52 = vrot.slane %v5952_v28, 2  ;;  %v2468_v40 = vpop.f32.mrf.mxu2 }
 0xf63   :  { %v2469_v37 = vadd.f32 %v2468_v40, %v8044_v23 }
 0xf64   :  { %v5954_v57 = vadd.f32 %v5953_v52, %v5952_v28 }
 0xf65   :  { %5530 = vperm.xlu1 %7344, %v9617_v14   ;;  %7351 = vset.pattern.permute.xlu2 %v7891_v3 }
 0xf66   :  { %v5955_v36 = vrot.slane %v5954_v57, 1 }
 0xf67   :  { %v4405_v51 = vpop.permute.xlu2 %4404 }
 0xf68   :  { %v5956_v25 = vadd.f32 %v5955_v36, %v5954_v57 }
 0xf6a   :  { %v9644_v19 = vsel %vm5996_vm1, %v4836_v46, %v5956_v25  ;;  %v2471_v7 = vpop.f32.mrf.mxu2 }
 0xf6b   :  { %v9684_v5 = vadd.f32 %v2471_v7, %v8044_v23 }
 0xf6d   :  { %7347 = vset.pattern.permute.xlu1 %v7931_v60 }
 0xf72   :  { %v2473_v38 = vpop.f32.mrf.mxu2 }
 0xf73   :  { %v9687_v57 = vadd.f32 %v2473_v38, %v8044_v23 }
 0xf75   :  { %5548 = vperm.xlu1 %7347, %v9617_v14  }
 0xf77   :  { %v4423_v29 = vpop.permute.xlu2 %4422 }
 0xf78   :  { %v4648_v59 = vmul.f32 %v4423_v29, %v2467_v63 }
 0xf7d   :  { %7349 = vset.pattern.permute.xlu1 %v7971_v41 }
 0xf7f   :  { %v3626_v33 = vpop.xlane.xlu1 %3625 }
 0xf80   :  { %7447 = vrcp.f32 %v3626_v33 }
 0xf85   :  { %5560 = vperm.xlu1 %7349, %v9617_v14   ;;  %v9661_v14 = vadd.f32 %v2458_v43, %v8044_v23 }
 0xf86   :  { %v7448_v24 = vpop.eup %7447 }
 0xf87   :  { %v9651_v9 = vmul.f32 %v7448_v24, %v9592_v49  ;;  %v4411_v49 = vpop.permute.xlu0 %4410  ;;  %v4645_v15 = vmul.f32 %v4405_v51, %v9661_v14  ;;  %v4435_v16 = vpop.permute.xlu2 %4434 }
 0xf88   :  { %v4646_v55 = vmul.f32 %v4411_v49, %v9664_v11  ;;  %v4650_v36 = vmul.f32 %v4435_v16, %v9684_v5 }
 0xf89   :  { %v4442_v21 = vperm.slane %v9651_v9, 0  ;;  %v9669_v0 = vperm.slane %v9651_v9, 1  ;;  %v3715_v49 = vrot.slane %v9651_v9, 4 }
 0xf8b   :  { %4471 = vperm.xlu0 %7346, %v4442_v21   ;;  %4453 = vperm.xlu2 %7351, %v4442_v21  }
 0xf8d   :  { %7350 = vset.pattern.permute.xlu1 %v7888_v2 }
 0xf8f   :  { %v4441_v50 = vpop.permute.xlu0 %4440 }
 0xf90   :  { %v4651_v25 = vmul.f32 %v4441_v50, %v9687_v57 }
 0xf93   :  { %7358 = vset.pattern.permute.xlu0 %v7891_v3  ;;  %7353 = vset.pattern.permute.xlu2 %v7922_v4 }
 0xf95   :  { %4447 = vperm.xlu1 %7350, %v4442_v21  }
 0xf97   :  { %v4399_v30 = vpop.permute.xlu1 %4398  ;;  %v5525_v24 = vpop.permute.xlu2 %5524 }
 0xf98   :  { %v4644_v42 = vmul.f32 %v4399_v30, %v9658_v48  ;;  %v5765_v9 = vmul.f32 %v5525_v24, %v9661_v14 }
 0xf9a   :  { %v4837_v20 = vadd.f32 %v4645_v15, %v4644_v42  ;;  %v3716_v42 = vsel %vm3663_vm3, %v3715_v49, %v9457_v17 }
 0xf9b   :  { %5573 = vperm.xlu0 %7358, %v9669_v0   ;;  %4465 = vperm.xlu2 %7353, %v4442_v21  }
 0xf9c   :  { %v4838_v54 = vadd.f32 %v4837_v20, %v4646_v55 }
 0xf9d   :  { %7352 = vset.pattern.permute.xlu1 %v7945_v10 }
 0xf9e   :  { %v5543_v33 = vpop.permute.xlu0 %5542 }
 0xf9f   :  { %v5768_v17 = vmul.f32 %v5543_v33, %v2467_v63 }
 0xfa3   :  { %7362 = vset.pattern.permute.xlu0 %v7962_v32  ;;  %7355 = vset.pattern.permute.xlu2 %v7962_v32 }
 0xfa5   :  { %4459 = vperm.xlu1 %7352, %v4442_v21  }
 0xfa7   :  { %v4417_v34 = vpop.permute.xlu1 %4416  ;;  %v5537_v20 = vpop.permute.xlu2 %5536 }
 0xfa8   :  { %v4647_v27 = vmul.f32 %v4417_v34, %v2464_v8 }
 0xfaa   :  { %v4839_v31 = vadd.f32 %v4838_v54, %v4647_v27 }
 0xfab   :  { %5603 = vperm.xlu0 %7362, %v9669_v0   ;;  %4483 = vperm.xlu2 %7355, %v4442_v21  }
 0xfac   :  { %v4840_v52 = vadd.f32 %v4839_v31, %v4648_v59  ;;  %v5767_v31 = vmul.f32 %v5537_v20, %v2464_v8 }
 0xfad   :  { %7354 = vset.pattern.permute.xlu1 %v7931_v60 }
 0xfb3   :  { %7357 = vset.pattern.permute.xlu2 %v7888_v2  ;;  %7365 = vset.pattern.permute.xlu0 %v7891_v3 }
 0xfb5   :  { %4477 = vperm.xlu1 %7354, %v4442_v21  }
 0xfb7   :  { %v4429_v47 = vpop.permute.xlu1 %4428  ;;  %v5555_v38 = vpop.permute.xlu2 %5554 }
 0xfb8   :  { %v4649_v28 = vmul.f32 %v4429_v47, %v2469_v37 }
 0xfba   :  { %v4841_v46 = vadd.f32 %v4840_v52, %v4649_v28  ;;  %v5770_v28 = vmul.f32 %v5555_v38, %v9684_v5 }
 0xfbb   :  { %5567 = vperm.xlu2 %7357, %v9669_v0  }
 0xfbc   :  { %v4842_v1 = vadd.f32 %v4841_v46, %v4650_v36 }
 0xfbd   :  { %7356 = vset.pattern.permute.xlu1 %v7971_v41 }
 0xfbe   :  { %v4843_v43 = vadd.f32 %v4842_v1, %v4651_v25 }
 0xfc0   :  { %v4844_v63 = vrot.slane %v4843_v43, 4 }
 0xfc2   :  { %v4845_v52 = vadd.f32 %v4844_v63, %v4843_v43 }
 0xfc3   :  { %7360 = vset.pattern.permute.xlu2 %v7922_v4 }
 0xfc5   :  { %4489 = vperm.xlu1 %7356, %v4442_v21  }
 0xfc7   :  { %v5519_v6 = vpop.permute.xlu1 %5518 }
 0xfc8   :  { %v5764_v21 = vmul.f32 %v5519_v6, %v9658_v48  ;;  %v3720_v48 = vperm.slane %v3716_v42, %v8318_v56 }
 0xfc9   :  { %v3629_v45 = vpop.xlane.xlu0 %3628 }
 0xfca   :  { %7449 = vrcp.f32 %v3629_v45  ;;  %v5957_v40 = vadd.f32 %v5765_v9, %v5764_v21 }
 0xfcb   :  { %5585 = vperm.xlu2 %7360, %v9669_v0  }
 0xfcd   :  { %7359 = vset.pattern.permute.xlu1 %v7945_v10 }
 0xfd0   :  { %v7450_v51 = vpop.eup %7449 }
 0xfd1   :  { %v3661_v30 = vmul.f32 %v7450_v51, %v9633_v62 }
 0xfd3   :  { %v3721_v26 = vrot.slane %v3661_v30, 4  ;;  %v9698_v15 = vperm.slane %v3661_v30, 0  ;;  %7364 = vset.pattern.permute.xlu2 %v7888_v2  ;;  %v9724_v59 = vperm.slane %v3661_v30, 1 }
 0xfd5   :  { %4502 = vperm.xlu0 %7365, %v9698_v15   ;;  %5579 = vperm.xlu1 %7359, %v9669_v0   ;;  %v3722_v55 = vsel %vm3663_vm3, %v3721_v26, %v9595_v18 }
 0xfd6   :  { %v3726_v62 = vperm.slane %v3722_v55, %v8318_v56  ;;  %v2476_v56 = vpop.f32.mrf.mxu2 }
 0xfd7   :  { %v5531_v54 = vpop.permute.xlu1 %5530  ;;  %v2477_v51 = vadd.f32 %v2476_v56, %v8044_v23 }
 0xfd8   :  { %v5766_v34 = vmul.f32 %v5531_v54, %v9664_v11  ;;  %v3733_v27 = vrot.slane %v3726_v62, 4 }
 0xfda   :  { %v5958_v7 = vadd.f32 %v5957_v40, %v5766_v34  ;;  %v9713_v29 = vsel %vm3663_vm3, %v3733_v27, %v3720_v48 }
 0xfdb   :  { %4496 = vperm.xlu2 %7364, %v9698_v15  }
 0xfdc   :  { %v5959_v18 = vadd.f32 %v5958_v7, %v5767_v31 }
 0xfdd   :  { %7370 = vset.pattern.permute.xlu0 %v7962_v32  ;;  %7361 = vset.pattern.permute.xlu1 %v8009_v22 }
 0xfde   :  { %v5960_v14 = vadd.f32 %v5959_v18, %v5768_v17  ;;  %v2478_v16 = vpop.f32.mrf.mxu2 }
 0xfdf   :  { %v9738_v49 = vadd.f32 %v2478_v16, %v8044_v23 }
 0xfe3   :  { %7367 = vset.pattern.permute.xlu2 %v7922_v4 }
 0xfe5   :  { %4532 = vperm.xlu0 %7370, %v9698_v15   ;;  %5591 = vperm.xlu1 %7361, %v9669_v0  }
 0xfe6   :  { %v2481_v1 = vpop.f32.mrf.mxu2 }
 0xfe7   :  { %v5549_v11 = vpop.permute.xlu1 %5548  ;;  %v2482_v54 = vadd.f32 %v2481_v1, %v8044_v23 }
 0xfe8   :  { %v5769_v8 = vmul.f32 %v5549_v11, %v2469_v37  ;;  %v4846_v37 = vrot.slane %v4845_v52, 2 }
 0xfea   :  { %v5961_v47 = vadd.f32 %v5960_v14, %v5769_v8  ;;  %v4847_v33 = vadd.f32 %v4846_v37, %v4845_v52  ;;  %v6024_v14 = vmul.f32 %v9440_v61, %v9495_v13 }
 0xfeb   :  { %4514 = vperm.xlu2 %7367, %v9698_v15  }
 0xfec   :  { %v5962_v36 = vadd.f32 %v5961_v47, %v5770_v28  ;;  %v4848_v5 = vrot.slane %v4847_v33, 1  ;;  %v6061_v8 = vsel %vm6030_vm2, %v6024_v14, 0.0 }
 0xfed   :  { %7375 = vset.pattern.permute.xlu0 %v7922_v4  ;;  %7363 = vset.pattern.permute.xlu1 %v7971_v41 }
 0xfee   :  { %v4849_v26 = vadd.f32 %v4848_v5, %v4847_v33  ;;  %v2483_v42 = vpop.f32.mrf.mxu2 }
 0xfef   :  { %v2484_v48 = vadd.f32 %v2483_v42, %v8044_v23 }
 0xff3   :  { %7369 = vset.pattern.permute.xlu2 %v7931_v60 }
 0xff5   :  { %5634 = vperm.xlu0 %7375, %v9724_v59   ;;  %5609 = vperm.xlu1 %7363, %v9669_v0  }
 0xff6   :  { %v2486_v20 = vpop.f32.mrf.mxu2 }
 0xff7   :  { %v5561_v50 = vpop.permute.xlu1 %5560  ;;  %v2487_v7 = vadd.f32 %v2486_v20, %v8044_v23 }
 0xff8   :  { %v5771_v4 = vmul.f32 %v5561_v50, %v9687_v57  ;;  %v4454_v57 = vpop.permute.xlu2 %4453 }
 0xff9   :  { %v4653_v55 = vmul.f32 %v4454_v57, %v9738_v49 }
 0xffa   :  { %v5963_v46 = vadd.f32 %v5962_v36, %v5771_v4 }
 0xffb   :  { %4526 = vperm.xlu2 %7369, %v9698_v15  }
 0xffc   :  { %v5964_v25 = vrot.slane %v5963_v46, 4 }
 0xffd   :  { %7366 = vset.pattern.permute.xlu1 %v7945_v10  ;;  %7377 = vset.pattern.permute.xlu0 %v7888_v2  ;;  %v4472_v31 = vpop.permute.xlu0 %4471 }
 0xffe   :  { %v5965_v45 = vadd.f32 %v5964_v25, %v5963_v46  ;;  %v4656_v56 = vmul.f32 %v4472_v31, %v2487_v7 }
0x1000   :  { %v5966_v24 = vrot.slane %v5965_v45, 2  ;;  %v4466_v40 = vpop.permute.xlu2 %4465 }
0x1001   :  { %v4655_v17 = vmul.f32 %v4466_v40, %v2484_v48 }
0x1002   :  { %v5967_v6 = vadd.f32 %v5966_v24, %v5965_v45 }
0x1003   :  { %7372 = vset.pattern.permute.xlu2 %v7888_v2 }
0x1004   :  { %v5968_v43 = vrot.slane %v5967_v6, 1 }
0x1005   :  { %4508 = vperm.xlu1 %7366, %v9698_v15  }
0x1006   :  { %v5969_v30 = vadd.f32 %v5968_v43, %v5967_v6  ;;  %v9782_v6 = vld [vmem:[%s9966_s6] sm:$0x3] }
0x1007   :  { %v4448_v21 = vpop.permute.xlu1 %4447  ;;  %v6026_v5 = vmul.f32 %v9782_v6, %v9644_v19 }
0x1008   :  { %v4652_v9 = vmul.f32 %v4448_v21, %v2477_v51  ;;  %v9742_v62 = vsel %vm5996_vm1, %v4849_v26, %v5969_v30  ;;  %v4484_v61 = vpop.permute.xlu2 %4483 }
0x1009   :  { %v6067_v57 = vsel %vm6030_vm2, %v6026_v5, 0.0 }
0x100a   :  { %v4850_v2 = vadd.f32 %v4653_v55, %v4652_v9 }
0x100b   :  { %5616 = vperm.xlu2 %7372, %v9724_v59  }
0x100d   :  { %7368 = vset.pattern.permute.xlu1 %v8009_v22  ;;  %v5574_v46 = vpop.permute.xlu0 %5573 }
0x100e   :  { %v5773_v55 = vmul.f32 %v5574_v46, %v9738_v49 }
0x1013   :  { %7374 = vset.pattern.permute.xlu2 %v7945_v10  ;;  %v2488_v10 = vpop.f32.mrf.mxu2 }
0x1014   :  { %v9759_v38 = vadd.f32 %v2488_v10, %v8044_v23 }
0x1015   :  { %4520 = vperm.xlu1 %7368, %v9698_v15   ;;  %v5568_v36 = vpop.permute.xlu2 %5567 }
0x1016   :  { %v5772_v30 = vmul.f32 %v5568_v36, %v2477_v51 }
0x1017   :  { %v4460_v34 = vpop.permute.xlu1 %4459 }
0x1018   :  { %v4654_v27 = vmul.f32 %v4460_v34, %v2482_v54  ;;  %v5970_v20 = vadd.f32 %v5773_v55, %v5772_v30 }
0x101a   :  { %v4851_v18 = vadd.f32 %v4850_v2, %v4654_v27 }
0x101b   :  { %5628 = vperm.xlu2 %7374, %v9724_v59   ;;  %v2491_v16 = vpop.f32.mrf.mxu2 }
0x101c   :  { %v4852_v11 = vadd.f32 %v4851_v18, %v4655_v17  ;;  %v9762_v47 = vadd.f32 %v2491_v16, %v8044_v23 }
0x101d   :  { %7371 = vset.pattern.permute.xlu1 %v7971_v41  ;;  %v9777_v24 = vpop.permute.xlu0 %5603 }
0x101e   :  { %v4853_v63 = vadd.f32 %v4852_v11, %v4656_v56  ;;  %v4658_v52 = vmul.f32 %v4484_v61, %v9762_v47  ;;  %v6025_v56 = vmul.f32 %v9782_v6, %v9573_v39 }
0x101f   :  { %6062 = vadd.xlane.f32.xlu0 %v6061_v8 }
0x1020   :  { %v6064_v49 = vsel %vm6030_vm2, %v6025_v56, 0.0 }
0x1023   :  { %7376 = vset.pattern.permute.xlu2 %v7931_v60  ;;  %v7386_v60 = vld [vmem:[%s9967_s7] ss:$0 sm:$0xff] }
0x1025   :  { %4538 = vperm.xlu1 %7371, %v9698_v15   ;;  %v2493_v15 = vpop.f32.mrf.mxu2 }
0x1026   :  { %v9772_v37 = vadd.f32 %v2493_v15, %v8044_v23 }
0x1027   :  { %v4478_v13 = vpop.permute.xlu1 %4477 }
0x1028   :  { %v4657_v28 = vmul.f32 %v4478_v13, %v9759_v38 }
0x102a   :  { %v4854_v50 = vadd.f32 %v4853_v63, %v4657_v28 }
0x102c   :  { %v4855_v4 = vadd.f32 %v4854_v50, %v4658_v52 }
0x102d   :  { %7373 = vset.pattern.permute.xlu1 %v7891_v3  ;;  %v2496_v33 = vpop.f32.mrf.mxu2  ;;  %v5586_v3 = vpop.permute.xlu2 %5585 }
0x102e   :  { %v9788_v21 = vadd.f32 %v2496_v33, %v8044_v23  ;;  %v5775_v31 = vmul.f32 %v5586_v3, %v2484_v48 }
0x1033   :  { %6086 = vperm.xlu0 %7377, %v7386_v60   ;;  %v7597_v60 = vmov 0  }
0x1035   :  { %5622 = vperm.xlu1 %7373, %v9724_v59   ;;  %v2498_v43 = vpop.f32.mrf.mxu2  ;;  %v4497_v26 = vpop.permute.xlu2 %4496 }
0x1036   :  { %v9791_v42 = vadd.f32 %v2498_v43, %v8044_v23  ;;  %v4660_v40 = vmul.f32 %v4497_v26, %v9788_v21 }
0x1037   :  { %v4490_v25 = vpop.permute.xlu1 %4489 }
0x1038   :  { %v4659_v1 = vmul.f32 %v4490_v25, %v9772_v37 }
0x103a   :  { %v9775_v45 = vadd.f32 %v4855_v4, %v4659_v1 }
0x103b   :  { %7384 = vset.pattern.permute.xlu0 %v7597_v60 }
0x103d   :  { %v2501_v11 = vpop.f32.mrf.mxu2  ;;  %7378 = vset.pattern.permute.xlu1 %v7597_v60 }
0x103e   :  { %v2502_v8 = vadd.f32 %v2501_v11, %v8044_v23 }
0x1044   :  { %6068 = vadd.xlane.f32.xlu2 %v6067_v57 }
0x1045   :  { %v4515_v63 = vpop.permute.xlu2 %4514 }
0x1047   :  { %v4503_v9 = vpop.permute.xlu0 %4502  ;;  %v5580_v2 = vpop.permute.xlu1 %5579 }
0x1048   :  { %v4661_v19 = vmul.f32 %v4503_v9, %v9791_v42  ;;  %v5774_v34 = vmul.f32 %v5580_v2, %v2482_v54  ;;  %v2503_v54 = vpop.f32.mrf.mxu2 }
0x104a   :  { %v4863_v27 = vadd.f32 %v4661_v19, %v4660_v40  ;;  %v5971_v51 = vadd.f32 %v5970_v20, %v5774_v34 }
0x104c   :  { %v5972_v14 = vadd.f32 %v5971_v51, %v5775_v31  ;;  %v10087_v51 = vld [vmem:[#allocation23_spill] sm:$0xff] }
0x1057   :  { %v5592_v17 = vpop.permute.xlu1 %5591  ;;  %v4533_v25 = vpop.permute.xlu0 %4532 }
0x1058   :  { %v5776_v18 = vmul.f32 %v5592_v17, %v2487_v7  ;;  %v2506_v7 = vpop.f32.mrf.mxu2  ;;  %v10088_v17 = vld [vmem:[#allocation16_spill] sm:$0xff] }
0x1059   :  { %v9810_v50 = vadd.f32 %v2506_v7, %v8044_v23 }
0x105a   :  { %v9796_v10 = vadd.f32 %v5972_v14, %v5776_v18 }
0x105c   :  { %5597 = vperm.xlu2 %7376, %v9669_v0   ;;  %v2504_v0 = vadd.f32 %v2503_v54, %v8044_v23 }
0x105e   :  { %v4663_v61 = vmul.f32 %v4515_v63, %v2504_v0 }
0x105f   :  { %6065 = vadd.xlane.f32.xlu1 %v6064_v49 }
0x1060   :  { %v2508_v52 = vpop.f32.mrf.mxu2 }
0x1061   :  { %v9815_v15 = vadd.f32 %v2508_v52, %v8044_v23 }
0x1064   :  { %5646 = vperm.xlu2 %7376, %v9724_v59  }
0x1067   :  { %v9804_v48 = vpop.permute.xlu1 %5609  ;;  %v5635_v26 = vpop.permute.xlu0 %5634 }
0x1068   :  { %v2511_v46 = vpop.f32.mrf.mxu2  ;;  %v5783_v7 = vmul.f32 %v5635_v26, %v2504_v0 }
0x1069   :  { %v9820_v1 = vadd.f32 %v2511_v46, %v8044_v23 }
0x106b   :  { %v4666_v5 = vmul.f32 %v4533_v25, %v9820_v1 }
0x106c   :  { %7381 = vset.pattern.permute.xlu2 %v7971_v41  ;;  %v4527_v41 = vpop.permute.xlu2 %4526 }
0x106d   :  { %v4665_v33 = vmul.f32 %v4527_v41, %v9815_v15 }
0x1070   :  { %v2513_v30 = vpop.f32.mrf.mxu2 }
0x1071   :  { %v9825_v55 = vadd.f32 %v2513_v30, %v8044_v23  ;;  %v10092_v30 = vld [vmem:[#allocation31_spill] sm:$0xff] }
0x1074   :  { %5658 = vperm.xlu2 %7381, %v9724_v59   ;;  %v5617_v19 = vpop.permute.xlu2 %5616 }
0x1075   :  { %v5780_v56 = vmul.f32 %v5617_v19, %v9788_v21 }
0x1077   :  { %v4509_v39 = vpop.permute.xlu1 %4508 }
0x1078   :  { %v4662_v16 = vmul.f32 %v4509_v39, %v2502_v8 }
0x107a   :  { %v4864_v13 = vadd.f32 %v4863_v27, %v4662_v16 }
0x107c   :  { %v4865_v28 = vadd.f32 %v4864_v13, %v4663_v61  ;;  %7382 = vset.pattern.permute.xlu2 %v7597_v60  ;;  %v5629_v23 = vpop.permute.xlu2 %5628  ;;  %v10090_v61 = vld [vmem:[#allocation20_spill] sm:$0xff] }
0x107d   :  { %v5782_v11 = vmul.f32 %v5629_v23, %v2502_v8 }
0x1087   :  { %v4521_v4 = vpop.permute.xlu1 %4520 }
0x1088   :  { %v4664_v36 = vmul.f32 %v4521_v4, %v9810_v50  ;;  %v5779_v4 = vmul.f32 %v9804_v48, %v9772_v37 }
0x108a   :  { %v4866_v3 = vadd.f32 %v4865_v28, %v4664_v36 }
0x108c   :  { %v4867_v43 = vadd.f32 %v4866_v3, %v4665_v33 }
0x108e   :  { %v4868_v57 = vadd.f32 %v4867_v43, %v4666_v5 }
0x1092   :  { %v6063_v40 = vpop.xlane.xlu0 %6062 }
0x1097   :  { %v4539_v9 = vpop.permute.xlu1 %4538 }
0x1098   :  { %v4667_v2 = vmul.f32 %v4539_v9, %v9825_v55 }
0x109a   :  { %v9828_v20 = vadd.f32 %v4868_v57, %v4667_v2 }
0x10a5   :  { %v9830_v34 = vpop.permute.xlu0 %6086 }
0x10a6   :  { %v6095_v27 = vadd.f32 %v9830_v34, %v9291_v53  ;;  %v6090_v31 = vadd.f32 %v9830_v34, %v10087_v51  ;;  %v6089_v18 = vadd.f32 %v9830_v34, %v10088_v17  ;;  %v10089_v53 = vld [vmem:[#allocation37_spill] sm:$0xff]  ;;  %v6094_v21 = vadd.f32 %v9830_v34, %v10090_v61 }
0x10a7   :  { %v5623_v14 = vpop.permute.xlu1 %5622  ;;  %v6092_v39 = vadd.f32 %v9830_v34, %v10089_v53  ;;  %v6097_v8 = vadd.f32 %v9830_v34, %v9511_v44  ;;  %v6099_v44 = vadd.f32 %v9830_v34, %v6063_v40  ;;  %v6093_v26 = vadd.f32 %v9830_v34, %v10092_v30  ;;  %v10093_v40 = vld [vmem:[#allocation43_spill] sm:$0xff] }
0x10a8   :  { %v5781_v49 = vmul.f32 %v5623_v14, %v9791_v42  ;;  %6140 = vperm.xlu0 %7384, %v6095_v27   ;;  %6125 = vperm.xlu2 %7382, %v6090_v31   ;;  %v4857_v42 = vrot.slane %v9775_v45, 4  ;;  %v9877_v19 = vperm.slane %v9428_v58, %v10093_v40  ;;  %v9881_v27 = vperm.slane %v9713_v29, %v10093_v40 }
0x10a9   :  { %6122 = vperm.xlu1 %7378, %v6089_v18  }
0x10aa   :  { %v5983_v54 = vadd.f32 %v5781_v49, %v5780_v56  ;;  %v4858_v52 = vadd.f32 %v4857_v42, %v9775_v45  ;;  %v3741_v51 = vrot.slane %v9877_v19, 4  ;;  %v4870_v49 = vrot.slane %v9828_v20, 4 }
0x10ac   :  { %v5984_v63 = vadd.f32 %v5983_v54, %v5782_v11  ;;  %v4859_v46 = vrot.slane %v4858_v52, 2 }
0x10ae   :  { %v9842_v16 = vadd.f32 %v5984_v63, %v5783_v7  ;;  %v4871_v63 = vadd.f32 %v4870_v49, %v9828_v20 }
0x10b0   :  { %6131 = vperm.xlu2 %7382, %v6092_v39   ;;  %v4872_v42 = vrot.slane %v4871_v63, 2 }
0x10b1   :  { %7379 = vset.pattern.permute.xlu1 %v8009_v22  ;;  %v5778_v22 = vmul.f32 %v9777_v24, %v9762_v47  ;;  %v6027_v47 = vmul.f32 %v9782_v6, %v9742_v62  ;;  %v6096_v62 = vadd.f32 %v9830_v34, %v9334_v12  ;;  %v3742_v12 = vsel %vm3663_vm3, %v9881_v27, %v3741_v51 }
0x10b3   :  { %v6070_v5 = vsel %vm6030_vm2, %v6027_v47, 0.0 }
0x10b7   :  { %v6069_v13 = vpop.xlane.xlu2 %6068 }
0x10b8   :  { %6137 = vperm.xlu2 %7382, %v6094_v21   ;;  %v6101_v14 = vadd.f32 %v9830_v34, %v6069_v13 }
0x10b9   :  { %5640 = vperm.xlu1 %7379, %v9724_v59  }
0x10bf   :  { %v5598_v0 = vpop.permute.xlu2 %5597 }
0x10c0   :  { %v5777_v28 = vmul.f32 %v5598_v0, %v9759_v38  ;;  %6146 = vperm.xlu2 %7382, %v6097_v8   ;;  %v4873_v0 = vadd.f32 %v4872_v42, %v4871_v63 }
0x10c1   :  { %7380 = vset.pattern.permute.xlu1 %v7962_v32  ;;  %v4860_v32 = vadd.f32 %v4859_v46, %v4858_v52  ;;  %v10094_v52 = vlaneseq }
0x10c2   :  { %v5974_v41 = vadd.f32 %v9796_v10, %v5777_v28  ;;  %v10091_v10 = vld [vmem:[#allocation30_spill] sm:$0xff] }
0x10c3   :  { %v4861_v45 = vrot.slane %v4860_v32, 1  ;;  %v6091_v37 = vadd.f32 %v9830_v34, %v10091_v10 }
0x10c4   :  { %v5975_v36 = vadd.f32 %v5974_v41, %v5778_v22 }
0x10c5   :  { %v4862_v43 = vadd.f32 %v4861_v45, %v4860_v32 }
0x10c6   :  { %v5976_v25 = vadd.f32 %v5975_v36, %v5779_v4  ;;  %v4874_v4 = vrot.slane %v4873_v0, 1 }
0x10c7   :  { %v5647_v17 = vpop.permute.xlu2 %5646 }
0x10c8   :  { %v5977_v33 = vrot.slane %v5976_v25, 4  ;;  %6152 = vperm.xlu2 %7382, %v6099_v44   ;;  %v5785_v54 = vmul.f32 %v5647_v17, %v9815_v15  ;;  %v4875_v44 = vadd.f32 %v4874_v4, %v4873_v0 }
0x10c9   :  { %5652 = vperm.xlu1 %7380, %v9724_v59  }
0x10ca   :  { %v5978_v38 = vadd.f32 %v5977_v33, %v5976_v25 }
0x10cc   :  { %v5979_v3 = vrot.slane %v5978_v38, 2 }
0x10ce   :  { %v5980_v24 = vadd.f32 %v5979_v3, %v5978_v38 }
0x10cf   :  { %v5659_v58 = vpop.permute.xlu2 %5658 }
0x10d0   :  { %v5981_v48 = vrot.slane %v5980_v24, 1  ;;  %v5787_v21 = vmul.f32 %v5659_v58, %v9825_v55  ;;  %v3739_v58 = vrot.slane %v9881_v27, 4 }
0x10d1   :  { %7383 = vset.pattern.permute.xlu1 %v7597_v60  ;;  %v6098_v60 = vadd.f32 %v9830_v34, %v9597_v35 }
0x10d2   :  { %6128 = vperm.xlu1 %7383, %v6091_v37   ;;  %6071 = vadd.xlane.f32.xlu0 %v6070_v5  ;;  %v5982_v59 = vadd.f32 %v5981_v48, %v5980_v24  ;;  %v6066_v9 = vpop.xlane.xlu1 %6065 }
0x10d3   :  { %v6100_v2 = vadd.f32 %v9830_v34, %v6066_v9 }
0x10d4   :  { %v6011_v57 = vsel %vm5996_vm1, %v4862_v43, %v5982_v59 }
0x10d5   :  { %v6028_v31 = vmul.f32 %v9782_v6, %v6011_v57 }
0x10d7   :  { %v6073_v35 = vsel %vm6030_vm2, %v6028_v31, 0.0 }
0x10da   :  { %6134 = vperm.xlu1 %7383, %v6093_v26  }
0x10e2   :  { %6143 = vperm.xlu1 %7383, %v6096_v62  }
0x10e6   :  { %6155 = vperm.xlu0 %7384, %v6100_v2  }
0x10ea   :  { %6149 = vperm.xlu1 %7383, %v6098_v60  }
0x10f2   :  { %3747 = vrot.lane.b32.xlu1 %v3742_v12, %s7590_s23 }
0x1102   :  { %v6126_v29 = vpop.permute.xlu2 %6125 }
0x110a   :  { %v6132_v61 = vpop.permute.xlu2 %6131 }
0x1112   :  { %v6138_v41 = vpop.permute.xlu2 %6137 }
0x111a   :  { %v6141_v33 = vpop.permute.xlu0 %6140  ;;  %v6147_v43 = vpop.permute.xlu2 %6146 }
0x111b   :  { %v6123_v18 = vpop.permute.xlu1 %6122 }
0x111c   :  { %6074 = vadd.xlane.f32.xlu1 %v6073_v35 }
0x1122   :  { %v6153_v60 = vpop.permute.xlu2 %6152 }
0x112b   :  { %v5641_v23 = vpop.permute.xlu1 %5640 }
0x112c   :  { %v5784_v56 = vmul.f32 %v5641_v23, %v9810_v50 }
0x112e   :  { %v5986_v11 = vadd.f32 %v9842_v16, %v5784_v56  ;;  %v9898_v16 = vand.u32 127, %v10094_v52 }
0x1130   :  { %v5987_v53 = vadd.f32 %v5986_v11, %v5785_v54  ;;  %v6171_v20 = vperm.slane %v6123_v18, %v9898_v16  ;;  %v6172_v55 = vperm.slane %v6126_v29, %v9898_v16  ;;  %v6174_v47 = vperm.slane %v6132_v61, %v9898_v16 }
0x1131   :  { %v6176_v5 = vperm.slane %v6138_v41, %v9898_v16  ;;  %v6177_v30 = vperm.slane %v6141_v33, %v9898_v16  ;;  %v6179_v12 = vperm.slane %v6147_v43, %v9898_v16  ;;  %v6181_v35 = vperm.slane %v6153_v60, %v9898_v16 }
0x1132   :  { %v6188_v25 = vsel %vm6187_vm5, %v6172_v55, %v6171_v20  ;;  %v3740_v29 = vsel %vm3663_vm3, %v3739_v58, %v9877_v19 }
0x1135   :  { %6158 = vperm.xlu1 %7383, %v6101_v14  }
0x113b   :  { %v5653_v7 = vpop.permute.xlu1 %5652 }
0x113c   :  { %v5786_v39 = vmul.f32 %v5653_v7, %v9820_v1 }
0x113e   :  { %v5988_v13 = vadd.f32 %v5987_v53, %v5786_v39 }
0x1140   :  { %v5989_v8 = vadd.f32 %v5988_v13, %v5787_v21 }
0x1142   :  { %v5990_v50 = vrot.slane %v5989_v8, 4 }
0x1144   :  { %v5991_v28 = vadd.f32 %v5990_v50, %v5989_v8  ;;  %v6129_v22 = vpop.permute.xlu1 %6128 }
0x1145   :  { %v6173_v36 = vperm.slane %v6129_v22, %v9898_v16  ;;  %v6072_v26 = vpop.xlane.xlu0 %6071 }
0x1146   :  { %v5992_v15 = vrot.slane %v5991_v28, 2  ;;  %v6102_v11 = vadd.f32 %v9830_v34, %v6072_v26 }
0x1147   :  { %v6190_v32 = vsel %vm6189_vm6, %v6173_v36, %v6188_v25 }
0x1148   :  { %v5993_v1 = vadd.f32 %v5992_v15, %v5991_v28  ;;  %v6192_v10 = vsel %vm6191_vm7, %v6174_v47, %v6190_v32 }
0x114a   :  { %v5994_v46 = vrot.slane %v5993_v1, 1 }
0x114c   :  { %v6135_v38 = vpop.permute.xlu1 %6134  ;;  %v5995_v3 = vadd.f32 %v5994_v46, %v5993_v1 }
0x114d   :  { %v6175_v45 = vperm.slane %v6135_v38, %v9898_v16 }
0x114e   :  { %v6012_v24 = vsel %vm5996_vm1, %v4875_v44, %v5995_v3 }
0x114f   :  { %v6029_v37 = vmul.f32 %v9782_v6, %v6012_v24  ;;  %v6194_v48 = vsel %vm6193_vm8, %v6175_v45, %v6192_v10 }
0x1150   :  { %v6196_v57 = vsel %vm6195_vm9, %v6176_v5, %v6194_v48 }
0x1151   :  { %v6076_v59 = vsel %vm6030_vm2, %v6029_v37, 0.0  ;;  %v6198_v9 = vsel %vm6197_vm10, %v6177_v30, %v6196_v57 }
0x1152   :  { %6077 = vadd.xlane.f32.xlu2 %v6076_v59 }
0x1154   :  { %v6144_v62 = vpop.permute.xlu1 %6143 }
0x1155   :  { %v6178_v6 = vperm.slane %v6144_v62, %v9898_v16 }
0x1157   :  { %v6200_v2 = vsel %vm6199_vm11, %v6178_v6, %v6198_v9 }
0x1158   :  { %6211 = vst.msk [vmem:[%s9968_s8] sm:$0xff] %vm6210_vm12, %v6200_v2  ;;  %v6156_v40 = vpop.permute.xlu0 %6155 }
0x1159   :  { %v6182_v17 = vperm.slane %v6156_v40, %v9898_v16 }
0x115c   :  { %v6150_v51 = vpop.permute.xlu1 %6149 }
0x115d   :  { %v6180_v31 = vperm.slane %v6150_v51, %v9898_v16 }
0x115f   :  { %v6201_v18 = vsel %vm6187_vm5, %v6180_v31, %v6179_v12 }
0x1160   :  { %v6202_v23 = vsel %vm6189_vm6, %v6181_v35, %v6201_v18 }
0x1161   :  { %v6203_v14 = vsel %vm6191_vm7, %v6182_v17, %v6202_v23 }
0x1164   :  { %v3748_v56 = vpop.permute.xlu1 %3747 }
0x1165   :  { %v3753_v49 = vsel %vm3751_vm4, %v3740_v29, %v3748_v56 }
0x1166   :  { %3755 = vst [vmem:[#allocation8 + $0x8] sm:$0xff] %v3753_v49 }
0x1167   :  { %6227 = dma.vmem_to_hbm [thread:$0]  %s6220_s16, 256, %s6222_s19, [#allocation4], %s7593_s0, %s7593_s0, %s7594_s29  }
0x116a   :  { %6161 = vperm.xlu2 %7382, %v6102_v11  }
0x118f   :  { %v6075_v54 = vpop.xlane.xlu1 %6074 }
0x1190   :  { %v6103_v7 = vadd.f32 %v9830_v34, %v6075_v54 }
0x1192   :  { %6164 = vperm.xlu0 %7384, %v6103_v7  }
0x11a7   :  { %v6159_v63 = vpop.permute.xlu1 %6158 }
0x11a8   :  { %v6183_v61 = vperm.slane %v6159_v63, %v9898_v16 }
0x11aa   :  { %v6204_v42 = vsel %vm6193_vm8, %v6183_v61, %v6203_v14 }
0x11c5   :  { %v6078_v19 = vpop.xlane.xlu2 %6077 }
0x11c6   :  { %v6104_v27 = vadd.f32 %v9830_v34, %v6078_v19 }
0x11c8   :  { %6167 = vperm.xlu1 %7383, %v6104_v27  }
0x11cd   :  { %v6162_v53 = vpop.permute.xlu2 %6161 }
0x11ce   :  { %v6184_v21 = vperm.slane %v6162_v53, %v9898_v16 }
0x11d0   :  { %v6205_v50 = vsel %vm6195_vm9, %v6184_v21, %v6204_v42 }
0x1204   :  { %v6165_v39 = vpop.permute.xlu0 %6164 }
0x1205   :  { %v6185_v13 = vperm.slane %v6165_v39, %v9898_v16 }
0x1207   :  { %v6206_v28 = vsel %vm6197_vm10, %v6185_v13, %v6205_v50 }
0x123a   :  { %v6168_v8 = vpop.permute.xlu1 %6167 }
0x123b   :  { %v6186_v0 = vperm.slane %v6168_v8, %v9898_v16 }
0x123d   :  { %v6207_v34 = vsel %vm6199_vm11, %v6186_v0, %v6206_v28 }
0x123e   :  { %6212 = vst.msk [vmem:[%s9968_s8 + $0x8] sm:$0xff] %vm6210_vm12, %v6207_v34 }
0x123f   :  { %7584 = dma.done.wait [#allocation4], 256  }
0x1240   :  { %7585 = vsyncadd [#allocation4], 4294967040 }
0x1241   :  { %7586 = dma.done.wait [#allocation10], 8192  }
0x1242   :  { %7587 = vsyncadd [#allocation10], 4294959104 }
0x1243   :  { %6251 = vsyncpa [#allocation3], 1 }
0x1244   :  { %6252 = vsyncpa [#allocation6], 1 }
0x1245   :  { %6253 = vsyncpa [#allocation4], 1 }
0x1246   :  { %6254 = vsyncpa [#allocation10], 1 }

</bundles_post_ra>
